<compile_context>
chip_gen: v7x
topology: tpu7x:2x2x1
jax: 0.10.0
libtpu: 0.0.40
codegen_flags: <defaults>
</compile_context>

<pallas_src>
import functools

import jax
import jax.numpy as jnp
from jax.experimental import pallas as pl
from jax.experimental.pallas import tpu as pltpu


# ----------------------------------------------------------------------------
# Kernel
# ----------------------------------------------------------------------------
def _attention_kernel(x_ref, wqkv_ref, wproj_ref, bproj_ref, o_ref,
                      *, num_heads, head_dim):
    # x_ref block: (Bb, N, C) bf16; weights full-resident bf16; bias (1, C) f32.
    Bb, N, C = x_ref.shape
    H, D = num_heads, head_dim

    x = x_ref[...].reshape(Bb * N, C)                        # (Bb*N, C) bf16

    # Fused qkv projection on the flattened slab (tall M fills the MXU).
    qkv = jnp.dot(x, wqkv_ref[...],
                  preferred_element_type=jnp.float32)        # (Bb*N, 3C) f32
    # Cast to bf16 BEFORE the head split / permute: halves relayout traffic
    # and the live footprint of the largest intermediate.
    qkv = qkv.astype(jnp.bfloat16)

    # Split q/k/v exactly like torch's reshape(B,N,3,H,D).permute(2,0,3,1,4).
    # The softmax scale is already folded into the q columns of wqkv.
    def split(i):
        t = qkv[:, i * C:(i + 1) * C].reshape(Bb, N, H, D)
        return t.transpose(0, 2, 1, 3).reshape(Bb * H, N, D)  # (Bb*H, N, D) bf16

    q = split(0)
    k = split(1)
    v = split(2)

    # Per (batch, head) attention scores; leading batch dim = Bb*H.
    s = jnp.einsum('bnd,bmd->bnm', q, k,
                   preferred_element_type=jnp.float32)       # (Bb*H, N, N) f32
    s = s - jnp.max(s, axis=-1, keepdims=True)
    p = jnp.exp(s)                                           # unnormalized probs
    l = jnp.sum(p, axis=-1, keepdims=True)                   # (Bb*H, N, 1) f32
    # attn_drop: p = 0.0 -> identity (no-op)

    ctx = jnp.einsum('bnm,bmd->bnd', p.astype(jnp.bfloat16), v,
                     preferred_element_type=jnp.float32)     # (Bb*H, N, D) f32
    # Normalize AFTER the PV matmul: N*D multiplies instead of N*N per head.
    ctx = ctx * pl.reciprocal(l, approx=True)
    # bf16 BEFORE the head-merge permute (same relayout argument as for qkv).
    ctx = ctx.astype(jnp.bfloat16)
    ctx = ctx.reshape(Bb, H, N, D).transpose(0, 2, 1, 3).reshape(Bb * N, C)

    # Output projection (+ bias) on the flattened slab.
    y = jnp.dot(ctx, wproj_ref[...],
                preferred_element_type=jnp.float32)          # (Bb*N, C) f32
    y = y + bproj_ref[...]                                   # (1, C) broadcast
    # proj_drop: p = 0.0 -> identity (no-op)

    o_ref[...] = y.reshape(Bb, N, C).astype(o_ref.dtype)


# ----------------------------------------------------------------------------
# Generation-aware tiling helpers
# ----------------------------------------------------------------------------
def _generation_config():
    """Returns (vmem_limit_bytes, min_grid_steps) tuned per TPU generation."""
    vmem_cap = 128 << 20
    try:
        vmem_cap = int(pltpu.get_tpu_info().vmem_capacity_bytes)
    except Exception:
        pass
    kind = ""
    try:
        kind = jax.devices()[0].device_kind.lower()
    except Exception:
        pass
    # v7x: 2 TensorCores/chip and only 64 MiB VMEM -> keep >=2 parallel grid
    # steps and a tighter scoped-VMEM limit. v5e/v6e: single TC, 128 MiB.
    two_tensorcores = "7" in kind
    vmem_limit = min(max(vmem_cap - (16 << 20), 32 << 20), 96 << 20)
    min_grid_steps = 2 if two_tensorcores else 1
    return vmem_limit, min_grid_steps


def _vmem_estimate(Bb, N, C, H, out_bytes, weight_bufs):
    """Rough per-step VMEM bytes: pipelined I/O blocks + weights + live temps."""
    blk = Bb * N * C
    io = 2 * (2 * blk) + 2 * (out_bytes * blk)               # x bf16, out (2 bufs each)
    weights = weight_bufs * (2 * (C * 3 * C + C * C) + 4 * C)
    # qkv f32+bf16, q/k/v bf16, ctx f32+bf16, y f32, scores f32 + probs bf16.
    inter = blk * (12 + 6 + 6 + 6 + 4) + Bb * H * N * N * (4 + 2) + 4 * Bb * H * N
    return io + weights + inter


def _pick_batch_block(B, N, C, H, out_bytes, vmem_budget, min_grid_steps,
                      weight_bufs):
    """Largest divisor of B whose VMEM estimate fits the budget, preferring to
    keep >= min_grid_steps grid steps (feeds both TensorCores on v7x)."""
    divisors = sorted(d for d in range(1, B + 1) if B % d == 0)
    prefer = [d for d in divisors if B // d >= min_grid_steps] or divisors
    best = prefer[0]
    for d in prefer:
        if _vmem_estimate(d, N, C, H, out_bytes, weight_bufs) <= vmem_budget:
            best = d
    return best


# ----------------------------------------------------------------------------
# Host-side wrapper
# ----------------------------------------------------------------------------
def prepare_attention_params(wqkv, wproj, bproj, *, dim, num_heads,
                             qk_scale=None):
    """One-time weight prep (hoisted out of the per-forward path):
    transpose to (in, out), fold the qk scale into the q columns, cast to bf16.

    wqkv:  (3C, C) = nn.Linear(dim, 3*dim, bias=False).weight
    wproj: (C, C)  = nn.Linear(dim, dim).weight
    bproj: (C,)    = nn.Linear(dim, dim).bias
    """
    C = dim
    D = C // num_heads
    scale = qk_scale if qk_scale is not None else D ** (-0.5)

    wqkv_t = jnp.asarray(wqkv, jnp.float32).T                # (C, 3C)
    wqkv_t = wqkv_t.at[:, :C].multiply(scale)                # fold qk scale into q
    wqkv_t = wqkv_t.astype(jnp.bfloat16)
    wproj_t = jnp.asarray(wproj, jnp.float32).T.astype(jnp.bfloat16)  # (C, C)
    bproj2 = jnp.asarray(bproj, jnp.float32).reshape(1, C)
    return wqkv_t, wproj_t, bproj2


def _build_call(B, Bb, N, C, H, D, out_dtype, vmem_limit, single_buffer_weights):
    kernel = functools.partial(_attention_kernel, num_heads=H, head_dim=D)
    # Invariant operands: constant index_map; request single buffering to save
    # VMEM (Pallas elides the re-DMA either way).
    wkw = dict(pipeline_mode=pl.Buffered(1)) if single_buffer_weights else {}
    in_specs = [
        pl.BlockSpec((Bb, N, C), lambda b: (b, 0, 0)),
        pl.BlockSpec((C, 3 * C), lambda b: (0, 0), **wkw),
        pl.BlockSpec((C, C), lambda b: (0, 0), **wkw),
        pl.BlockSpec((1, C), lambda b: (0, 0), **wkw),
    ]
    return pl.pallas_call(
        kernel,
        out_shape=jax.ShapeDtypeStruct((B, N, C), out_dtype),
        grid_spec=pltpu.PrefetchScalarGridSpec(
            num_scalar_prefetch=0,
            grid=(B // Bb,),
            in_specs=in_specs,
            out_specs=pl.BlockSpec((Bb, N, C), lambda b: (b, 0, 0)),
        ),
        compiler_params=pltpu.CompilerParams(
            dimension_semantics=("parallel",),
            vmem_limit_bytes=vmem_limit),
    )


def attention_forward(x, params, *, num_heads, out_dtype=None):
    """x: (B, N, C). params: output of prepare_attention_params().
    out_dtype: pass jnp.bfloat16 on bandwidth-bound parts (e.g. v5e) if the
    consumer tolerates it; defaults to x.dtype."""
    wqkv_t, wproj_t, bproj2 = params
    B, N, C = x.shape
    H = num_heads
    D = C // H
    out_dtype = x.dtype if out_dtype is None else out_dtype
    out_bytes = jnp.dtype(out_dtype).itemsize

    vmem_limit, min_grid_steps = _generation_config()
    Bb = _pick_batch_block(B, N, C, H, out_bytes,
                           vmem_budget=(vmem_limit * 3) // 4,
                           min_grid_steps=min_grid_steps,
                           weight_bufs=1)

    x_bf16 = x.astype(jnp.bfloat16)
    try:
        call = _build_call(B, Bb, N, C, H, D, out_dtype, vmem_limit,
                           single_buffer_weights=True)
        return call(x_bf16, wqkv_t, wproj_t, bproj2)
    except Exception:
        # Fallback if this JAX build rejects pipeline_mode=pl.Buffered(1).
        call = _build_call(B, Bb, N, C, H, D, out_dtype, vmem_limit,
                           single_buffer_weights=False)
        return call(x_bf16, wqkv_t, wproj_t, bproj2)


# ----------------------------------------------------------------------------
# Reference + demo
# ----------------------------------------------------------------------------
def _reference(x, wqkv, wproj, bproj, *, num_heads):
    """Pure-JAX f32 reference matching the PyTorch module."""
    B, N, C = x.shape
    D = C // num_heads
    scale = D ** (-0.5)
    qkv = x @ wqkv.T                                         # (B, N, 3C)
    qkv = qkv.reshape(B, N, 3, num_heads, D).transpose(2, 0, 3, 1, 4)
    q, k, v = qkv[0], qkv[1], qkv[2]                         # (B, H, N, D)
    attn = jnp.einsum('bhnd,bhmd->bhnm', q, k) * scale
    attn = jax.nn.softmax(attn, axis=-1)
    ctx = jnp.einsum('bhnm,bhmd->bhnd', attn, v)
    ctx = ctx.transpose(0, 2, 1, 3).reshape(B, N, C)
    return ctx @ wproj.T + bproj


if __name__ == "__main__":
    # Small but lane-dense shapes: C multiple of 128 keeps stores unmasked.
    B, N, C = 4, 16, 128
    num_heads = 8

    key = jax.random.PRNGKey(0)
    kx, kw1, kw2, kb = jax.random.split(key, 4)

    x = jax.random.normal(kx, (B, N, C), dtype=jnp.float32)
    # nn.Linear(dim, 3*dim, bias=False): weight (3C, C)
    wqkv = jax.random.normal(kw1, (3 * C, C), dtype=jnp.float32) * 0.05
    # nn.Linear(dim, dim): weight (C, C) + bias (C,)
    wproj = jax.random.normal(kw2, (C, C), dtype=jnp.float32) * 0.05
    bproj = jax.random.normal(kb, (C,), dtype=jnp.float32) * 0.05

    # Weight prep hoisted out of the per-forward path (done once per model).
    params = prepare_attention_params(wqkv, wproj, bproj,
                                      dim=C, num_heads=num_heads)

    out = attention_forward(x, params, num_heads=num_heads)
    out = jax.block_until_ready(out)

    ref = _reference(x, wqkv, wproj, bproj, num_heads=num_heads)
    assert out.shape == (B, N, C)
    # bf16 matmul operands with f32 accumulation: tolerance loosened vs pure f32.
    assert jnp.allclose(out, ref, atol=2e-2, rtol=2e-2), float(
        jnp.max(jnp.abs(out - ref)))

    print("KERNEL_OK")
</pallas_src>

<mosaic_0001>
module attributes {stable_mosaic.version = 11 : i64} {
  func.func @_attention_kernel(%arg0: i32, %arg1: memref<4x16x128xbf16, #tpu.memory_space<vmem>>, %arg2: memref<128x384xbf16, #tpu.memory_space<vmem>>, %arg3: memref<128x128xbf16, #tpu.memory_space<vmem>>, %arg4: memref<1x128xf32, #tpu.memory_space<vmem>>, %arg5: memref<4x16x128xf32, #tpu.memory_space<vmem>>) attributes {dimension_semantics = [#tpu.dimension_semantics<parallel>], iteration_bounds = array<i64: 1>, scalar_prefetch = 0 : i64, scratch_operands = 0 : i64, tpu.core_type = #tpu.core_type<tc>, window_params = [{transform_indices = @transform_0, window_bounds = array<i64: 4, 16, 128>}, {pipeline_mode = #tpu.pipeline_mode<synchronous>, transform_indices = @transform_1, window_bounds = array<i64: 128, 384>}, {pipeline_mode = #tpu.pipeline_mode<synchronous>, transform_indices = @transform_2, window_bounds = array<i64: 128, 128>}, {pipeline_mode = #tpu.pipeline_mode<synchronous>, transform_indices = @transform_3, window_bounds = array<i64: 1, 128>}, {transform_indices = @transform_4, window_bounds = array<i64: 4, 16, 128>}]} {
    %c0 = arith.constant 0 : index
    %c0_0 = arith.constant 0 : index
    %c0_1 = arith.constant 0 : index
    %0 = vector.load %arg1[%c0, %c0_0, %c0_1] : memref<4x16x128xbf16, #tpu.memory_space<vmem>>, vector<4x16x128xbf16>
    %1 = vector.shape_cast %0 : vector<4x16x128xbf16> to vector<64x128xbf16>
    %c0_2 = arith.constant 0 : index
    %c0_3 = arith.constant 0 : index
    %2 = vector.load %arg2[%c0_2, %c0_3] : memref<128x384xbf16, #tpu.memory_space<vmem>>, vector<128x384xbf16>
    %cst = arith.constant dense<0.000000e+00> : vector<64x384xf32>
    %3 = tpu.matmul %1, %2, %cst {dimension_numbers = #tpu.dot_dimension_numbers<[1], [0], [0], [1], [0, 0, 1, 1], [], []>} : vector<64x128xbf16>, vector<128x384xbf16>, vector<64x384xf32> -> vector<64x384xf32>
    %4 = arith.truncf %3 : vector<64x384xf32> to vector<64x384xbf16>
    %5 = vector.extract_strided_slice %4 {offsets = [0, 0], sizes = [64, 128], strides = [1, 1]} : vector<64x384xbf16> to vector<64x128xbf16>
    %6 = vector.shape_cast %5 : vector<64x128xbf16> to vector<4x16x8x16xbf16>
    %7 = tpu.transpose %6, [0, 2, 1, 3] : vector<4x16x8x16xbf16> -> vector<4x8x16x16xbf16>
    %8 = vector.shape_cast %7 : vector<4x8x16x16xbf16> to vector<32x16x16xbf16>
    %9 = vector.extract_strided_slice %4 {offsets = [0, 128], sizes = [64, 128], strides = [1, 1]} : vector<64x384xbf16> to vector<64x128xbf16>
    %10 = vector.shape_cast %9 : vector<64x128xbf16> to vector<4x16x8x16xbf16>
    %11 = tpu.transpose %10, [0, 2, 1, 3] : vector<4x16x8x16xbf16> -> vector<4x8x16x16xbf16>
    %12 = vector.shape_cast %11 : vector<4x8x16x16xbf16> to vector<32x16x16xbf16>
    %13 = vector.extract_strided_slice %4 {offsets = [0, 256], sizes = [64, 128], strides = [1, 1]} : vector<64x384xbf16> to vector<64x128xbf16>
    %14 = vector.shape_cast %13 : vector<64x128xbf16> to vector<4x16x8x16xbf16>
    %15 = tpu.transpose %14, [0, 2, 1, 3] : vector<4x16x8x16xbf16> -> vector<4x8x16x16xbf16>
    %16 = vector.shape_cast %15 : vector<4x8x16x16xbf16> to vector<32x16x16xbf16>
    "tpu.trace_start"() <{level = 10 : i32, message = "bnd,bmd->bnm"}> : () -> ()
    %cst_4 = arith.constant dense<0.000000e+00> : vector<32x16x16xf32>
    %17 = tpu.matmul %8, %12, %cst_4 {dimension_numbers = #tpu.dot_dimension_numbers<[2], [2], [1], [1], [0, 0, 0, 1, 1, 1], [0], [0]>} : vector<32x16x16xbf16>, vector<32x16x16xbf16>, vector<32x16x16xf32> -> vector<32x16x16xf32>
    "tpu.trace_stop"() : () -> ()
    %cst_5 = arith.constant dense<0xFF800000> : vector<32x16xf32>
    %18 = vector.multi_reduction <maximumf>, %17, %cst_5 [2] : vector<32x16x16xf32> to vector<32x16xf32>
    %19 = vector.shape_cast %18 : vector<32x16xf32> to vector<32x16x1xf32>
    %20 = vector.broadcast %19 : vector<32x16x1xf32> to vector<32x16x16xf32>
    %21 = arith.subf %17, %20 : vector<32x16x16xf32>
    %22 = math.exp %21 : vector<32x16x16xf32>
    %cst_6 = arith.constant dense<0.000000e+00> : vector<32x16xf32>
    %23 = vector.multi_reduction <add>, %22, %cst_6 [2] : vector<32x16x16xf32> to vector<32x16xf32>
    %24 = vector.shape_cast %23 : vector<32x16xf32> to vector<32x16x1xf32>
    %25 = arith.truncf %22 : vector<32x16x16xf32> to vector<32x16x16xbf16>
    "tpu.trace_start"() <{level = 10 : i32, message = "bnm,bmd->bnd"}> : () -> ()
    %cst_7 = arith.constant dense<0.000000e+00> : vector<32x16x16xf32>
    %26 = tpu.matmul %25, %16, %cst_7 {dimension_numbers = #tpu.dot_dimension_numbers<[2], [1], [1], [2], [0, 0, 0, 1, 1, 2], [0], [0]>} : vector<32x16x16xbf16>, vector<32x16x16xbf16>, vector<32x16x16xf32> -> vector<32x16x16xf32>
    "tpu.trace_stop"() : () -> ()
    %27 = tpu.reciprocal %24 {approx = true} : vector<32x16x1xf32> -> vector<32x16x1xf32>
    %28 = vector.broadcast %27 : vector<32x16x1xf32> to vector<32x16x16xf32>
    %29 = arith.mulf %26, %28 : vector<32x16x16xf32>
    %30 = arith.truncf %29 : vector<32x16x16xf32> to vector<32x16x16xbf16>
    %31 = vector.shape_cast %30 : vector<32x16x16xbf16> to vector<4x8x16x16xbf16>
    %32 = tpu.transpose %31, [0, 2, 1, 3] : vector<4x8x16x16xbf16> -> vector<4x16x8x16xbf16>
    %33 = vector.shape_cast %32 : vector<4x16x8x16xbf16> to vector<64x128xbf16>
    %c0_8 = arith.constant 0 : index
    %c0_9 = arith.constant 0 : index
    %34 = vector.load %arg3[%c0_8, %c0_9] : memref<128x128xbf16, #tpu.memory_space<vmem>>, vector<128x128xbf16>
    %cst_10 = arith.constant dense<0.000000e+00> : vector<64x128xf32>
    %35 = tpu.matmul %33, %34, %cst_10 {dimension_numbers = #tpu.dot_dimension_numbers<[1], [0], [0], [1], [0, 0, 1, 1], [], []>} : vector<64x128xbf16>, vector<128x128xbf16>, vector<64x128xf32> -> vector<64x128xf32>
    %c0_11 = arith.constant 0 : index
    %c0_12 = arith.constant 0 : index
    %36 = vector.load %arg4[%c0_11, %c0_12] : memref<1x128xf32, #tpu.memory_space<vmem>>, vector<1x128xf32>
    %37 = vector.broadcast %36 : vector<1x128xf32> to vector<64x128xf32>
    %38 = arith.addf %35, %37 : vector<64x128xf32>
    %39 = vector.shape_cast %38 : vector<64x128xf32> to vector<4x16x128xf32>
    %c0_13 = arith.constant 0 : index
    %c0_14 = arith.constant 0 : index
    %c0_15 = arith.constant 0 : index
    %40 = vector.load %arg5[%c0_13, %c0_14, %c0_15] : memref<4x16x128xf32, #tpu.memory_space<vmem>>, vector<4x16x128xf32>
    tpu.vector_store %arg5[%c0_13, %c0_14, %c0_15], %39 {strides = array<i32>} : memref<4x16x128xf32, #tpu.memory_space<vmem>>, vector<4x16x128xf32>,
    return
  }
  func.func @transform_0(%arg0: i32) -> (i32, i32, i32) {
    %c0_i32 = arith.constant 0 : i32
    %c0_i32_0 = arith.constant 0 : i32
    %c0_i32_1 = arith.constant 0 : i32
    return %arg0, %c0_i32, %c0_i32_0 : i32, i32, i32
  }
  func.func @transform_1(%arg0: i32) -> (i32, i32) {
    %c0_i32 = arith.constant 0 : i32
    %c0_i32_0 = arith.constant 0 : i32
    %c0_i32_1 = arith.constant 0 : i32
    return %c0_i32, %c0_i32_0 : i32, i32
  }
  func.func @transform_2(%arg0: i32) -> (i32, i32) {
    %c0_i32 = arith.constant 0 : i32
    %c0_i32_0 = arith.constant 0 : i32
    %c0_i32_1 = arith.constant 0 : i32
    return %c0_i32, %c0_i32_0 : i32, i32
  }
  func.func @transform_3(%arg0: i32) -> (i32, i32) {
    %c0_i32 = arith.constant 0 : i32
    %c0_i32_0 = arith.constant 0 : i32
    %c0_i32_1 = arith.constant 0 : i32
    return %c0_i32, %c0_i32_0 : i32, i32
  }
  func.func @transform_4(%arg0: i32) -> (i32, i32, i32) {
    %c0_i32 = arith.constant 0 : i32
    %c0_i32_0 = arith.constant 0 : i32
    %c0_i32_1 = arith.constant 0 : i32
    return %arg0, %c0_i32, %c0_i32_0 : i32, i32, i32
  }
}

module attributes {stable_mosaic.version = 11 : i64} {
  func.func @_attention_kernel(%arg0: i32, %arg1: memref<4x16x128xbf16, #tpu.memory_space<vmem>>, %arg2: memref<128x384xbf16, #tpu.memory_space<vmem>>, %arg3: memref<128x128xbf16, #tpu.memory_space<vmem>>, %arg4: memref<1x128xf32, #tpu.memory_space<vmem>>, %arg5: memref<4x16x128xf32, #tpu.memory_space<vmem>>) attributes {dimension_semantics = [#tpu.dimension_semantics<parallel>], iteration_bounds = array<i64: 1>, scalar_prefetch = 0 : i64, scratch_operands = 0 : i64, tpu.core_type = #tpu.core_type<tc>, window_params = [{transform_indices = @transform_0, window_bounds = array<i64: 4, 16, 128>}, {pipeline_mode = #tpu.pipeline_mode<synchronous>, transform_indices = @transform_1, window_bounds = array<i64: 128, 384>}, {pipeline_mode = #tpu.pipeline_mode<synchronous>, transform_indices = @transform_2, window_bounds = array<i64: 128, 128>}, {pipeline_mode = #tpu.pipeline_mode<synchronous>, transform_indices = @transform_3, window_bounds = array<i64: 1, 128>}, {transform_indices = @transform_4, window_bounds = array<i64: 4, 16, 128>}]} {
    %c0 = arith.constant 0 : index
    %c0_0 = arith.constant 0 : index
    %c0_1 = arith.constant 0 : index
    %0 = vector.load %arg1[%c0, %c0_0, %c0_1] : memref<4x16x128xbf16, #tpu.memory_space<vmem>>, vector<4x16x128xbf16>
    %1 = vector.shape_cast %0 : vector<4x16x128xbf16> to vector<64x128xbf16>
    %c0_2 = arith.constant 0 : index
    %c0_3 = arith.constant 0 : index
    %2 = vector.load %arg2[%c0_2, %c0_3] : memref<128x384xbf16, #tpu.memory_space<vmem>>, vector<128x384xbf16>
    %cst = arith.constant dense<0.000000e+00> : vector<64x384xf32>
    %3 = tpu.matmul %1, %2, %cst {dimension_numbers = #tpu.dot_dimension_numbers<[1], [0], [0], [1], [0, 0, 1, 1], [], []>} : vector<64x128xbf16>, vector<128x384xbf16>, vector<64x384xf32> -> vector<64x384xf32>
    %4 = arith.truncf %3 : vector<64x384xf32> to vector<64x384xbf16>
    %5 = vector.extract_strided_slice %4 {offsets = [0, 0], sizes = [64, 128], strides = [1, 1]} : vector<64x384xbf16> to vector<64x128xbf16>
    %6 = vector.shape_cast %5 : vector<64x128xbf16> to vector<4x16x8x16xbf16>
    %7 = tpu.transpose %6, [0, 2, 1, 3] : vector<4x16x8x16xbf16> -> vector<4x8x16x16xbf16>
    %8 = vector.shape_cast %7 : vector<4x8x16x16xbf16> to vector<32x16x16xbf16>
    %9 = vector.extract_strided_slice %4 {offsets = [0, 128], sizes = [64, 128], strides = [1, 1]} : vector<64x384xbf16> to vector<64x128xbf16>
    %10 = vector.shape_cast %9 : vector<64x128xbf16> to vector<4x16x8x16xbf16>
    %11 = tpu.transpose %10, [0, 2, 1, 3] : vector<4x16x8x16xbf16> -> vector<4x8x16x16xbf16>
    %12 = vector.shape_cast %11 : vector<4x8x16x16xbf16> to vector<32x16x16xbf16>
    %13 = vector.extract_strided_slice %4 {offsets = [0, 256], sizes = [64, 128], strides = [1, 1]} : vector<64x384xbf16> to vector<64x128xbf16>
    %14 = vector.shape_cast %13 : vector<64x128xbf16> to vector<4x16x8x16xbf16>
    %15 = tpu.transpose %14, [0, 2, 1, 3] : vector<4x16x8x16xbf16> -> vector<4x8x16x16xbf16>
    %16 = vector.shape_cast %15 : vector<4x8x16x16xbf16> to vector<32x16x16xbf16>
    "tpu.trace_start"() <{level = 10 : i32, message = "bnd,bmd->bnm"}> : () -> ()
    %cst_4 = arith.constant dense<0.000000e+00> : vector<32x16x16xf32>
    %17 = tpu.matmul %8, %12, %cst_4 {dimension_numbers = #tpu.dot_dimension_numbers<[2], [2], [1], [1], [0, 0, 0, 1, 1, 1], [0], [0]>} : vector<32x16x16xbf16>, vector<32x16x16xbf16>, vector<32x16x16xf32> -> vector<32x16x16xf32>
    "tpu.trace_stop"() : () -> ()
    %cst_5 = arith.constant dense<0xFF800000> : vector<32x16xf32>
    %18 = vector.multi_reduction <maximumf>, %17, %cst_5 [2] : vector<32x16x16xf32> to vector<32x16xf32>
    %19 = vector.shape_cast %18 : vector<32x16xf32> to vector<32x16x1xf32>
    %20 = vector.broadcast %19 : vector<32x16x1xf32> to vector<32x16x16xf32>
    %21 = arith.subf %17, %20 : vector<32x16x16xf32>
    %22 = math.exp %21 : vector<32x16x16xf32>
    %cst_6 = arith.constant dense<0.000000e+00> : vector<32x16xf32>
    %23 = vector.multi_reduction <add>, %22, %cst_6 [2] : vector<32x16x16xf32> to vector<32x16xf32>
    %24 = vector.shape_cast %23 : vector<32x16xf32> to vector<32x16x1xf32>
    %25 = arith.truncf %22 : vector<32x16x16xf32> to vector<32x16x16xbf16>
    "tpu.trace_start"() <{level = 10 : i32, message = "bnm,bmd->bnd"}> : () -> ()
    %cst_7 = arith.constant dense<0.000000e+00> : vector<32x16x16xf32>
    %26 = tpu.matmul %25, %16, %cst_7 {dimension_numbers = #tpu.dot_dimension_numbers<[2], [1], [1], [2], [0, 0, 0, 1, 1, 2], [0], [0]>} : vector<32x16x16xbf16>, vector<32x16x16xbf16>, vector<32x16x16xf32> -> vector<32x16x16xf32>
    "tpu.trace_stop"() : () -> ()
    %27 = tpu.reciprocal %24 {approx = true} : vector<32x16x1xf32> -> vector<32x16x1xf32>
    %28 = vector.broadcast %27 : vector<32x16x1xf32> to vector<32x16x16xf32>
    %29 = arith.mulf %26, %28 : vector<32x16x16xf32>
    %30 = arith.truncf %29 : vector<32x16x16xf32> to vector<32x16x16xbf16>
    %31 = vector.shape_cast %30 : vector<32x16x16xbf16> to vector<4x8x16x16xbf16>
    %32 = tpu.transpose %31, [0, 2, 1, 3] : vector<4x8x16x16xbf16> -> vector<4x16x8x16xbf16>
    %33 = vector.shape_cast %32 : vector<4x16x8x16xbf16> to vector<64x128xbf16>
    %c0_8 = arith.constant 0 : index
    %c0_9 = arith.constant 0 : index
    %34 = vector.load %arg3[%c0_8, %c0_9] : memref<128x128xbf16, #tpu.memory_space<vmem>>, vector<128x128xbf16>
    %cst_10 = arith.constant dense<0.000000e+00> : vector<64x128xf32>
    %35 = tpu.matmul %33, %34, %cst_10 {dimension_numbers = #tpu.dot_dimension_numbers<[1], [0], [0], [1], [0, 0, 1, 1], [], []>} : vector<64x128xbf16>, vector<128x128xbf16>, vector<64x128xf32> -> vector<64x128xf32>
    %c0_11 = arith.constant 0 : index
    %c0_12 = arith.constant 0 : index
    %36 = vector.load %arg4[%c0_11, %c0_12] : memref<1x128xf32, #tpu.memory_space<vmem>>, vector<1x128xf32>
    %37 = vector.broadcast %36 : vector<1x128xf32> to vector<64x128xf32>
    %38 = arith.addf %35, %37 : vector<64x128xf32>
    %39 = vector.shape_cast %38 : vector<64x128xf32> to vector<4x16x128xf32>
    %c0_13 = arith.constant 0 : index
    %c0_14 = arith.constant 0 : index
    %c0_15 = arith.constant 0 : index
    %40 = vector.load %arg5[%c0_13, %c0_14, %c0_15] : memref<4x16x128xf32, #tpu.memory_space<vmem>>, vector<4x16x128xf32>
    tpu.vector_store %arg5[%c0_13, %c0_14, %c0_15], %39 {strides = array<i32>} : memref<4x16x128xf32, #tpu.memory_space<vmem>>, vector<4x16x128xf32>,
    return
  }
  func.func @transform_0(%arg0: i32) -> (i32, i32, i32) {
    %c0_i32 = arith.constant 0 : i32
    %c0_i32_0 = arith.constant 0 : i32
    %c0_i32_1 = arith.constant 0 : i32
    return %arg0, %c0_i32, %c0_i32_0 : i32, i32, i32
  }
  func.func @transform_1(%arg0: i32) -> (i32, i32) {
    %c0_i32 = arith.constant 0 : i32
    %c0_i32_0 = arith.constant 0 : i32
    %c0_i32_1 = arith.constant 0 : i32
    return %c0_i32, %c0_i32_0 : i32, i32
  }
  func.func @transform_2(%arg0: i32) -> (i32, i32) {
    %c0_i32 = arith.constant 0 : i32
    %c0_i32_0 = arith.constant 0 : i32
    %c0_i32_1 = arith.constant 0 : i32
    return %c0_i32, %c0_i32_0 : i32, i32
  }
  func.func @transform_3(%arg0: i32) -> (i32, i32) {
    %c0_i32 = arith.constant 0 : i32
    %c0_i32_0 = arith.constant 0 : i32
    %c0_i32_1 = arith.constant 0 : i32
    return %c0_i32, %c0_i32_0 : i32, i32
  }
  func.func @transform_4(%arg0: i32) -> (i32, i32, i32) {
    %c0_i32 = arith.constant 0 : i32
    %c0_i32_0 = arith.constant 0 : i32
    %c0_i32_1 = arith.constant 0 : i32
    return %arg0, %c0_i32, %c0_i32_0 : i32, i32, i32
  }
}

</mosaic_0001>

<bundles_post_ra>
// kernel: tpu_custom_call.1
= control target key start
LH: loop header
LB: loop body
LE: loop exit
PB: predicated region body
PF: predicated region fallthrough
CT: control target
= control target key end

     0   :  { %9 = vsyncpa [#allocation3], 0  ;;  %s14306_s0 = inlined_call_operand.hbm [shape: bf16[4,16,128], index: 0, kind: input, shape index: {}]   ;;  %s14307_s1 = inlined_call_operand.hbm [shape: bf16[128,384], index: 1, kind: input, shape index: {}]   ;;  %s14308_s2 = inlined_call_operand.hbm [shape: bf16[128,128], index: 2, kind: input, shape index: {}]   ;;  %s14309_s3 = inlined_call_operand.hbm [shape: f32[1,128], index: 3, kind: input, shape index: {}]   ;;  %s14310_s4 = inlined_call_operand.hbm [shape: f32[4,16,128], index: 4, kind: output, shape index: {}]  }
   0x1   :  { %10 = vsyncpa [#allocation6], 0 }
   0x2   :  { %11 = vsyncpa [#allocation9], 0 }
   0x3   :  { %12 = vsyncpa [#allocation4], 0  ;;  %s11033_s15 = smov [#allocation5]   ;;  %s10915_s19 = scalar_lea.hbm %s14307_s1, 3072 }
   0x4   :  { %s30_s16 = sshll.u32 %s11033_s15, 4  ;;  %p10916_p0 = scmp.ne.s32.totalorder %s14307_s1, %s10915_s19  ;;  %s31_s16 = int_to_ptr.vmem [resolvable:$true] %s30_s16 }
   0x5   :  { %p10919_p1 = scmp.lt.u32.totalorder %s10915_s19, %s14307_s1 }
   0x7   :  { %p10921_p2 = pnand %p10919_p1, %p10916_p0 }
   0x9   :  { %10924 = shalt.err (!%p10921_p2)
}
   0xa   :  { %s10925_s24 = scalar_lea.vmem %s31_s16, 3072  ;;  %p10930_p4 = scmp.lt.s32.totalorder %s31_s16, %s31_s16 }
   0xb   :  { %p10926_p3 = scmp.ne.s32.totalorder %s31_s16, %s10925_s24  ;;  %p10931_p5 = scmp.lt.s32.totalorder %s10925_s24, %s10925_s24 }
   0xd   :  { %p10932_p6 = por %p10931_p5, %p10930_p4 }
   0xf   :  { %p10933_p7 = pnand %p10932_p6, %p10926_p3 }
  0x11   :  { %10936 = shalt.err (!%p10933_p7)
}
  0x12   :  { %s11034_s25 = smov 192   ;;  %s11035_s26 = smov 12  }
  0x13   :  { %36 = dma.hbm_to_vmem [thread:$0]  %s14307_s1, 3072, %s31_s16, [#allocation6], %s11034_s25, %s11034_s25, %s11035_s26  }
  0x14   :  { %s11036_s29 = smov [#allocation2]   ;;  %s10937_s7 = scalar_lea.hbm %s14306_s0, 512 }
  0x15   :  { %s18_s30 = sshll.u32 %s11036_s29, 4  ;;  %p10938_p8 = scmp.ne.s32.totalorder %s14306_s0, %s10937_s7  ;;  %s19_s30 = int_to_ptr.vmem [resolvable:$true] %s18_s30 }
  0x16   :  { %p10941_p9 = scmp.lt.u32.totalorder %s10937_s7, %s14306_s0 }
  0x18   :  { %p10943_p10 = pnand %p10941_p9, %p10938_p8 }
  0x1a   :  { %10946 = shalt.err (!%p10943_p10)
}
  0x1b   :  { %s10947_s12 = scalar_lea.vmem %s19_s30, 512  ;;  %p10952_p12 = scmp.lt.s32.totalorder %s19_s30, %s19_s30 }
  0x1c   :  { %p10948_p11 = scmp.ne.s32.totalorder %s19_s30, %s10947_s12  ;;  %p10953_p13 = scmp.lt.s32.totalorder %s10947_s12, %s10947_s12 }
  0x1e   :  { %p10954_p0 = por %p10953_p13, %p10952_p12 }
  0x20   :  { %p10955_p1 = pnand %p10954_p0, %p10948_p11 }
  0x22   :  { %10958 = shalt.err (!%p10955_p1)
}
  0x23   :  { %s11037_s1 = smov 64   ;;  %s11038_s13 = smov 4  }
  0x24   :  { %24 = dma.hbm_to_vmem [thread:$0]  %s14306_s0, 512, %s19_s30, [#allocation3], %s11037_s1, %s11037_s1, %s11038_s13  }
  0x25   :  { %s11039_s16 = smov [#allocation7]   ;;  %s11040_s18 = smov [#allocation8]  }
  0x26   :  { %s42_s17 = sshll.u32 %s11039_s16, 4  ;;  %s55_s19 = sshll.u32 %s11040_s18, 4  ;;  %s43_s17 = int_to_ptr.vmem [resolvable:$true] %s42_s17  ;;  %s56_s19 = int_to_ptr.vmem [resolvable:$true] %s55_s19 }
  0x27   :  { %s10959_s22 = scalar_lea.hbm %s14308_s2, 1024 }
  0x28   :  { %p10960_p2 = scmp.ne.s32.totalorder %s14308_s2, %s10959_s22  ;;  %p10963_p3 = scmp.lt.u32.totalorder %s10959_s22, %s14308_s2 }
  0x2a   :  { %p10965_p4 = pnand %p10963_p3, %p10960_p2 }
  0x2c   :  { %10968 = shalt.err (!%p10965_p4)
}
  0x2d   :  { %s10969_s0 = scalar_lea.vmem %s43_s17, 1024  ;;  %p10974_p6 = scmp.lt.s32.totalorder %s43_s17, %s43_s17 }
  0x2e   :  { %p10970_p5 = scmp.ne.s32.totalorder %s43_s17, %s10969_s0  ;;  %p10975_p7 = scmp.lt.s32.totalorder %s10969_s0, %s10969_s0 }
  0x30   :  { %p10976_p8 = por %p10975_p7, %p10974_p6 }
  0x32   :  { %p10977_p9 = pnand %p10976_p8, %p10970_p5 }
  0x34   :  { %10980 = shalt.err (!%p10977_p9)
}
  0x35   :  { %48 = dma.hbm_to_vmem [thread:$0]  %s14308_s2, 1024, %s43_s17, [#allocation6], %s11037_s1, %s11037_s1, %s11038_s13  }
  0x36   :  { %s10981_s5 = scalar_lea.hbm %s14309_s3, 16 }
  0x37   :  { %p10982_p10 = scmp.ne.s32.totalorder %s14309_s3, %s10981_s5  ;;  %p10985_p11 = scmp.lt.u32.totalorder %s10981_s5, %s14309_s3 }
  0x39   :  { %p10987_p12 = pnand %p10985_p11, %p10982_p10 }
  0x3b   :  { %10990 = shalt.err (!%p10987_p12)
}
  0x3c   :  { %s10991_s10 = scalar_lea.vmem %s56_s19, 16  ;;  %s10995_s11 = scalar_lea.vmem %s56_s19, 32 }
  0x3d   :  { %p10992_p13 = scmp.ne.s32.totalorder %s56_s19, %s10991_s10  ;;  %p10996_p0 = scmp.lt.s32.totalorder %s56_s19, %s56_s19 }
  0x3e   :  { %p10997_p1 = scmp.lt.s32.totalorder %s10995_s11, %s10991_s10 }
  0x40   :  { %p10998_p2 = por %p10997_p1, %p10996_p0 }
  0x42   :  { %p10999_p3 = pnand %p10998_p2, %p10992_p13 }
  0x44   :  { %11002 = shalt.err (!%p10999_p3)
}
  0x45   :  { %58 = dma.hbm_to_vmem [thread:$0]  %s14309_s3, 16, %s56_s19, [#allocation9]  }
  0x46   :  { %11025 = dma.done.wait [#allocation3], 512  }
  0x47   :  { %11026 = vsyncadd [#allocation3], 4294966784 }
  0x48   :  { %11027 = dma.done.wait [#allocation6], 4096  }
  0x49   :  { %11028 = vsyncadd [#allocation6], 4294963200 }
  0x4a   :  { %11029 = dma.done.wait [#allocation9], 16  }
  0x4b   :  { %11030 = vsyncadd [#allocation9], 4294967280  ;;  %v11041_v0 = vmov 0   ;;  %v10615_v1 = vld [vmem:[#allocation5 + $0x4] ss:$12 sps:$4 sm:$0xff]   ;;  %v10640_v25 = vld [vmem:[#allocation2 + $0x8] sm:$0xff]  }
  0x4c   :  { %296 = vmatprep.mubr.bf16.mxu1 %v11041_v0  ;;  %v10617_v2 = vld [vmem:[#allocation5] ss:$12 sps:$4 sm:$0xff]   ;;  %264 = vmatprep.subr.bf16.mxu1 %v10615_v1  ;;  %v10618_v3 = vld [vmem:[#allocation5 + $0x1c] ss:$12 sps:$4 sm:$0xff]   ;;  %v10620_v4 = vld [vmem:[#allocation5 + $0x18] ss:$12 sps:$4 sm:$0xff]  }
  0x4d   :  { %265 = vmatpush1.bf16.msra.mxu1 %v10617_v2  ;;  %v10621_v5 = vld [vmem:[#allocation5 + $0x34] ss:$12 sps:$4 sm:$0xff]   ;;  %v10623_v6 = vld [vmem:[#allocation5 + $0x30] ss:$12 sps:$4 sm:$0xff]   ;;  %v10624_v7 = vld [vmem:[#allocation5 + $0x4c] ss:$12 sps:$4 sm:$0xff]   ;;  %v607_v2 = vlaneseq }
  0x4e   :  { %266 = vmatprep.subr.bf16.mxu1 %v10618_v3  ;;  %v10626_v8 = vld [vmem:[#allocation5 + $0x48] ss:$12 sps:$4 sm:$0xff]   ;;  %v10639_v9 = vld [vmem:[#allocation2] sm:$0xff]   ;;  %v10635_v18 = vld [vmem:[#allocation5 + $0x90] ss:$12 sps:$4 sm:$0xff]   ;;  %s11042_s3 = smov 96  }
  0x4f   :  { %v10627_v10 = vld [vmem:[#allocation5 + $0x64] ss:$12 sps:$4 sm:$0xff]   ;;  %v10629_v11 = vld [vmem:[#allocation5 + $0x60] ss:$12 sps:$4 sm:$0xff]   ;;  %10177 = vmatprep.mubr.bf16.mxu0 %v10639_v9  ;;  %v10630_v12 = vld [vmem:[#allocation5 + $0x7c] ss:$12 sps:$4 sm:$0xff]  }
  0x50   :  { %v10643_v13 = vld [vmem:[#allocation5 + $0x8] ss:$12 sps:$4 sm:$0xff]   ;;  %v10644_v14 = vld [vmem:[#allocation5 + $0x20] ss:$12 sps:$4 sm:$0xff]   ;;  %v10632_v15 = vld [vmem:[#allocation5 + $0x78] ss:$12 sps:$4 sm:$0xff]  }
  0x51   :  { %267 = vmatpush1.bf16.msra.mxu1 %v10620_v4  ;;  %10161 = vmatprep.subr.bf16.mxu0 %v10643_v13  ;;  %v10645_v16 = vld [vmem:[#allocation5 + $0x38] ss:$12 sps:$4 sm:$0xff]   ;;  %v10633_v17 = vld [vmem:[#allocation5 + $0x94] ss:$12 sps:$4 sm:$0xff]   ;;  %v10646_v20 = vld [vmem:[#allocation5 + $0x50] ss:$12 sps:$4 sm:$0xff]  }
  0x52   :  { %268 = vmatprep.subr.bf16.mxu1 %v10621_v5  ;;  %10162 = vmatpush3.bf16.msra.mxu0 %v10643_v13  ;;  %v10636_v19 = vld [vmem:[#allocation5 + $0xac] ss:$12 sps:$4 sm:$0xff]   ;;  %v10638_v21 = vld [vmem:[#allocation5 + $0xa8] ss:$12 sps:$4 sm:$0xff]   ;;  %v10650_v26 = vld [vmem:[#allocation5 + $0xb0] ss:$12 sps:$4 sm:$0xff]  }
  0x53   :  { %10163 = vmatprep.subr.bf16.mxu0 %v10644_v14  ;;  %v10647_v22 = vld [vmem:[#allocation5 + $0x68] ss:$12 sps:$4 sm:$0xff]   ;;  %v10648_v23 = vld [vmem:[#allocation5 + $0x80] ss:$12 sps:$4 sm:$0xff]   ;;  %v10649_v24 = vld [vmem:[#allocation5 + $0x98] ss:$12 sps:$4 sm:$0xff]  }
  0x54   :  { %v10641_v27 = vld [vmem:[#allocation2 + $0x10] sm:$0xff]   ;;  %v10642_v28 = vld [vmem:[#allocation2 + $0x18] sm:$0xff]   ;;  %s11043_s13 = smov 112   ;;  %s11044_s14 = smov 80   ;;  %v14311_v53 = vmov 0.0   ;;  %vm11049_vm0 = vmmov 0  }
  0x55   :  { %269 = vmatpush1.bf16.msra.mxu1 %v10623_v6  ;;  %s11045_s15 = smov 48   ;;  %s11046_s16 = smov 32   ;;  %v608_v6 = vshrl.u32 %v607_v2, 7  ;;  %vm4562_vm1 = vcmask 130048   ;;  %vm9623_vm2 = vcmask 261120   ;;  %vm9632_vm3 = vcmask 392192  }
  0x56   :  { %270 = vmatprep.subr.bf16.mxu1 %v10624_v7  ;;  %10164 = vmatpush3.bf16.msra.mxu0 %v10644_v14  ;;  %s11047_s17 = smov 16   ;;  %v11051_v7 = vmov 1934713408   ;;  %vm9641_vm4 = vcmask 523264   ;;  %vm9650_vm5 = vcmask 654336   ;;  %vm9659_vm6 = vcmask 785408  }
  0x57   :  { %10165 = vmatprep.subr.bf16.mxu0 %v10645_v16  ;;  %vm9668_vm7 = vcmask 916480  }
  0x59   :  { %271 = vmatpush1.bf16.msra.mxu1 %v10626_v8  ;;  %v637_v8 = vunpack.c.l.s4 %v11051_v7 }
  0x5a   :  { %272 = vmatprep.subr.bf16.mxu1 %v10627_v10  ;;  %10166 = vmatpush3.bf16.msra.mxu0 %v10645_v16 }
  0x5b   :  { %10167 = vmatprep.subr.bf16.mxu0 %v10646_v20 }
  0x5d   :  { %273 = vmatpush1.bf16.msra.mxu1 %v10629_v11 }
  0x5e   :  { %274 = vmatprep.subr.bf16.mxu1 %v10630_v12  ;;  %10168 = vmatpush3.bf16.msra.mxu0 %v10646_v20 }
  0x5f   :  { %10169 = vmatprep.subr.bf16.mxu0 %v10647_v22 }
  0x61   :  { %275 = vmatpush1.bf16.msra.mxu1 %v10632_v15  ;;  %v638_v15 = vunpack.c.0.s8 %v637_v8 }
  0x62   :  { %276 = vmatprep.subr.bf16.mxu1 %v10633_v17  ;;  %10170 = vmatpush3.bf16.msra.mxu0 %v10647_v22 }
  0x63   :  { %10171 = vmatprep.subr.bf16.mxu0 %v10648_v23 }
  0x65   :  { %277 = vmatpush1.bf16.msra.mxu1 %v10635_v18 }
  0x66   :  { %278 = vmatprep.subr.bf16.mxu1 %v10636_v19  ;;  %10172 = vmatpush3.bf16.msra.mxu0 %v10648_v23 }
  0x67   :  { %10173 = vmatprep.subr.bf16.mxu0 %v10649_v24 }
  0x69   :  { %279 = vmatpush1.bf16.msra.mxu1 %v10638_v21 }
  0x6a   :  { %10174 = vmatpush3.bf16.msra.mxu0 %v10649_v24  ;;  %10185 = vmatprep.subr.bf16.mxu1 %v14311_v53 }
  0x6b   :  { %10175 = vmatprep.subr.bf16.mxu0 %v10650_v26 }
  0x6c   :  { %297 = vmatmul.mubr.bf16.vlgmr.msra.gmra.mrb[0].mxu1 %v10639_v9 }
  0x6d   :  { %306 = vmatprep.mubr.bf16.mxu1 %v11041_v0 }
  0x6e   :  { %10176 = vmatpush3.bf16.msra.mxu0 %v10650_v26 }
  0x6f   :  { %10197 = vmatprep.subr.bf16.mxu0 %v14311_v53 }
  0x71   :  { %10178 = vmatmul.mubr.bf16.vlgmr.msra.gmra.mrb[0].mxu0 %v10640_v25 }
  0x72   :  { %10181 = vmatprep.mubr.bf16.mxu0 %v10641_v27 }
  0x74   :  { %307 = vmatmul.mubr.bf16.gmra.mrb[4].mxu1 %v10640_v25 }
  0x75   :  { %316 = vmatprep.mubr.bf16.mxu1 %v11041_v0 }
  0x79   :  { %10182 = vmatmul.mubr.bf16.gmra.mrb[4].mxu0 %v10642_v28 }
  0x7a   :  { %10199 = vmatprep.mubr.msk.bf16.mxu0 %vm11049_vm0, %v14311_v53 }
  0x7c   :  { %317 = vmatmul.mubr.bf16.gmra.mrb[8].mxu1 %v10641_v27 }
  0x7d   :  { %326 = vmatprep.mubr.bf16.mxu1 %v11041_v0  ;;  %v11050_v0 = vmov 1983009808  }
  0x7e   :  { %v605_v1 = vunpack.c.l.s4 %v11050_v0 }
  0x80   :  { %v606_v5 = vunpack.c.0.s8 %v605_v1 }
  0x82   :  { %v11302_v13 = vsub.s32 %v606_v5, %v608_v6 }
  0x84   :  { %327 = vmatmul.mubr.bf16.gmra.mrb[12].mxu1 %v10642_v28 }
  0x85   :  { %10187 = vmatprep.mubr.msk.bf16.mxu1 %vm11049_vm0, %v14311_v53 }
 0x13f   :  { %v298_v29 = vpop.f32.mrb[0].mxu1 }
 0x140   :  { %v300_v30 = vpop.f32.mrb[1].mxu1 }
 0x141   :  { %v302_v31 = vpop.f32.mrb[2].mxu1 }
 0x142   :  { %v11136_v32 = vpack.c.bf16 %v302_v31, %v298_v29  ;;  %v304_v33 = vpop.f32.mrb[3].mxu1 }
 0x143   :  { %v11138_v34 = vpack.c.bf16 %v304_v33, %v300_v30 }
 0x144   :  { %426 = vrot.lane.b32.xlu0 %v11136_v32, %s11042_s3  ;;  %418 = vrot.lane.b32.xlu1 %v11136_v32, %s11043_s13  ;;  %v10179_v54 = vpop.f32.mrb[0].mxu0  ;;  %v478_v11 = vshrl.u32 %v11136_v32, 16 }
 0x145   :  { %v371_v55 = vpop.f32.mrb[1].mxu0  ;;  %v1850_v12 = vshrl.u32 %v11138_v34, 16 }
 0x146   :  { %v10180_v56 = vpop.f32.mrb[2].mxu0 }
 0x147   :  { %v308_v35 = vpop.f32.mrb[4].mxu1  ;;  %v374_v57 = vpop.f32.mrb[3].mxu0  ;;  %v11244_v59 = vpack.c.bf16 %v10180_v56, %v10179_v54 }
 0x148   :  { %434 = vrot.lane.b32.xlu1 %v11136_v32, %s11044_s14  ;;  %1790 = vrot.lane.b32.xlu0 %v11138_v34, %s11043_s13  ;;  %v310_v36 = vpop.f32.mrb[5].mxu1  ;;  %v11242_v58 = vpack.c.bf16 %v374_v57, %v371_v55 }
 0x149   :  { %v312_v37 = vpop.f32.mrb[6].mxu1  ;;  %14374 = vst [vmem:[#allocation17_spill] sm:$0xff] %v11244_v59 }
 0x14a   :  { %v11148_v38 = vpack.c.bf16 %v312_v37, %v308_v35  ;;  %v314_v39 = vpop.f32.mrb[7].mxu1  ;;  %14373 = vst [vmem:[#allocation16_spill] sm:$0xff] %v11242_v58  ;;  %v11313_v35 = vsub.s32 %v638_v15, %v608_v6 }
 0x14b   :  { %v11150_v40 = vpack.c.bf16 %v314_v39, %v310_v36 }
 0x14c   :  { %1806 = vrot.lane.b32.xlu1 %v11138_v34, %s11044_s14  ;;  %1798 = vrot.lane.b32.xlu0 %v11138_v34, %s11042_s3  ;;  %v510_v20 = vshrl.u32 %v11148_v38, 16  ;;  %v11309_v30 = vpop.f32.mrb[4].mxu0 }
 0x14d   :  { %v1882_v21 = vshrl.u32 %v11150_v40, 16  ;;  %v11316_v36 = vpop.f32.mrb[5].mxu0 }
 0x14e   :  { %14375 = vst [vmem:[#allocation18_spill] sm:$0xff] %v11316_v36  ;;  %v11321_v54 = vpop.f32.mrb[6].mxu0 }
 0x14f   :  { %v318_v41 = vpop.f32.mrb[8].mxu1  ;;  %14376 = vst [vmem:[#allocation19_spill] sm:$0xff] %v11321_v54  ;;  %v11331_v15 = vpop.f32.mrb[7].mxu0 }
 0x150   :  { %1814 = vrot.lane.b32.xlu1 %v11138_v34, %s11037_s1  ;;  %1822 = vrot.lane.b32.xlu0 %v11138_v34, %s11045_s15  ;;  %v320_v42 = vpop.f32.mrb[9].mxu1  ;;  %14377 = vst [vmem:[#allocation20_spill] sm:$0xff] %v11331_v15 }
 0x151   :  { %v322_v43 = vpop.f32.mrb[10].mxu1 }
 0x152   :  { %v11160_v44 = vpack.c.bf16 %v322_v43, %v318_v41  ;;  %v324_v45 = vpop.f32.mrb[11].mxu1 }
 0x153   :  { %v11162_v46 = vpack.c.bf16 %v324_v45, %v320_v42 }
 0x154   :  { %1830 = vrot.lane.b32.xlu1 %v11138_v34, %s11046_s16  ;;  %1838 = vrot.lane.b32.xlu0 %v11138_v34, %s11047_s17 }
 0x157   :  { %v328_v47 = vpop.f32.mrb[12].mxu1 }
 0x158   :  { %450 = vrot.lane.b32.xlu1 %v11136_v32, %s11045_s15  ;;  %442 = vrot.lane.b32.xlu0 %v11136_v32, %s11037_s1  ;;  %v330_v48 = vpop.f32.mrb[13].mxu1 }
 0x159   :  { %v332_v49 = vpop.f32.mrb[14].mxu1 }
 0x15a   :  { %v11172_v50 = vpack.c.bf16 %v332_v49, %v328_v47  ;;  %v334_v51 = vpop.f32.mrb[15].mxu1 }
 0x15b   :  { %v11174_v52 = vpack.c.bf16 %v334_v51, %v330_v48 }
 0x15c   :  { %466 = vrot.lane.b32.xlu1 %v11136_v32, %s11047_s17  ;;  %458 = vrot.lane.b32.xlu0 %v11136_v32, %s11046_s16 }
 0x15d   :  { %14372 = vst [vmem:[#allocation15_spill] sm:$0xff] %v11174_v52 }
 0x160   :  { %428 = vrot.lane.b32.xlu0 %v11148_v38, %s11042_s3  ;;  %420 = vrot.lane.b32.xlu1 %v11148_v38, %s11043_s13 }
 0x164   :  { %436 = vrot.lane.b32.xlu1 %v11148_v38, %s11044_s14  ;;  %1792 = vrot.lane.b32.xlu0 %v11150_v40, %s11043_s13 }
 0x168   :  { %1800 = vrot.lane.b32.xlu1 %v11150_v40, %s11042_s3  ;;  %1808 = vrot.lane.b32.xlu0 %v11150_v40, %s11044_s14 }
 0x16c   :  { %1816 = vrot.lane.b32.xlu1 %v11150_v40, %s11037_s1  ;;  %1824 = vrot.lane.b32.xlu0 %v11150_v40, %s11045_s15 }
 0x170   :  { %1832 = vrot.lane.b32.xlu1 %v11150_v40, %s11046_s16  ;;  %1840 = vrot.lane.b32.xlu0 %v11150_v40, %s11047_s17 }
 0x174   :  { %452 = vrot.lane.b32.xlu1 %v11148_v38, %s11045_s15  ;;  %444 = vrot.lane.b32.xlu0 %v11148_v38, %s11037_s1 }
 0x178   :  { %468 = vrot.lane.b32.xlu1 %v11148_v38, %s11047_s17  ;;  %460 = vrot.lane.b32.xlu0 %v11148_v38, %s11046_s16 }
 0x17c   :  { %430 = vrot.lane.b32.xlu0 %v11160_v44, %s11042_s3  ;;  %422 = vrot.lane.b32.xlu1 %v11160_v44, %s11043_s13 }
 0x180   :  { %438 = vrot.lane.b32.xlu1 %v11160_v44, %s11044_s14  ;;  %1794 = vrot.lane.b32.xlu0 %v11162_v46, %s11043_s13 }
 0x184   :  { %1802 = vrot.lane.b32.xlu1 %v11162_v46, %s11042_s3  ;;  %1810 = vrot.lane.b32.xlu0 %v11162_v46, %s11044_s14 }
 0x188   :  { %1818 = vrot.lane.b32.xlu1 %v11162_v46, %s11037_s1  ;;  %1826 = vrot.lane.b32.xlu0 %v11162_v46, %s11045_s15 }
 0x18c   :  { %1834 = vrot.lane.b32.xlu1 %v11162_v46, %s11046_s16  ;;  %1842 = vrot.lane.b32.xlu0 %v11162_v46, %s11047_s17 }
 0x190   :  { %454 = vrot.lane.b32.xlu1 %v11160_v44, %s11045_s15  ;;  %446 = vrot.lane.b32.xlu0 %v11160_v44, %s11037_s1 }
 0x194   :  { %470 = vrot.lane.b32.xlu1 %v11160_v44, %s11047_s17  ;;  %462 = vrot.lane.b32.xlu0 %v11160_v44, %s11046_s16 }
 0x198   :  { %432 = vrot.lane.b32.xlu0 %v11172_v50, %s11042_s3  ;;  %424 = vrot.lane.b32.xlu1 %v11172_v50, %s11043_s13 }
 0x19c   :  { %440 = vrot.lane.b32.xlu1 %v11172_v50, %s11044_s14  ;;  %1796 = vrot.lane.b32.xlu0 %v11174_v52, %s11043_s13 }
 0x1a0   :  { %1804 = vrot.lane.b32.xlu1 %v11174_v52, %s11042_s3  ;;  %1812 = vrot.lane.b32.xlu0 %v11174_v52, %s11044_s14 }
 0x1a4   :  { %1820 = vrot.lane.b32.xlu1 %v11174_v52, %s11037_s1  ;;  %1828 = vrot.lane.b32.xlu0 %v11174_v52, %s11045_s15 }
 0x1a8   :  { %1836 = vrot.lane.b32.xlu1 %v11174_v52, %s11046_s16  ;;  %1844 = vrot.lane.b32.xlu0 %v11174_v52, %s11047_s17 }
 0x1ac   :  { %456 = vrot.lane.b32.xlu1 %v11172_v50, %s11045_s15  ;;  %448 = vrot.lane.b32.xlu0 %v11172_v50, %s11037_s1 }
 0x1b0   :  { %472 = vrot.lane.b32.xlu1 %v11172_v50, %s11047_s17  ;;  %464 = vrot.lane.b32.xlu0 %v11172_v50, %s11046_s16 }
 0x1b4   :  { %3162 = vrot.lane.b32.xlu1 %v11242_v58, %s11043_s13  ;;  %3170 = vrot.lane.b32.xlu0 %v11242_v58, %s11042_s3 }
 0x1b6   :  { %v11278_v60 = vpop.permute.xlu0 %426  ;;  %v11280_v61 = vpop.permute.xlu1 %418 }
 0x1b7   :  { %v476_v47 = vpack.i.b16 %v11280_v61, %v11136_v32  ;;  %v479_v55 = vshrl.u32 %v11280_v61, 16 }
 0x1b8   :  { %3178 = vrot.lane.b32.xlu1 %v11242_v58, %s11044_s14  ;;  %3194 = vrot.lane.b32.xlu0 %v11242_v58, %s11045_s15 }
 0x1ba   :  { %v11286_v62 = vpop.permute.xlu1 %434  ;;  %v1791_v63 = vpop.permute.xlu0 %1790 }
 0x1bb   :  { %v1848_v22 = vpack.i.b16 %v1791_v63, %v11138_v34  ;;  %v1851_v23 = vshrl.u32 %v1791_v63, 16  ;;  %v487_v0 = vshrl.u32 %v11286_v62, 16 }
 0x1bc   :  { %3186 = vrot.lane.b32.xlu1 %v11242_v58, %s11037_s1  ;;  %3210 = vrot.lane.b32.xlu0 %v11242_v58, %s11047_s17 }
 0x1bd   :  { %v1852_v56 = vpack.i.b16 %v1851_v23, %v1850_v12  ;;  %v484_v23 = vpack.i.b16 %v11286_v62, %v11278_v60 }
 0x1be   :  { %v1807_v3 = vpop.permute.xlu1 %1806  ;;  %v1799_v4 = vpop.permute.xlu0 %1798 }
 0x1bf   :  { %v1859_v24 = vshrl.u32 %v1807_v3, 16  ;;  %v1858_v25 = vshrl.u32 %v1799_v4, 16  ;;  %v1856_v26 = vpack.i.b16 %v1807_v3, %v1799_v4 }
 0x1c0   :  { %3202 = vrot.lane.b32.xlu1 %v11242_v58, %s11046_s16  ;;  %3164 = vrot.lane.b32.xlu0 %v11244_v59, %s11043_s13 }
 0x1c1   :  { %v1860_v48 = vpack.i.b16 %v1859_v24, %v1858_v25 }
 0x1c2   :  { %v1815_v9 = vpop.permute.xlu1 %1814  ;;  %v1823_v10 = vpop.permute.xlu0 %1822 }
 0x1c3   :  { %v1864_v14 = vpack.i.b16 %v1823_v10, %v1815_v9  ;;  %v1866_v16 = vshrl.u32 %v1815_v9, 16  ;;  %v1867_v17 = vshrl.u32 %v1823_v10, 16 }
 0x1c4   :  { %3172 = vrot.lane.b32.xlu1 %v11244_v59, %s11042_s3  ;;  %3188 = vrot.lane.b32.xlu0 %v11244_v59, %s11037_s1 }
 0x1c5   :  { %v1974_v31 = vcombine.low %v1848_v22, %v1864_v14  ;;  %v1975_v33 = vcombine.high %v1848_v22, %v1864_v14  ;;  %v1868_v37 = vpack.i.b16 %v1867_v17, %v1866_v16  ;;  %v486_v16 = vshrl.u32 %v11278_v60, 16 }
 0x1c6   :  { %v1831_v18 = vpop.permute.xlu1 %1830  ;;  %v1839_v19 = vpop.permute.xlu0 %1838  ;;  %v480_v22 = vpack.i.b16 %v479_v55, %v478_v11 }
 0x1c7   :  { %v1874_v27 = vshrl.u32 %v1831_v18, 16  ;;  %v1872_v28 = vpack.i.b16 %v1839_v19, %v1831_v18  ;;  %v1875_v29 = vshrl.u32 %v1839_v19, 16  ;;  %v1982_v1 = vrot.slane %v1974_v31, %v11302_v13 }
 0x1c8   :  { %3180 = vrot.lane.b32.xlu1 %v11244_v59, %s11044_s14  ;;  %3204 = vrot.lane.b32.xlu0 %v11244_v59, %s11046_s16  ;;  %v1989_v2 = vrot.slane %v1975_v33, %v11302_v13  ;;  %v2042_v4 = vcombine.low %v1852_v56, %v1868_v37  ;;  %v2043_v5 = vcombine.high %v1852_v56, %v1868_v37 }
 0x1c9   :  { %v1876_v39 = vpack.i.b16 %v1875_v29, %v1874_v27  ;;  %v1990_v41 = vcombine.low %v1856_v26, %v1872_v28  ;;  %v1991_v42 = vcombine.high %v1856_v26, %v1872_v28  ;;  %v488_v26 = vpack.i.b16 %v487_v0, %v486_v16 }
 0x1ca   :  { %v451_v43 = vpop.permute.xlu1 %450  ;;  %v443_v45 = vpop.permute.xlu0 %442  ;;  %v2050_v27 = vrot.slane %v2042_v4, %v11302_v13  ;;  %v2057_v28 = vrot.slane %v2043_v5, %v11302_v13 }
 0x1cb   :  { %v492_v49 = vpack.i.b16 %v451_v43, %v443_v45  ;;  %v1998_v57 = vrot.slane %v1990_v41, %v11302_v13  ;;  %v2005_v63 = vrot.slane %v1991_v42, %v11302_v13  ;;  %v2058_v3 = vcombine.low %v1860_v48, %v1876_v39 }
 0x1cc   :  { %3196 = vrot.lane.b32.xlu1 %v11244_v59, %s11045_s15  ;;  %v2059_v6 = vcombine.high %v1860_v48, %v1876_v39  ;;  %v495_v7 = vshrl.u32 %v451_v43, 16  ;;  %v494_v12 = vshrl.u32 %v443_v45, 16 }
 0x1cd   :  { %v2006_v9 = vcombine.low %v1982_v1, %v1998_v57  ;;  %v2007_v10 = vcombine.high %v1982_v1, %v1998_v57  ;;  %v602_v14 = vcombine.low %v476_v47, %v492_v49  ;;  %v2022_v17 = vcombine.low %v1989_v2, %v2005_v63 }
 0x1ce   :  { %v467_v61 = vpop.permute.xlu1 %466  ;;  %v459_v8 = vpop.permute.xlu0 %458  ;;  %v2023_v18 = vcombine.high %v1989_v2, %v2005_v63  ;;  %v2066_v24 = vrot.slane %v2058_v3, %v11302_v13  ;;  %v603_v25 = vcombine.high %v476_v47, %v492_v49  ;;  %v2073_v29 = vrot.slane %v2059_v6, %v11302_v13 }
 0x1cf   :  { %v11350_v32 = vrot.slane %v2006_v9, %v11313_v35  ;;  %v11353_v11 = vrot.slane %v2007_v10, %v11313_v35  ;;  %v496_v60 = vpack.i.b16 %v495_v7, %v494_v12  ;;  %v610_v62 = vrot.slane %v602_v14, %v11302_v13 }
 0x1d0   :  { %3212 = vrot.lane.b32.xlu1 %v11244_v59, %s11047_s17  ;;  %v11357_v37 = vrot.slane %v2022_v17, %v11313_v35  ;;  %v11360_v39 = vrot.slane %v2023_v18, %v11313_v35  ;;  %v503_v41 = vshrl.u32 %v467_v61, 16  ;;  %v500_v42 = vpack.i.b16 %v467_v61, %v459_v8 }
 0x1d1   :  { %v2074_v43 = vcombine.low %v2050_v27, %v2066_v24  ;;  %v2075_v45 = vcombine.high %v2050_v27, %v2066_v24  ;;  %v617_v47 = vrot.slane %v603_v25, %v11302_v13  ;;  %v502_v48 = vshrl.u32 %v459_v8, 16 }
 0x1d2   :  { %v11345_v31 = vpop.permute.xlu0 %428  ;;  %v11347_v33 = vpop.permute.xlu1 %420  ;;  %v2090_v49 = vcombine.low %v2057_v28, %v2073_v29  ;;  %v2091_v55 = vcombine.high %v2057_v28, %v2073_v29  ;;  %v618_v56 = vcombine.low %v484_v23, %v500_v42  ;;  %v619_v57 = vcombine.high %v484_v23, %v500_v42 }
 0x1d3   :  { %v2518_v0 = vcombine.low %v11350_v32, %v11353_v11  ;;  %v670_v1 = vcombine.low %v480_v22, %v496_v60  ;;  %v671_v2 = vcombine.high %v480_v22, %v496_v60  ;;  %v504_v3 = vpack.i.b16 %v503_v41, %v502_v48 }
 0x1d4   :  { %v9888_v5 = vcombine.high %v11350_v32, %v11353_v11  ;;  %v2534_v6 = vcombine.low %v11357_v37, %v11360_v39  ;;  %v626_v7 = vrot.slane %v618_v56, %v11302_v13  ;;  %v633_v61 = vrot.slane %v619_v57, %v11302_v13 }
 0x1d5   :  { %v11372_v8 = vrot.slane %v2074_v43, %v11313_v35  ;;  %v9889_v9 = vcombine.high %v11357_v37, %v11360_v39  ;;  %v686_v10 = vcombine.low %v488_v26, %v504_v3  ;;  %v687_v12 = vcombine.high %v488_v26, %v504_v3 }
 0x1d6   :  { %v437_v63 = vpop.permute.xlu1 %436  ;;  %v1793_v4 = vpop.permute.xlu0 %1792  ;;  %v634_v14 = vcombine.low %v610_v62, %v626_v7  ;;  %v635_v16 = vcombine.high %v610_v62, %v626_v7  ;;  %v650_v17 = vcombine.low %v617_v47, %v633_v61  ;;  %v651_v18 = vcombine.high %v617_v47, %v633_v61 }
 0x1d7   :  { %v678_v22 = vrot.slane %v670_v1, %v11302_v13  ;;  %v685_v23 = vrot.slane %v671_v2, %v11302_v13  ;;  %v694_v24 = vrot.slane %v686_v10, %v11302_v13  ;;  %v701_v25 = vrot.slane %v687_v12, %v11302_v13 }
 0x1d8   :  { %v642_v27 = vrot.slane %v634_v14, %v11313_v35  ;;  %v649_v28 = vrot.slane %v635_v16, %v11313_v35  ;;  %v658_v29 = vrot.slane %v650_v17, %v11313_v35  ;;  %v665_v26 = vrot.slane %v651_v18, %v11313_v35 }
 0x1d9   :  { %v702_v11 = vcombine.low %v678_v22, %v694_v24  ;;  %v703_v60 = vcombine.high %v678_v22, %v694_v24  ;;  %v718_v62 = vcombine.low %v685_v23, %v701_v25  ;;  %v719_v37 = vcombine.high %v685_v23, %v701_v25 }
 0x1da   :  { %v11384_v32 = vpop.permute.xlu1 %1800  ;;  %v11386_v39 = vpop.permute.xlu0 %1808  ;;  %v1146_v41 = vcombine.low %v642_v27, %v649_v28  ;;  %v9872_v42 = vcombine.high %v642_v27, %v649_v28  ;;  %v1162_v43 = vcombine.low %v658_v29, %v665_v26  ;;  %v9873_v47 = vcombine.high %v658_v29, %v665_v26 }
 0x1db   :  { %v2089_v48 = vrot.slane %v2075_v45, %v11313_v35  ;;  %v710_v56 = vrot.slane %v702_v11, %v11313_v35  ;;  %v717_v57 = vrot.slane %v703_v60, %v11313_v35  ;;  %v511_v1 = vshrl.u32 %v11347_v33, 16 }
 0x1dc   :  { %v2098_v2 = vrot.slane %v2090_v49, %v11313_v35  ;;  %v2105_v3 = vrot.slane %v2091_v55, %v11313_v35  ;;  %v519_v7 = vshrl.u32 %v437_v63, 16  ;;  %v1883_v61 = vshrl.u32 %v1793_v4, 16 }
 0x1dd   :  { %v726_v10 = vrot.slane %v718_v62, %v11313_v35  ;;  %v733_v12 = vrot.slane %v719_v37, %v11313_v35  ;;  %v11397_v14 = vrot.slane %v1146_v41, %v11302_v13  ;;  %v11400_v45 = vrot.slane %v9872_v42, %v11302_v13 }
 0x1de   :  { %v11403_v16 = vrot.slane %v1162_v43, %v11302_v13  ;;  %v11406_v17 = vrot.slane %v9873_v47, %v11302_v13  ;;  %v518_v49 = vshrl.u32 %v11345_v31, 16  ;;  %v11411_v55 = vpack.i.b16 %v11347_v33, %v11148_v38  ;;  %v1817_v18 = vpop.permute.xlu1 %1816  ;;  %v1825_v27 = vpop.permute.xlu0 %1824 }
 0x1df   :  { %v1214_v22 = vcombine.low %v710_v56, %v717_v57  ;;  %v11415_v23 = vpack.i.b16 %v511_v1, %v510_v20  ;;  %v11418_v24 = vpack.i.b16 %v437_v63, %v11345_v31  ;;  %v1880_v25 = vpack.i.b16 %v1793_v4, %v11150_v40 }
 0x1e0   :  { %v9874_v28 = vcombine.high %v710_v56, %v717_v57  ;;  %v11421_v29 = vpack.i.b16 %v519_v7, %v518_v49  ;;  %v11425_v26 = vpack.i.b16 %v1883_v61, %v1882_v21  ;;  %v11428_v33 = vrot.slane %v2518_v0, %v11302_v13 }
 0x1e1   :  { %v1178_v38 = vcombine.low %v11397_v14, %v11400_v45  ;;  %v1230_v20 = vcombine.low %v726_v10, %v733_v12  ;;  %v9875_v11 = vcombine.high %v726_v10, %v733_v12  ;;  %v1890_v31 = vshrl.u32 %v11384_v32, 16 }
 0x1e2   :  { %v1194_v4 = vcombine.low %v11403_v16, %v11406_v17  ;;  %v11438_v40 = vrot.slane %v9888_v5, %v11302_v13  ;;  %v11441_v21 = vrot.slane %v2534_v6, %v11302_v13  ;;  %v11446_v60 = vrot.slane %v1214_v22, %v11302_v13  ;;  %v1833_v6 = vpop.permute.xlu1 %1832 }
 0x1e3   :  { %v11449_v62 = vrot.slane %v9889_v9, %v11302_v13  ;;  %v2586_v37 = vcombine.low %v11372_v8, %v2089_v48  ;;  %v11453_v41 = vrot.slane %v9874_v28, %v11302_v13  ;;  %v1896_v42 = vpack.i.b16 %v1825_v27, %v1817_v18  ;;  %v1841_v9 = vpop.permute.xlu0 %1840 }
 0x1e4   :  { %v9890_v5 = vcombine.high %v11372_v8, %v2089_v48  ;;  %v2602_v43 = vcombine.low %v2098_v2, %v2105_v3  ;;  %v11457_v47 = vrot.slane %v1230_v20, %v11302_v13  ;;  %v1898_v56 = vshrl.u32 %v1817_v18, 16 }
 0x1e5   :  { %v1899_v57 = vshrl.u32 %v1825_v27, 16  ;;  %v11460_v1 = vrot.slane %v2586_v37, %v11302_v13  ;;  %v11463_v7 = vrot.slane %v9875_v11, %v11302_v13  ;;  %v2550_v61 = vcombine.low %v11428_v33, %v11438_v40 }
 0x1e6   :  { %v2566_v8 = vcombine.low %v11441_v21, %v11449_v62  ;;  %v11470_v48 = vrot.slane %v9890_v5, %v11302_v13  ;;  %v1888_v10 = vpack.i.b16 %v11386_v39, %v11384_v32  ;;  %v11475_v12 = vrot.slane %v2602_v43, %v11302_v13 }
 0x1e7   :  { %v9891_v49 = vcombine.high %v2098_v2, %v2105_v3  ;;  %v1906_v18 = vshrl.u32 %v1833_v6, 16  ;;  %v1891_v22 = vshrl.u32 %v11386_v39, 16  ;;  %v2110_v27 = vcombine.low %v1880_v25, %v1896_v42 }
 0x1e8   :  { %v2618_v28 = vcombine.low %v11460_v1, %v11470_v48  ;;  %v1904_v20 = vpack.i.b16 %v1841_v9, %v1833_v6  ;;  %v1900_v11 = vpack.i.b16 %v1899_v57, %v1898_v56  ;;  %v2111_v37 = vcombine.high %v1880_v25, %v1896_v42 }
 0x1e9   :  { %v11481_v5 = vrot.slane %v9891_v49, %v11302_v13  ;;  %v1907_v19 = vshrl.u32 %v1841_v9, 16  ;;  %v2558_v32 = vrot.slane %v2550_v61, %v11313_v35  ;;  %v2574_v43 = vrot.slane %v2566_v8, %v11313_v35  ;;  %v445_v49 = vpop.permute.xlu0 %444 }
 0x1ea   :  { %v2126_v2 = vcombine.low %v1888_v10, %v1904_v20  ;;  %v2127_v3 = vcombine.high %v1888_v10, %v1904_v20  ;;  %v1186_v39 = vrot.slane %v1178_v38, %v11313_v35  ;;  %v2626_v51 = vrot.slane %v2618_v28, %v11313_v35  ;;  %v453_v10 = vpop.permute.xlu1 %452 }
 0x1eb   :  { %v2634_v34 = vcombine.low %v11475_v12, %v11481_v5  ;;  %v1908_v6 = vpack.i.b16 %v1907_v19, %v1906_v18  ;;  %v1202_v25 = vrot.slane %v1194_v4, %v11313_v35  ;;  %v1246_v42 = vcombine.low %v11446_v60, %v11453_v41 }
 0x1ec   :  { %v1892_v56 = vpack.i.b16 %v1891_v22, %v1890_v31  ;;  %v2134_v57 = vrot.slane %v2126_v2, %v11302_v13  ;;  %v2118_v9 = vrot.slane %v2110_v27, %v11302_v13  ;;  %v2125_v61 = vrot.slane %v2111_v37, %v11302_v13 }
 0x1ed   :  { %v2642_v38 = vrot.slane %v2634_v34, %v11313_v35  ;;  %v2141_v8 = vrot.slane %v2127_v3, %v11302_v13  ;;  %v2178_v19 = vcombine.low %v11425_v26, %v1900_v11  ;;  %v2179_v4 = vcombine.high %v11425_v26, %v1900_v11 }
 0x1ee   :  { %v2582_v18 = vcombine.low %v2558_v32, %v2574_v43  ;;  %v2194_v28 = vcombine.low %v1892_v56, %v1908_v6  ;;  %v11499_v31 = vcombine.high %v2558_v32, %v2574_v43  ;;  %v2195_v27 = vcombine.high %v1892_v56, %v1908_v6 }
 0x1ef   :  { %v2650_v20 = vcombine.low %v2626_v51, %v2642_v38  ;;  %v11501_v22 = vcombine.high %v2626_v51, %v2642_v38  ;;  %v2142_v2 = vcombine.low %v2118_v9, %v2134_v57  ;;  %v2143_v37 = vcombine.high %v2118_v9, %v2134_v57 }
 0x1f0   :  { %v527_v0 = vshrl.u32 %v453_v10, 16  ;;  %v526_v34 = vshrl.u32 %v445_v49, 16  ;;  %v2158_v53 = vcombine.low %v2125_v61, %v2141_v8  ;;  %v2159_v59 = vcombine.high %v2125_v61, %v2141_v8 }
 0x1f1   :  { %v3064_v63 = vpack.i.b16 %v2650_v20, %v2582_v18  ;;  %v3070_v3 = vpack.i.b16 %v11501_v22, %v11499_v31  ;;  %v1262_v26 = vcombine.low %v11457_v47, %v11463_v7  ;;  %v11508_v11 = vrot.slane %v2178_v19, %v11302_v13 }
 0x1f2   :  { %v11511_v51 = vrot.slane %v2179_v4, %v11302_v13  ;;  %v11514_v32 = vrot.slane %v2194_v28, %v11302_v13  ;;  %v11519_v56 = vrot.slane %v2195_v27, %v11302_v13  ;;  %v524_v57 = vpack.i.b16 %v453_v10, %v445_v49 }
 0x1f3   :  { %v4567_v43 = vsel %vm4562_vm1, %v3064_v63, 0  ;;  %v4661_v6 = vsel %vm4562_vm1, %v3070_v3, 0  ;;  %v11521_v9 = vpack.i.b16 %v527_v0, %v526_v34  ;;  %v11523_v61 = vcombine.low %v1186_v39, %v1202_v25  ;;  %v469_v34 = vpop.permute.xlu1 %468 }
 0x1f4   :  { %10186 = vmatpush3.bf16.xpose.msra.mxu1 %v4567_v43  ;;  %10198 = vmatpush3.bf16.xpose.msra.mxu0 %v4661_v6  ;;  %v1254_v38 = vrot.slane %v1246_v42, %v11313_v35  ;;  %v11528_v19 = vrot.slane %v2142_v2, %v11313_v35  ;;  %v11531_v63 = vrot.slane %v2143_v37, %v11313_v35  ;;  %v14378_v0 = vmov 0.0  }
 0x1f5   :  { %v11534_v4 = vrot.slane %v2158_v53, %v11313_v35  ;;  %v11537_v10 = vrot.slane %v2159_v59, %v11313_v35  ;;  %10191 = vmatprep.subr.bf16.mxu1 %v14378_v0  ;;  %v1270_v42 = vrot.slane %v1262_v26, %v11313_v35  ;;  %10209 = vmatprep.subr.bf16.mxu0 %v14378_v0  ;;  %v3065_v28 = vshrl.u32 %v2582_v18, 16  ;;  %v461_v18 = vpop.permute.xlu0 %460 }
 0x1f6   :  { %v3066_v27 = vshrl.u32 %v2650_v20, 16  ;;  %v738_v59 = vcombine.low %v11411_v55, %v524_v57  ;;  %v2551_v37 = vcombine.high %v11428_v33, %v11438_v40  ;;  %v11551_v43 = vcombine.high %v1186_v39, %v1202_v25 }
 0x1f7   :  { %v1278_v3 = vcombine.low %v1254_v38, %v1270_v42  ;;  %v11553_v26 = vcombine.high %v1254_v38, %v1270_v42  ;;  %v2567_v8 = vcombine.high %v11441_v21, %v11449_v62  ;;  %v2619_v53 = vcombine.high %v11460_v1, %v11470_v48 }
 0x1f8   :  { %v3067_v6 = vpack.i.b16 %v3066_v27, %v3065_v28  ;;  %v11556_v20 = vrot.slane %v2551_v37, %v11313_v35  ;;  %v2635_v33 = vcombine.high %v11475_v12, %v11481_v5  ;;  %v739_v40 = vcombine.high %v11411_v55, %v524_v57 }
 0x1f9   :  { %v1692_v39 = vpack.i.b16 %v1278_v3, %v11523_v61  ;;  %v1698_v25 = vpack.i.b16 %v11553_v26, %v11551_v43  ;;  %v535_v38 = vshrl.u32 %v469_v34, 16  ;;  %v11569_v42 = vrot.slane %v2567_v8, %v11313_v35 }
 0x1fa   :  { %v11572_v28 = vrot.slane %v2619_v53, %v11313_v35  ;;  %v11575_v21 = vrot.slane %v2635_v33, %v11313_v35  ;;  %v532_v62 = vpack.i.b16 %v469_v34, %v461_v18  ;;  %v806_v55 = vcombine.low %v11415_v23, %v11521_v9 }
 0x1fb   :  { %10188 = vmatmul.mubr.msk.bf16.vlgmr.msra.gmra.mrb[16].mxu1 %vm4562_vm1, %v1692_v39  ;;  %10200 = vmatmul.mubr.msk.bf16.vlgmr.msra.gmra.mrb[8].mxu0 %vm4562_vm1, %v1698_v25  ;;  %v4614_v48 = vsel %vm4562_vm1, %v3067_v6, 0  ;;  %v534_v12 = vshrl.u32 %v461_v18, 16  ;;  %v11586_v5 = vcombine.low %v11556_v20, %v11569_v42  ;;  %v746_v53 = vrot.slane %v738_v59, %v11302_v13  ;;  %v11601_v6 = vpop.permute.xlu1 %422 }
 0x1fc   :  { %10192 = vmatpush3.bf16.xpose.msra.mxu1 %v4614_v48  ;;  %v11590_v57 = vcombine.low %v11572_v28, %v11575_v21  ;;  %v754_v8 = vcombine.low %v11418_v24, %v532_v62  ;;  %v755_v27 = vcombine.high %v11418_v24, %v532_v62  ;;  %v807_v37 = vcombine.high %v11415_v23, %v11521_v9  ;;  %v11608_v23 = vpop.permute.xlu0 %430 }
 0x1fd   :  { %v536_v34 = vpack.i.b16 %v535_v38, %v534_v12  ;;  %10193 = vmatprep.mubr.msk.bf16.mxu1 %vm11049_vm0, %v14378_v0  ;;  %10211 = vmatprep.mubr.msk.bf16.mxu0 %vm11049_vm0, %v14378_v0  ;;  %v1694_v18 = vshrl.u32 %v1278_v3, 16  ;;  %v753_v33 = vrot.slane %v739_v40, %v11302_v13  ;;  %v814_v9 = vrot.slane %v806_v55, %v11302_v13 }
 0x1fe   :  { %v3076_v24 = vpack.i.b16 %v11590_v57, %v11586_v5  ;;  %v762_v59 = vrot.slane %v754_v8, %v11302_v13  ;;  %v769_v39 = vrot.slane %v755_v27, %v11302_v13  ;;  %10203 = vmatprep.subr.bf16.mxu1 %v14378_v0  ;;  %v1693_v3 = vshrl.u32 %v11523_v61, 16 }
 0x1ff   :  { %v822_v25 = vcombine.low %v11421_v29, %v536_v34  ;;  %v823_v38 = vcombine.high %v11421_v29, %v536_v34  ;;  %v821_v55 = vrot.slane %v807_v37, %v11302_v13  ;;  %v2654_v37 = vcombine.low %v11528_v19, %v11531_v63 }
 0x200   :  { %v4755_v40 = vsel %vm4562_vm1, %v3076_v24, 0  ;;  %v770_v62 = vcombine.low %v746_v53, %v762_v59  ;;  %v771_v48 = vcombine.high %v746_v53, %v762_v59  ;;  %v786_v12 = vcombine.low %v753_v33, %v769_v39 }
 0x201   :  { %10210 = vmatpush3.bf16.xpose.msra.mxu0 %v4755_v40  ;;  %v787_v8 = vcombine.high %v753_v33, %v769_v39  ;;  %v830_v27 = vrot.slane %v822_v25, %v11302_v13  ;;  %v837_v1 = vrot.slane %v823_v38, %v11302_v13  ;;  %v1695_v2 = vpack.i.b16 %v1694_v18, %v1693_v3  ;;  %v11627_v18 = vpop.permute.xlu1 %438  ;;  %v11633_v38 = vpop.permute.xlu0 %1794 }
 0x202   :  { %v778_v49 = vrot.slane %v770_v62, %v11313_v35  ;;  %v785_v29 = vrot.slane %v771_v48, %v11313_v35  ;;  %v794_v61 = vrot.slane %v786_v12, %v11313_v35  ;;  %10221 = vmatprep.subr.bf16.mxu0 %v14378_v0  ;;  %v1247_v33 = vcombine.high %v11446_v60, %v11453_v41 }
 0x203   :  { %v801_v53 = vrot.slane %v787_v8, %v11313_v35  ;;  %v838_v34 = vcombine.low %v814_v9, %v830_v27  ;;  %v839_v24 = vcombine.high %v814_v9, %v830_v27  ;;  %10194 = vmatmul.mubr.msk.bf16.vlgmr.msra.gmra.mrb[20].mxu1 %vm4562_vm1, %v1695_v2  ;;  %v9892_v59 = vcombine.high %v11528_v19, %v11531_v63 }
 0x204   :  { %v854_v39 = vcombine.low %v821_v55, %v837_v1  ;;  %v855_v25 = vcombine.high %v821_v55, %v837_v1  ;;  %10205 = vmatprep.mubr.msk.bf16.mxu1 %vm11049_vm0, %v14378_v0  ;;  %v14379_v2 = vcombine.low %v11508_v11, %v11514_v32  ;;  %v1282_v41 = vcombine.low %v778_v49, %v785_v29 }
 0x205   :  { %v14380_v9 = vcombine.high %v11397_v14, %v11400_v45  ;;  %v14381_v1 = vcombine.high %v11403_v16, %v11406_v17  ;;  %v846_v62 = vrot.slane %v838_v34, %v11313_v35  ;;  %v853_v48 = vrot.slane %v839_v24, %v11313_v35 }
 0x206   :  { %v11641_v60 = vrot.slane %v14379_v2, %v11313_v35  ;;  %v9876_v12 = vcombine.high %v778_v49, %v785_v29  ;;  %v1298_v8 = vcombine.low %v794_v61, %v801_v53  ;;  %v14382_v27 = vcombine.high %v11508_v11, %v11514_v32 }
 0x207   :  { %v11647_v3 = vrot.slane %v14380_v9, %v11313_v35  ;;  %v11653_v40 = vrot.slane %v14381_v1, %v11313_v35  ;;  %v14383_v14 = vcombine.low %v11511_v51, %v11519_v56  ;;  %v1261_v16 = vrot.slane %v1247_v33, %v11313_v35 }
 0x208   :  { %v11661_v55 = vrot.slane %v14382_v27, %v11313_v35  ;;  %v1263_v17 = vcombine.high %v11457_v47, %v11463_v7  ;;  %v14384_v49 = vcombine.high %v11511_v51, %v11519_v56  ;;  %v11679_v11 = vrot.slane %v854_v39, %v11313_v35  ;;  %v11692_v51 = vpop.permute.xlu1 %1802 }
 0x209   :  { %v11667_v45 = vrot.slane %v14383_v14, %v11313_v35  ;;  %v11682_v32 = vrot.slane %v855_v25, %v11313_v35  ;;  %v9877_v34 = vcombine.high %v794_v61, %v801_v53  ;;  %v2670_v24 = vcombine.low %v11534_v4, %v11537_v10  ;;  %v11703_v25 = vpop.permute.xlu0 %1810 }
 0x20a   :  { %v11676_v29 = vrot.slane %v14384_v49, %v11313_v35  ;;  %v543_v33 = vshrl.u32 %v11601_v6, 16  ;;  %v11689_v47 = vcombine.low %v11647_v3, %v11653_v40  ;;  %v1277_v7 = vrot.slane %v1263_v17, %v11313_v35 }
 0x20b   :  { %v11695_v56 = vrot.slane %v1282_v41, %v11302_v13  ;;  %v11698_v39 = vrot.slane %v9876_v12, %v11302_v13  ;;  %v11701_v61 = vrot.slane %v1298_v8, %v11302_v13  ;;  %v1350_v53 = vcombine.low %v846_v62, %v853_v48 }
 0x20c   :  { %v9878_v2 = vcombine.high %v846_v62, %v853_v48  ;;  %v11705_v9 = vcombine.low %v1261_v16, %v1277_v7  ;;  %v3071_v1 = vshrl.u32 %v11499_v31, 16  ;;  %v3072_v27 = vshrl.u32 %v11501_v22, 16 }
 0x20d   :  { %v11710_v14 = vrot.slane %v9877_v34, %v11302_v13  ;;  %v1366_v41 = vcombine.low %v11679_v11, %v11682_v32  ;;  %v11716_v12 = vcombine.high %v11556_v20, %v11569_v42  ;;  %v11720_v8 = vcombine.high %v11572_v28, %v11575_v21  ;;  %v1819_v34 = vpop.permute.xlu1 %1818 }
 0x20e   :  { %v9893_v62 = vcombine.high %v11534_v4, %v11537_v10  ;;  %v550_v31 = vshrl.u32 %v11608_v23, 16  ;;  %v1704_v22 = vpack.i.b16 %v11705_v9, %v11689_v47  ;;  %v3073_v48 = vpack.i.b16 %v3072_v27, %v3071_v1 }
 0x20f   :  { %v11731_v20 = vpack.i.b16 %v11601_v6, %v11160_v44  ;;  %v14385_v42 = vshrl.u32 %v11160_v44, 16  ;;  %v3082_v4 = vpack.i.b16 %v11720_v8, %v11716_v12  ;;  %v11742_v21 = vrot.slane %v1350_v53, %v11302_v13 }
 0x210   :  { %v11745_v49 = vrot.slane %v9878_v2, %v11302_v13  ;;  %10212 = vmatmul.mubr.msk.bf16.vlgmr.msra.gmra.mrb[12].mxu0 %vm4562_vm1, %v1704_v22  ;;  %v4708_v6 = vsel %vm4562_vm1, %v3073_v48, 0  ;;  %v9879_v1 = vcombine.high %v11679_v11, %v11682_v32  ;;  %v1827_v2 = vpop.permute.xlu0 %1826  ;;  %v11761_v27 = vpack.i.b16 %v11633_v38, %v11162_v46 }
 0x211   :  { %v11735_v28 = vpack.i.b16 %v543_v33, %v14385_v42  ;;  %v11752_v33 = vrot.slane %v1366_v41, %v11302_v13  ;;  %10204 = vmatpush3.bf16.xpose.msra.mxu1 %v4708_v6  ;;  %v4849_v53 = vsel %vm4562_vm1, %v3082_v4, 0  ;;  %10223 = vmatprep.mubr.msk.bf16.mxu0 %vm11049_vm0, %v14378_v0  ;;  %v1700_v22 = vshrl.u32 %v11553_v26, 16 }
 0x212   :  { %10222 = vmatpush3.bf16.xpose.msra.mxu0 %v4849_v53  ;;  %10215 = vmatprep.subr.bf16.mxu1 %v14378_v0  ;;  %v3077_v41 = vshrl.u32 %v11586_v5, 16  ;;  %v3078_v48 = vshrl.u32 %v11590_v57, 16  ;;  %v1915_v42 = vshrl.u32 %v11633_v38, 16  ;;  %v1699_v4 = vshrl.u32 %v11551_v43, 16 }
 0x213   :  { %v11769_v6 = vcombine.high %v1261_v16, %v1277_v7  ;;  %10233 = vmatprep.subr.bf16.mxu0 %v14378_v0  ;;  %v11776_v53 = vrot.slane %v2654_v37, %v11302_v13  ;;  %v11782_v5 = vrot.slane %v9892_v59, %v11302_v13  ;;  %v11785_v57 = vrot.slane %v2670_v24, %v11302_v13  ;;  %v1835_v24 = vpop.permute.xlu1 %1834 }
 0x214   :  { %v3079_v26 = vpack.i.b16 %v3078_v48, %v3077_v41  ;;  %v11788_v43 = vrot.slane %v9893_v62, %v11302_v13  ;;  %v11792_v38 = vcombine.high %v11647_v3, %v11653_v40  ;;  %v1930_v16 = vshrl.u32 %v1819_v34, 16  ;;  %v1843_v10 = vpop.permute.xlu0 %1842 }
 0x215   :  { %v1931_v37 = vshrl.u32 %v1827_v2, 16  ;;  %v2722_v7 = vcombine.low %v11641_v60, %v11661_v55  ;;  %v1922_v41 = vshrl.u32 %v11692_v51, 16  ;;  %v1701_v19 = vpack.i.b16 %v1700_v22, %v1699_v4 }
 0x216   :  { %v11797_v63 = vpack.i.b16 %v1827_v2, %v1819_v34  ;;  %v9894_v59 = vcombine.high %v11641_v60, %v11661_v55  ;;  %v1920_v62 = vpack.i.b16 %v11703_v25, %v11692_v51  ;;  %v1923_v3 = vshrl.u32 %v11703_v25, 16 }
 0x217   :  { %v1710_v40 = vpack.i.b16 %v11769_v6, %v11792_v38  ;;  %v2686_v48 = vcombine.low %v11776_v53, %v11782_v5  ;;  %v4802_v34 = vsel %vm4562_vm1, %v3079_v26, 0  ;;  %v2702_v60 = vcombine.low %v11785_v57, %v11788_v43 }
 0x218   :  { %10206 = vmatmul.mubr.msk.bf16.vlgmr.msra.gmra.mrb[24].mxu1 %vm4562_vm1, %v1701_v19  ;;  %v11813_v55 = vrot.slane %v2722_v7, %v11302_v13  ;;  %v11816_v51 = vrot.slane %v9894_v59, %v11302_v13  ;;  %v14386_v25 = vshrl.u32 %v11162_v46, 16  ;;  %v1932_v22 = vpack.i.b16 %v1931_v37, %v1930_v16 }
 0x219   :  { %10224 = vmatmul.mubr.msk.bf16.vlgmr.msra.gmra.mrb[16].mxu0 %vm4562_vm1, %v1710_v40  ;;  %10216 = vmatpush3.bf16.xpose.msra.mxu1 %v4802_v34  ;;  %v2738_v4 = vcombine.low %v11667_v45, %v11676_v29  ;;  %v1938_v26 = vshrl.u32 %v1835_v24, 16  ;;  %v2246_v19 = vcombine.low %v11761_v27, %v11797_v63  ;;  %v9895_v7 = vcombine.high %v11667_v45, %v11676_v29 }
 0x21a   :  { %v1916_v2 = vpack.i.b16 %v1915_v42, %v14386_v25  ;;  %v2754_v59 = vcombine.low %v11813_v55, %v11816_v51  ;;  %10217 = vmatprep.mubr.msk.bf16.mxu1 %vm11049_vm0, %v14378_v0  ;;  %v1936_v46 = vpack.i.b16 %v1843_v10, %v1835_v24  ;;  %v11832_v42 = vrot.slane %v2686_v48, %v11313_v35 }
 0x21b   :  { %v11835_v16 = vrot.slane %v2738_v4, %v11302_v13  ;;  %v1939_v37 = vshrl.u32 %v1843_v10, 16  ;;  %v1706_v40 = vshrl.u32 %v11705_v9, 16  ;;  %10227 = vmatprep.subr.bf16.mxu1 %v14378_v0  ;;  %10235 = vmatprep.mubr.msk.bf16.mxu0 %vm11049_vm0, %v14378_v0  ;;  %v11842_v45 = vrot.slane %v2702_v60, %v11313_v35 }
 0x21c   :  { %v11845_v29 = vrot.slane %v9895_v7, %v11302_v13  ;;  %v2262_v24 = vcombine.low %v1920_v62, %v1936_v46  ;;  %v1705_v48 = vshrl.u32 %v11689_v47, 16  ;;  %v2263_v25 = vcombine.high %v1920_v62, %v1936_v46 }
 0x21d   :  { %v1940_v34 = vpack.i.b16 %v1939_v37, %v1938_v26  ;;  %v3083_v10 = vshrl.u32 %v11716_v12, 16  ;;  %v3084_v9 = vshrl.u32 %v11720_v8, 16  ;;  %v2762_v4 = vrot.slane %v2754_v59, %v11313_v35  ;;  %v455_v37 = vpop.permute.xlu1 %454 }
 0x21e   :  { %v2770_v44 = vcombine.low %v11835_v16, %v11845_v29  ;;  %v2270_v60 = vrot.slane %v2262_v24, %v11302_v13  ;;  %v1707_v17 = vpack.i.b16 %v1706_v40, %v1705_v48  ;;  %v11858_v7 = vrot.slane %v9879_v1, %v11302_v13  ;;  %v447_v40 = vpop.permute.xlu0 %446 }
 0x21f   :  { %v1924_v47 = vpack.i.b16 %v1923_v3, %v1922_v41  ;;  %v2247_v12 = vcombine.high %v11761_v27, %v11797_v63  ;;  %v3085_v62 = vpack.i.b16 %v3084_v9, %v3083_v10  ;;  %v551_v8 = vshrl.u32 %v11627_v18, 16 }
 0x220   :  { %v2254_v26 = vrot.slane %v2246_v19, %v11302_v13  ;;  %v2314_v59 = vcombine.low %v1916_v2, %v1932_v22  ;;  %v2778_v46 = vrot.slane %v2770_v44, %v11313_v35  ;;  %10218 = vmatmul.mubr.msk.bf16.vlgmr.msra.gmra.mrb[28].mxu1 %vm4562_vm1, %v1707_v17  ;;  %v2315_v24 = vcombine.high %v1916_v2, %v1932_v22 }
 0x221   :  { %v2277_v11 = vrot.slane %v2263_v25, %v11302_v13  ;;  %v2330_v32 = vcombine.low %v1924_v47, %v1940_v34  ;;  %v4896_v1 = vsel %vm4562_vm1, %v3085_v62, 0  ;;  %10229 = vmatprep.mubr.msk.bf16.mxu1 %vm11049_vm0, %v14378_v0  ;;  %v11872_v27 = vcombine.low %v11832_v42, %v11842_v45 }
 0x222   :  { %v11874_v41 = vcombine.low %v2762_v4, %v2778_v46  ;;  %v2278_v44 = vcombine.low %v2254_v26, %v2270_v60  ;;  %v2331_v63 = vcombine.high %v1924_v47, %v1940_v34  ;;  %10228 = vmatpush3.bf16.xpose.msra.mxu1 %v4896_v1  ;;  %v548_v17 = vpack.i.b16 %v11627_v18, %v11608_v23 }
 0x223   :  { %v2261_v3 = vrot.slane %v2247_v12, %v11302_v13  ;;  %v2279_v2 = vcombine.high %v2254_v26, %v2270_v60  ;;  %v556_v22 = vpack.i.b16 %v455_v37, %v447_v40  ;;  %10239 = vmatprep.subr.bf16.mxu1 %v14378_v0  ;;  %v11882_v19 = vpack.i.b16 %v551_v8, %v550_v31 }
 0x224   :  { %v11885_v48 = vrot.slane %v2314_v59, %v11302_v13  ;;  %v3088_v34 = vpack.i.b16 %v11874_v41, %v11872_v27  ;;  %v559_v25 = vshrl.u32 %v455_v37, 16  ;;  %v11890_v10 = vrot.slane %v2315_v24, %v11302_v13 }
 0x225   :  { %v2294_v18 = vcombine.low %v2261_v3, %v2277_v11  ;;  %v2295_v9 = vcombine.high %v2261_v3, %v2277_v11  ;;  %v11893_v60 = vrot.slane %v2330_v32, %v11302_v13  ;;  %v11897_v23 = vrot.slane %v2278_v44, %v11313_v35  ;;  %v463_v44 = vpop.permute.xlu0 %462 }
 0x226   :  { %v4943_v47 = vsel %vm4562_vm1, %v3088_v34, 0  ;;  %v11900_v31 = vrot.slane %v2331_v63, %v11302_v13  ;;  %v558_v12 = vshrl.u32 %v447_v40, 16  ;;  %v11903_v62 = vrot.slane %v2279_v2, %v11313_v35 }
 0x227   :  { %10234 = vmatpush3.bf16.xpose.msra.mxu0 %v4943_v47  ;;  %v874_v8 = vcombine.low %v11731_v20, %v556_v22  ;;  %v875_v26 = vcombine.high %v11731_v20, %v556_v22  ;;  %v14387_v59 = vcombine.low %v11695_v56, %v11698_v39  ;;  %v14388_v11 = vcombine.low %v11701_v61, %v11710_v14  ;;  %v471_v20 = vpop.permute.xlu1 %470 }
 0x228   :  { %v560_v24 = vpack.i.b16 %v559_v25, %v558_v12  ;;  %v1382_v32 = vcombine.low %v11742_v21, %v11745_v49  ;;  %v1398_v1 = vcombine.low %v11752_v33, %v11858_v7  ;;  %10245 = vmatprep.subr.bf16.mxu0 %v14378_v0  ;;  %v11925_v63 = vrot.slane %v2294_v18, %v11313_v35 }
 0x229   :  { %v11911_v37 = vrot.slane %v14387_v59, %v11313_v35  ;;  %v11917_v40 = vrot.slane %v14388_v11, %v11313_v35  ;;  %v11928_v3 = vrot.slane %v2295_v9, %v11313_v35  ;;  %v11932_v22 = vcombine.high %v2762_v4, %v2778_v46 }
 0x22a   :  { %v882_v34 = vrot.slane %v874_v8, %v11302_v13  ;;  %v11936_v25 = vrot.slane %v1382_v32, %v11313_v35  ;;  %v11939_v47 = vrot.slane %v1398_v1, %v11313_v35  ;;  %v11943_v18 = vcombine.high %v11832_v42, %v11842_v45 }
 0x22b   :  { %v889_v9 = vrot.slane %v875_v26, %v11302_v13  ;;  %v567_v12 = vshrl.u32 %v471_v20, 16  ;;  %v564_v59 = vpack.i.b16 %v471_v20, %v463_v44  ;;  %v566_v11 = vshrl.u32 %v463_v44, 16 }
 0x22c   :  { %v942_v4 = vcombine.low %v11735_v28, %v560_v24  ;;  %v11949_v46 = vcombine.low %v11911_v37, %v11917_v40  ;;  %v11953_v8 = vcombine.low %v11936_v25, %v11939_v47  ;;  %v3094_v32 = vpack.i.b16 %v11932_v22, %v11943_v18 }
 0x22d   :  { %v568_v42 = vpack.i.b16 %v567_v12, %v566_v11  ;;  %v890_v45 = vcombine.low %v548_v17, %v564_v59  ;;  %v891_v1 = vcombine.high %v548_v17, %v564_v59  ;;  %v1711_v26 = vshrl.u32 %v11792_v38, 16  ;;  %v11967_v17 = vpop.permute.xlu1 %424  ;;  %v11972_v11 = vpop.permute.xlu0 %432 }
 0x22e   :  { %v1716_v20 = vpack.i.b16 %v11953_v8, %v11949_v46  ;;  %v1712_v44 = vshrl.u32 %v11769_v6, 16  ;;  %v3089_v2 = vshrl.u32 %v11872_v27, 16  ;;  %v3090_v58 = vshrl.u32 %v11874_v41, 16 }
 0x22f   :  { %v898_v52 = vrot.slane %v890_v45, %v11302_v13  ;;  %v905_v15 = vrot.slane %v891_v1, %v11302_v13  ;;  %v958_v36 = vcombine.low %v11882_v19, %v568_v42  ;;  %v959_v12 = vcombine.high %v11882_v19, %v568_v42 }
 0x230   :  { %v943_v38 = vcombine.high %v11735_v28, %v560_v24  ;;  %10236 = vmatmul.mubr.msk.bf16.vlgmr.msra.gmra.mrb[20].mxu0 %vm4562_vm1, %v1716_v20  ;;  %v5037_v6 = vsel %vm4562_vm1, %v3094_v32, 0  ;;  %v1713_v59 = vpack.i.b16 %v1712_v44, %v1711_v26  ;;  %v3091_v27 = vpack.i.b16 %v3090_v58, %v3089_v2 }
 0x231   :  { %10246 = vmatpush3.bf16.xpose.msra.mxu0 %v5037_v6  ;;  %v906_v41 = vcombine.low %v882_v34, %v898_v52  ;;  %v907_v45 = vcombine.high %v882_v34, %v898_v52  ;;  %v922_v1 = vcombine.low %v889_v9, %v905_v15  ;;  %v923_v54 = vcombine.high %v889_v9, %v905_v15  ;;  %v12003_v6 = vpop.permute.xlu0 %1796 }
 0x232   :  { %v2347_v19 = vcombine.high %v11885_v48, %v11893_v60  ;;  %v966_v42 = vrot.slane %v958_v36, %v11302_v13  ;;  %v973_v28 = vrot.slane %v959_v12, %v11302_v13  ;;  %10230 = vmatmul.mubr.msk.bf16.vlgmr.msra.gmra.mrb[32].mxu1 %vm4562_vm1, %v1713_v59  ;;  %v4990_v24 = vsel %vm4562_vm1, %v3091_v27, 0  ;;  %10247 = vmatprep.mubr.msk.bf16.mxu0 %vm11049_vm0, %v14378_v0 }
 0x233   :  { %v2362_v58 = vcombine.low %v11890_v10, %v11900_v31  ;;  %v950_v52 = vrot.slane %v942_v4, %v11302_v13  ;;  %v914_v15 = vrot.slane %v906_v41, %v11313_v35  ;;  %v921_v2 = vrot.slane %v907_v45, %v11313_v35  ;;  %10240 = vmatpush3.bf16.xpose.msra.mxu1 %v4990_v24 }
 0x234   :  { %v2363_v36 = vcombine.high %v11890_v10, %v11900_v31  ;;  %v957_v34 = vrot.slane %v943_v38, %v11302_v13  ;;  %v930_v9 = vrot.slane %v922_v1, %v11313_v35  ;;  %v937_v32 = vrot.slane %v923_v54, %v11313_v35  ;;  %10257 = vmatprep.subr.bf16.mxu0 %v14378_v0  ;;  %v11999_v10 = vpop.permute.xlu1 %440 }
 0x235   :  { %v1331_v26 = vcombine.high %v11701_v61, %v11710_v14  ;;  %v974_v20 = vcombine.low %v950_v52, %v966_v42  ;;  %v975_v44 = vcombine.high %v950_v52, %v966_v42  ;;  %10241 = vmatprep.mubr.msk.bf16.mxu1 %vm11049_vm0, %v14378_v0  ;;  %v1418_v38 = vcombine.low %v914_v15, %v921_v2 }
 0x236   :  { %v990_v12 = vcombine.low %v957_v34, %v973_v28  ;;  %v991_v54 = vcombine.high %v957_v34, %v973_v28  ;;  %10251 = vmatprep.subr.bf16.mxu1 %v14378_v0  ;;  %v14389_v59 = vcombine.low %v11885_v48, %v11893_v60  ;;  %v12013_v41 = vrot.slane %v2347_v19, %v11313_v35 }
 0x237   :  { %v12016_v45 = vrot.slane %v2362_v58, %v11313_v35  ;;  %v9880_v1 = vcombine.high %v914_v15, %v921_v2  ;;  %v12019_v42 = vrot.slane %v2363_v36, %v11313_v35  ;;  %v1434_v52 = vcombine.low %v930_v9, %v937_v32 }
 0x238   :  { %v12010_v27 = vrot.slane %v14389_v59, %v11313_v35  ;;  %v12026_v48 = vrot.slane %v974_v20, %v11313_v35  ;;  %v12029_v60 = vrot.slane %v975_v44, %v11313_v35  ;;  %v9881_v19 = vcombine.high %v930_v9, %v937_v32 }
 0x239   :  { %v12033_v58 = vpack.i.b16 %v11967_v17, %v11172_v50  ;;  %v12036_v15 = vrot.slane %v990_v12, %v11313_v35  ;;  %v12039_v2 = vrot.slane %v991_v54, %v11313_v35  ;;  %v12042_v36 = vrot.slane %v1418_v38, %v11302_v13  ;;  %v12058_v12 = vpop.permute.xlu1 %1804 }
 0x23a   :  { %v12046_v20 = vrot.slane %v9880_v1, %v11302_v13  ;;  %v12050_v9 = vcombine.high %v11911_v37, %v11917_v40  ;;  %v12054_v32 = vcombine.high %v11936_v25, %v11939_v47  ;;  %v2687_v44 = vcombine.high %v11776_v53, %v11782_v5  ;;  %v12069_v40 = vpop.permute.xlu0 %1812 }
 0x23b   :  { %v12061_v54 = vrot.slane %v1434_v52, %v11302_v13  ;;  %v2703_v38 = vcombine.high %v11785_v57, %v11788_v43  ;;  %v2755_v59 = vcombine.high %v11813_v55, %v11816_v51  ;;  %v2771_v37 = vcombine.high %v11835_v16, %v11845_v29 }
 0x23c   :  { %v12072_v25 = vrot.slane %v9881_v19, %v11302_v13  ;;  %v1486_v53 = vcombine.low %v12026_v48, %v12029_v60  ;;  %v1722_v5 = vpack.i.b16 %v12054_v32, %v12050_v9  ;;  %v2701_v47 = vrot.slane %v2687_v44, %v11313_v35 }
 0x23d   :  { %v9882_v57 = vcombine.high %v12026_v48, %v12029_v60  ;;  %v2717_v43 = vrot.slane %v2703_v38, %v11313_v35  ;;  %v2769_v55 = vrot.slane %v2755_v59, %v11313_v35  ;;  %v2785_v51 = vrot.slane %v2771_v37, %v11313_v35 }
 0x23e   :  { %v1502_v16 = vcombine.low %v12036_v15, %v12039_v2  ;;  %10248 = vmatmul.mubr.msk.bf16.vlgmr.msra.gmra.mrb[24].mxu0 %vm4562_vm1, %v1722_v5  ;;  %v1717_v1 = vshrl.u32 %v11949_v46, 16  ;;  %v1718_v52 = vshrl.u32 %v11953_v8, 16  ;;  %v3095_v60 = vshrl.u32 %v11943_v18, 16  ;;  %v1821_v8 = vpop.permute.xlu1 %1820  ;;  %v1829_v59 = vpop.permute.xlu0 %1828 }
 0x23f   :  { %v2720_v19 = vcombine.low %v2701_v47, %v2717_v43  ;;  %v2788_v48 = vcombine.low %v2769_v55, %v2785_v51  ;;  %v3096_v44 = vshrl.u32 %v11932_v22, 16  ;;  %10259 = vmatprep.mubr.msk.bf16.mxu0 %vm11049_vm0, %v14378_v0  ;;  %v14390_v22 = vcombine.high %v11695_v56, %v11698_v39  ;;  %v14391_v39 = vld [vmem:[#allocation19_spill] sm:$0xff] }
 0x240   :  { %v1719_v37 = vpack.i.b16 %v1718_v52, %v1717_v1  ;;  %v12111_v38 = vrot.slane %v1331_v26, %v11313_v35  ;;  %v1383_v1 = vcombine.high %v11742_v21, %v11745_v49  ;;  %v1399_v56 = vcombine.high %v11752_v33, %v11858_v7 }
 0x241   :  { %v3100_v5 = vpack.i.b16 %v2788_v48, %v2720_v19  ;;  %v3097_v34 = vpack.i.b16 %v3096_v44, %v3095_v60  ;;  %v12105_v18 = vrot.slane %v14390_v22, %v11313_v35  ;;  %v12122_v52 = vpack.c.bf16 %v14391_v39, %v11309_v30  ;;  %v14392_v44 = vld [vmem:[#allocation18_spill] sm:$0xff] }
 0x242   :  { %10242 = vmatmul.mubr.msk.bf16.vlgmr.msra.gmra.mrb[36].mxu1 %vm4562_vm1, %v1719_v37  ;;  %v12125_v61 = vrot.slane %v1486_v53, %v11302_v13  ;;  %v1947_v26 = vshrl.u32 %v12003_v6, 16  ;;  %v1954_v21 = vshrl.u32 %v12058_v12, 16  ;;  %v1397_v49 = vrot.slane %v1383_v1, %v11313_v35  ;;  %v14393_v37 = vld [vmem:[#allocation20_spill] sm:$0xff] }
 0x243   :  { %v5131_v14 = vsel %vm4562_vm1, %v3100_v5, 0  ;;  %v5084_v60 = vsel %vm4562_vm1, %v3097_v34, 0  ;;  %10253 = vmatprep.mubr.msk.bf16.mxu1 %vm11049_vm0, %v14378_v0  ;;  %v1413_v30 = vrot.slane %v1399_v56, %v11313_v35  ;;  %v12135_v33 = vcombine.high %v2769_v55, %v2785_v51  ;;  %v1837_v56 = vpop.permute.xlu1 %1836 }
 0x244   :  { %10258 = vmatpush3.bf16.xpose.msra.mxu0 %v5131_v14  ;;  %10252 = vmatpush3.bf16.xpose.msra.mxu1 %v5084_v60  ;;  %v1955_v7 = vshrl.u32 %v12069_v40, 16  ;;  %v12140_v53 = vcombine.low %v12105_v18, %v12111_v38  ;;  %v12143_v34 = vcombine.high %v2701_v47, %v2717_v43  ;;  %v12147_v5 = vpack.c.bf16 %v14393_v37, %v14392_v44  ;;  %v1845_v60 = vpop.permute.xlu0 %1844  ;;  %v14394_v37 = vld [vmem:[#allocation15_spill] sm:$0xff] }
 0x245   :  { %10269 = vmatprep.subr.bf16.mxu0 %v14378_v0  ;;  %10263 = vmatprep.subr.bf16.mxu1 %v14378_v0  ;;  %v12150_v22 = vcombine.low %v1397_v49, %v1413_v30  ;;  %v1962_v55 = vshrl.u32 %v1821_v8, 16  ;;  %v12152_v51 = vpack.i.b16 %v1829_v59, %v1821_v8  ;;  %v1724_v1 = vshrl.u32 %v12054_v32, 16 }
 0x246   :  { %v3106_v39 = vpack.i.b16 %v12135_v33, %v12143_v34  ;;  %v1963_v14 = vshrl.u32 %v1829_v59, 16  ;;  %v1723_v47 = vshrl.u32 %v12050_v9, 16  ;;  %v3102_v43 = vshrl.u32 %v2788_v48, 16  ;;  %3166 = vrot.lane.b32.xlu1 %v12147_v5, %s11043_s13  ;;  %3174 = vrot.lane.b32.xlu0 %v12147_v5, %s11042_s3 }
 0x247   :  { %v12163_v8 = vrot.slane %v9882_v57, %v11302_v13  ;;  %v12166_v32 = vrot.slane %v1502_v16, %v11302_v13  ;;  %v1952_v44 = vpack.i.b16 %v12069_v40, %v12058_v12  ;;  %v3101_v59 = vshrl.u32 %v2720_v19, 16 }
 0x248   :  { %v1944_v9 = vpack.i.b16 %v12003_v6, %v14394_v37  ;;  %v1728_v48 = vpack.i.b16 %v12150_v22, %v12140_v53  ;;  %v1725_v46 = vpack.i.b16 %v1724_v1, %v1723_v47  ;;  %v1970_v24 = vshrl.u32 %v1837_v56, 16 }
 0x249   :  { %v14395_v28 = vshrl.u32 %v14394_v37, 16  ;;  %v3103_v57 = vpack.i.b16 %v3102_v43, %v3101_v59  ;;  %v1968_v31 = vpack.i.b16 %v1845_v60, %v1837_v56  ;;  %v1971_v4 = vshrl.u32 %v1845_v60, 16 }
 0x24a   :  { %v1956_v16 = vpack.i.b16 %v1955_v7, %v1954_v21  ;;  %v5225_v12 = vsel %vm4562_vm1, %v3106_v39, 0  ;;  %v1964_v40 = vpack.i.b16 %v1963_v14, %v1962_v55  ;;  %v2382_v19 = vcombine.low %v1944_v9, %v12152_v51  ;;  %3182 = vrot.lane.b32.xlu1 %v12147_v5, %s11044_s14  ;;  %3198 = vrot.lane.b32.xlu0 %v12147_v5, %s11045_s15 }
 0x24b   :  { %v1948_v29 = vpack.i.b16 %v1947_v26, %v14395_v28  ;;  %10260 = vmatmul.mubr.msk.bf16.vlgmr.msra.gmra.mrb[28].mxu0 %vm4562_vm1, %v1728_v48  ;;  %10254 = vmatmul.mubr.msk.bf16.vlgmr.msra.gmra.mrb[40].mxu1 %vm4562_vm1, %v1725_v46  ;;  %v5178_v6 = vsel %vm4562_vm1, %v3103_v57, 0  ;;  %v2398_v28 = vcombine.low %v1952_v44, %v1968_v31  ;;  %v2399_v26 = vcombine.high %v1952_v44, %v1968_v31 }
 0x24c   :  { %10270 = vmatpush3.bf16.xpose.msra.mxu0 %v5225_v12  ;;  %10271 = vmatprep.mubr.msk.bf16.mxu0 %vm11049_vm0, %v14378_v0  ;;  %v12183_v1 = vcombine.high %v1397_v49, %v1413_v30  ;;  %v582_v21 = vshrl.u32 %v11972_v11, 16  ;;  %v1972_v7 = vpack.i.b16 %v1971_v4, %v1970_v24  ;;  %v14396_v46 = vcombine.low %v11897_v23, %v11903_v62 }
 0x24d   :  { %10264 = vmatpush3.bf16.xpose.msra.mxu1 %v5178_v6  ;;  %10281 = vmatprep.subr.bf16.mxu0 %v14378_v0  ;;  %v14397_v56 = vcombine.high %v11897_v23, %v11903_v62  ;;  %v14398_v31 = vcombine.high %v12036_v15, %v12039_v2  ;;  %v583_v4 = vshrl.u32 %v11999_v10, 16  ;;  %v2383_v24 = vcombine.high %v1944_v9, %v12152_v51  ;;  %v449_v9 = vpop.permute.xlu0 %448 }
 0x24e   :  { %v12191_v55 = vrot.slane %v14396_v46, %v11302_v13  ;;  %v2406_v30 = vrot.slane %v2398_v28, %v11302_v13  ;;  %v2450_v14 = vcombine.low %v1948_v29, %v1964_v40  ;;  %v12212_v23 = vcombine.high %v12105_v18, %v12111_v38  ;;  %10265 = vmatprep.mubr.msk.bf16.mxu1 %vm11049_vm0, %v14378_v0 }
 0x24f   :  { %v12197_v39 = vrot.slane %v14397_v56, %v11302_v13  ;;  %v12203_v49 = vrot.slane %v14398_v31, %v11302_v13  ;;  %v14399_v62 = vcombine.low %v11925_v63, %v11928_v3  ;;  %v14400_v2 = vcombine.high %v11925_v63, %v11928_v3  ;;  %10275 = vmatprep.subr.bf16.mxu1 %v14378_v0 }
 0x250   :  { %v14401_v47 = vshrl.u32 %v11172_v50, 16  ;;  %v14402_v38 = vshrl.u32 %v11967_v17, 16  ;;  %v2390_v43 = vrot.slane %v2382_v19, %v11302_v13  ;;  %v2451_v60 = vcombine.high %v1948_v29, %v1964_v40  ;;  %v457_v50 = vpop.permute.xlu1 %456  ;;  %3190 = vrot.lane.b32.xlu1 %v12147_v5, %s11037_s1  ;;  %3214 = vrot.lane.b32.xlu0 %v12147_v5, %s11047_s17 }
 0x251   :  { %v12218_v15 = vrot.slane %v14399_v62, %v11302_v13  ;;  %v12224_v51 = vrot.slane %v14400_v2, %v11302_v13  ;;  %v2413_v44 = vrot.slane %v2399_v26, %v11302_v13  ;;  %v2466_v59 = vcombine.low %v1956_v16, %v1972_v7 }
 0x252   :  { %v12232_v18 = vpack.i.b16 %v14402_v38, %v14401_v47  ;;  %v2467_v63 = vcombine.high %v1956_v16, %v1972_v7  ;;  %v1734_v3 = vpack.i.b16 %v12183_v1, %v12212_v23  ;;  %v2822_v37 = vcombine.low %v12191_v55, %v12197_v39 }
 0x253   :  { %v12245_v17 = vpack.i.b16 %v11999_v10, %v11972_v11  ;;  %v2397_v29 = vrot.slane %v2383_v24, %v11302_v13  ;;  %v2414_v48 = vcombine.low %v2390_v43, %v2406_v30  ;;  %v2858_v57 = vcombine.low %v12010_v27, %v12013_v41 }
 0x254   :  { %v12252_v16 = vpack.i.b16 %v583_v4, %v582_v21  ;;  %v12255_v12 = vrot.slane %v2450_v14, %v11302_v13  ;;  %v2415_v40 = vcombine.high %v2390_v43, %v2406_v30  ;;  %10272 = vmatmul.mubr.msk.bf16.vlgmr.msra.gmra.mrb[32].mxu0 %vm4562_vm1, %v1734_v3  ;;  %v2838_v11 = vcombine.low %v12218_v15, %v12224_v51  ;;  %v465_v3 = vpop.permute.xlu0 %464 }
 0x255   :  { %v12261_v10 = vrot.slane %v2451_v60, %v11302_v13  ;;  %v2430_v19 = vcombine.low %v2397_v29, %v2413_v44  ;;  %v591_v6 = vshrl.u32 %v457_v50, 16  ;;  %v590_v28 = vshrl.u32 %v449_v9, 16  ;;  %10283 = vmatprep.mubr.msk.bf16.mxu0 %vm11049_vm0, %v14378_v0  ;;  %3206 = vrot.lane.b32.xlu1 %v12147_v5, %s11046_s16 }
 0x256   :  { %v2431_v26 = vcombine.high %v2397_v29, %v2413_v44  ;;  %v12266_v21 = vrot.slane %v2466_v59, %v11302_v13  ;;  %v12269_v7 = vrot.slane %v2467_v63, %v11302_v13  ;;  %v12272_v46 = vrot.slane %v2822_v37, %v11313_v35  ;;  %3168 = vrot.lane.b32.xlu0 %v12122_v52, %s11043_s13 }
 0x257   :  { %v12277_v56 = vrot.slane %v2414_v48, %v11313_v35  ;;  %v12280_v31 = vrot.slane %v2858_v57, %v11302_v13  ;;  %v9898_v4 = vcombine.high %v12010_v27, %v12013_v41  ;;  %v2874_v24 = vcombine.low %v12016_v45, %v12019_v42 }
 0x258   :  { %v12289_v30 = vrot.slane %v2415_v40, %v11313_v35  ;;  %v12292_v14 = vrot.slane %v2838_v11, %v11313_v35  ;;  %v9899_v62 = vcombine.high %v12016_v45, %v12019_v42  ;;  %v588_v2 = vpack.i.b16 %v457_v50, %v449_v9  ;;  %v473_v42 = vpop.permute.xlu1 %472 }
 0x259   :  { %v12297_v47 = vrot.slane %v9898_v4, %v11302_v13  ;;  %v12300_v27 = vrot.slane %v2874_v24, %v11302_v13  ;;  %v1729_v41 = vshrl.u32 %v12140_v53, 16  ;;  %v1730_v38 = vshrl.u32 %v12150_v22, 16  ;;  %3176 = vrot.lane.b32.xlu1 %v12122_v52, %s11042_s3 }
 0x25a   :  { %v12305_v43 = vrot.slane %v2430_v19, %v11313_v35  ;;  %v12308_v60 = vrot.slane %v2431_v26, %v11313_v35  ;;  %v12311_v44 = vrot.slane %v9899_v62, %v11302_v13  ;;  %v12313_v45 = vpack.i.b16 %v591_v6, %v590_v28  ;;  %3192 = vrot.lane.b32.xlu0 %v12122_v52, %s11037_s1 }
 0x25b   :  { %v2482_v53 = vcombine.low %v12255_v12, %v12266_v21  ;;  %v2483_v22 = vcombine.high %v12255_v12, %v12266_v21  ;;  %v2890_v59 = vcombine.low %v12280_v31, %v12297_v47  ;;  %v1731_v63 = vpack.i.b16 %v1730_v38, %v1729_v41 }
 0x25c   :  { %v12327_v37 = vcombine.low %v12272_v46, %v12292_v14  ;;  %v2906_v50 = vcombine.low %v12300_v27, %v12311_v44  ;;  %v1010_v9 = vcombine.low %v12033_v58, %v588_v2  ;;  %v1011_v29 = vcombine.high %v12033_v58, %v588_v2 }
 0x25d   :  { %v2898_v48 = vrot.slane %v2890_v59, %v11313_v35  ;;  %10266 = vmatmul.mubr.msk.bf16.vlgmr.msra.gmra.mrb[44].mxu1 %vm4562_vm1, %v1731_v63  ;;  %v3107_v57 = vshrl.u32 %v12143_v34, 16  ;;  %v3108_v40 = vshrl.u32 %v12135_v33, 16  ;;  %v599_v11 = vshrl.u32 %v473_v42, 16  ;;  %3184 = vrot.lane.b32.xlu1 %v12122_v52, %s11044_s14 }
 0x25e   :  { %v2914_v19 = vrot.slane %v2906_v50, %v11313_v35  ;;  %v1078_v6 = vcombine.low %v12232_v18, %v12313_v45  ;;  %v596_v28 = vpack.i.b16 %v473_v42, %v465_v3  ;;  %v598_v26 = vshrl.u32 %v465_v3, 16  ;;  %10277 = vmatprep.mubr.msk.bf16.mxu1 %vm11049_vm0, %v14378_v0 }
 0x25f   :  { %v3109_v58 = vpack.i.b16 %v3108_v40, %v3107_v57  ;;  %v14403_v34 = vcombine.low %v12042_v36, %v12046_v20  ;;  %v1518_v4 = vcombine.low %v12125_v61, %v12163_v8  ;;  %v1534_v24 = vcombine.low %v12166_v32, %v12203_v49 }
 0x260   :  { %v12356_v62 = vcombine.low %v2898_v48, %v2914_v19  ;;  %v600_v2 = vpack.i.b16 %v599_v11, %v598_v26  ;;  %v1026_v41 = vcombine.low %v12245_v17, %v596_v28  ;;  %v1027_v38 = vcombine.high %v12245_v17, %v596_v28 }
 0x261   :  { %v12348_v33 = vrot.slane %v14403_v34, %v11313_v35  ;;  %v5272_v42 = vsel %vm4562_vm1, %v3109_v58, 0  ;;  %v14404_v59 = vcombine.low %v12061_v54, %v12072_v25  ;;  %v12368_v3 = vrot.slane %v1518_v4, %v11313_v35  ;;  %3200 = vrot.lane.b32.xlu1 %v12122_v52, %s11045_s15 }
 0x262   :  { %v12371_v50 = vrot.slane %v1534_v24, %v11313_v35  ;;  %v3112_v57 = vpack.i.b16 %v12356_v62, %v12327_v37  ;;  %10276 = vmatpush3.bf16.xpose.msra.mxu1 %v5272_v42  ;;  %v1034_v17 = vrot.slane %v1026_v41, %v11302_v13  ;;  %v1041_v40 = vrot.slane %v1027_v38, %v11302_v13 }
 0x263   :  { %v12365_v63 = vrot.slane %v14404_v59, %v11313_v35  ;;  %v1094_v11 = vcombine.low %v12252_v16, %v600_v2  ;;  %v1018_v28 = vrot.slane %v1010_v9, %v11302_v13  ;;  %v1025_v26 = vrot.slane %v1011_v29, %v11302_v13  ;;  %10287 = vmatprep.subr.bf16.mxu1 %v14378_v0 }
 0x264   :  { %v1079_v58 = vcombine.high %v12232_v18, %v12313_v45  ;;  %v1095_v34 = vcombine.high %v12252_v16, %v600_v2  ;;  %v5319_v4 = vsel %vm4562_vm1, %v3112_v57, 0  ;;  %v1086_v24 = vrot.slane %v1078_v6, %v11302_v13 }
 0x265   :  { %v12388_v41 = vcombine.low %v12368_v3, %v12371_v50  ;;  %v12390_v38 = vcombine.high %v2898_v48, %v2914_v19  ;;  %10282 = vmatpush3.bf16.xpose.msra.mxu0 %v5319_v4  ;;  %v1042_v9 = vcombine.low %v1018_v28, %v1034_v17  ;;  %v1043_v18 = vcombine.high %v1018_v28, %v1034_v17 }
 0x266   :  { %v1102_v16 = vrot.slane %v1094_v11, %v11302_v13  ;;  %v1109_v45 = vrot.slane %v1095_v34, %v11302_v13  ;;  %v1058_v29 = vcombine.low %v1025_v26, %v1041_v40  ;;  %v1059_v2 = vcombine.high %v1025_v26, %v1041_v40  ;;  %10293 = vmatprep.subr.bf16.mxu0 %v14378_v0 }
 0x267   :  { %v12398_v6 = vcombine.low %v12348_v33, %v12365_v63  ;;  %v12403_v48 = vcombine.high %v12272_v46, %v12292_v14  ;;  %v2498_v19 = vcombine.low %v12261_v10, %v12269_v7  ;;  %v1093_v42 = vrot.slane %v1079_v58, %v11302_v13 }
 0x268   :  { %v1110_v59 = vcombine.low %v1086_v24, %v1102_v16  ;;  %v1111_v57 = vcombine.high %v1086_v24, %v1102_v16  ;;  %v2499_v17 = vcombine.high %v12261_v10, %v12269_v7  ;;  %v2926_v40 = vcombine.low %v12277_v56, %v12289_v30 }
 0x269   :  { %v1740_v11 = vpack.i.b16 %v12388_v41, %v12398_v6  ;;  %v3118_v46 = vpack.i.b16 %v12390_v38, %v12403_v48  ;;  %v12417_v14 = vrot.slane %v1042_v9, %v11313_v35  ;;  %v12420_v28 = vrot.slane %v1043_v18, %v11313_v35 }
 0x26a   :  { %v1126_v26 = vcombine.low %v1093_v42, %v1109_v45  ;;  %v1127_v58 = vcombine.high %v1093_v42, %v1109_v45  ;;  %v12423_v34 = vrot.slane %v1058_v29, %v11313_v35  ;;  %v12426_v10 = vrot.slane %v1059_v2, %v11313_v35 }
 0x26b   :  { %v12429_v7 = vrot.slane %v1110_v59, %v11313_v35  ;;  %v12432_v4 = vrot.slane %v1111_v57, %v11313_v35  ;;  %v12438_v24 = vrot.slane %v2482_v53, %v11313_v35  ;;  %v9900_v9 = vcombine.high %v12277_v56, %v12289_v30 }
 0x26c   :  { %v2942_v18 = vcombine.low %v12305_v43, %v12308_v60  ;;  %v9901_v16 = vcombine.high %v12305_v43, %v12308_v60  ;;  %v12450_v45 = vrot.slane %v2483_v22, %v11313_v35  ;;  %v12453_v29 = vrot.slane %v2498_v19, %v11313_v35  ;;  %10284 = vmatmul.mubr.msk.bf16.vlgmr.msra.gmra.mrb[36].mxu0 %vm4562_vm1, %v1740_v11 }
 0x26d   :  { %v12456_v53 = vrot.slane %v2499_v17, %v11313_v35  ;;  %v5413_v2 = vsel %vm4562_vm1, %v3118_v46, 0  ;;  %v1134_v42 = vrot.slane %v1126_v26, %v11313_v35  ;;  %v1141_v59 = vrot.slane %v1127_v58, %v11313_v35  ;;  %10295 = vmatprep.mubr.msk.bf16.mxu0 %vm11049_vm0, %v14378_v0 }
 0x26e   :  { %10294 = vmatpush3.bf16.xpose.msra.mxu0 %v5413_v2  ;;  %v1735_v57 = vshrl.u32 %v12212_v23, 16  ;;  %v1736_v12 = vshrl.u32 %v12183_v1, 16  ;;  %v1554_v21 = vcombine.low %v12417_v14, %v12420_v28  ;;  %v9884_v22 = vcombine.high %v12417_v14, %v12420_v28 }
 0x26f   :  { %v1570_v19 = vcombine.low %v12423_v34, %v12426_v10  ;;  %v1622_v17 = vcombine.low %v12429_v7, %v12432_v4  ;;  %10305 = vmatprep.subr.bf16.mxu0 %v14378_v0  ;;  %v3113_v1 = vshrl.u32 %v12327_v37, 16  ;;  %v3114_v11 = vshrl.u32 %v12356_v62, 16 }
 0x270   :  { %v1737_v23 = vpack.i.b16 %v1736_v12, %v1735_v57  ;;  %v12479_v46 = vcombine.high %v12348_v33, %v12365_v63  ;;  %v12483_v14 = vcombine.high %v12368_v3, %v12371_v50  ;;  %v2823_v28 = vcombine.high %v12191_v55, %v12197_v39 }
 0x271   :  { %v2839_v26 = vcombine.high %v12218_v15, %v12224_v51  ;;  %v2891_v58 = vcombine.high %v12280_v31, %v12297_v47  ;;  %v9886_v37 = vcombine.high %v12429_v7, %v12432_v4  ;;  %v1638_v62 = vcombine.low %v1134_v42, %v1141_v59 }
 0x272   :  { %10278 = vmatmul.mubr.msk.bf16.vlgmr.msra.gmra.mrb[48].mxu1 %vm4562_vm1, %v1737_v23  ;;  %v3115_v33 = vpack.i.b16 %v3114_v11, %v3113_v1  ;;  %v2907_v63 = vcombine.high %v12300_v27, %v12311_v44  ;;  %v1746_v3 = vpack.i.b16 %v12483_v14, %v12479_v46  ;;  %v2837_v55 = vrot.slane %v2823_v28, %v11313_v35 }
 0x273   :  { %v2853_v39 = vrot.slane %v2839_v26, %v11313_v35  ;;  %v2905_v15 = vrot.slane %v2891_v58, %v11313_v35  ;;  %10289 = vmatprep.mubr.msk.bf16.mxu1 %vm11049_vm0, %v14378_v0  ;;  %v9887_v51 = vcombine.high %v1134_v42, %v1141_v59  ;;  %v1742_v50 = vshrl.u32 %v12388_v41, 16 }
 0x274   :  { %v5366_v31 = vsel %vm4562_vm1, %v3115_v33, 0  ;;  %v2921_v47 = vrot.slane %v2907_v63, %v11313_v35  ;;  %v3120_v44 = vshrl.u32 %v12390_v38, 16  ;;  %v14405_v7 = vcombine.high %v12042_v36, %v12046_v20 }
 0x275   :  { %10288 = vmatpush3.bf16.xpose.msra.mxu1 %v5366_v31  ;;  %10296 = vmatmul.mubr.msk.bf16.vlgmr.msra.gmra.mrb[40].mxu0 %vm4562_vm1, %v1746_v3  ;;  %v2856_v27 = vcombine.low %v2837_v55, %v2853_v39  ;;  %v14406_v2 = vcombine.high %v12061_v54, %v12072_v25  ;;  %v3119_v41 = vshrl.u32 %v12403_v48, 16  ;;  %v1519_v38 = vcombine.high %v12125_v61, %v12163_v8 }
 0x276   :  { %v12512_v4 = vrot.slane %v14405_v7, %v11313_v35  ;;  %v2924_v59 = vcombine.low %v2905_v15, %v2921_v47  ;;  %10299 = vmatprep.subr.bf16.mxu1 %v14378_v0  ;;  %10307 = vmatprep.mubr.msk.bf16.mxu0 %vm11049_vm0, %v14378_v0  ;;  %v1535_v36 = vcombine.high %v12166_v32, %v12203_v49  ;;  %v1741_v48 = vshrl.u32 %v12398_v6, 16 }
 0x277   :  { %v12518_v42 = vrot.slane %v14406_v2, %v11313_v35  ;;  %v12529_v20 = vrot.slane %v1554_v21, %v11302_v13  ;;  %v12532_v54 = vrot.slane %v9884_v22, %v11302_v13  ;;  %v9885_v25 = vcombine.high %v12423_v34, %v12426_v10 }
 0x278   :  { %v3124_v57 = vpack.i.b16 %v2924_v59, %v2856_v27  ;;  %v3121_v12 = vpack.i.b16 %v3120_v44, %v3119_v41  ;;  %v1533_v23 = vrot.slane %v1519_v38, %v11313_v35  ;;  %v1549_v61 = vrot.slane %v1535_v36, %v11313_v35 }
 0x279   :  { %v12540_v8 = vrot.slane %v1622_v17, %v11302_v13  ;;  %v12543_v32 = vrot.slane %v9886_v37, %v11302_v13  ;;  %v12546_v49 = vrot.slane %v1638_v62, %v11302_v13  ;;  %v12548_v21 = vcombine.high %v2905_v15, %v2921_v47 }
 0x27a   :  { %v12551_v22 = vrot.slane %v9887_v51, %v11302_v13  ;;  %v5507_v6 = vsel %vm4562_vm1, %v3124_v57, 0  ;;  %v1743_v1 = vpack.i.b16 %v1742_v50, %v1741_v48  ;;  %v12556_v11 = vcombine.low %v12512_v4, %v12518_v42  ;;  %v12653_v48 = vpop.permute.xlu1 %3162 }
 0x27b   :  { %10306 = vmatpush3.bf16.xpose.msra.mxu0 %v5507_v6  ;;  %v12558_v17 = vcombine.high %v2837_v55, %v2853_v39  ;;  %v1748_v28 = vshrl.u32 %v12483_v14, 16  ;;  %v3126_v26 = vshrl.u32 %v2924_v59, 16  ;;  %v12565_v58 = vrot.slane %v2926_v40, %v11302_v13 }
 0x27c   :  { %10290 = vmatmul.mubr.msk.bf16.vlgmr.msra.gmra.mrb[52].mxu1 %vm4562_vm1, %v1743_v1  ;;  %v5460_v37 = vsel %vm4562_vm1, %v3121_v12, 0  ;;  %v1552_v62 = vcombine.low %v1533_v23, %v1549_v61  ;;  %10317 = vmatprep.subr.bf16.mxu0 %v14378_v0  ;;  %v12574_v33 = vrot.slane %v9900_v9, %v11302_v13  ;;  %v12580_v14 = vrot.slane %v2942_v18, %v11302_v13 }
 0x27d   :  { %10300 = vmatpush3.bf16.xpose.msra.mxu1 %v5460_v37  ;;  %v3130_v40 = vpack.i.b16 %v12548_v21, %v12558_v17  ;;  %10301 = vmatprep.mubr.msk.bf16.mxu1 %vm11049_vm0, %v14378_v0  ;;  %v3125_v63 = vshrl.u32 %v2856_v27, 16  ;;  %v12590_v56 = vrot.slane %v9901_v16, %v11302_v13  ;;  %v2994_v30 = vcombine.low %v12438_v24, %v12450_v45 }
 0x27e   :  { %10311 = vmatprep.subr.bf16.mxu1 %v14378_v0  ;;  %v2958_v9 = vcombine.low %v12565_v58, %v12574_v33  ;;  %v9902_v18 = vcombine.high %v12438_v24, %v12450_v45  ;;  %v3010_v3 = vcombine.low %v12453_v29, %v12456_v53  ;;  %v9903_v55 = vcombine.high %v12453_v29, %v12456_v53 }
 0x27f   :  { %v1747_v43 = vshrl.u32 %v12479_v46, 16  ;;  %v3127_v60 = vpack.i.b16 %v3126_v26, %v3125_v63  ;;  %v2974_v16 = vcombine.low %v12580_v14, %v12590_v56  ;;  %v12607_v39 = vrot.slane %v2994_v30, %v11302_v13 }
 0x280   :  { %v1752_v15 = vpack.i.b16 %v1552_v62, %v12556_v11  ;;  %v12611_v51 = vrot.slane %v9902_v18, %v11302_v13  ;;  %v12614_v24 = vrot.slane %v3010_v3, %v11302_v13  ;;  %v3025_v45 = vrot.slane %v9903_v55, %v11302_v13  ;;  %v12676_v18 = vpop.permute.xlu1 %3178 }
 0x281   :  { %v12621_v29 = vrot.slane %v1570_v19, %v11302_v13  ;;  %v12624_v53 = vrot.slane %v9885_v25, %v11302_v13  ;;  %v5601_v46 = vsel %vm4562_vm1, %v3130_v40, 0  ;;  %v1749_v31 = vpack.i.b16 %v1748_v28, %v1747_v43 }
 0x282   :  { %10308 = vmatmul.mubr.msk.bf16.vlgmr.msra.gmra.mrb[44].mxu0 %vm4562_vm1, %v1752_v15  ;;  %v2966_v47 = vrot.slane %v2958_v9, %v11313_v35  ;;  %v2982_v50 = vrot.slane %v2974_v16, %v11313_v35  ;;  %v3026_v27 = vcombine.low %v12607_v39, %v12611_v51  ;;  %v3042_v44 = vcombine.low %v12614_v24, %v3025_v45 }
 0x283   :  { %10318 = vmatpush3.bf16.xpose.msra.mxu0 %v5601_v46  ;;  %v5554_v34 = vsel %vm4562_vm1, %v3127_v60, 0  ;;  %10319 = vmatprep.mubr.msk.bf16.mxu0 %vm11049_vm0, %v14378_v0  ;;  %v12636_v10 = vcombine.high %v1533_v23, %v1549_v61  ;;  %v1654_v19 = vcombine.low %v12540_v8, %v12543_v32  ;;  %v3132_v59 = vshrl.u32 %v12548_v21, 16 }
 0x284   :  { %10302 = vmatmul.mubr.msk.bf16.vlgmr.msra.gmra.mrb[56].mxu1 %vm4562_vm1, %v1749_v31  ;;  %10329 = vmatprep.subr.bf16.mxu0 %v14378_v0  ;;  %v3034_v7 = vrot.slane %v3026_v27, %v11313_v35  ;;  %v3050_v2 = vrot.slane %v3042_v44, %v11313_v35  ;;  %v1670_v41 = vcombine.low %v12546_v49, %v12551_v22  ;;  %v1754_v25 = vshrl.u32 %v1552_v62, 16 }
 0x285   :  { %v1586_v38 = vcombine.low %v12529_v20, %v12532_v54  ;;  %10312 = vmatpush3.bf16.xpose.msra.mxu1 %v5554_v34  ;;  %v1485_v36 = vcombine.high %v12512_v4, %v12518_v42  ;;  %10313 = vmatprep.mubr.msk.bf16.mxu1 %vm11049_vm0, %v14378_v0  ;;  %v1602_v57 = vcombine.low %v12621_v29, %v12624_v53  ;;  %v3131_v61 = vshrl.u32 %v12558_v17, 16 }
 0x286   :  { %v2990_v12 = vcombine.low %v2966_v47, %v2982_v50  ;;  %v3058_v23 = vcombine.low %v3034_v7, %v3050_v2  ;;  %10323 = vmatprep.subr.bf16.mxu1 %v14378_v0  ;;  %v1753_v6 = vshrl.u32 %v12556_v11, 16  ;;  %v1662_v1 = vrot.slane %v1654_v19, %v11313_v35 }
 0x287   :  { %v1758_v21 = vpack.i.b16 %v12636_v10, %v1485_v36  ;;  %v3133_v42 = vpack.i.b16 %v3132_v59, %v3131_v61  ;;  %v1678_v28 = vrot.slane %v1670_v41, %v11313_v35  ;;  %v3027_v37 = vcombine.high %v12607_v39, %v12611_v51  ;;  %v14407_v61 = vld [vmem:[#allocation16_spill] sm:$0xff] }
 0x288   :  { %v3136_v4 = vpack.i.b16 %v3058_v23, %v2990_v12  ;;  %v1755_v26 = vpack.i.b16 %v1754_v25, %v1753_v6  ;;  %v1594_v17 = vrot.slane %v1586_v38, %v11313_v35  ;;  %v1610_v40 = vrot.slane %v1602_v57, %v11313_v35 }
 0x289   :  { %v3059_v63 = vcombine.high %v3034_v7, %v3050_v2  ;;  %v2959_v11 = vcombine.high %v12565_v58, %v12574_v33  ;;  %v2975_v30 = vcombine.high %v12580_v14, %v12590_v56  ;;  %v3043_v9 = vcombine.high %v12614_v24, %v3025_v45  ;;  %v3171_v14 = vpop.permute.xlu0 %3170 }
 0x28a   :  { %10320 = vmatmul.mubr.msk.bf16.vlgmr.msra.gmra.mrb[48].mxu0 %vm4562_vm1, %v1758_v21  ;;  %v5695_v62 = vsel %vm4562_vm1, %v3136_v4, 0  ;;  %v5648_v3 = vsel %vm4562_vm1, %v3133_v42, 0  ;;  %v1686_v55 = vcombine.low %v1662_v1, %v1678_v28  ;;  %v2991_v43 = vcombine.high %v2966_v47, %v2982_v50 }
 0x28b   :  { %10330 = vmatpush3.bf16.xpose.msra.mxu0 %v5695_v62  ;;  %10331 = vmatprep.mubr.msk.bf16.mxu0 %vm11049_vm0, %v14378_v0  ;;  %v3138_v60 = vshrl.u32 %v3058_v23, 16  ;;  %v1587_v16 = vcombine.high %v12529_v20, %v12532_v54  ;;  %v3041_v58 = vrot.slane %v3027_v37, %v11313_v35  ;;  %v3057_v33 = vrot.slane %v3043_v9, %v11313_v35 }
 0x28c   :  { %10314 = vmatmul.mubr.msk.bf16.vlgmr.msra.gmra.mrb[60].mxu1 %vm4562_vm1, %v1755_v26  ;;  %10341 = vmatprep.subr.bf16.mxu0 %v14378_v0  ;;  %v1618_v56 = vcombine.low %v1594_v17, %v1610_v40  ;;  %v3142_v39 = vpack.i.b16 %v3059_v63, %v2991_v43  ;;  %v1760_v15 = vshrl.u32 %v12636_v10, 16  ;;  %v3137_v51 = vshrl.u32 %v2990_v12, 16 }
 0x28d   :  { %10324 = vmatpush3.bf16.xpose.msra.mxu1 %v5648_v3  ;;  %10325 = vmatprep.mubr.msk.bf16.mxu1 %vm11049_vm0, %v14378_v0  ;;  %v1603_v24 = vcombine.high %v12621_v29, %v12624_v53  ;;  %v12691_v20 = vcombine.high %v1662_v1, %v1678_v28  ;;  %v2973_v54 = vrot.slane %v2959_v11, %v11313_v35  ;;  %v1759_v31 = vshrl.u32 %v1485_v36, 16  ;;  %v3187_v53 = vpop.permute.xlu1 %3186 }
 0x28e   :  { %10335 = vmatprep.subr.bf16.mxu1 %v14378_v0  ;;  %v2989_v45 = vrot.slane %v2975_v30, %v11313_v35  ;;  %v1764_v46 = vpack.i.b16 %v1686_v55, %v1618_v56  ;;  %v3139_v47 = vpack.i.b16 %v3138_v60, %v3137_v51  ;;  %v1766_v50 = vshrl.u32 %v1686_v55, 16 }
 0x28f   :  { %v12695_v27 = vcombine.high %v1594_v17, %v1610_v40  ;;  %v12697_v44 = vcombine.low %v3041_v58, %v3057_v33  ;;  %v1655_v34 = vcombine.high %v12540_v8, %v12543_v32  ;;  %v1671_v29 = vcombine.high %v12546_v49, %v12551_v22  ;;  %v3195_v8 = vpop.permute.xlu0 %3194 }
 0x290   :  { %v5789_v10 = vsel %vm4562_vm1, %v3142_v39, 0  ;;  %v1761_v19 = vpack.i.b16 %v1760_v15, %v1759_v31  ;;  %v1765_v7 = vshrl.u32 %v1618_v56, 16  ;;  %v3144_v2 = vshrl.u32 %v3059_v63, 16 }
 0x291   :  { %v1770_v59 = vpack.i.b16 %v12691_v20, %v12695_v27  ;;  %v2992_v41 = vcombine.low %v2973_v54, %v2989_v45  ;;  %v5742_v32 = vsel %vm4562_vm1, %v3139_v47, 0  ;;  %v3143_v22 = vshrl.u32 %v2991_v43, 16  ;;  %v3203_v26 = vpop.permute.xlu1 %3202 }
 0x292   :  { %10332 = vmatmul.mubr.msk.bf16.vlgmr.msra.gmra.mrb[52].mxu0 %vm4562_vm1, %v1764_v46  ;;  %v1767_v49 = vpack.i.b16 %v1766_v50, %v1765_v7  ;;  %v12713_v38 = vrot.slane %v1587_v16, %v11313_v35  ;;  %v1669_v25 = vrot.slane %v1655_v34, %v11313_v35  ;;  %v1685_v57 = vrot.slane %v1671_v29, %v11313_v35 }
 0x293   :  { %10342 = vmatpush3.bf16.xpose.msra.mxu0 %v5789_v10  ;;  %10343 = vmatprep.mubr.msk.bf16.mxu0 %vm11049_vm0, %v14378_v0  ;;  %v3148_v36 = vpack.i.b16 %v12697_v44, %v2992_v41  ;;  %v3145_v12 = vpack.i.b16 %v3144_v2, %v3143_v22  ;;  %v12722_v23 = vrot.slane %v1603_v24, %v11313_v35  ;;  %v3222_v21 = vshrl.u32 %v14407_v61, 16  ;;  %v3211_v3 = vpop.permute.xlu0 %3210 }
 0x294   :  { %10326 = vmatmul.mubr.msk.bf16.vlgmr.msra.gmra.mrb[64].mxu1 %vm4562_vm1, %v1761_v19  ;;  %10353 = vmatprep.subr.bf16.mxu0 %v14378_v0  ;;  %v3223_v6 = vshrl.u32 %v12653_v48, 16  ;;  %v12726_v4 = vcombine.high %v2973_v54, %v2989_v45  ;;  %v3220_v42 = vpack.i.b16 %v12653_v48, %v14407_v61  ;;  %v3231_v1 = vshrl.u32 %v12676_v18, 16 }
 0x295   :  { %10336 = vmatpush3.bf16.xpose.msra.mxu1 %v5742_v32  ;;  %10337 = vmatprep.mubr.msk.bf16.mxu1 %vm11049_vm0, %v14378_v0  ;;  %v3238_v28 = vshrl.u32 %v3187_v53, 16  ;;  %v12731_v37 = vcombine.high %v3041_v58, %v3057_v33  ;;  %v3228_v62 = vpack.i.b16 %v12676_v18, %v3171_v14  ;;  %v3230_v17 = vshrl.u32 %v3171_v14, 16 }
 0x296   :  { %10347 = vmatprep.subr.bf16.mxu1 %v14378_v0  ;;  %v3246_v40 = vshrl.u32 %v3203_v26, 16  ;;  %v5883_v63 = vsel %vm4562_vm1, %v3148_v36, 0  ;;  %v12735_v11 = vcombine.low %v1669_v25, %v1685_v57  ;;  %v3236_v30 = vpack.i.b16 %v3195_v8, %v3187_v53 }
 0x297   :  { %v3239_v9 = vshrl.u32 %v3195_v8, 16  ;;  %v3224_v48 = vpack.i.b16 %v3223_v6, %v3222_v21  ;;  %v3232_v55 = vpack.i.b16 %v3231_v1, %v3230_v17  ;;  %v3244_v43 = vpack.i.b16 %v3211_v3, %v3203_v26 }
 0x298   :  { %v3247_v60 = vshrl.u32 %v3211_v3, 16  ;;  %v3150_v18 = vshrl.u32 %v12697_v44, 16  ;;  %v3346_v58 = vcombine.low %v3220_v42, %v3236_v30  ;;  %v3347_v33 = vcombine.high %v3220_v42, %v3236_v30 }
 0x299   :  { %v3240_v16 = vpack.i.b16 %v3239_v9, %v3238_v28  ;;  %v5836_v14 = vsel %vm4562_vm1, %v3145_v12, 0  ;;  %v3362_v39 = vcombine.low %v3228_v62, %v3244_v43  ;;  %v3363_v15 = vcombine.high %v3228_v62, %v3244_v43  ;;  %v12766_v12 = vpop.permute.xlu1 %3172 }
 0x29a   :  { %10344 = vmatmul.mubr.msk.bf16.vlgmr.msra.gmra.mrb[56].mxu0 %vm4562_vm1, %v1770_v59  ;;  %v3248_v56 = vpack.i.b16 %v3247_v60, %v3246_v40  ;;  %v1620_v51 = vcombine.low %v12713_v38, %v12722_v23  ;;  %v3149_v24 = vshrl.u32 %v2992_v41, 16  ;;  %v3354_v54 = vrot.slane %v3346_v58, %v11302_v13 }
 0x29b   :  { %10354 = vmatpush3.bf16.xpose.msra.mxu0 %v5883_v63  ;;  %10355 = vmatprep.mubr.msk.bf16.mxu0 %vm11049_vm0, %v14378_v0  ;;  %v3154_v45 = vpack.i.b16 %v12731_v37, %v12726_v4  ;;  %v1771_v46 = vshrl.u32 %v12695_v27, 16  ;;  %v1772_v31 = vshrl.u32 %v12691_v20, 16  ;;  %v3370_v47 = vrot.slane %v3362_v39, %v11302_v13  ;;  %v12799_v39 = vpop.permute.xlu0 %3164 }
 0x29c   :  { %10338 = vmatmul.mubr.msk.bf16.vlgmr.msra.gmra.mrb[68].mxu1 %vm4562_vm1, %v1767_v49  ;;  %10365 = vmatprep.subr.bf16.mxu0 %v14378_v0  ;;  %v1776_v50 = vpack.i.b16 %v12735_v11, %v1620_v51  ;;  %v3151_v44 = vpack.i.b16 %v3150_v18, %v3149_v24  ;;  %v3361_v34 = vrot.slane %v3347_v33, %v11302_v13  ;;  %v3156_v32 = vshrl.u32 %v12731_v37, 16 }
 0x29d   :  { %10348 = vmatpush3.bf16.xpose.msra.mxu1 %v5836_v14  ;;  %10349 = vmatprep.mubr.msk.bf16.mxu1 %vm11049_vm0, %v14378_v0  ;;  %v3377_v29 = vrot.slane %v3363_v15, %v11302_v13  ;;  %v3414_v53 = vcombine.low %v3224_v48, %v3240_v16  ;;  %v3378_v10 = vcombine.low %v3354_v54, %v3370_v47  ;;  %v5977_v20 = vsel %vm4562_vm1, %v3154_v45, 0 }
 0x29e   :  { %10359 = vmatprep.subr.bf16.mxu1 %v14378_v0  ;;  %v3379_v19 = vcombine.high %v3354_v54, %v3370_v47  ;;  %v3430_v7 = vcombine.low %v3232_v55, %v3248_v56  ;;  %v3415_v2 = vcombine.high %v3224_v48, %v3240_v16  ;;  %v3431_v59 = vcombine.high %v3232_v55, %v3248_v56 }
 0x29f   :  { %v1773_v27 = vpack.i.b16 %v1772_v31, %v1771_v46  ;;  %v1689_v41 = vcombine.high %v1669_v25, %v1685_v57  ;;  %v5930_v8 = vsel %vm4562_vm1, %v3151_v44, 0  ;;  %v3394_v49 = vcombine.low %v3361_v34, %v3377_v29 }
 0x2a0   :  { %v3395_v22 = vcombine.high %v3361_v34, %v3377_v29  ;;  %v3422_v36 = vrot.slane %v3414_v53, %v11302_v13  ;;  %v3386_v61 = vrot.slane %v3378_v10, %v11313_v35  ;;  %v3393_v25 = vrot.slane %v3379_v19, %v11313_v35  ;;  %v12809_v19 = vpop.permute.xlu0 %3188 }
 0x2a1   :  { %v3438_v57 = vrot.slane %v3430_v7, %v11302_v13  ;;  %v1621_v21 = vcombine.high %v12713_v38, %v12722_v23  ;;  %v3155_v6 = vshrl.u32 %v12726_v4, 16  ;;  %v3429_v42 = vrot.slane %v3415_v2, %v11302_v13 }
 0x2a2   :  { %10356 = vmatmul.mubr.msk.bf16.vlgmr.msra.gmra.mrb[60].mxu0 %vm4562_vm1, %v1776_v50  ;;  %v3445_v1 = vrot.slane %v3431_v59, %v11302_v13  ;;  %v1777_v28 = vshrl.u32 %v1620_v51, 16  ;;  %v1778_v26 = vshrl.u32 %v12735_v11, 16  ;;  %v3402_v17 = vrot.slane %v3394_v49, %v11313_v35  ;;  %v12784_v11 = vpop.permute.xlu1 %3180 }
 0x2a3   :  { %10366 = vmatpush3.bf16.xpose.msra.mxu0 %v5977_v20  ;;  %10367 = vmatprep.mubr.msk.bf16.mxu0 %vm11049_vm0, %v14378_v0  ;;  %v1782_v37 = vpack.i.b16 %v1689_v41, %v1621_v21  ;;  %v3157_v62 = vpack.i.b16 %v3156_v32, %v3155_v6  ;;  %v3409_v38 = vrot.slane %v3395_v22, %v11313_v35  ;;  %v1784_v56 = vshrl.u32 %v1689_v41, 16 }
 0x2a4   :  { %10350 = vmatmul.mubr.msk.bf16.vlgmr.msra.gmra.mrb[72].mxu1 %vm4562_vm1, %v1773_v27  ;;  %10377 = vmatprep.subr.bf16.mxu0 %v14378_v0  ;;  %v3446_v23 = vcombine.low %v3422_v36, %v3438_v57  ;;  %v3447_v40 = vcombine.high %v3422_v36, %v3438_v57  ;;  %v3890_v4 = vcombine.low %v3386_v61, %v3393_v25  ;;  %v1783_v24 = vshrl.u32 %v1621_v21, 16 }
 0x2a5   :  { %10360 = vmatpush3.bf16.xpose.msra.mxu1 %v5930_v8  ;;  %10361 = vmatprep.mubr.msk.bf16.mxu1 %vm11049_vm0, %v14378_v0  ;;  %v9904_v63 = vcombine.high %v3386_v61, %v3393_v25  ;;  %v3462_v30 = vcombine.low %v3429_v42, %v3445_v1  ;;  %v3463_v9 = vcombine.high %v3429_v42, %v3445_v1  ;;  %v6024_v48 = vsel %vm4562_vm1, %v3157_v62, 0 }
 0x2a6   :  { %10371 = vmatprep.subr.bf16.mxu1 %v14378_v0  ;;  %v1779_v3 = vpack.i.b16 %v1778_v26, %v1777_v28  ;;  %v3906_v55 = vcombine.low %v3402_v17, %v3409_v38  ;;  %v9905_v43 = vcombine.high %v3402_v17, %v3409_v38  ;;  %v3454_v60 = vrot.slane %v3446_v23, %v11313_v35  ;;  %v12803_v46 = vpop.permute.xlu1 %3196  ;;  %v12826_v28 = vpop.permute.xlu0 %3204 }
 0x2a7   :  { %v3461_v18 = vrot.slane %v3447_v40, %v11313_v35  ;;  %v3897_v16 = vrot.slane %v3890_v4, %v11302_v13  ;;  %v3905_v58 = vrot.slane %v9904_v63, %v11302_v13  ;;  %v3470_v33 = vrot.slane %v3462_v30, %v11313_v35 }
 0x2a8   :  { %v3477_v14 = vrot.slane %v3463_v9, %v11313_v35  ;;  %v3913_v15 = vrot.slane %v3906_v55, %v11302_v13  ;;  %v3921_v51 = vrot.slane %v9905_v43, %v11302_v13  ;;  %v1785_v50 = vpack.i.b16 %v1784_v56, %v1783_v24 }
 0x2a9   :  { %v3958_v54 = vcombine.low %v3454_v60, %v3461_v18  ;;  %v9906_v45 = vcombine.high %v3454_v60, %v3461_v18  ;;  %v3922_v31 = vcombine.low %v3897_v16, %v3905_v58  ;;  %v3923_v32 = vcombine.high %v3897_v16, %v3905_v58 }
 0x2aa   :  { %10368 = vmatmul.mubr.msk.bf16.vlgmr.msra.gmra.mrb[64].mxu0 %vm4562_vm1, %v1782_v37  ;;  %v3974_v47 = vcombine.low %v3470_v33, %v3477_v14  ;;  %v9907_v44 = vcombine.high %v3470_v33, %v3477_v14  ;;  %v3938_v29 = vcombine.low %v3913_v15, %v3921_v51  ;;  %v12815_v59 = vpop.permute.xlu1 %3212  ;;  %v3939_v49 = vcombine.high %v3913_v15, %v3921_v51 }
 0x2ab   :  { %10379 = vmatprep.mubr.msk.bf16.mxu0 %vm11049_vm0, %v14378_v0  ;;  %v3930_v34 = vrot.slane %v3922_v31, %v11313_v35  ;;  %v3965_v53 = vrot.slane %v3958_v54, %v11302_v13  ;;  %v3973_v10 = vrot.slane %v9906_v45, %v11302_v13  ;;  %v3937_v57 = vrot.slane %v3923_v32, %v11313_v35 }
 0x2ac   :  { %10362 = vmatmul.mubr.msk.bf16.vlgmr.msra.gmra.mrb[76].mxu1 %vm4562_vm1, %v1779_v3  ;;  %v3946_v7 = vrot.slane %v3938_v29, %v11313_v35  ;;  %v3981_v2 = vrot.slane %v3974_v47, %v11302_v13  ;;  %v3989_v20 = vrot.slane %v9907_v44, %v11302_v13  ;;  %v3953_v21 = vrot.slane %v3939_v49, %v11313_v35 }
 0x2ad   :  { %10372 = vmatpush3.bf16.xpose.msra.mxu1 %v6024_v48  ;;  %10373 = vmatprep.mubr.msk.bf16.mxu1 %vm11049_vm0, %v14378_v0  ;;  %v3990_v27 = vcombine.low %v3965_v53, %v3973_v10  ;;  %v3991_v61 = vcombine.high %v3965_v53, %v3973_v10  ;;  %v3286_v51 = vshrl.u32 %v12147_v5, 16 }
 0x2ae   :  { %10383 = vmatprep.subr.bf16.mxu1 %v14378_v0  ;;  %v3954_v41 = vcombine.low %v3930_v34, %v3946_v7  ;;  %v12818_v8 = vcombine.high %v3930_v34, %v3946_v7  ;;  %v4006_v36 = vcombine.low %v3981_v2, %v3989_v20  ;;  %v4007_v25 = vcombine.high %v3981_v2, %v3989_v20 }
 0x2af   :  { %v3998_v22 = vrot.slane %v3990_v27, %v11313_v35  ;;  %v4005_v42 = vrot.slane %v3991_v61, %v11313_v35  ;;  %v12828_v26 = vcombine.low %v3937_v57, %v3953_v21  ;;  %v12830_v37 = vcombine.high %v3937_v57, %v3953_v21 }
 0x2b0   :  { %v4014_v6 = vrot.slane %v4006_v36, %v11313_v35  ;;  %v4021_v1 = vrot.slane %v4007_v25, %v11313_v35  ;;  %v4438_v38 = vshrl.u32 %v3954_v41, 16  ;;  %v4446_v4 = vshrl.u32 %v12818_v8, 16 }
 0x2b1   :  { %v4454_v3 = vshrl.u32 %v12828_v26, 16  ;;  %v4462_v15 = vshrl.u32 %v12830_v37, 16 }
 0x2b2   :  { %v4022_v17 = vcombine.low %v3998_v22, %v4014_v6  ;;  %v12832_v23 = vcombine.high %v3998_v22, %v4014_v6  ;;  %v12834_v40 = vcombine.low %v4005_v42, %v4021_v1  ;;  %v12837_v63 = vcombine.high %v4005_v42, %v4021_v1 }
 0x2b4   :  { %10374 = vmatmul.mubr.msk.bf16.vlgmr.msra.gmra.mrb[80].mxu1 %vm4562_vm1, %v1785_v50  ;;  %v4436_v30 = vpack.i.b16 %v4022_v17, %v3954_v41  ;;  %v4439_v9 = vshrl.u32 %v4022_v17, 16  ;;  %v4447_v60 = vshrl.u32 %v12832_v23, 16  ;;  %v4455_v58 = vshrl.u32 %v12834_v40, 16 }
 0x2b5   :  { %10385 = vmatprep.mubr.msk.bf16.mxu1 %vm11049_vm0, %v14378_v0  ;;  %v4463_v54 = vshrl.u32 %v12837_v63, 16 }
 0x2b6   :  { %10378 = vmatpush3.bf16.msra.mxu0 %v4436_v30  ;;  %v4440_v16 = vpack.i.b16 %v4439_v9, %v4438_v38  ;;  %v12849_v33 = vpack.i.b16 %v4447_v60, %v4446_v4  ;;  %v12851_v56 = vpack.i.b16 %v4455_v58, %v4454_v3 }
 0x2b7   :  { %10389 = vmatprep.subr.bf16.mxu0 %v14378_v0  ;;  %v12858_v44 = vpack.i.b16 %v4463_v54, %v4462_v15 }
 0x2b8   :  { %v3167_v62 = vpop.permute.xlu1 %3166  ;;  %v3175_v48 = vpop.permute.xlu0 %3174  ;;  %10384 = vmatpush3.bf16.msra.mxu1 %v4440_v16 }
 0x2b9   :  { %10395 = vmatprep.subr.bf16.mxu1 %v14378_v0  ;;  %v3287_v24 = vshrl.u32 %v3167_v62, 16  ;;  %v3284_v31 = vpack.i.b16 %v3167_v62, %v12147_v5  ;;  %14408 = vst [vmem:[#allocation19_spill] sm:$0xff] %v12858_v44  ;;  %v3294_v53 = vshrl.u32 %v3175_v48, 16 }
 0x2bb   :  { %v3288_v7 = vpack.i.b16 %v3287_v24, %v3286_v51 }
 0x2bc   :  { %v3183_v14 = vpop.permute.xlu1 %3182  ;;  %v3199_v45 = vpop.permute.xlu0 %3198 }
 0x2bd   :  { %v3303_v50 = vshrl.u32 %v3199_v45, 16  ;;  %v3295_v34 = vshrl.u32 %v3183_v14, 16  ;;  %v3292_v27 = vpack.i.b16 %v3183_v14, %v3175_v48 }
 0x2bf   :  { %v3296_v36 = vpack.i.b16 %v3295_v34, %v3294_v53 }
 0x2c2   :  { %v3191_v47 = vpop.permute.xlu1 %3190  ;;  %v3215_v20 = vpop.permute.xlu0 %3214 }
 0x2c3   :  { %v3302_v29 = vshrl.u32 %v3191_v47, 16  ;;  %v3300_v10 = vpack.i.b16 %v3199_v45, %v3191_v47  ;;  %v3311_v22 = vshrl.u32 %v3215_v20, 16 }
 0x2c5   :  { %v3304_v2 = vpack.i.b16 %v3303_v50, %v3302_v29  ;;  %v3618_v32 = vcombine.low %v3284_v31, %v3300_v10  ;;  %v3619_v49 = vcombine.high %v3284_v31, %v3300_v10 }
 0x2c7   :  { %v3207_v41 = vpop.permute.xlu1 %3206  ;;  %v3686_v25 = vcombine.low %v3288_v7, %v3304_v2  ;;  %v3687_v5 = vcombine.high %v3288_v7, %v3304_v2  ;;  %v3626_v6 = vrot.slane %v3618_v32, %v11302_v13  ;;  %v3633_v42 = vrot.slane %v3619_v49, %v11302_v13 }
 0x2c8   :  { %v3310_v61 = vshrl.u32 %v3207_v41, 16  ;;  %v3308_v57 = vpack.i.b16 %v3215_v20, %v3207_v41 }
 0x2c9   :  { %v3694_v4 = vrot.slane %v3686_v25, %v11302_v13  ;;  %v3701_v30 = vrot.slane %v3687_v5, %v11302_v13 }
 0x2ca   :  { %v3312_v21 = vpack.i.b16 %v3311_v22, %v3310_v61  ;;  %v3634_v1 = vcombine.low %v3292_v27, %v3308_v57  ;;  %v3635_v62 = vcombine.high %v3292_v27, %v3308_v57 }
 0x2cc   :  { %v3702_v17 = vcombine.low %v3296_v36, %v3312_v21  ;;  %v3703_v38 = vcombine.high %v3296_v36, %v3312_v21  ;;  %v3642_v9 = vrot.slane %v3634_v1, %v11302_v13  ;;  %v3649_v3 = vrot.slane %v3635_v62, %v11302_v13 }
 0x2ce   :  { %v12866_v48 = vpop.f32.mrb[16].mxu1  ;;  %v12868_v60 = vpop.f32.mrb[8].mxu0  ;;  %v3710_v16 = vrot.slane %v3702_v17, %v11302_v13  ;;  %v3717_v58 = vrot.slane %v3703_v38, %v11302_v13  ;;  %v3650_v51 = vcombine.low %v3626_v6, %v3642_v9  ;;  %v3651_v24 = vcombine.high %v3626_v6, %v3642_v9 }
 0x2cf   :  { %v10189_v14 = vpop.f32.mrb[17].mxu1  ;;  %v6079_v15 = vsel %vm4562_vm1, %v12868_v60, -inf  ;;  %v3666_v54 = vcombine.low %v3633_v42, %v3649_v3  ;;  %v3667_v45 = vcombine.high %v3633_v42, %v3649_v3  ;;  %v10201_v31 = vpop.f32.mrb[9].mxu0  ;;  %v6067_v5 = vsel %vm4562_vm1, %v12866_v48, -inf }
 0x2d0   :  { %6080 = vmax.xlane.f32.xlu1 %v6079_v15  ;;  %v12874_v47 = vpop.f32.mrb[18].mxu1  ;;  %v12876_v50 = vpop.f32.mrb[10].mxu0  ;;  %v3718_v34 = vcombine.low %v3694_v4, %v3710_v16  ;;  %v3719_v29 = vcombine.high %v3694_v4, %v3710_v16  ;;  %v3734_v53 = vcombine.low %v3701_v30, %v3717_v58  ;;  %v3735_v10 = vcombine.high %v3701_v30, %v3717_v58 }
 0x2d1   :  { %v10190_v7 = vpop.f32.mrb[19].mxu1  ;;  %v10202_v2 = vpop.f32.mrb[11].mxu0  ;;  %v3658_v20 = vrot.slane %v3650_v51, %v11313_v35  ;;  %v3665_v27 = vrot.slane %v3651_v24, %v11313_v35  ;;  %v3674_v41 = vrot.slane %v3666_v54, %v11313_v35  ;;  %v3681_v32 = vrot.slane %v3667_v45, %v11313_v35  ;;  %6068 = vmax.xlane.f32.xlu0 %v6067_v5 }
 0x2d2   :  { %v3726_v49 = vrot.slane %v3718_v34, %v11313_v35  ;;  %v3733_v22 = vrot.slane %v3719_v29, %v11313_v35  ;;  %v3742_v36 = vrot.slane %v3734_v53, %v11313_v35  ;;  %v3749_v61 = vrot.slane %v3735_v10, %v11313_v35 }
 0x2d3   :  { %v6070_v57 = vsel %vm4562_vm1, %v12874_v47, -inf  ;;  %v4162_v6 = vcombine.low %v3658_v20, %v3665_v27  ;;  %v9912_v42 = vcombine.high %v3658_v20, %v3665_v27  ;;  %v4178_v1 = vcombine.low %v3674_v41, %v3681_v32 }
 0x2d4   :  { %6071 = vmax.xlane.f32.xlu1 %v6070_v57  ;;  %v9913_v17 = vcombine.high %v3674_v41, %v3681_v32  ;;  %v4230_v4 = vcombine.low %v3726_v49, %v3733_v22  ;;  %v9914_v30 = vcombine.high %v3726_v49, %v3733_v22  ;;  %v4246_v9 = vcombine.low %v3742_v36, %v3749_v61 }
 0x2d5   :  { %v9915_v3 = vcombine.high %v3742_v36, %v3749_v61  ;;  %v6082_v16 = vsel %vm4562_vm1, %v12876_v50, -inf  ;;  %v12897_v58 = vrot.slane %v4162_v6, %v11302_v13  ;;  %v12900_v14 = vrot.slane %v9912_v42, %v11302_v13 }
 0x2d6   :  { %v12886_v25 = vpop.f32.mrb[20].mxu1  ;;  %6083 = vmax.xlane.f32.xlu0 %v6082_v16  ;;  %v12903_v15 = vrot.slane %v4178_v1, %v11302_v13  ;;  %v12908_v24 = vrot.slane %v9913_v17, %v11302_v13  ;;  %v12911_v54 = vrot.slane %v4230_v4, %v11302_v13  ;;  %v12914_v45 = vrot.slane %v9914_v30, %v11302_v13 }
 0x2d7   :  { %v10195_v21 = vpop.f32.mrb[21].mxu1  ;;  %14409 = vst [vmem:[#allocation18_spill] sm:$0xff] %v12897_v58  ;;  %14410 = vst [vmem:[#allocation20_spill] sm:$0xff] %v12900_v14  ;;  %v6073_v51 = vsel %vm4562_vm1, %v12886_v25, -inf  ;;  %v12917_v31 = vrot.slane %v4246_v9, %v11302_v13  ;;  %v12920_v34 = vrot.slane %v9915_v3, %v11302_v13  ;;  %v4195_v29 = vcombine.high %v12897_v58, %v12900_v14  ;;  %v14454_v58 = vld [vmem:[#allocation17_spill] sm:$0xff] }
 0x2d8   :  { %v12892_v62 = vpop.f32.mrb[22].mxu1  ;;  %14411 = vst [vmem:[#allocation15_spill] sm:$0xff] %v12903_v15  ;;  %14412 = vst [vmem:[#allocation16_spill] sm:$0xff] %v12908_v24  ;;  %v4211_v53 = vcombine.high %v12903_v15, %v12908_v24  ;;  %v4263_v10 = vcombine.high %v12911_v54, %v12914_v45  ;;  %v3270_v14 = vshrl.u32 %v12809_v19, 16 }
 0x2d9   :  { %v10196_v38 = vpop.f32.mrb[23].mxu1  ;;  %14413 = vst [vmem:[#allocation21_spill] sm:$0xff] %v12911_v54  ;;  %14414 = vst [vmem:[#allocation22_spill] sm:$0xff] %v12914_v45  ;;  %v12931_v2 = vrot.slane %v4195_v29, %v11313_v35  ;;  %v4279_v27 = vcombine.high %v12917_v31, %v12920_v34  ;;  %v6076_v42 = vsel %vm4562_vm1, %v12892_v62, -inf }
 0x2da   :  { %14415 = vst [vmem:[#allocation23_spill] sm:$0xff] %v12917_v31  ;;  %14416 = vst [vmem:[#allocation24_spill] sm:$0xff] %v12920_v34  ;;  %6074 = vmax.xlane.f32.xlu0 %v6073_v51  ;;  %v12934_v20 = vrot.slane %v4211_v53, %v11313_v35  ;;  %v12947_v36 = vrot.slane %v4263_v10, %v11313_v35 }
 0x2db   :  { %14417 = vst [vmem:[#allocation25_spill] sm:$0xff] %v12931_v2  ;;  %v12950_v61 = vrot.slane %v4279_v27, %v11313_v35 }
 0x2dc   :  { %14418 = vst [vmem:[#allocation26_spill] sm:$0xff] %v12934_v20  ;;  %v12944_v22 = vcombine.low %v12931_v2, %v12934_v20  ;;  %14420 = vst [vmem:[#allocation28_spill] sm:$0xff] %v12947_v36 }
 0x2dd   :  { %14421 = vst [vmem:[#allocation29_spill] sm:$0xff] %v12950_v61  ;;  %v12956_v21 = vcombine.low %v12947_v36, %v12950_v61 }
 0x2de   :  { %14419 = vst [vmem:[#allocation27_spill] sm:$0xff] %v12944_v22  ;;  %v4518_v6 = vshrl.u32 %v12944_v22, 16 }
 0x2df   :  { %14422 = vst [vmem:[#allocation30_spill] sm:$0xff] %v12956_v21  ;;  %v4519_v1 = vshrl.u32 %v12956_v21, 16 }
 0x2e1   :  { %v12964_v38 = vpack.i.b16 %v4519_v1, %v4518_v6 }
 0x2e3   :  { %v12928_v7 = vpop.f32.mrb[12].mxu0  ;;  %14423 = vst [vmem:[#allocation31_spill] sm:$0xff] %v12964_v38 }
 0x2e4   :  { %v10213_v41 = vpop.f32.mrb[13].mxu0  ;;  %v6091_v32 = vsel %vm4562_vm1, %v12928_v7, -inf }
 0x2e5   :  { %v12940_v49 = vpop.f32.mrb[14].mxu0  ;;  %6092 = vmax.xlane.f32.xlu0 %v6091_v32 }
 0x2e6   :  { %v10214_v5 = vpop.f32.mrb[15].mxu0  ;;  %v6094_v57 = vsel %vm4562_vm1, %v12940_v49, -inf }
 0x2e7   :  { %6095 = vmax.xlane.f32.xlu1 %v6094_v57 }
 0x2e9   :  { %6077 = vmax.xlane.f32.xlu0 %v6076_v42 }
 0x2eb   :  { %v12962_v17 = vpop.f32.mrb[24].mxu1 }
 0x2ec   :  { %v12966_v4 = vpop.f32.mrb[16].mxu0  ;;  %v10207_v30 = vpop.f32.mrb[25].mxu1  ;;  %v6085_v9 = vsel %vm4562_vm1, %v12962_v17, -inf }
 0x2ed   :  { %v10225_v3 = vpop.f32.mrb[17].mxu0  ;;  %v12970_v16 = vpop.f32.mrb[26].mxu1  ;;  %6086 = vmax.xlane.f32.xlu0 %v6085_v9  ;;  %v6103_v27 = vsel %vm4562_vm1, %v12966_v4, -inf }
 0x2ee   :  { %v12972_v51 = vpop.f32.mrb[18].mxu0  ;;  %v10208_v29 = vpop.f32.mrb[27].mxu1  ;;  %v6088_v53 = vsel %vm4562_vm1, %v12970_v16, -inf }
 0x2ef   :  { %v10226_v10 = vpop.f32.mrb[19].mxu0  ;;  %6089 = vmax.xlane.f32.xlu1 %v6088_v53  ;;  %v6106_v41 = vsel %vm4562_vm1, %v12972_v51, -inf }
 0x2f1   :  { %6104 = vmax.xlane.f32.xlu0 %v6103_v27 }
 0x2f3   :  { %v12980_v32 = vpop.f32.mrb[28].mxu1  ;;  %6107 = vmax.xlane.f32.xlu1 %v6106_v41 }
 0x2f4   :  { %v10219_v5 = vpop.f32.mrb[29].mxu1  ;;  %v6097_v57 = vsel %vm4562_vm1, %v12980_v32, -inf }
 0x2f5   :  { %v12984_v6 = vpop.f32.mrb[30].mxu1  ;;  %6098 = vmax.xlane.f32.xlu0 %v6097_v57 }
 0x2f6   :  { %v10220_v42 = vpop.f32.mrb[31].mxu1  ;;  %v6100_v1 = vsel %vm4562_vm1, %v12984_v6, -inf }
 0x2f7   :  { %6101 = vmax.xlane.f32.xlu1 %v6100_v1 }
 0x303   :  { %v12988_v30 = vpop.f32.mrb[20].mxu0 }
 0x304   :  { %v10237_v9 = vpop.f32.mrb[21].mxu0  ;;  %v6115_v3 = vsel %vm4562_vm1, %v12988_v30, -inf }
 0x305   :  { %v12992_v29 = vpop.f32.mrb[22].mxu0  ;;  %v12994_v53 = vpop.f32.mrb[32].mxu1  ;;  %6116 = vmax.xlane.f32.xlu0 %v6115_v3 }
 0x306   :  { %v10238_v10 = vpop.f32.mrb[23].mxu0  ;;  %v6118_v27 = vsel %vm4562_vm1, %v12992_v29, -inf  ;;  %v10231_v41 = vpop.f32.mrb[33].mxu1  ;;  %v6109_v1 = vsel %vm4562_vm1, %v12994_v53, -inf }
 0x307   :  { %6119 = vmax.xlane.f32.xlu1 %v6118_v27  ;;  %v12998_v5 = vpop.f32.mrb[34].mxu1 }
 0x308   :  { %v10232_v57 = vpop.f32.mrb[35].mxu1  ;;  %v6112_v42 = vsel %vm4562_vm1, %v12998_v5, -inf }
 0x309   :  { %6110 = vmax.xlane.f32.xlu0 %v6109_v1 }
 0x30b   :  { %6113 = vmax.xlane.f32.xlu1 %v6112_v42 }
 0x311   :  { %v13004_v9 = vpop.f32.mrb[24].mxu0 }
 0x312   :  { %14424 = vst [vmem:[#allocation32_spill] sm:$0xff] %v13004_v9  ;;  %v10249_v3 = vpop.f32.mrb[25].mxu0  ;;  %v6127_v10 = vsel %vm4562_vm1, %v13004_v9, -inf }
 0x313   :  { %v13008_v18 = vpop.f32.mrb[26].mxu0  ;;  %6128 = vmax.xlane.f32.xlu0 %v6127_v10 }
 0x314   :  { %14425 = vst [vmem:[#allocation33_spill] sm:$0xff] %v13008_v18  ;;  %v10250_v27 = vpop.f32.mrb[27].mxu0  ;;  %v6130_v41 = vsel %vm4562_vm1, %v13008_v18, -inf }
 0x315   :  { %v13012_v57 = vpop.f32.mrb[36].mxu1  ;;  %6131 = vmax.xlane.f32.xlu1 %v6130_v41 }
 0x316   :  { %14426 = vst [vmem:[#allocation34_spill] sm:$0xff] %v13012_v57  ;;  %v10243_v43 = vpop.f32.mrb[37].mxu1  ;;  %v6121_v42 = vsel %vm4562_vm1, %v13012_v57, -inf }
 0x317   :  { %v13016_v1 = vpop.f32.mrb[38].mxu1  ;;  %6122 = vmax.xlane.f32.xlu0 %v6121_v42 }
 0x318   :  { %14427 = vst [vmem:[#allocation35_spill] sm:$0xff] %v13016_v1  ;;  %v10244_v3 = vpop.f32.mrb[39].mxu1 }
 0x319   :  { %v6124_v3 = vsel %vm4562_vm1, %v13016_v1, -inf }
 0x31e   :  { %v13018_v55 = vpop.f32.mrb[28].mxu0  ;;  %v13020_v38 = vpop.f32.mrb[40].mxu1 }
 0x31f   :  { %14428 = vst [vmem:[#allocation36_spill] sm:$0xff] %v13018_v55  ;;  %14429 = vst [vmem:[#allocation37_spill] sm:$0xff] %v13020_v38  ;;  %v10261_v10 = vpop.f32.mrb[29].mxu0  ;;  %v6139_v27 = vsel %vm4562_vm1, %v13018_v55, -inf  ;;  %v10255_v36 = vpop.f32.mrb[41].mxu1  ;;  %v3276_v55 = vpack.i.b16 %v12815_v59, %v12826_v28 }
 0x320   :  { %v13024_v61 = vpop.f32.mrb[30].mxu0  ;;  %6140 = vmax.xlane.f32.xlu1 %v6139_v27  ;;  %v13026_v43 = vpop.f32.mrb[42].mxu1  ;;  %v6133_v10 = vsel %vm4562_vm1, %v13020_v38, -inf }
 0x321   :  { %14430 = vst [vmem:[#allocation38_spill] sm:$0xff] %v13024_v61  ;;  %14431 = vst [vmem:[#allocation39_spill] sm:$0xff] %v13026_v43  ;;  %v10262_v41 = vpop.f32.mrb[31].mxu0  ;;  %v6142_v2 = vsel %vm4562_vm1, %v13024_v61, -inf  ;;  %v10256_v42 = vpop.f32.mrb[43].mxu1  ;;  %v3260_v61 = vpack.i.b16 %v12784_v11, %v12766_v12 }
 0x322   :  { %6143 = vmax.xlane.f32.xlu0 %v6142_v2  ;;  %v6136_v2 = vsel %vm4562_vm1, %v13026_v43, -inf  ;;  %v3252_v43 = vpack.i.b16 %v12799_v39, %v14454_v58 }
 0x323   :  { %v3499_v44 = vcombine.high %v3260_v61, %v3276_v55 }
 0x324   :  { %6125 = vmax.xlane.f32.xlu1 %v6124_v3 }
 0x326   :  { %6134 = vmax.xlane.f32.xlu0 %v6133_v10 }
 0x327   :  { %v13034_v20 = vpop.f32.mrb[32].mxu0 }
 0x328   :  { %14432 = vst [vmem:[#allocation40_spill] sm:$0xff] %v13034_v20  ;;  %v10273_v36 = vpop.f32.mrb[33].mxu0  ;;  %v6151_v27 = vsel %vm4562_vm1, %v13034_v20, -inf  ;;  %v3268_v20 = vpack.i.b16 %v12803_v46, %v12809_v19 }
 0x329   :  { %v13038_v41 = vpop.f32.mrb[34].mxu0  ;;  %6152 = vmax.xlane.f32.xlu1 %v6151_v27 }
 0x32a   :  { %14433 = vst [vmem:[#allocation41_spill] sm:$0xff] %v13038_v41  ;;  %v10274_v21 = vpop.f32.mrb[35].mxu0  ;;  %6137 = vmax.xlane.f32.xlu0 %v6136_v2  ;;  %v6154_v42 = vsel %vm4562_vm1, %v13038_v41, -inf }
 0x32e   :  { %6155 = vmax.xlane.f32.xlu0 %v6154_v42 }
 0x330   :  { %v13044_v3 = vpop.f32.mrb[44].mxu1 }
 0x331   :  { %14434 = vst [vmem:[#allocation42_spill] sm:$0xff] %v13044_v3  ;;  %v10267_v22 = vpop.f32.mrb[45].mxu1  ;;  %v6145_v10 = vsel %vm4562_vm1, %v13044_v3, -inf }
 0x332   :  { %v13048_v36 = vpop.f32.mrb[46].mxu1  ;;  %6146 = vmax.xlane.f32.xlu1 %v6145_v10 }
 0x333   :  { %14435 = vst [vmem:[#allocation43_spill] sm:$0xff] %v13048_v36  ;;  %v10268_v31 = vpop.f32.mrb[47].mxu1  ;;  %v6148_v21 = vsel %vm4562_vm1, %v13048_v36, -inf }
 0x334   :  { %6149 = vmax.xlane.f32.xlu0 %v6148_v21 }
 0x33f   :  { %v13052_v27 = vpop.f32.mrb[36].mxu0 }
 0x340   :  { %14436 = vst [vmem:[#allocation44_spill] sm:$0xff] %v13052_v27  ;;  %v10285_v2 = vpop.f32.mrb[37].mxu0  ;;  %v6163_v42 = vsel %vm4562_vm1, %v13052_v27, -inf }
 0x341   :  { %v13056_v34 = vpop.f32.mrb[38].mxu0  ;;  %6164 = vmax.xlane.f32.xlu1 %v6163_v42 }
 0x342   :  { %14437 = vst [vmem:[#allocation45_spill] sm:$0xff] %v13056_v34  ;;  %v10286_v22 = vpop.f32.mrb[39].mxu0  ;;  %v6166_v54 = vsel %vm4562_vm1, %v13056_v34, -inf }
 0x343   :  { %6167 = vmax.xlane.f32.xlu0 %v6166_v54 }
 0x345   :  { %v13060_v10 = vpop.f32.mrb[48].mxu1 }
 0x346   :  { %14438 = vst [vmem:[#allocation46_spill] sm:$0xff] %v13060_v10  ;;  %v10279_v31 = vpop.f32.mrb[49].mxu1  ;;  %v6157_v21 = vsel %vm4562_vm1, %v13060_v10, -inf }
 0x347   :  { %v13064_v36 = vpop.f32.mrb[50].mxu1  ;;  %6158 = vmax.xlane.f32.xlu1 %v6157_v21 }
 0x348   :  { %14439 = vst [vmem:[#allocation47_spill] sm:$0xff] %v13064_v36  ;;  %v10280_v2 = vpop.f32.mrb[51].mxu1  ;;  %v13066_v45 = vpop.f32.mrb[40].mxu0  ;;  %v6160_v42 = vsel %vm4562_vm1, %v13064_v36, -inf }
 0x349   :  { %14440 = vst [vmem:[#allocation48_spill] sm:$0xff] %v13066_v45  ;;  %v10297_v22 = vpop.f32.mrb[41].mxu0  ;;  %v6175_v34 = vsel %vm4562_vm1, %v13066_v45, -inf  ;;  %6161 = vmax.xlane.f32.xlu0 %v6160_v42  ;;  %v13078_v2 = vpop.permute.xlu1 %3176 }
 0x34a   :  { %v13072_v54 = vpop.f32.mrb[42].mxu0  ;;  %14443 = vst [vmem:[#allocation51_spill] sm:$0xff] %v13078_v2 }
 0x34b   :  { %14441 = vst [vmem:[#allocation49_spill] sm:$0xff] %v13072_v54  ;;  %6176 = vmax.xlane.f32.xlu1 %v6175_v34  ;;  %v10298_v31 = vpop.f32.mrb[43].mxu0  ;;  %v6178_v10 = vsel %vm4562_vm1, %v13072_v54, -inf }
 0x34d   :  { %6179 = vmax.xlane.f32.xlu0 %v6178_v10  ;;  %v13086_v34 = vpop.permute.xlu1 %3184 }
 0x34e   :  { %14446 = vst [vmem:[#allocation54_spill] sm:$0xff] %v13086_v34 }
 0x34f   :  { %v13076_v21 = vpop.f32.mrb[52].mxu1 }
 0x350   :  { %14442 = vst [vmem:[#allocation50_spill] sm:$0xff] %v13076_v21  ;;  %v10291_v27 = vpop.f32.mrb[53].mxu1  ;;  %v6169_v22 = vsel %vm4562_vm1, %v13076_v21, -inf }
 0x351   :  { %v13082_v36 = vpop.f32.mrb[54].mxu1  ;;  %6170 = vmax.xlane.f32.xlu1 %v6169_v22 }
 0x352   :  { %14444 = vst [vmem:[#allocation52_spill] sm:$0xff] %v13082_v36  ;;  %v10292_v42 = vpop.f32.mrb[55].mxu1  ;;  %v6172_v34 = vsel %vm4562_vm1, %v13082_v36, -inf }
 0x355   :  { %v13084_v45 = vpop.f32.mrb[44].mxu0 }
 0x356   :  { %14445 = vst [vmem:[#allocation53_spill] sm:$0xff] %v13084_v45  ;;  %v10309_v31 = vpop.f32.mrb[45].mxu0  ;;  %v6187_v10 = vsel %vm4562_vm1, %v13084_v45, -inf  ;;  %v13102_v45 = vpop.permute.xlu0 %3168 }
 0x357   :  { %v13090_v54 = vpop.f32.mrb[46].mxu0  ;;  %v13092_v15 = vpop.f32.mrb[56].mxu1  ;;  %6188 = vmax.xlane.f32.xlu0 %v6187_v10  ;;  %14449 = vst [vmem:[#allocation57_spill] sm:$0xff] %v13102_v45 }
 0x358   :  { %14447 = vst [vmem:[#allocation55_spill] sm:$0xff] %v13090_v54  ;;  %v10310_v27 = vpop.f32.mrb[47].mxu0  ;;  %v6190_v2 = vsel %vm4562_vm1, %v13090_v54, -inf  ;;  %v10303_v21 = vpop.f32.mrb[57].mxu1 }
 0x359   :  { %6191 = vmax.xlane.f32.xlu1 %v6190_v2  ;;  %v13096_v22 = vpop.f32.mrb[58].mxu1  ;;  %v13106_v10 = vpop.permute.xlu1 %3200 }
 0x35a   :  { %14448 = vst [vmem:[#allocation56_spill] sm:$0xff] %v13096_v22  ;;  %v10304_v42 = vpop.f32.mrb[59].mxu1  ;;  %v6184_v31 = vsel %vm4562_vm1, %v13096_v22, -inf  ;;  %14450 = vst [vmem:[#allocation58_spill] sm:$0xff] %v13106_v10  ;;  %v13118_v3 = vpop.permute.xlu0 %3192  ;;  %v3262_v10 = vshrl.u32 %v12766_v12, 16 }
 0x35b   :  { %6173 = vmax.xlane.f32.xlu0 %v6172_v34  ;;  %14453 = vst [vmem:[#allocation61_spill] sm:$0xff] %v13118_v3  ;;  %v3278_v3 = vshrl.u32 %v12826_v28, 16  ;;  %v3483_v28 = vcombine.high %v3252_v43, %v3268_v20 }
 0x35d   :  { %v13104_v24 = vpop.f32.mrb[48].mxu0  ;;  %6185 = vmax.xlane.f32.xlu1 %v6184_v31  ;;  %v6081_v31 = vpop.xlane.xlu1 %6080 }
 0x35e   :  { %v10321_v27 = vpop.f32.mrb[49].mxu0  ;;  %v6263_v18 = vsub.f32 %v12868_v60, %v6081_v31 }
 0x35f   :  { %v13108_v21 = vpop.f32.mrb[50].mxu0  ;;  %v13110_v2 = vpop.f32.mrb[60].mxu1 }
 0x360   :  { %14451 = vst [vmem:[#allocation59_spill] sm:$0xff] %v13108_v21  ;;  %v10322_v42 = vpop.f32.mrb[51].mxu0  ;;  %v6202_v22 = vsel %vm4562_vm1, %v13108_v21, -inf  ;;  %v10315_v54 = vpop.f32.mrb[61].mxu1  ;;  %v3254_v21 = vshrl.u32 %v14454_v58, 16 }
 0x361   :  { %6203 = vmax.xlane.f32.xlu1 %v6202_v22  ;;  %v13114_v36 = vpop.f32.mrb[62].mxu1  ;;  %v3263_v42 = vshrl.u32 %v12784_v11, 16  ;;  %v3255_v54 = vshrl.u32 %v12799_v39, 16  ;;  %v6069_v39 = vpop.xlane.xlu0 %6068 }
 0x362   :  { %14452 = vst [vmem:[#allocation60_spill] sm:$0xff] %v13114_v36  ;;  %v10316_v34 = vpop.f32.mrb[63].mxu1  ;;  %v6196_v45 = vsel %vm4562_vm1, %v13114_v36, -inf  ;;  %v3279_v36 = vshrl.u32 %v12815_v59, 16  ;;  %v6259_v19 = vsub.f32 %v12866_v48, %v6069_v39  ;;  %v3482_v59 = vcombine.low %v3252_v43, %v3268_v20 }
 0x363   :  { %v3271_v34 = vshrl.u32 %v12803_v46, 16  ;;  %v3264_v58 = vpack.i.b16 %v3263_v42, %v3262_v10 }
 0x364   :  { %v3280_v12 = vpack.i.b16 %v3279_v36, %v3278_v3  ;;  %v3490_v20 = vrot.slane %v3482_v59, %v11302_v13 }
 0x365   :  { %6197 = vmax.xlane.f32.xlu1 %v6196_v45  ;;  %v13120_v27 = vpop.f32.mrb[52].mxu0  ;;  %v6084_v31 = vpop.xlane.xlu0 %6083 }
 0x366   :  { %v10333_v22 = vpop.f32.mrb[53].mxu0  ;;  %v6264_v48 = vsub.f32 %v12876_v50, %v6084_v31  ;;  %v3513_v50 = vrot.slane %v3499_v44, %v11302_v13 }
 0x367   :  { %v13130_v45 = vpop.f32.mrb[54].mxu0  ;;  %v13132_v41 = vpop.f32.mrb[64].mxu1 }
 0x368   :  { %14455 = vst [vmem:[#allocation17_spill] sm:$0xff] %v13130_v45  ;;  %14456 = vst [vmem:[#allocation62_spill] sm:$0xff] %v13132_v41  ;;  %v10334_v38 = vpop.f32.mrb[55].mxu0  ;;  %v6214_v22 = vsel %vm4562_vm1, %v13130_v45, -inf  ;;  %v10327_v1 = vpop.f32.mrb[65].mxu1  ;;  %v3272_v45 = vpack.i.b16 %v3271_v34, %v3270_v14  ;;  %v3498_v41 = vcombine.low %v3260_v61, %v3276_v55  ;;  %v3566_v14 = vcombine.low %v3264_v58, %v3280_v12 }
 0x369   :  { %6215 = vmax.xlane.f32.xlu1 %v6214_v22  ;;  %v13144_v57 = vpop.f32.mrb[66].mxu1  ;;  %v6072_v38 = vpop.xlane.xlu1 %6071  ;;  %v3256_v1 = vpack.i.b16 %v3255_v54, %v3254_v21  ;;  %v6323_v22 = vmul.f32 1.442695, %v6259_v19  ;;  %v3567_v61 = vcombine.high %v3264_v58, %v3280_v12  ;;  %v3497_v54 = vrot.slane %v3483_v28, %v11302_v13 }
 0x36a   :  { %v10328_v9 = vpop.f32.mrb[67].mxu1  ;;  %v6208_v46 = vsel %vm4562_vm1, %v13144_v57, -inf  ;;  %v6260_v11 = vsub.f32 %v12874_v47, %v6072_v38  ;;  %v3506_v34 = vrot.slane %v3498_v41, %v11302_v13  ;;  %v3574_v38 = vrot.slane %v3566_v14, %v11302_v13 }
 0x36b   :  { %v6331_v9 = vmul.f32 1.442695, %v6263_v18  ;;  %10659 = vpow2.f32 %v6323_v22  ;;  %v3550_v21 = vcombine.low %v3256_v1, %v3272_v45  ;;  %v3551_v55 = vcombine.high %v3256_v1, %v3272_v45 }
 0x36c   :  { %v6325_v10 = vmul.f32 1.442695, %v6260_v11  ;;  %v6333_v18 = vmul.f32 1.442695, %v6264_v48  ;;  %v3581_v44 = vrot.slane %v3567_v61, %v11302_v13  ;;  %v3514_v1 = vcombine.low %v3490_v20, %v3506_v34 }
 0x36d   :  { %6209 = vmax.xlane.f32.xlu1 %v6208_v46  ;;  %v13151_v60 = vpop.f32.mrb[56].mxu0  ;;  %v6075_v46 = vpop.xlane.xlu0 %6074  ;;  %v3558_v58 = vrot.slane %v3550_v21, %v11302_v13  ;;  %v3565_v41 = vrot.slane %v3551_v55, %v11302_v13  ;;  %v3515_v12 = vcombine.high %v3490_v20, %v3506_v34  ;;  %v3530_v11 = vcombine.low %v3497_v54, %v3513_v50 }
 0x36e   :  { %v10345_v42 = vpop.f32.mrb[57].mxu0  ;;  %10661 = vpow2.f32 %v6325_v10  ;;  %v3531_v22 = vcombine.high %v3497_v54, %v3513_v50  ;;  %v6261_v10 = vsub.f32 %v12886_v25, %v6075_v46  ;;  %v3522_v25 = vrot.slane %v3514_v1, %v11313_v35 }
 0x36f   :  { %v13154_v3 = vpop.f32.mrb[58].mxu0  ;;  %v13156_v47 = vpop.f32.mrb[68].mxu1  ;;  %10663 = vpow2.f32 %v6331_v9  ;;  %v3582_v48 = vcombine.low %v3558_v58, %v3574_v38  ;;  %v3583_v21 = vcombine.high %v3558_v58, %v3574_v38  ;;  %v3538_v46 = vrot.slane %v3530_v11, %v11313_v35 }
 0x370   :  { %v10346_v43 = vpop.f32.mrb[59].mxu0  ;;  %v10339_v36 = vpop.f32.mrb[69].mxu1  ;;  %10665 = vpow2.f32 %v6333_v18  ;;  %v6327_v38 = vmul.f32 1.442695, %v6261_v10 }
 0x371   :  { %v13162_v39 = vpop.f32.mrb[70].mxu1  ;;  %3208 = vrot.lane.b32.xlu0 %v12122_v52, %s11046_s16  ;;  %v3598_v43 = vcombine.low %v3565_v41, %v3581_v44  ;;  %v3599_v36 = vcombine.high %v3565_v41, %v3581_v44  ;;  %v3590_v1 = vrot.slane %v3582_v48, %v11313_v35  ;;  %v14459_v48 = vpack.i.b16 %v12832_v23, %v12818_v8 }
 0x372   :  { %14457 = vst [vmem:[#allocation63_spill] sm:$0xff] %v13162_v39  ;;  %v10340_v19 = vpop.f32.mrb[71].mxu1  ;;  %v6220_v45 = vsel %vm4562_vm1, %v13162_v39, -inf  ;;  %v6093_v42 = vpop.xlane.xlu0 %6092 }
 0x373   :  { %6221 = vmax.xlane.f32.xlu1 %v6220_v45  ;;  %v6267_v61 = vsub.f32 %v12928_v7, %v6093_v42  ;;  %v3545_v7 = vrot.slane %v3531_v22, %v11313_v35  ;;  %v3606_v22 = vrot.slane %v3598_v43, %v11313_v35  ;;  %v3613_v10 = vrot.slane %v3599_v36, %v11313_v35 }
 0x374   :  { %v6096_v28 = vpop.xlane.xlu1 %6095 }
 0x375   :  { %v13172_v59 = vpop.f32.mrb[60].mxu0  ;;  %v6268_v31 = vsub.f32 %v12940_v49, %v6096_v28  ;;  %v13181_v20 = vpop.eup %10659  ;;  %v3529_v49 = vrot.slane %v3515_v12, %v11313_v35  ;;  %v6339_v45 = vmul.f32 1.442695, %v6267_v61  ;;  %v3597_v12 = vrot.slane %v3583_v21, %v11313_v35 }
 0x376   :  { %v10357_v9 = vpop.f32.mrb[61].mxu0  ;;  %v6078_v41 = vpop.xlane.xlu0 %6077  ;;  %v4042_v43 = vcombine.low %v3538_v46, %v3545_v7 }
 0x377   :  { %v13176_v14 = vpop.f32.mrb[62].mxu0  ;;  %v13178_v55 = vpop.f32.mrb[72].mxu1  ;;  %v6341_v34 = vmul.f32 1.442695, %v6268_v31  ;;  %v6262_v11 = vsub.f32 %v12892_v62, %v6078_v41  ;;  %v4026_v31 = vcombine.low %v3522_v25, %v3529_v49  ;;  %v9908_v21 = vcombine.high %v3522_v25, %v3529_v49 }
 0x378   :  { %v10358_v18 = vpop.f32.mrb[63].mxu0  ;;  %v10351_v54 = vpop.f32.mrb[73].mxu1  ;;  %v9911_v25 = vcombine.high %v3606_v22, %v3613_v10 }
 0x379   :  { %v13183_v50 = vpop.eup %10661  ;;  %v13188_v19 = vpop.f32.mrb[74].mxu1  ;;  %10667 = vpow2.f32 %v6341_v34  ;;  %v6329_v61 = vmul.f32 1.442695, %v6262_v11  ;;  %v4110_v11 = vcombine.low %v3606_v22, %v3613_v10 }
 0x37a   :  { %v10352_v58 = vpop.f32.mrb[75].mxu1  ;;  %v6643_v44 = vpack.c.bf16 %v13183_v50, %v13181_v20  ;;  %v13193_v28 = vpop.eup %10663  ;;  %10669 = vpow2.f32 %v6339_v45  ;;  %v9909_v45 = vcombine.high %v3538_v46, %v3545_v7  ;;  %v13222_v46 = vrot.slane %v4026_v31, %v11302_v13 }
 0x37b   :  { %v13198_v9 = vpop.eup %10665  ;;  %10671 = vpow2.f32 %v6327_v38  ;;  %v6087_v34 = vpop.xlane.xlu0 %6086  ;;  %v4094_v58 = vcombine.low %v3590_v1, %v3597_v12 }
 0x37c   :  { %10380 = vmatmul.mubr.msk.bf16.vlgmr.msra.gmra.mrb[68].mxu0 %vm4562_vm1, %v6643_v44  ;;  %v6090_v18 = vpop.xlane.xlu1 %6089  ;;  %v6645_v62 = vpack.c.bf16 %v13198_v9, %v13193_v28  ;;  %10673 = vpow2.f32 %v6329_v61  ;;  %v6265_v23 = vsub.f32 %v12962_v17, %v6087_v34  ;;  %v9910_v44 = vcombine.high %v3590_v1, %v3597_v12 }
 0x37d   :  { %v13203_v42 = vpop.f32.mrb[64].mxu0  ;;  %10390 = vmatpush3.bf16.msra.mxu0 %v14459_v48  ;;  %10391 = vmatprep.mubr.msk.bf16.mxu0 %vm11049_vm0, %v14378_v0  ;;  %v6266_v54 = vsub.f32 %v12970_v16, %v6090_v18  ;;  %v13226_v17 = vrot.slane %v9908_v21, %v11302_v13  ;;  %v13229_v1 = vrot.slane %v4042_v43, %v11302_v13 }
 0x37e   :  { %14458 = vst [vmem:[#allocation64_spill] sm:$0xff] %v13203_v42  ;;  %v10369_v36 = vpop.f32.mrb[65].mxu0  ;;  %10401 = vmatprep.subr.bf16.mxu0 %v14378_v0  ;;  %v6335_v16 = vmul.f32 1.442695, %v6265_v23  ;;  %v13233_v22 = vrot.slane %v9909_v45, %v11302_v13  ;;  %v13236_v10 = vrot.slane %v4094_v58, %v11302_v13  ;;  %v13244_v21 = vrot.slane %v9910_v44, %v11302_v13 }
 0x37f   :  { %v13214_v41 = vpop.f32.mrb[66].mxu0  ;;  %v13216_v8 = vpop.f32.mrb[76].mxu1  ;;  %v6337_v38 = vmul.f32 1.442695, %v6266_v54  ;;  %v13247_v43 = vrot.slane %v4110_v11, %v11302_v13  ;;  %v14463_v58 = vpack.i.b16 %v12834_v40, %v12828_v26  ;;  %v4058_v26 = vcombine.low %v13222_v46, %v13226_v17 }
 0x380   :  { %14460 = vst [vmem:[#allocation65_spill] sm:$0xff] %v13214_v41  ;;  %14461 = vst [vmem:[#allocation66_spill] sm:$0xff] %v13216_v8  ;;  %v10370_v49 = vpop.f32.mrb[67].mxu0  ;;  %v10363_v48 = vpop.f32.mrb[77].mxu1 }
 0x381   :  { %v13219_v36 = vpop.f32.mrb[78].mxu1  ;;  %v6108_v18 = vpop.xlane.xlu1 %6107  ;;  %10675 = vpow2.f32 %v6337_v38  ;;  %v4126_v48 = vcombine.low %v13236_v10, %v13244_v21 }
 0x382   :  { %14462 = vst [vmem:[#allocation67_spill] sm:$0xff] %v13219_v36  ;;  %v10364_v7 = vpop.f32.mrb[79].mxu1  ;;  %v6272_v39 = vsub.f32 %v12972_v51, %v6108_v18  ;;  %v6105_v61 = vpop.xlane.xlu0 %6104  ;;  %10677 = vpow2.f32 %v6335_v16 }
 0x383   :  { %v6271_v12 = vsub.f32 %v12966_v4, %v6105_v61  ;;  %v13238_v31 = vpop.eup %10667  ;;  %v13250_v4 = vrot.slane %v9911_v25, %v11302_v13 }
 0x384   :  { %3216 = vrot.lane.b32.xlu1 %v12122_v52, %s11047_s17  ;;  %v6349_v51 = vmul.f32 1.442695, %v6272_v39  ;;  %10392 = vmatmul.mubr.msk.bf16.vlgmr.msra.gmra.mrb[72].mxu0 %vm4562_vm1, %v6645_v62  ;;  %v13252_v54 = vpop.eup %10669 }
 0x385   :  { %v6347_v34 = vmul.f32 1.442695, %v6271_v12  ;;  %v6102_v45 = vpop.xlane.xlu1 %6101  ;;  %10402 = vmatpush3.bf16.msra.mxu0 %v14463_v58  ;;  %10403 = vmatprep.mubr.msk.bf16.mxu0 %vm11049_vm0, %v14378_v0  ;;  %v6647_v23 = vpack.c.bf16 %v13238_v31, %v13252_v54  ;;  %v13268_v40 = vpop.eup %10671  ;;  %v4142_v38 = vcombine.low %v13247_v43, %v13250_v4  ;;  %v13283_v12 = vrot.slane %v4058_v26, %v11313_v35 }
 0x386   :  { %10679 = vpow2.f32 %v6349_v51  ;;  %v6270_v39 = vsub.f32 %v12984_v6, %v6102_v45  ;;  %v6099_v62 = vpop.xlane.xlu0 %6098  ;;  %10413 = vmatprep.subr.bf16.mxu0 %v14378_v0  ;;  %v4074_v6 = vcombine.low %v13229_v1, %v13233_v22  ;;  %v13276_v16 = vpop.eup %10673  ;;  %v4134_v45 = vrot.slane %v4126_v48, %v11313_v35 }
 0x387   :  { %v13263_v44 = vpop.f32.mrb[80].mxu1  ;;  %10681 = vpow2.f32 %v6347_v34  ;;  %v6269_v11 = vsub.f32 %v12980_v32, %v6099_v62  ;;  %v6644_v61 = vpack.c.bf16 %v13276_v16, %v13268_v40  ;;  %v4150_v58 = vrot.slane %v4142_v38, %v11313_v35 }
 0x388   :  { %14464 = vst [vmem:[#allocation68_spill] sm:$0xff] %v13263_v44  ;;  %v10375_v25 = vpop.f32.mrb[81].mxu1  ;;  %v6345_v49 = vmul.f32 1.442695, %v6270_v39  ;;  %v4082_v34 = vrot.slane %v4074_v6, %v11313_v35  ;;  %v14466_v62 = vpack.i.b16 %v12837_v63, %v12830_v37 }
 0x389   :  { %v13278_v18 = vpop.f32.mrb[82].mxu1  ;;  %v6343_v32 = vmul.f32 1.442695, %v6269_v11  ;;  %10386 = vmatmul.mubr.msk.bf16.vlgmr.msra.gmra.mrb[84].mxu1 %vm4562_vm1, %v6644_v61  ;;  %v6181_v11 = vsel %vm4562_vm1, %v13092_v15, -inf  ;;  %v13313_v63 = vcombine.low %v4134_v45, %v4150_v58 }
 0x38a   :  { %14465 = vst [vmem:[#allocation69_spill] sm:$0xff] %v13278_v18  ;;  %v10376_v7 = vpop.f32.mrb[83].mxu1  ;;  %10683 = vpow2.f32 %v6345_v49  ;;  %10396 = vmatpush3.bf16.msra.mxu1 %v12849_v33  ;;  %10397 = vmatprep.mubr.msk.bf16.mxu1 %vm11049_vm0, %v14378_v0  ;;  %v13311_v37 = vcombine.low %v13283_v12, %v4082_v34  ;;  %v6199_v49 = vsel %vm4562_vm1, %v13104_v24, -inf }
 0x38b   :  { %10685 = vpow2.f32 %v6343_v32  ;;  %v13285_v51 = vpop.eup %10675  ;;  %10407 = vmatprep.subr.bf16.mxu1 %v14378_v0 }
 0x38c   :  { %10404 = vmatmul.mubr.msk.bf16.vlgmr.msra.gmra.mrb[76].mxu0 %vm4562_vm1, %v6647_v23  ;;  %v13292_v39 = vpop.eup %10677  ;;  %v4468_v32 = vpack.i.b16 %v13313_v63, %v13311_v37 }
 0x38d   :  { %10414 = vmatpush3.bf16.msra.mxu0 %v14466_v62  ;;  %v6646_v23 = vpack.c.bf16 %v13285_v51, %v13292_v39  ;;  %10415 = vmatprep.mubr.msk.bf16.mxu0 %vm11049_vm0, %v14378_v0 }
 0x38e   :  { %10425 = vmatprep.subr.bf16.mxu0 %v14378_v0 }
 0x390   :  { %v13308_v33 = vpop.eup %10679  ;;  %6182 = vmax.xlane.f32.xlu0 %v6181_v11 }
 0x391   :  { %v13315_v26 = vpop.eup %10681  ;;  %10398 = vmatmul.mubr.msk.bf16.vlgmr.msra.gmra.mrb[88].mxu1 %vm4562_vm1, %v6646_v23  ;;  %v6193_v23 = vsel %vm4562_vm1, %v13110_v2, -inf }
 0x392   :  { %v6649_v25 = vpack.c.bf16 %v13308_v33, %v13315_v26  ;;  %v6117_v6 = vpop.xlane.xlu0 %6116  ;;  %10408 = vmatpush3.bf16.msra.mxu1 %v12851_v56  ;;  %10409 = vmatprep.mubr.msk.bf16.mxu1 %vm11049_vm0, %v14378_v0 }
 0x393   :  { %v6275_v38 = vsub.f32 %v12988_v30, %v6117_v6  ;;  %10419 = vmatprep.subr.bf16.mxu1 %v14378_v0 }
 0x394   :  { %v13321_v48 = vpop.eup %10683  ;;  %6200 = vmax.xlane.f32.xlu0 %v6199_v49  ;;  %v6120_v61 = vpop.xlane.xlu1 %6119  ;;  %10416 = vmatmul.mubr.msk.bf16.vlgmr.msra.gmra.mrb[80].mxu0 %vm4562_vm1, %v6649_v25 }
 0x395   :  { %v13327_v7 = vpop.eup %10685  ;;  %v6276_v62 = vsub.f32 %v12992_v29, %v6120_v61  ;;  %v6355_v11 = vmul.f32 1.442695, %v6275_v38  ;;  %10426 = vmatpush3.bf16.msra.mxu0 %v4468_v32  ;;  %10427 = vmatprep.mubr.msk.bf16.mxu0 %vm11049_vm0, %v14378_v0  ;;  %v6211_v32 = vsel %vm4562_vm1, %v13120_v27, -inf }
 0x396   :  { %v6648_v30 = vpack.c.bf16 %v13321_v48, %v13327_v7  ;;  %v6111_v49 = vpop.xlane.xlu0 %6110  ;;  %10437 = vmatprep.subr.bf16.mxu0 %v14378_v0 }
 0x397   :  { %v6357_v56 = vmul.f32 1.442695, %v6276_v62  ;;  %10687 = vpow2.f32 %v6355_v11  ;;  %v6273_v29 = vsub.f32 %v12994_v53, %v6111_v49  ;;  %v14468_v53 = vld [vmem:[#allocation62_spill] sm:$0xff]  ;;  %v13356_v49 = vcombine.high %v13283_v12, %v4082_v34 }
 0x398   :  { %6194 = vmax.xlane.f32.xlu0 %v6193_v23  ;;  %v6114_v25 = vpop.xlane.xlu1 %6113  ;;  %v14467_v23 = vld [vmem:[#allocation19_spill] sm:$0xff]  ;;  %v4470_v34 = vshrl.u32 %v13311_v37, 16  ;;  %v4075_v37 = vcombine.high %v13229_v1, %v13233_v22 }
 0x399   :  { %10689 = vpow2.f32 %v6357_v56  ;;  %v6274_v6 = vsub.f32 %v12998_v5, %v6114_v25  ;;  %v6351_v38 = vmul.f32 1.442695, %v6273_v29  ;;  %10410 = vmatmul.mubr.msk.bf16.vlgmr.msra.gmra.mrb[92].mxu1 %vm4562_vm1, %v6648_v30  ;;  %v6205_v5 = vsel %vm4562_vm1, %v14468_v53, -inf  ;;  %v14469_v29 = vld [vmem:[#allocation32_spill] sm:$0xff] }
 0x39a   :  { %10420 = vmatpush3.bf16.msra.mxu1 %v14467_v23  ;;  %10421 = vmatprep.mubr.msk.bf16.mxu1 %vm11049_vm0, %v14378_v0  ;;  %v13358_v56 = vcombine.high %v4134_v45, %v4150_v58  ;;  %v6217_v30 = vsel %vm4562_vm1, %v13156_v47, -inf  ;;  %v4471_v45 = vshrl.u32 %v13313_v63, 16  ;;  %v6226_v58 = vsel %vm4562_vm1, %v13154_v3, -inf }
 0x39b   :  { %v6353_v61 = vmul.f32 1.442695, %v6274_v6  ;;  %10691 = vpow2.f32 %v6351_v38  ;;  %10431 = vmatprep.subr.bf16.mxu1 %v14378_v0 }
 0x39c   :  { %6212 = vmax.xlane.f32.xlu0 %v6211_v32  ;;  %v14470_v32 = vld [vmem:[#allocation33_spill] sm:$0xff]  ;;  %v4476_v12 = vpack.i.b16 %v13358_v56, %v13356_v49  ;;  %v4472_v22 = vpack.i.b16 %v4471_v45, %v4470_v34  ;;  %v14472_v45 = vld [vmem:[#allocation36_spill] sm:$0xff] }
 0x39d   :  { %10693 = vpow2.f32 %v6353_v61 }
 0x3a0   :  { %6206 = vmax.xlane.f32.xlu0 %v6205_v5  ;;  %v6129_v11 = vpop.xlane.xlu0 %6128 }
 0x3a1   :  { %v13353_v62 = vpop.eup %10687  ;;  %v6279_v25 = vsub.f32 %v14469_v29, %v6129_v11  ;;  %v6223_v11 = vsel %vm4562_vm1, %v13151_v60, -inf }
 0x3a2   :  { %v6132_v38 = vpop.xlane.xlu1 %6131 }
 0x3a3   :  { %v13363_v6 = vpop.eup %10689  ;;  %v6280_v61 = vsub.f32 %v14470_v32, %v6132_v38  ;;  %v6363_v23 = vmul.f32 1.442695, %v6279_v25  ;;  %v4059_v25 = vcombine.high %v13222_v46, %v13226_v17  ;;  %v4127_v38 = vcombine.high %v13236_v10, %v13244_v21 }
 0x3a4   :  { %6218 = vmax.xlane.f32.xlu0 %v6217_v30  ;;  %v6651_v5 = vpack.c.bf16 %v13363_v6, %v13353_v62  ;;  %v4143_v32 = vcombine.high %v13247_v43, %v13250_v4  ;;  %v6235_v46 = vsel %vm4562_vm1, %v13172_v59, -inf  ;;  %v6229_v17 = vsel %vm4562_vm1, %v13178_v55, -inf  ;;  %v6123_v1 = vpop.xlane.xlu0 %6122 }
 0x3a5   :  { %v13368_v53 = vpop.eup %10691  ;;  %v6365_v30 = vmul.f32 1.442695, %v6280_v61  ;;  %10695 = vpow2.f32 %v6363_v23  ;;  %v4073_v61 = vrot.slane %v4059_v25, %v11313_v35  ;;  %v4089_v10 = vrot.slane %v4075_v37, %v11313_v35 }
 0x3a6   :  { %10428 = vmatmul.mubr.msk.bf16.vlgmr.msra.gmra.mrb[84].mxu0 %vm4562_vm1, %v6651_v5  ;;  %v4141_v21 = vrot.slane %v4127_v38, %v11313_v35  ;;  %v4157_v43 = vrot.slane %v4143_v32, %v11313_v35  ;;  %v6241_v4 = vsel %vm4562_vm1, %v13216_v8, -inf  ;;  %v6232_v23 = vsel %vm4562_vm1, %v13188_v19, -inf  ;;  %v14473_v38 = vld [vmem:[#allocation38_spill] sm:$0xff] }
 0x3a7   :  { %v13379_v29 = vpop.eup %10693  ;;  %10697 = vpow2.f32 %v6365_v30  ;;  %10438 = vmatpush3.bf16.msra.mxu0 %v4476_v12  ;;  %10439 = vmatprep.mubr.msk.bf16.mxu0 %vm11049_vm0, %v14378_v0  ;;  %v14471_v12 = vld [vmem:[#allocation34_spill] sm:$0xff]  ;;  %v13414_v25 = vcombine.low %v4073_v61, %v4089_v10 }
 0x3a8   :  { %6227 = vmax.xlane.f32.xlu1 %v6226_v58  ;;  %6224 = vmax.xlane.f32.xlu0 %v6223_v11  ;;  %v6650_v63 = vpack.c.bf16 %v13379_v29, %v13368_v53  ;;  %v6277_v34 = vsub.f32 %v14471_v12, %v6123_v1  ;;  %v13416_v37 = vcombine.low %v4141_v21, %v4157_v43  ;;  %v6238_v1 = vsel %vm4562_vm1, %v13176_v14, -inf }
 0x3a9   :  { %10449 = vmatprep.subr.bf16.mxu0 %v14378_v0 }
 0x3aa   :  { %10422 = vmatmul.mubr.msk.bf16.vlgmr.msra.gmra.mrb[96].mxu1 %vm4562_vm1, %v6650_v63 }
 0x3ab   :  { %10432 = vmatpush3.bf16.msra.mxu1 %v4472_v22  ;;  %10433 = vmatprep.mubr.msk.bf16.mxu1 %vm11049_vm0, %v14378_v0  ;;  %v6359_v22 = vmul.f32 1.442695, %v6277_v34  ;;  %v6253_v34 = vsel %vm4562_vm1, %v13263_v44, -inf  ;;  %v14488_v44 = vld [vmem:[#allocation43_spill] sm:$0xff] }
 0x3ac   :  { %6236 = vmax.xlane.f32.xlu1 %v6235_v46  ;;  %6230 = vmax.xlane.f32.xlu0 %v6229_v17  ;;  %v6247_v17 = vsel %vm4562_vm1, %v13203_v42, -inf  ;;  %v14475_v42 = vld [vmem:[#allocation37_spill] sm:$0xff] }
 0x3ad   :  { %10443 = vmatprep.subr.bf16.mxu1 %v14378_v0  ;;  %v6141_v5 = vpop.xlane.xlu1 %6140 }
 0x3ae   :  { %v6283_v58 = vsub.f32 %v14472_v45, %v6141_v5 }
 0x3af   :  { %v13412_v11 = vpop.eup %10695  ;;  %v6144_v30 = vpop.xlane.xlu0 %6143 }
 0x3b0   :  { %6242 = vmax.xlane.f32.xlu1 %v6241_v4  ;;  %6233 = vmax.xlane.f32.xlu0 %v6232_v23  ;;  %v6371_v63 = vmul.f32 1.442695, %v6283_v58  ;;  %v6284_v32 = vsub.f32 %v14473_v38, %v6144_v30  ;;  %v14474_v23 = vld [vmem:[#allocation35_spill] sm:$0xff]  ;;  %v4484_v30 = vpack.i.b16 %v13416_v37, %v13414_v25 }
 0x3b1   :  { %v13419_v46 = vpop.eup %10697  ;;  %v6126_v4 = vpop.xlane.xlu1 %6125 }
 0x3b2   :  { %v6278_v5 = vsub.f32 %v14474_v23, %v6126_v4  ;;  %v6373_v12 = vmul.f32 1.442695, %v6284_v32  ;;  %v6653_v45 = vpack.c.bf16 %v13419_v46, %v13412_v11  ;;  %10699 = vpow2.f32 %v6371_v63  ;;  %v14476_v63 = vld [vmem:[#allocation40_spill] sm:$0xff]  ;;  %v14477_v23 = vld [vmem:[#allocation39_spill] sm:$0xff] }
 0x3b3   :  { %v6135_v58 = vpop.xlane.xlu0 %6134  ;;  %v6244_v32 = vsel %vm4562_vm1, %v13219_v36, -inf }
 0x3b4   :  { %6248 = vmax.xlane.f32.xlu1 %v6247_v17  ;;  %6239 = vmax.xlane.f32.xlu0 %v6238_v1  ;;  %v6361_v38 = vmul.f32 1.442695, %v6278_v5  ;;  %10701 = vpow2.f32 %v6373_v12  ;;  %v6281_v8 = vsub.f32 %v14475_v42, %v6135_v58  ;;  %v6451_v12 = vsel %vm4562_vm1, %v13181_v20, 0.0 }
 0x3b5   :  { %10440 = vmatmul.mubr.msk.bf16.vlgmr.msra.gmra.mrb[88].mxu0 %vm4562_vm1, %v6653_v45  ;;  %10703 = vpow2.f32 %v6359_v22  ;;  %v6250_v22 = vsel %vm4562_vm1, %v13214_v41, -inf  ;;  %v13445_v58 = vcombine.high %v4073_v61, %v4089_v10  ;;  %v6463_v20 = vsel %vm4562_vm1, %v13193_v28, 0.0 }
 0x3b6   :  { %v6153_v17 = vpop.xlane.xlu1 %6152  ;;  %10450 = vmatpush3.bf16.msra.mxu0 %v4484_v30  ;;  %10451 = vmatprep.mubr.msk.bf16.mxu0 %vm11049_vm0, %v14378_v0  ;;  %10705 = vpow2.f32 %v6361_v38  ;;  %v6367_v42 = vmul.f32 1.442695, %v6281_v8  ;;  %v13447_v30 = vcombine.high %v4141_v21, %v4157_v43  ;;  %v4479_v43 = vshrl.u32 %v13358_v56, 16 }
 0x3b7   :  { %v6287_v1 = vsub.f32 %v14476_v63, %v6153_v17  ;;  %v6138_v4 = vpop.xlane.xlu0 %6137  ;;  %10461 = vmatprep.subr.bf16.mxu0 %v14378_v0  ;;  %v6256_v63 = vsel %vm4562_vm1, %v13278_v18, -inf  ;;  %v6454_v56 = vsel %vm4562_vm1, %v13183_v50, 0.0  ;;  %v14486_v18 = vld [vmem:[#allocation24_spill] sm:$0xff] }
 0x3b8   :  { %6254 = vmax.xlane.f32.xlu1 %v6253_v34  ;;  %6245 = vmax.xlane.f32.xlu0 %v6244_v32  ;;  %v6282_v5 = vsub.f32 %v14477_v23, %v6138_v4  ;;  %10707 = vpow2.f32 %v6367_v42  ;;  %v14478_v34 = vld [vmem:[#allocation41_spill] sm:$0xff]  ;;  %v4478_v4 = vshrl.u32 %v13356_v49, 16  ;;  %v14479_v42 = vld [vmem:[#allocation20_spill] sm:$0xff]  ;;  %v14480_v23 = vld [vmem:[#allocation18_spill] sm:$0xff] }
 0x3b9   :  { %v6379_v38 = vmul.f32 1.442695, %v6287_v1  ;;  %v4492_v1 = vpack.i.b16 %v13447_v30, %v13445_v58 }
 0x3ba   :  { %v6369_v45 = vmul.f32 1.442695, %v6282_v5  ;;  %v4194_v5 = vcombine.low %v14480_v23, %v14479_v42  ;;  %v14485_v42 = vld [vmem:[#allocation21_spill] sm:$0xff]  ;;  %v4480_v50 = vpack.i.b16 %v4479_v43, %v4478_v4  ;;  %v6466_v4 = vsel %vm4562_vm1, %v13198_v9, 0.0 }
 0x3bb   :  { %v6156_v8 = vpop.xlane.xlu0 %6155 }
 0x3bc   :  { %6452 = vadd.xlane.f32.xlu1 %v6451_v12  ;;  %6251 = vmax.xlane.f32.xlu0 %v6250_v22  ;;  %10709 = vpow2.f32 %v6369_v45  ;;  %v6288_v32 = vsub.f32 %v14478_v34, %v6156_v8  ;;  %v13450_v17 = vpop.eup %10699  ;;  %v14481_v12 = vld [vmem:[#allocation42_spill] sm:$0xff]  ;;  %v14482_v45 = vld [vmem:[#allocation16_spill] sm:$0xff]  ;;  %v14483_v8 = vld [vmem:[#allocation15_spill] sm:$0xff] }
 0x3bd   :  { %10711 = vpow2.f32 %v6379_v38  ;;  %v4210_v34 = vcombine.low %v14483_v8, %v14482_v45  ;;  %v14487_v38 = vld [vmem:[#allocation23_spill] sm:$0xff]  ;;  %v6469_v8 = vsel %vm4562_vm1, %v13292_v39, 0.0 }
 0x3be   :  { %v13457_v61 = vpop.eup %10701  ;;  %v6381_v21 = vmul.f32 1.442695, %v6288_v32  ;;  %v4278_v41 = vcombine.low %v14487_v38, %v14486_v18  ;;  %v14489_v38 = vld [vmem:[#allocation44_spill] sm:$0xff] }
 0x3bf   :  { %v6147_v10 = vpop.xlane.xlu1 %6146  ;;  %v13464_v28 = vpop.eup %10703  ;;  %v6655_v49 = vpack.c.bf16 %v13457_v61, %v13450_v17 }
 0x3c0   :  { %6464 = vadd.xlane.f32.xlu1 %v6463_v20  ;;  %6257 = vmax.xlane.f32.xlu0 %v6256_v63  ;;  %v6285_v22 = vsub.f32 %v14481_v12, %v6147_v10  ;;  %v13471_v32 = vpop.eup %10705  ;;  %10713 = vpow2.f32 %v6381_v21  ;;  %v14484_v63 = vld [vmem:[#allocation22_spill] sm:$0xff]  ;;  %v6457_v10 = vsel %vm4562_vm1, %v13268_v40, 0.0  ;;  %v13489_v40 = vrot.slane %v4194_v5, %v11313_v35 }
 0x3c1   :  { %v6150_v20 = vpop.xlane.xlu0 %6149  ;;  %v4262_v23 = vcombine.low %v14485_v42, %v14484_v63  ;;  %v6652_v45 = vpack.c.bf16 %v13471_v32, %v13464_v28  ;;  %10452 = vmatmul.mubr.msk.bf16.vlgmr.msra.gmra.mrb[92].mxu0 %vm4562_vm1, %v6655_v49  ;;  %v13507_v43 = vrot.slane %v4278_v41, %v11313_v35  ;;  %v4486_v5 = vshrl.u32 %v13414_v25, 16 }
 0x3c2   :  { %v6375_v12 = vmul.f32 1.442695, %v6285_v22  ;;  %v6286_v36 = vsub.f32 %v14488_v44, %v6150_v20  ;;  %10462 = vmatpush3.bf16.msra.mxu0 %v4492_v1  ;;  %v13492_v44 = vrot.slane %v4210_v34, %v11313_v35  ;;  %v13497_v22 = vpop.eup %10707  ;;  %10463 = vmatprep.mubr.msk.bf16.mxu0 %vm11049_vm0, %v14378_v0  ;;  %v6460_v41 = vsel %vm4562_vm1, %v13276_v16, 0.0 }
 0x3c3   :  { %10434 = vmatmul.mubr.msk.bf16.vlgmr.msra.gmra.mrb[100].mxu1 %vm4562_vm1, %v6652_v45  ;;  %v13495_v18 = vrot.slane %v4262_v23, %v11313_v35  ;;  %10473 = vmatprep.subr.bf16.mxu0 %v14378_v0  ;;  %v6487_v16 = vsel %vm4562_vm1, %v13315_v26, 0.0  ;;  %v6478_v63 = vsel %vm4562_vm1, %v13238_v31, 0.0  ;;  %v4495_v26 = vshrl.u32 %v13447_v30, 16 }
 0x3c4   :  { %6458 = vadd.xlane.f32.xlu1 %v6457_v10  ;;  %6455 = vadd.xlane.f32.xlu0 %v6454_v56  ;;  %v6377_v21 = vmul.f32 1.442695, %v6286_v36  ;;  %10715 = vpow2.f32 %v6375_v12  ;;  %v6475_v36 = vsel %vm4562_vm1, %v13252_v54, 0.0  ;;  %v4487_v54 = vshrl.u32 %v13416_v37, 16 }
 0x3c5   :  { %10444 = vmatpush3.bf16.msra.mxu1 %v4480_v50  ;;  %10445 = vmatprep.mubr.msk.bf16.mxu1 %vm11049_vm0, %v14378_v0  ;;  %v13524_v34 = vcombine.low %v13489_v40, %v13492_v44  ;;  %v13528_v25 = vcombine.low %v13495_v18, %v13507_v43  ;;  %v4494_v12 = vshrl.u32 %v13445_v58, 16  ;;  %v6481_v58 = vsel %vm4562_vm1, %v13327_v7, 0.0 }
 0x3c6   :  { %10717 = vpow2.f32 %v6377_v21  ;;  %10455 = vmatprep.subr.bf16.mxu1 %v14378_v0  ;;  %v13509_v1 = vpop.eup %10709  ;;  %v4488_v56 = vpack.i.b16 %v4487_v54, %v4486_v5  ;;  %v14490_v21 = vld [vmem:[#allocation45_spill] sm:$0xff]  ;;  %v6472_v30 = vsel %vm4562_vm1, %v13285_v51, 0.0  ;;  %v6499_v51 = vsel %vm4562_vm1, %v13353_v62, 0.0 }
 0x3c7   :  { %v6654_v9 = vpack.c.bf16 %v13509_v1, %v13497_v22  ;;  %v13516_v49 = vpop.eup %10711  ;;  %v4500_v42 = vpack.i.b16 %v13528_v25, %v13524_v34  ;;  %v6493_v62 = vsel %vm4562_vm1, %v13368_v53, 0.0  ;;  %v6502_v53 = vsel %vm4562_vm1, %v13363_v6, 0.0 }
 0x3c8   :  { %6476 = vadd.xlane.f32.xlu1 %v6475_v36  ;;  %6467 = vadd.xlane.f32.xlu0 %v6466_v4 }
 0x3ca   :  { %v13530_v37 = vpop.eup %10713 }
 0x3cb   :  { %10446 = vmatmul.mubr.msk.bf16.vlgmr.msra.gmra.mrb[104].mxu1 %vm4562_vm1, %v6654_v9  ;;  %v6657_v39 = vpack.c.bf16 %v13530_v37, %v13516_v49  ;;  %v4496_v9 = vpack.i.b16 %v4495_v26, %v4494_v12  ;;  %v6484_v12 = vsel %vm4562_vm1, %v13321_v48, 0.0  ;;  %v6511_v48 = vsel %vm4562_vm1, %v13412_v11, 0.0 }
 0x3cc   :  { %6470 = vadd.xlane.f32.xlu1 %v6469_v8  ;;  %6461 = vadd.xlane.f32.xlu0 %v6460_v41  ;;  %v14491_v8 = vld [vmem:[#allocation46_spill] sm:$0xff]  ;;  %v6496_v11 = vsel %vm4562_vm1, %v13379_v29, 0.0 }
 0x3cd   :  { %10456 = vmatpush3.bf16.msra.mxu1 %v4488_v56  ;;  %10457 = vmatprep.mubr.msk.bf16.mxu1 %vm11049_vm0, %v14378_v0 }
 0x3ce   :  { %v6165_v20 = vpop.xlane.xlu1 %6164  ;;  %10464 = vmatmul.mubr.msk.bf16.vlgmr.msra.gmra.mrb[96].mxu0 %vm4562_vm1, %v6657_v39  ;;  %10467 = vmatprep.subr.bf16.mxu1 %v14378_v0  ;;  %v13545_v23 = vpop.eup %10715  ;;  %v6490_v39 = vsel %vm4562_vm1, %v13308_v33, 0.0  ;;  %v14494_v33 = vld [vmem:[#allocation49_spill] sm:$0xff] }
 0x3cf   :  { %v6291_v10 = vsub.f32 %v14489_v38, %v6165_v20  ;;  %10474 = vmatpush3.bf16.msra.mxu0 %v4500_v42  ;;  %10475 = vmatprep.mubr.msk.bf16.mxu0 %vm11049_vm0, %v14378_v0  ;;  %v14493_v42 = vld [vmem:[#allocation48_spill] sm:$0xff] }
 0x3d0   :  { %6488 = vadd.xlane.f32.xlu1 %v6487_v16  ;;  %6479 = vadd.xlane.f32.xlu0 %v6478_v63  ;;  %v13550_v45 = vpop.eup %10717  ;;  %v6168_v31 = vpop.xlane.xlu0 %6167  ;;  %v14492_v16 = vld [vmem:[#allocation47_spill] sm:$0xff] }
 0x3d1   :  { %v6387_v50 = vmul.f32 1.442695, %v6291_v10  ;;  %v6292_v36 = vsub.f32 %v14490_v21, %v6168_v31  ;;  %v6656_v4 = vpack.c.bf16 %v13550_v45, %v13545_v23  ;;  %10485 = vmatprep.subr.bf16.mxu0 %v14378_v0 }
 0x3d3   :  { %v6389_v54 = vmul.f32 1.442695, %v6292_v36  ;;  %10719 = vpow2.f32 %v6387_v50  ;;  %10458 = vmatmul.mubr.msk.bf16.vlgmr.msra.gmra.mrb[108].mxu1 %vm4562_vm1, %v6656_v4  ;;  %v13580_v36 = vcombine.high %v13489_v40, %v13492_v44  ;;  %v6505_v44 = vsel %vm4562_vm1, %v13464_v28, 0.0 }
 0x3d4   :  { %6482 = vadd.xlane.f32.xlu1 %v6481_v58  ;;  %v6159_v5 = vpop.xlane.xlu1 %6158  ;;  %6473 = vadd.xlane.f32.xlu0 %v6472_v30  ;;  %v13590_v58 = vcombine.high %v13495_v18, %v13507_v43  ;;  %v14495_v43 = vld [vmem:[#allocation50_spill] sm:$0xff] }
 0x3d5   :  { %v6289_v41 = vsub.f32 %v14491_v8, %v6159_v5  ;;  %10721 = vpow2.f32 %v6389_v54  ;;  %10468 = vmatpush3.bf16.msra.mxu1 %v4496_v9  ;;  %10469 = vmatprep.mubr.msk.bf16.mxu1 %vm11049_vm0, %v14378_v0  ;;  %v4502_v8 = vshrl.u32 %v13524_v34, 16  ;;  %v6523_v34 = vsel %vm4562_vm1, %v13450_v17, 0.0 }
 0x3d6   :  { %v6162_v56 = vpop.xlane.xlu0 %6161  ;;  %10479 = vmatprep.subr.bf16.mxu1 %v14378_v0  ;;  %v4508_v6 = vpack.i.b16 %v13590_v58, %v13580_v36 }
 0x3d7   :  { %v6383_v7 = vmul.f32 1.442695, %v6289_v41  ;;  %v6290_v20 = vsub.f32 %v14492_v16, %v6162_v56  ;;  %v4503_v41 = vshrl.u32 %v13528_v25, 16  ;;  %v14496_v56 = vld [vmem:[#allocation53_spill] sm:$0xff]  ;;  %v6514_v25 = vsel %vm4562_vm1, %v13419_v46, 0.0 }
 0x3d8   :  { %6500 = vadd.xlane.f32.xlu1 %v6499_v51  ;;  %v6177_v63 = vpop.xlane.xlu1 %6176  ;;  %6491 = vadd.xlane.f32.xlu0 %v6490_v39  ;;  %v14497_v39 = vld [vmem:[#allocation55_spill] sm:$0xff] }
 0x3d9   :  { %v6295_v38 = vsub.f32 %v14493_v42, %v6177_v63  ;;  %v6385_v10 = vmul.f32 1.442695, %v6290_v20  ;;  %10723 = vpow2.f32 %v6383_v7 }
 0x3da   :  { %v6180_v26 = vpop.xlane.xlu0 %6179 }
 0x3db   :  { %v6395_v31 = vmul.f32 1.442695, %v6295_v38  ;;  %10725 = vpow2.f32 %v6385_v10  ;;  %v6296_v50 = vsub.f32 %v14494_v33, %v6180_v26  ;;  %v4504_v10 = vpack.i.b16 %v4503_v41, %v4502_v8  ;;  %v14504_v8 = vld [vmem:[#allocation28_spill] sm:$0xff] }
 0x3dc   :  { %6494 = vadd.xlane.f32.xlu1 %v6493_v62  ;;  %6485 = vadd.xlane.f32.xlu0 %v6484_v12 }
 0x3dd   :  { %v6397_v21 = vmul.f32 1.442695, %v6296_v50  ;;  %10727 = vpow2.f32 %v6395_v31  ;;  %v13582_v4 = vpop.eup %10719  ;;  %v14498_v31 = vld [vmem:[#allocation52_spill] sm:$0xff]  ;;  %v6517_v50 = vsel %vm4562_vm1, %v13497_v22, 0.0  ;;  %v6526_v22 = vsel %vm4562_vm1, %v13457_v61, 0.0  ;;  %v14503_v61 = vld [vmem:[#allocation29_spill] sm:$0xff] }
 0x3de   :  { %v6171_v5 = vpop.xlane.xlu1 %6170  ;;  %v13662_v41 = vcombine.high %v14504_v8, %v14503_v61 }
 0x3df   :  { %10729 = vpow2.f32 %v6397_v21  ;;  %v13592_v30 = vpop.eup %10721  ;;  %v6293_v54 = vsub.f32 %v14495_v43, %v6171_v5  ;;  %v6508_v21 = vsel %vm4562_vm1, %v13471_v32, 0.0  ;;  %v6535_v32 = vsel %vm4562_vm1, %v13516_v49, 0.0  ;;  %v14502_v49 = vld [vmem:[#allocation25_spill] sm:$0xff] }
 0x3e0   :  { %6512 = vadd.xlane.f32.xlu1 %v6511_v48  ;;  %6503 = vadd.xlane.f32.xlu0 %v6502_v53  ;;  %v6659_v40 = vpack.c.bf16 %v13592_v30, %v13582_v4  ;;  %v14499_v48 = vld [vmem:[#allocation27_spill] sm:$0xff]  ;;  %v14500_v53 = vld [vmem:[#allocation30_spill] sm:$0xff]  ;;  %v6520_v43 = vsel %vm4562_vm1, %v13509_v1, 0.0 }
 0x3e1   :  { %v6391_v42 = vmul.f32 1.442695, %v6293_v54  ;;  %v4516_v5 = vpack.i.b16 %v14500_v53, %v14499_v48  ;;  %v14501_v54 = vld [vmem:[#allocation26_spill] sm:$0xff] }
 0x3e2   :  { %10476 = vmatmul.mubr.msk.bf16.vlgmr.msra.gmra.mrb[100].mxu0 %vm4562_vm1, %v6659_v40  ;;  %v14508_v48 = vld [vmem:[#allocation54_spill] sm:$0xff] }
 0x3e3   :  { %v13603_v18 = vpop.eup %10723  ;;  %10486 = vmatpush3.bf16.msra.mxu0 %v4508_v6  ;;  %10487 = vmatprep.mubr.msk.bf16.mxu0 %vm11049_vm0, %v14378_v0  ;;  %v6529_v6 = vsel %vm4562_vm1, %v13545_v23, 0.0  ;;  %v3327_v53 = vshrl.u32 %v14508_v48, 16 }
 0x3e4   :  { %6506 = vadd.xlane.f32.xlu1 %v6505_v44  ;;  %v6189_v9 = vpop.xlane.xlu0 %6188  ;;  %6497 = vadd.xlane.f32.xlu0 %v6496_v11 }
 0x3e5   :  { %v13608_v28 = vpop.eup %10725  ;;  %v6299_v29 = vsub.f32 %v14496_v56, %v6189_v9  ;;  %10497 = vmatprep.subr.bf16.mxu0 %v14378_v0  ;;  %v13658_v9 = vcombine.high %v14502_v49, %v14501_v54  ;;  %v14511_v54 = vld [vmem:[#allocation60_spill] sm:$0xff]  ;;  %v14512_v49 = vld [vmem:[#allocation61_spill] sm:$0xff] }
 0x3e6   :  { %v6192_v7 = vpop.xlane.xlu1 %6191  ;;  %v6658_v51 = vpack.c.bf16 %v13608_v28, %v13603_v18  ;;  %v3334_v61 = vshrl.u32 %v14512_v49, 16 }
 0x3e7   :  { %v6300_v16 = vsub.f32 %v14497_v39, %v6192_v7  ;;  %v6403_v20 = vmul.f32 1.442695, %v6299_v29  ;;  %v13621_v63 = vpop.eup %10727  ;;  %v4510_v29 = vshrl.u32 %v13580_v36, 16  ;;  %v4511_v7 = vshrl.u32 %v13590_v58, 16 }
 0x3e8   :  { %6524 = vadd.xlane.f32.xlu1 %v6523_v34  ;;  %v6174_v38 = vpop.xlane.xlu0 %6173  ;;  %6515 = vadd.xlane.f32.xlu0 %v6514_v25  ;;  %v4524_v36 = vpack.i.b16 %v13662_v41, %v13658_v9  ;;  %v6541_v58 = vsel %vm4562_vm1, %v13603_v18, 0.0  ;;  %v6550_v18 = vsel %vm4562_vm1, %v13592_v30, 0.0  ;;  %v14507_v30 = vld [vmem:[#allocation51_spill] sm:$0xff] }
 0x3e9   :  { %v13623_v12 = vpop.eup %10729  ;;  %v6405_v26 = vmul.f32 1.442695, %v6300_v16  ;;  %10731 = vpow2.f32 %v6403_v20  ;;  %v6294_v62 = vsub.f32 %v14498_v31, %v6174_v38  ;;  %10470 = vmatmul.mubr.msk.bf16.vlgmr.msra.gmra.mrb[112].mxu1 %vm4562_vm1, %v6658_v51  ;;  %v6547_v16 = vsel %vm4562_vm1, %v13582_v4, 0.0  ;;  %v14506_v31 = vld [vmem:[#allocation59_spill] sm:$0xff] }
 0x3ea   :  { %v13627_v33 = vpop.xlane.xlu1 %6185  ;;  %10480 = vmatpush3.bf16.msra.mxu1 %v4504_v10  ;;  %v6661_v46 = vpack.c.bf16 %v13623_v12, %v13621_v63  ;;  %10481 = vmatprep.mubr.msk.bf16.mxu1 %vm11049_vm0, %v14378_v0  ;;  %v6538_v20 = vsel %vm4562_vm1, %v13530_v37, 0.0  ;;  %v4512_v25 = vpack.i.b16 %v4511_v7, %v4510_v29  ;;  %v6532_v4 = vsel %vm4562_vm1, %v13550_v45, 0.0 }
 0x3eb   :  { %10733 = vpow2.f32 %v6405_v26  ;;  %v6393_v17 = vmul.f32 1.442695, %v6294_v62  ;;  %10491 = vmatprep.subr.bf16.mxu1 %v14378_v0  ;;  %v6559_v45 = vsel %vm4562_vm1, %v13621_v63, 0.0  ;;  %v6562_v7 = vsel %vm4562_vm1, %v13623_v12, 0.0 }
 0x3ec   :  { %10735 = vpow2.f32 %v6391_v42  ;;  %6518 = vadd.xlane.f32.xlu1 %v6517_v50  ;;  %6509 = vadd.xlane.f32.xlu0 %v6508_v21  ;;  %v14505_v42 = vld [vmem:[#allocation56_spill] sm:$0xff]  ;;  %v3209_v50 = vpop.permute.xlu0 %3208  ;;  %v3326_v21 = vshrl.u32 %v14507_v30, 16 }
 0x3ed   :  { %10737 = vpow2.f32 %v6393_v17  ;;  %10488 = vmatmul.mubr.msk.bf16.vlgmr.msra.gmra.mrb[104].mxu0 %vm4562_vm1, %v6661_v46  ;;  %v6298_v38 = vsub.f32 %v14505_v42, %v13627_v33  ;;  %v6544_v33 = vsel %vm4562_vm1, %v13608_v28, 0.0  ;;  %v3318_v17 = vshrl.u32 %v12122_v52, 16 }
 0x3ee   :  { %v13641_v40 = vpop.xlane.xlu1 %6203  ;;  %10498 = vmatpush3.bf16.msra.mxu0 %v4516_v5  ;;  %10499 = vmatprep.mubr.msk.bf16.mxu0 %vm11049_vm0, %v14378_v0  ;;  %v14509_v5 = vld [vmem:[#allocation57_spill] sm:$0xff]  ;;  %v3342_v8 = vshrl.u32 %v3209_v50, 16 }
 0x3ef   :  { %10509 = vmatprep.subr.bf16.mxu0 %v14378_v0  ;;  %v6401_v26 = vmul.f32 1.442695, %v6298_v38  ;;  %v6304_v62 = vsub.f32 %v14506_v31, %v13641_v40  ;;  %v3316_v12 = vpack.i.b16 %v14509_v5, %v12122_v52 }
 0x3f0   :  { %6536 = vadd.xlane.f32.xlu1 %v6535_v32  ;;  %6527 = vadd.xlane.f32.xlu0 %v6526_v22  ;;  %v3319_v32 = vshrl.u32 %v14509_v5, 16 }
 0x3f1   :  { %10739 = vpow2.f32 %v6401_v26 }
 0x3f2   :  { %v13650_v44 = vpop.xlane.xlu1 %6197 }
 0x3f3   :  { %v10732_v11 = vpop.eup %10731  ;;  %v6302_v28 = vsub.f32 %v14511_v54, %v13650_v44 }
 0x3f4   :  { %6530 = vadd.xlane.f32.xlu1 %v6529_v6  ;;  %6521 = vadd.xlane.f32.xlu0 %v6520_v43  ;;  %v14510_v6 = vld [vmem:[#allocation58_spill] sm:$0xff]  ;;  %v6413_v43 = vmul.f32 1.442695, %v6304_v62  ;;  %v6571_v29 = vsel %vm4562_vm1, %v10732_v11, 0.0 }
 0x3f5   :  { %v13664_v56 = vpop.eup %10733  ;;  %v3335_v40 = vshrl.u32 %v14510_v6, 16 }
 0x3f6   :  { %v10736_v23 = vpop.eup %10735  ;;  %v13668_v51 = vpop.xlane.xlu1 %6215  ;;  %v6663_v1 = vpack.c.bf16 %v13664_v56, %v10732_v11  ;;  %10741 = vpow2.f32 %v6413_v43  ;;  %v3324_v11 = vpack.i.b16 %v14508_v48, %v14507_v30 }
 0x3f7   :  { %v10738_v39 = vpop.eup %10737  ;;  %v6553_v46 = vsel %vm4562_vm1, %v10736_v23, 0.0 }
 0x3f8   :  { %6548 = vadd.xlane.f32.xlu1 %v6547_v16  ;;  %6539 = vadd.xlane.f32.xlu0 %v6538_v20  ;;  %v6660_v34 = vpack.c.bf16 %v10738_v39, %v10736_v23  ;;  %v6409_v16 = vmul.f32 1.442695, %v6302_v28  ;;  %v14513_v20 = vld [vmem:[#allocation17_spill] sm:$0xff] }
 0x3f9   :  { %10500 = vmatmul.mubr.msk.bf16.vlgmr.msra.gmra.mrb[108].mxu0 %vm4562_vm1, %v6663_v1  ;;  %v3320_v1 = vpack.i.b16 %v3319_v32, %v3318_v17 }
 0x3fa   :  { %10482 = vmatmul.mubr.msk.bf16.vlgmr.msra.gmra.mrb[116].mxu1 %vm4562_vm1, %v6660_v34  ;;  %10510 = vmatpush3.bf16.msra.mxu0 %v4524_v36  ;;  %v13685_v37 = vpop.xlane.xlu1 %6209  ;;  %v6308_v34 = vsub.f32 %v14513_v20, %v13668_v51  ;;  %v3328_v36 = vpack.i.b16 %v3327_v53, %v3326_v21  ;;  %10743 = vpow2.f32 %v6409_v16 }
 0x3fb   :  { %10492 = vmatpush3.bf16.msra.mxu1 %v4512_v25  ;;  %10493 = vmatprep.mubr.msk.bf16.mxu1 %vm11049_vm0, %v14378_v0  ;;  %v3336_v25 = vpack.i.b16 %v3335_v40, %v3334_v61  ;;  %v6306_v51 = vsub.f32 %v13144_v57, %v13685_v37  ;;  %v13728_v31 = vpop.eup %10739 }
 0x3fc   :  { %6542 = vadd.xlane.f32.xlu1 %v6541_v58  ;;  %6533 = vadd.xlane.f32.xlu0 %v6532_v4  ;;  %v6556_v58 = vsel %vm4562_vm1, %v10738_v39, 0.0  ;;  %v3332_v4 = vpack.i.b16 %v14510_v6, %v14512_v49  ;;  %v6421_v38 = vmul.f32 1.442695, %v6308_v34  ;;  %v6574_v39 = vsel %vm4562_vm1, %v13664_v56, 0.0 }
 0x3fd   :  { %10503 = vmatprep.subr.bf16.mxu1 %v14378_v0  ;;  %10511 = vmatprep.mubr.msk.bf16.mxu0 %vm11049_vm0, %v14378_v0  ;;  %v3823_v62 = vcombine.high %v3320_v1, %v3336_v25  ;;  %v6568_v56 = vsel %vm4562_vm1, %v13728_v31, 0.0 }
 0x3fe   :  { %10521 = vmatprep.subr.bf16.mxu0 %v14378_v0  ;;  %v3754_v52 = vcombine.low %v3316_v12, %v3332_v4  ;;  %v3755_v17 = vcombine.high %v3316_v12, %v3332_v4  ;;  %10745 = vpow2.f32 %v6421_v38 }
 0x3ff   :  { %v3837_v21 = vrot.slane %v3823_v62, %v11302_v13 }
 0x400   :  { %v13697_v10 = vpop.xlane.xlu1 %6221  ;;  %6560 = vadd.xlane.f32.xlu1 %v6559_v45  ;;  %6551 = vadd.xlane.f32.xlu0 %v6550_v18  ;;  %v3822_v18 = vcombine.low %v3320_v1, %v3336_v25  ;;  %v13736_v30 = vpop.eup %10741  ;;  %v3762_v53 = vrot.slane %v3754_v52, %v11302_v13 }
 0x401   :  { %v6586_v28 = vsel %vm4562_vm1, %v13736_v30, 0.0 }
 0x402   :  { %v3830_v57 = vrot.slane %v3822_v18, %v11302_v13 }
 0x404   :  { %v3217_v63 = vpop.permute.xlu1 %3216  ;;  %6554 = vadd.xlane.f32.xlu1 %v6553_v46  ;;  %6545 = vadd.xlane.f32.xlu0 %v6544_v33  ;;  %v13744_v49 = vpop.eup %10743 }
 0x405   :  { %v3343_v22 = vshrl.u32 %v3217_v63, 16  ;;  %v3340_v44 = vpack.i.b16 %v3217_v63, %v3209_v50  ;;  %v6417_v50 = vmul.f32 1.442695, %v6306_v51  ;;  %v6580_v34 = vsel %vm4562_vm1, %v13744_v49, 0.0 }
 0x407   :  { %v3344_v23 = vpack.i.b16 %v3343_v22, %v3342_v8  ;;  %v3770_v26 = vcombine.low %v3324_v11, %v3340_v44  ;;  %v3771_v46 = vcombine.high %v3324_v11, %v3340_v44  ;;  %v3769_v22 = vrot.slane %v3755_v17, %v11302_v13 }
 0x408   :  { %6572 = vadd.xlane.f32.xlu1 %v6571_v29  ;;  %6563 = vadd.xlane.f32.xlu0 %v6562_v7  ;;  %10747 = vpow2.f32 %v6417_v50 }
 0x409   :  { %v3838_v42 = vcombine.low %v3328_v36, %v3344_v23  ;;  %v3839_v45 = vcombine.high %v3328_v36, %v3344_v23  ;;  %v3778_v37 = vrot.slane %v3770_v26, %v11302_v13  ;;  %v3785_v48 = vrot.slane %v3771_v46, %v11302_v13  ;;  %v13754_v36 = vpop.eup %10745 }
 0x40b   :  { %v3846_v33 = vrot.slane %v3838_v42, %v11302_v13  ;;  %v3853_v63 = vrot.slane %v3839_v45, %v11302_v13  ;;  %v3786_v43 = vcombine.low %v3762_v53, %v3778_v37  ;;  %v3787_v54 = vcombine.high %v3762_v53, %v3778_v37 }
 0x40c   :  { %6557 = vadd.xlane.f32.xlu0 %v6556_v58  ;;  %v3802_v61 = vcombine.low %v3769_v22, %v3785_v48  ;;  %v3803_v8 = vcombine.high %v3769_v22, %v3785_v48  ;;  %v6598_v45 = vsel %vm4562_vm1, %v13754_v36, 0.0 }
 0x40d   :  { %v3854_v5 = vcombine.low %v3830_v57, %v3846_v33  ;;  %v3855_v32 = vcombine.high %v3830_v57, %v3846_v33  ;;  %v3870_v6 = vcombine.low %v3837_v21, %v3853_v63  ;;  %v3871_v40 = vcombine.high %v3837_v21, %v3853_v63 }
 0x40e   :  { %v3794_v16 = vrot.slane %v3786_v43, %v11313_v35  ;;  %v3801_v20 = vrot.slane %v3787_v54, %v11313_v35  ;;  %v3810_v25 = vrot.slane %v3802_v61, %v11313_v35  ;;  %v3817_v44 = vrot.slane %v3803_v8, %v11313_v35 }
 0x40f   :  { %v3862_v29 = vrot.slane %v3854_v5, %v11313_v35  ;;  %v3869_v7 = vrot.slane %v3855_v32, %v11313_v35  ;;  %v3878_v23 = vrot.slane %v3870_v6, %v11313_v35  ;;  %v3885_v1 = vrot.slane %v3871_v40, %v11313_v35 }
 0x410   :  { %6575 = vadd.xlane.f32.xlu0 %v6574_v39  ;;  %v4298_v51 = vcombine.low %v3794_v16, %v3801_v20  ;;  %v9916_v26 = vcombine.high %v3794_v16, %v3801_v20  ;;  %v4314_v39 = vcombine.low %v3810_v25, %v3817_v44  ;;  %v9917_v62 = vcombine.high %v3810_v25, %v3817_v44 }
 0x411   :  { %v4366_v58 = vcombine.low %v3862_v29, %v3869_v7  ;;  %v9918_v11 = vcombine.high %v3862_v29, %v3869_v7  ;;  %v4382_v4 = vcombine.low %v3878_v23, %v3885_v1  ;;  %v9919_v42 = vcombine.high %v3878_v23, %v3885_v1  ;;  %v14514_v1 = vld [vmem:[#allocation63_spill] sm:$0xff] }
 0x412   :  { %v13761_v18 = vpop.eup %10747  ;;  %v13779_v37 = vrot.slane %v4298_v51, %v11302_v13  ;;  %v13782_v21 = vrot.slane %v9916_v26, %v11302_v13  ;;  %v13785_v48 = vrot.slane %v4314_v39, %v11302_v13  ;;  %v6310_v16 = vsub.f32 %v14514_v1, %v13697_v10 }
 0x413   :  { %v13764_v33 = vrot.slane %v4366_v58, %v11302_v13  ;;  %v13767_v17 = vrot.slane %v9918_v11, %v11302_v13  ;;  %v13771_v50 = vrot.slane %v4382_v4, %v11302_v13  ;;  %v13774_v63 = vrot.slane %v9919_v42, %v11302_v13  ;;  %v14516_v4 = vld [vmem:[#allocation31_spill] sm:$0xff] }
 0x414   :  { %6569 = vadd.xlane.f32.xlu0 %v6568_v56  ;;  %v6592_v57 = vsel %vm4562_vm1, %v13761_v18, 0.0  ;;  %v4330_v40 = vcombine.low %v13779_v37, %v13782_v21  ;;  %v6425_v10 = vmul.f32 1.442695, %v6310_v16 }
 0x415   :  { %v4398_v32 = vcombine.low %v13764_v33, %v13767_v17  ;;  %v4414_v22 = vcombine.low %v13771_v50, %v13774_v63 }
 0x416   :  { %v4338_v7 = vrot.slane %v4330_v40, %v11313_v35 }
 0x417   :  { %v4406_v61 = vrot.slane %v4398_v32, %v11313_v35 }
 0x418   :  { %6587 = vadd.xlane.f32.xlu0 %v6586_v28 }
 0x41c   :  { %6581 = vadd.xlane.f32.xlu0 %v6580_v34 }
 0x41d   :  { %v6183_v12 = vpop.xlane.xlu0 %6182 }
 0x41e   :  { %v6297_v38 = vsub.f32 %v13092_v15, %v6183_v12 }
 0x420   :  { %v6399_v46 = vmul.f32 1.442695, %v6297_v38  ;;  %6599 = vadd.xlane.f32.xlu0 %v6598_v45  ;;  %v4526_v45 = vshrl.u32 %v13658_v9, 16 }
 0x421   :  { %v6201_v52 = vpop.xlane.xlu0 %6200 }
 0x422   :  { %10749 = vpow2.f32 %v6399_v46  ;;  %v6303_v15 = vsub.f32 %v13104_v24, %v6201_v52  ;;  %v13788_v24 = vrot.slane %v9917_v62, %v11302_v13  ;;  %v4527_v62 = vshrl.u32 %v13662_v41, 16 }
 0x424   :  { %v6411_v56 = vmul.f32 1.442695, %v6303_v15  ;;  %6593 = vadd.xlane.f32.xlu0 %v6592_v57  ;;  %v4346_v43 = vcombine.low %v13785_v48, %v13788_v24 }
 0x425   :  { %v6195_v53 = vpop.xlane.xlu0 %6194 }
 0x426   :  { %10751 = vpow2.f32 %v6411_v56  ;;  %v6301_v5 = vsub.f32 %v13110_v2, %v6195_v53  ;;  %v4422_v2 = vrot.slane %v4414_v22, %v11313_v35  ;;  %v4354_v23 = vrot.slane %v4346_v43, %v11313_v35 }
 0x427   :  { %v4528_v53 = vpack.i.b16 %v4527_v62, %v4526_v45 }
 0x428   :  { %v6407_v6 = vmul.f32 1.442695, %v6301_v5  ;;  %v13809_v58 = vcombine.low %v4406_v61, %v4422_v2  ;;  %v13813_v42 = vcombine.low %v4338_v7, %v4354_v23  ;;  %v13831_v57 = vcombine.high %v4406_v61, %v4422_v2 }
 0x429   :  { %v6213_v54 = vpop.xlane.xlu0 %6212  ;;  %v13836_v5 = vcombine.high %v4338_v7, %v4354_v23 }
 0x42a   :  { %10753 = vpow2.f32 %v6407_v6  ;;  %v6307_v28 = vsub.f32 %v13120_v27, %v6213_v54  ;;  %v14515_v27 = vld [vmem:[#allocation62_spill] sm:$0xff]  ;;  %v4532_v39 = vpack.i.b16 %v13809_v58, %v13813_v42  ;;  %v4535_v61 = vshrl.u32 %v13809_v58, 16 }
 0x42b   :  { %v14517_v58 = vld [vmem:[#allocation66_spill] sm:$0xff] }
 0x42c   :  { %v10750_v8 = vpop.eup %10749  ;;  %v6419_v29 = vmul.f32 1.442695, %v6307_v28 }
 0x42d   :  { %v6207_v20 = vpop.xlane.xlu0 %6206  ;;  %v6565_v34 = vsel %vm4562_vm1, %v10750_v8, 0.0  ;;  %v6662_v25 = vpack.c.bf16 %v13728_v31, %v10750_v8  ;;  %v4331_v8 = vcombine.high %v13779_v37, %v13782_v21 }
 0x42e   :  { %10755 = vpow2.f32 %v6419_v29  ;;  %v6305_v44 = vsub.f32 %v14515_v27, %v6207_v20  ;;  %6566 = vadd.xlane.f32.xlu1 %v6565_v34  ;;  %v4347_v20 = vcombine.high %v13785_v48, %v13788_v24  ;;  %v4543_v27 = vshrl.u32 %v13831_v57, 16 }
 0x42f   :  { %10494 = vmatmul.mubr.msk.bf16.vlgmr.msra.gmra.mrb[120].mxu1 %vm4562_vm1, %v6662_v25 }
 0x430   :  { %v10752_v11 = vpop.eup %10751  ;;  %v6415_v12 = vmul.f32 1.442695, %v6305_v44  ;;  %10504 = vmatpush3.bf16.msra.mxu1 %v14516_v4  ;;  %10505 = vmatprep.mubr.msk.bf16.mxu1 %vm11049_vm0, %v14378_v0  ;;  %v13879_v44 = vrot.slane %v4347_v20, %v11313_v35 }
 0x431   :  { %v6219_v38 = vpop.xlane.xlu0 %6218  ;;  %v6583_v31 = vsel %vm4562_vm1, %v10752_v11, 0.0  ;;  %v6665_v51 = vpack.c.bf16 %v13736_v30, %v10752_v11  ;;  %10515 = vmatprep.subr.bf16.mxu1 %v14378_v0 }
 0x432   :  { %10757 = vpow2.f32 %v6415_v12  ;;  %v6309_v26 = vsub.f32 %v13156_v47, %v6219_v38  ;;  %6584 = vadd.xlane.f32.xlu1 %v6583_v31  ;;  %v14518_v12 = vld [vmem:[#allocation64_spill] sm:$0xff]  ;;  %v4542_v31 = vshrl.u32 %v13836_v5, 16 }
 0x433   :  { %10512 = vmatmul.mubr.msk.bf16.vlgmr.msra.gmra.mrb[112].mxu0 %vm4562_vm1, %v6665_v51  ;;  %10759 = vpow2.f32 %v6425_v10 }
 0x434   :  { %v10754_v46 = vpop.eup %10753  ;;  %v6423_v52 = vmul.f32 1.442695, %v6309_v26  ;;  %10522 = vmatpush3.bf16.msra.mxu0 %v4532_v39  ;;  %10523 = vmatprep.mubr.msk.bf16.mxu0 %vm11049_vm0, %v14378_v0 }
 0x435   :  { %v6228_v30 = vpop.xlane.xlu1 %6227  ;;  %v6225_v9 = vpop.xlane.xlu0 %6224  ;;  %v6577_v15 = vsel %vm4562_vm1, %v10754_v46, 0.0  ;;  %v6664_v47 = vpack.c.bf16 %v13744_v49, %v10754_v46  ;;  %10533 = vmatprep.subr.bf16.mxu0 %v14378_v0 }
 0x436   :  { %10761 = vpow2.f32 %v6423_v52  ;;  %v6312_v41 = vsub.f32 %v13154_v3, %v6228_v30  ;;  %v6311_v56 = vsub.f32 %v13151_v60, %v6225_v9  ;;  %6578 = vadd.xlane.f32.xlu1 %v6577_v15  ;;  %v4540_v60 = vpack.i.b16 %v13831_v57, %v13836_v5 }
 0x437   :  { %10506 = vmatmul.mubr.msk.bf16.vlgmr.msra.gmra.mrb[124].mxu1 %vm4562_vm1, %v6664_v47  ;;  %v4544_v47 = vpack.i.b16 %v4543_v27, %v4542_v31 }
 0x438   :  { %v10756_v32 = vpop.eup %10755  ;;  %v6429_v22 = vmul.f32 1.442695, %v6312_v41  ;;  %v6427_v6 = vmul.f32 1.442695, %v6311_v56  ;;  %10516 = vmatpush3.bf16.msra.mxu1 %v4528_v53  ;;  %10517 = vmatprep.mubr.msk.bf16.mxu1 %vm11049_vm0, %v14378_v0  ;;  %v14520_v53 = vld [vmem:[#allocation68_spill] sm:$0xff] }
 0x439   :  { %v6237_v49 = vpop.xlane.xlu1 %6236  ;;  %v6231_v40 = vpop.xlane.xlu0 %6230  ;;  %v6595_v43 = vsel %vm4562_vm1, %v10756_v32, 0.0  ;;  %v6667_v3 = vpack.c.bf16 %v13754_v36, %v10756_v32  ;;  %10527 = vmatprep.subr.bf16.mxu1 %v14378_v0  ;;  %v4534_v36 = vshrl.u32 %v13813_v42, 16 }
 0x43a   :  { %10763 = vpow2.f32 %v6429_v22  ;;  %v6315_v54 = vsub.f32 %v13172_v59, %v6237_v49  ;;  %v6313_v28 = vsub.f32 %v13178_v55, %v6231_v40  ;;  %6596 = vadd.xlane.f32.xlu1 %v6595_v43  ;;  %v4399_v59 = vcombine.high %v13764_v33, %v13767_v17  ;;  %v14521_v49 = vld [vmem:[#allocation65_spill] sm:$0xff] }
 0x43b   :  { %10765 = vpow2.f32 %v6427_v6  ;;  %10524 = vmatmul.mubr.msk.bf16.vlgmr.msra.gmra.mrb[116].mxu0 %vm4562_vm1, %v6667_v3  ;;  %v4415_v55 = vcombine.high %v13771_v50, %v13774_v63  ;;  %v4536_v33 = vpack.i.b16 %v4535_v61, %v4534_v36 }
 0x43c   :  { %v10758_v2 = vpop.eup %10757  ;;  %10534 = vmatpush3.bf16.msra.mxu0 %v4540_v60  ;;  %10535 = vmatprep.mubr.msk.bf16.mxu0 %vm11049_vm0, %v14378_v0  ;;  %v6435_v29 = vmul.f32 1.442695, %v6315_v54  ;;  %v6431_v34 = vmul.f32 1.442695, %v6313_v28  ;;  %v13871_v21 = vrot.slane %v4399_v59, %v11313_v35 }
 0x43d   :  { %v6243_v7 = vpop.xlane.xlu1 %6242  ;;  %v6234_v23 = vpop.xlane.xlu0 %6233  ;;  %v6589_v1 = vsel %vm4562_vm1, %v10758_v2, 0.0  ;;  %v6666_v16 = vpack.c.bf16 %v13761_v18, %v10758_v2  ;;  %10545 = vmatprep.subr.bf16.mxu0 %v14378_v0  ;;  %v13868_v18 = vrot.slane %v4331_v8, %v11313_v35  ;;  %v13874_v48 = vrot.slane %v4415_v55, %v11313_v35  ;;  %v14522_v55 = vld [vmem:[#allocation69_spill] sm:$0xff] }
 0x43e   :  { %v6314_v37 = vsub.f32 %v13188_v19, %v6234_v23  ;;  %6590 = vadd.xlane.f32.xlu1 %v6589_v1  ;;  %v10760_v17 = vpop.eup %10759  ;;  %10767 = vpow2.f32 %v6435_v29  ;;  %v6317_v11 = vsub.f32 %v14517_v58, %v6243_v7 }
 0x43f   :  { %10518 = vmatmul.mubr.msk.bf16.vlgmr.msra.gmra.mrb[128].mxu1 %vm4562_vm1, %v6666_v16  ;;  %10769 = vpow2.f32 %v6431_v34  ;;  %v4432_v51 = vcombine.low %v13871_v21, %v13874_v48  ;;  %v4364_v52 = vcombine.low %v13868_v18, %v13879_v44  ;;  %v6604_v22 = vsel %vm4562_vm1, %v10760_v17, 0.0 }
 0x440   :  { %v10762_v50 = vpop.eup %10761  ;;  %v6433_v63 = vmul.f32 1.442695, %v6314_v37  ;;  %10528 = vmatpush3.bf16.msra.mxu1 %v4536_v33  ;;  %10529 = vmatprep.mubr.msk.bf16.mxu1 %vm11049_vm0, %v14378_v0  ;;  %v6439_v30 = vmul.f32 1.442695, %v6317_v11  ;;  %v4433_v16 = vcombine.high %v13871_v21, %v13874_v48 }
 0x441   :  { %v6249_v19 = vpop.xlane.xlu1 %6248  ;;  %v6240_v24 = vpop.xlane.xlu0 %6239  ;;  %10539 = vmatprep.subr.bf16.mxu1 %v14378_v0  ;;  %v6668_v25 = vpack.c.bf16 %v10760_v17, %v10762_v50  ;;  %v4548_v56 = vpack.i.b16 %v4432_v51, %v4364_v52  ;;  %v6601_v43 = vsel %vm4562_vm1, %v10762_v50, 0.0  ;;  %v4551_v60 = vshrl.u32 %v4432_v51, 16 }
 0x442   :  { %v6319_v4 = vsub.f32 %v14518_v12, %v6249_v19  ;;  %v6316_v42 = vsub.f32 %v13176_v14, %v6240_v24  ;;  %10771 = vpow2.f32 %v6433_v63  ;;  %v14519_v14 = vld [vmem:[#allocation67_spill] sm:$0xff]  ;;  %v4550_v59 = vshrl.u32 %v4364_v52, 16 }
 0x443   :  { %v4365_v63 = vcombine.high %v13868_v18, %v13879_v44  ;;  %v4559_v58 = vshrl.u32 %v4433_v16, 16 }
 0x444   :  { %v10764_v10 = vpop.eup %10763  ;;  %v6437_v38 = vmul.f32 1.442695, %v6316_v42  ;;  %v6443_v26 = vmul.f32 1.442695, %v6319_v4  ;;  %v4552_v1 = vpack.i.b16 %v4551_v60, %v4550_v59 }
 0x445   :  { %v10766_v45 = vpop.eup %10765  ;;  %v6255_v39 = vpop.xlane.xlu1 %6254  ;;  %v6610_v62 = vsel %vm4562_vm1, %v10764_v10, 0.0  ;;  %v4556_v27 = vpack.i.b16 %v4433_v16, %v4365_v63  ;;  %v4558_v42 = vshrl.u32 %v4365_v63, 16 }
 0x446   :  { %v6246_v46 = vpop.xlane.xlu0 %6245  ;;  %6611 = vadd.xlane.f32.xlu0 %v6610_v62  ;;  %v6607_v15 = vsel %vm4562_vm1, %v10766_v45, 0.0  ;;  %10773 = vpow2.f32 %v6437_v38  ;;  %v6669_v57 = vpack.c.bf16 %v10764_v10, %v10766_v45  ;;  %v6321_v5 = vsub.f32 %v14520_v53, %v6255_v39 }
 0x447   :  { %v6318_v9 = vsub.f32 %v14519_v14, %v6246_v46  ;;  %6608 = vadd.xlane.f32.xlu1 %v6607_v15  ;;  %10530 = vmatmul.mubr.msk.bf16.vlgmr.msra.gmra.mrb[132].mxu1 %vm4562_vm1, %v6668_v25  ;;  %10775 = vpow2.f32 %v6443_v26  ;;  %v4560_v51 = vpack.i.b16 %v4559_v58, %v4558_v42 }
 0x448   :  { %10540 = vmatpush3.bf16.msra.mxu1 %v4544_v47  ;;  %10541 = vmatprep.mubr.msk.bf16.mxu1 %vm11049_vm0, %v14378_v0  ;;  %10777 = vpow2.f32 %v6439_v30  ;;  %v10768_v3 = vpop.eup %10767  ;;  %v6447_v2 = vmul.f32 1.442695, %v6321_v5 }
 0x449   :  { %v6441_v41 = vmul.f32 1.442695, %v6318_v9  ;;  %10536 = vmatmul.mubr.msk.bf16.vlgmr.msra.gmra.mrb[120].mxu0 %vm4562_vm1, %v6669_v57  ;;  %v6453_v32 = vpop.xlane.xlu1 %6452  ;;  %10551 = vmatprep.subr.bf16.mxu1 %v14378_v0  ;;  %v10770_v54 = vpop.eup %10769  ;;  %v6619_v7 = vsel %vm4562_vm1, %v10768_v3, 0.0 }
 0x44a   :  { %v6252_v6 = vpop.xlane.xlu0 %6251  ;;  %10546 = vmatpush3.bf16.msra.mxu0 %v4548_v56  ;;  %6605 = vadd.xlane.f32.xlu0 %v6604_v22  ;;  %v6613_v21 = vsel %vm4562_vm1, %v10770_v54, 0.0 }
 0x44b   :  { %v6320_v40 = vsub.f32 %v14521_v49, %v6252_v6  ;;  %10779 = vpow2.f32 %v6441_v41  ;;  %6602 = vadd.xlane.f32.xlu1 %v6601_v43  ;;  %10547 = vmatprep.mubr.msk.bf16.mxu0 %vm11049_vm0, %v14378_v0 }
 0x44c   :  { %10557 = vmatprep.subr.bf16.mxu0 %v14378_v0  ;;  %v10772_v61 = vpop.eup %10771 }
 0x44d   :  { %v6445_v28 = vmul.f32 1.442695, %v6320_v40  ;;  %v6465_v36 = vpop.xlane.xlu1 %6464  ;;  %v6670_v23 = vpack.c.bf16 %v10772_v61, %v10770_v54  ;;  %v6616_v38 = vsel %vm4562_vm1, %v10772_v61, 0.0 }
 0x44e   :  { %v6258_v8 = vpop.xlane.xlu0 %6257 }
 0x44f   :  { %10781 = vpow2.f32 %v6445_v28  ;;  %v6322_v29 = vsub.f32 %v14522_v55, %v6258_v8  ;;  %6620 = vadd.xlane.f32.xlu1 %v6619_v7  ;;  %v13908_v20 = vpop.f32.mrb[68].mxu0  ;;  %10542 = vmatmul.mubr.msk.bf16.vlgmr.msra.gmra.mrb[136].mxu1 %vm4562_vm1, %v6670_v23 }
 0x450   :  { %v10381_v37 = vpop.f32.mrb[69].mxu0  ;;  %v10774_v33 = vpop.eup %10773  ;;  %10783 = vpow2.f32 %v6447_v2  ;;  %10552 = vmatpush3.bf16.msra.mxu1 %v4552_v1  ;;  %10553 = vmatprep.mubr.msk.bf16.mxu1 %vm11049_vm0, %v14378_v0 }
 0x451   :  { %v6449_v34 = vmul.f32 1.442695, %v6322_v29  ;;  %v6459_v17 = vpop.xlane.xlu1 %6458  ;;  %v6622_v48 = vsel %vm4562_vm1, %v10774_v33, 0.0  ;;  %v6671_v19 = vpack.c.bf16 %v10774_v33, %v10768_v3  ;;  %10563 = vmatprep.subr.bf16.mxu1 %v14378_v0  ;;  %v6715_v24 = vpop.f32.mrb[70].mxu0 }
 0x452   :  { %v6456_v50 = vpop.xlane.xlu0 %6455  ;;  %v10776_v25 = vpop.eup %10775  ;;  %6623 = vadd.xlane.f32.xlu0 %v6622_v48 }
 0x453   :  { %10785 = vpow2.f32 %v6449_v34  ;;  %6614 = vadd.xlane.f32.xlu1 %v6613_v21  ;;  %v10382_v11 = vpop.f32.mrb[71].mxu0  ;;  %v10778_v18 = vpop.eup %10777  ;;  %10548 = vmatmul.mubr.msk.bf16.vlgmr.msra.gmra.mrb[124].mxu0 %vm4562_vm1, %v6671_v19  ;;  %v6631_v10 = vsel %vm4562_vm1, %v10776_v25, 0.0 }
 0x454   :  { %10787 = vrcp.f32 %v6453_v32  ;;  %10558 = vmatpush3.bf16.msra.mxu0 %v4556_v27  ;;  %10559 = vmatprep.mubr.msk.bf16.mxu0 %vm11049_vm0, %v14378_v0  ;;  %v6625_v14 = vsel %vm4562_vm1, %v10778_v18, 0.0 }
 0x455   :  { %10789 = vrcp.f32 %v6456_v50  ;;  %v10780_v44 = vpop.eup %10779  ;;  %v6477_v12 = vpop.xlane.xlu1 %6476 }
 0x456   :  { %v6468_v4 = vpop.xlane.xlu0 %6467  ;;  %10791 = vrcp.f32 %v6465_v36  ;;  %v6672_v31 = vpack.c.bf16 %v10780_v44, %v10778_v18  ;;  %6617 = vadd.xlane.f32.xlu0 %v6616_v38  ;;  %v6628_v22 = vsel %vm4562_vm1, %v10780_v44, 0.0 }
 0x457   :  { %10793 = vrcp.f32 %v6468_v4  ;;  %6632 = vadd.xlane.f32.xlu1 %v6631_v10  ;;  %v6800_v45 = vpop.f32.mrb[72].mxu0 }
 0x458   :  { %10554 = vmatmul.mubr.msk.bf16.vlgmr.msra.gmra.mrb[140].mxu1 %vm4562_vm1, %v6672_v31  ;;  %v10393_v39 = vpop.f32.mrb[73].mxu0  ;;  %10795 = vrcp.f32 %v6459_v17 }
 0x459   :  { %v10782_v26 = vpop.eup %10781  ;;  %10564 = vmatpush3.bf16.msra.mxu1 %v4560_v51  ;;  %v6471_v62 = vpop.xlane.xlu1 %6470  ;;  %10565 = vmatprep.mubr.msk.bf16.mxu1 %vm11049_vm0, %v14378_v0 }
 0x45a   :  { %v6462_v46 = vpop.xlane.xlu0 %6461  ;;  %v6634_v52 = vsel %vm4562_vm1, %v10782_v26, 0.0  ;;  %v6673_v30 = vpack.c.bf16 %v10782_v26, %v10776_v25  ;;  %v6803_v9 = vpop.f32.mrb[74].mxu0 }
 0x45b   :  { %v10784_v15 = vpop.eup %10783  ;;  %10797 = vrcp.f32 %v6462_v46  ;;  %6626 = vadd.xlane.f32.xlu1 %v6625_v14  ;;  %6635 = vadd.xlane.f32.xlu0 %v6634_v52  ;;  %v10394_v47 = vpop.f32.mrb[75].mxu0 }
 0x45c   :  { %10560 = vmatmul.mubr.msk.bf16.vlgmr.msra.gmra.mrb[128].mxu0 %vm4562_vm1, %v6673_v30  ;;  %10799 = vrcp.f32 %v6477_v12  ;;  %v6637_v0 = vsel %vm4562_vm1, %v10784_v15, 0.0  ;;  %v6756_v40 = vpop.f32.mrb[84].mxu1 }
 0x45d   :  { %v10786_v57 = vpop.eup %10785  ;;  %v6489_v32 = vpop.xlane.xlu1 %6488 }
 0x45e   :  { %v10788_v41 = vpop.eup %10787  ;;  %v6480_v56 = vpop.xlane.xlu0 %6479  ;;  %v6674_v53 = vpack.c.bf16 %v10786_v57, %v10784_v15  ;;  %v6640_v36 = vsel %vm4562_vm1, %v10786_v57, 0.0 }
 0x45f   :  { %v10790_v5 = vpop.eup %10789  ;;  %10801 = vrcp.f32 %v6480_v56  ;;  %6638 = vadd.xlane.f32.xlu1 %v6637_v0  ;;  %6629 = vadd.xlane.f32.xlu0 %v6628_v22  ;;  %v8147_v6 = vmul.f32 %v10788_v41, %v13908_v20  ;;  %v6888_v43 = vpop.f32.mrb[76].mxu0 }
 0x460   :  { %v8148_v49 = vmul.f32 %v10790_v5, %v6715_v24  ;;  %v10792_v3 = vpop.eup %10791  ;;  %10566 = vmatmul.mubr.msk.bf16.vlgmr.msra.gmra.mrb[144].mxu1 %vm4562_vm1, %v6674_v53  ;;  %v10387_v60 = vpop.f32.mrb[85].mxu1  ;;  %10803 = vrcp.f32 %v6471_v62 }
 0x461   :  { %v10405_v54 = vpop.f32.mrb[77].mxu0  ;;  %v10794_v28 = vpop.eup %10793  ;;  %v8151_v8 = vmul.f32 %v10792_v3, %v6800_v45 }
 0x462   :  { %v6474_v61 = vpop.xlane.xlu0 %6473  ;;  %v8211_v2 = vpack.c.bf16 %v8148_v49, %v8147_v6  ;;  %v8152_v59 = vmul.f32 %v10794_v28, %v6803_v9  ;;  %v6759_v55 = vpop.f32.mrb[86].mxu1 }
 0x463   :  { %v6891_v29 = vpop.f32.mrb[78].mxu0  ;;  %10805 = vrcp.f32 %v6474_v61  ;;  %6641 = vadd.xlane.f32.xlu0 %v6640_v36  ;;  %v10388_v7 = vpop.f32.mrb[87].mxu1 }
 0x464   :  { %v10406_v23 = vpop.f32.mrb[79].mxu0  ;;  %v10796_v1 = vpop.eup %10795  ;;  %v8213_v16 = vpack.c.bf16 %v8152_v59, %v8151_v8  ;;  %10807 = vrcp.f32 %v6489_v32  ;;  %v8247_v58 = vshrl.u32 %v8211_v2, 16 }
 0x465   :  { %v10798_v20 = vpop.eup %10797  ;;  %v6483_v37 = vpop.xlane.xlu1 %6482  ;;  %v8149_v33 = vmul.f32 %v10796_v1, %v6756_v40 }
 0x466   :  { %v6492_v34 = vpop.xlane.xlu0 %6491  ;;  %v8150_v17 = vmul.f32 %v10798_v20, %v6759_v55  ;;  %v6844_v50 = vpop.f32.mrb[88].mxu1  ;;  %v8255_v57 = vshrl.u32 %v8213_v16, 16 }
 0x467   :  { %10809 = vrcp.f32 %v6492_v34  ;;  %v10800_v63 = vpop.eup %10799  ;;  %v10399_v48 = vpop.f32.mrb[89].mxu1 }
 0x468   :  { %v8212_v21 = vpack.c.bf16 %v8150_v17, %v8149_v33  ;;  %v6976_v19 = vpop.f32.mrb[80].mxu0  ;;  %10811 = vrcp.f32 %v6483_v37  ;;  %v8155_v27 = vmul.f32 %v10800_v63, %v6888_v43  ;;  %v6847_v12 = vpop.f32.mrb[90].mxu1 }
 0x469   :  { %v10802_v24 = vpop.eup %10801  ;;  %v10417_v4 = vpop.f32.mrb[81].mxu0 }
 0x46a   :  { %v6486_v25 = vpop.xlane.xlu0 %6485  ;;  %v13934_v11 = vpack.i.b16 %v8212_v21, %v8211_v2  ;;  %v8248_v18 = vshrl.u32 %v8212_v21, 16  ;;  %v8156_v44 = vmul.f32 %v10802_v24, %v6891_v29  ;;  %v10400_v42 = vpop.f32.mrb[91].mxu1 }
 0x46b   :  { %10813 = vrcp.f32 %v6486_v25  ;;  %v6979_v10 = vpop.f32.mrb[82].mxu0  ;;  %v10804_v38 = vpop.eup %10803 }
 0x46c   :  { %v6501_v31 = vpop.xlane.xlu1 %6500  ;;  %v13936_v51 = vpack.i.b16 %v8248_v18, %v8247_v58  ;;  %v8215_v45 = vpack.c.bf16 %v8156_v44, %v8155_v27  ;;  %v10418_v26 = vpop.f32.mrb[83].mxu0  ;;  %v8153_v46 = vmul.f32 %v10804_v38, %v6844_v50 }
 0x46d   :  { %v10806_v39 = vpop.eup %10805  ;;  %v6932_v30 = vpop.f32.mrb[92].mxu1  ;;  %10815 = vrcp.f32 %v6501_v31 }
 0x46e   :  { %v6504_v62 = vpop.xlane.xlu0 %6503  ;;  %v8154_v52 = vmul.f32 %v10806_v39, %v6847_v12  ;;  %v10808_v14 = vpop.eup %10807  ;;  %v8263_v2 = vshrl.u32 %v8215_v45, 16 }
 0x46f   :  { %v10411_v15 = vpop.f32.mrb[93].mxu1  ;;  %v8159_v41 = vmul.f32 %v10808_v14, %v6976_v19  ;;  %10817 = vrcp.f32 %v6504_v62 }
 0x470   :  { %v8214_v9 = vpack.c.bf16 %v8154_v52, %v8153_v46  ;;  %v6495_v56 = vpop.xlane.xlu1 %6494  ;;  %v6935_v0 = vpop.f32.mrb[94].mxu1 }
 0x471   :  { %v10810_v47 = vpop.eup %10809  ;;  %v10412_v49 = vpop.f32.mrb[95].mxu1  ;;  %10819 = vrcp.f32 %v6495_v56 }
 0x472   :  { %v8253_v53 = vpack.i.b16 %v8214_v9, %v8213_v16  ;;  %v8256_v5 = vshrl.u32 %v8214_v9, 16  ;;  %v8160_v32 = vmul.f32 %v10810_v47, %v6979_v10  ;;  %v10812_v22 = vpop.eup %10811  ;;  %v6498_v6 = vpop.xlane.xlu0 %6497 }
 0x473   :  { %10821 = vrcp.f32 %v6498_v6  ;;  %v8157_v60 = vmul.f32 %v10812_v22, %v6932_v30 }
 0x474   :  { %v13938_v40 = vpack.i.b16 %v8256_v5, %v8255_v57  ;;  %v8217_v43 = vpack.c.bf16 %v8160_v32, %v8159_v41  ;;  %v6513_v55 = vpop.xlane.xlu1 %6512 }
 0x475   :  { %v10814_v3 = vpop.eup %10813  ;;  %10823 = vrcp.f32 %v6513_v55 }
 0x476   :  { %v8158_v54 = vmul.f32 %v10814_v3, %v6935_v0  ;;  %v6516_v37 = vpop.xlane.xlu0 %6515  ;;  %v8271_v42 = vshrl.u32 %v8217_v43, 16 }
 0x477   :  { %v10816_v61 = vpop.eup %10815  ;;  %10825 = vrcp.f32 %v6516_v37 }
 0x478   :  { %v8216_v28 = vpack.c.bf16 %v8158_v54, %v8157_v60  ;;  %v6507_v58 = vpop.xlane.xlu1 %6506 }
 0x479   :  { %v7064_v59 = vpop.f32.mrb[84].mxu0  ;;  %v10818_v23 = vpop.eup %10817  ;;  %10827 = vrcp.f32 %v6507_v58 }
 0x47a   :  { %v8261_v36 = vpack.i.b16 %v8216_v28, %v8215_v45  ;;  %v8264_v8 = vshrl.u32 %v8216_v28, 16  ;;  %v8163_v29 = vmul.f32 %v10816_v61, %v7064_v59  ;;  %v10429_v7 = vpop.f32.mrb[85].mxu0  ;;  %v6510_v12 = vpop.xlane.xlu0 %6509 }
 0x47b   :  { %v7067_v34 = vpop.f32.mrb[86].mxu0  ;;  %v10820_v21 = vpop.eup %10819 }
 0x47c   :  { %v8265_v1 = vpack.i.b16 %v8264_v8, %v8263_v2  ;;  %v8371_v16 = vcombine.low %v13934_v11, %v8261_v36  ;;  %v8372_v20 = vcombine.high %v13934_v11, %v8261_v36  ;;  %v8164_v33 = vmul.f32 %v10818_v23, %v7067_v34  ;;  %v10430_v50 = vpop.f32.mrb[87].mxu0  ;;  %v6525_v31 = vpop.xlane.xlu1 %6524 }
 0x47d   :  { %v7020_v63 = vpop.f32.mrb[96].mxu1  ;;  %v10822_v25 = vpop.eup %10821  ;;  %10829 = vrcp.f32 %v6525_v31 }
 0x47e   :  { %v8439_v17 = vcombine.low %v13936_v51, %v8265_v1  ;;  %v8440_v48 = vcombine.high %v13936_v51, %v8265_v1  ;;  %v13944_v19 = vpack.c.bf16 %v8164_v33, %v8163_v29  ;;  %v10423_v24 = vpop.f32.mrb[97].mxu1  ;;  %v8161_v18 = vmul.f32 %v10820_v21, %v7020_v63  ;;  %v6528_v46 = vpop.xlane.xlu0 %6527 }
 0x47f   :  { %v7023_v27 = vpop.f32.mrb[98].mxu1  ;;  %v8379_v39 = vrot.slane %v8371_v16, %v11302_v13  ;;  %v8386_v62 = vrot.slane %v8372_v20, %v11302_v13  ;;  %v10824_v57 = vpop.eup %10823  ;;  %10831 = vrcp.f32 %v6528_v46 }
 0x480   :  { %v8162_v44 = vmul.f32 %v10822_v25, %v7023_v27  ;;  %v10424_v11 = vpop.f32.mrb[99].mxu1  ;;  %v8447_v15 = vrot.slane %v8439_v17, %v11302_v13  ;;  %v8454_v41 = vrot.slane %v8440_v48, %v11302_v13  ;;  %10833 = vrcp.f32 %v6510_v12 }
 0x481   :  { %v10826_v0 = vpop.eup %10825 }
 0x482   :  { %v8218_v4 = vpack.c.bf16 %v8162_v44, %v8161_v18  ;;  %v6522_v55 = vpop.xlane.xlu0 %6521 }
 0x483   :  { %v10828_v50 = vpop.eup %10827 }
 0x484   :  { %v8269_v10 = vpack.i.b16 %v8218_v4, %v8217_v43  ;;  %v8272_v38 = vshrl.u32 %v8218_v4, 16 }
 0x486   :  { %v8273_v45 = vpack.i.b16 %v8272_v38, %v8271_v42  ;;  %v8387_v26 = vcombine.low %v8253_v53, %v8269_v10  ;;  %v8388_v51 = vcombine.high %v8253_v53, %v8269_v10  ;;  %v6540_v42 = vpop.xlane.xlu0 %6539 }
 0x487   :  { %v10830_v18 = vpop.eup %10829 }
 0x488   :  { %v8395_v52 = vrot.slane %v8387_v26, %v11302_v13  ;;  %v8402_v30 = vrot.slane %v8388_v51, %v11302_v13  ;;  %v8455_v14 = vcombine.low %v13938_v40, %v8273_v45  ;;  %v8456_v9 = vcombine.high %v13938_v40, %v8273_v45  ;;  %v7152_v47 = vpop.f32.mrb[88].mxu0  ;;  %v6519_v40 = vpop.xlane.xlu1 %6518 }
 0x489   :  { %v10441_v32 = vpop.f32.mrb[89].mxu0  ;;  %v8167_v43 = vmul.f32 %v10824_v57, %v7152_v47  ;;  %10835 = vrcp.f32 %v6519_v40 }
 0x48a   :  { %v8403_v56 = vcombine.low %v8379_v39, %v8395_v52  ;;  %v8404_v53 = vcombine.high %v8379_v39, %v8395_v52  ;;  %v8419_v5 = vcombine.low %v8386_v62, %v8402_v30  ;;  %v8420_v22 = vcombine.high %v8386_v62, %v8402_v30  ;;  %v7155_v3 = vpop.f32.mrb[90].mxu0  ;;  %v10832_v30 = vpop.eup %10831 }
 0x48b   :  { %v8463_v6 = vrot.slane %v8455_v14, %v11302_v13  ;;  %v8470_v49 = vrot.slane %v8456_v9, %v11302_v13  ;;  %v8168_v61 = vmul.f32 %v10826_v0, %v7155_v3  ;;  %v10442_v59 = vpop.f32.mrb[91].mxu0 }
 0x48c   :  { %v8411_v60 = vrot.slane %v8403_v56, %v11313_v35  ;;  %v8418_v54 = vrot.slane %v8404_v53, %v11313_v35  ;;  %v8427_v28 = vrot.slane %v8419_v5, %v11313_v35  ;;  %v8434_v2 = vrot.slane %v8420_v22, %v11313_v35  ;;  %v6537_v24 = vpop.xlane.xlu1 %6536  ;;  %v10834_v56 = vpop.eup %10833 }
 0x48d   :  { %v8471_v36 = vcombine.low %v8447_v15, %v8463_v6  ;;  %v8472_v8 = vcombine.high %v8447_v15, %v8463_v6  ;;  %v8487_v29 = vcombine.low %v8454_v41, %v8470_v49  ;;  %v8488_v7 = vcombine.high %v8454_v41, %v8470_v49 }
 0x48e   :  { %v13960_v23 = vpack.c.bf16 %v8168_v61, %v8167_v43  ;;  %v8915_v20 = vcombine.low %v8411_v60, %v8418_v54  ;;  %v9984_v34 = vcombine.high %v8411_v60, %v8418_v54  ;;  %v8931_v17 = vcombine.low %v8427_v28, %v8434_v2  ;;  %v6534_v54 = vpop.xlane.xlu0 %6533 }
 0x48f   :  { %v8479_v1 = vrot.slane %v8471_v36, %v11313_v35  ;;  %v8486_v16 = vrot.slane %v8472_v8, %v11313_v35  ;;  %v8495_v37 = vrot.slane %v8487_v29, %v11313_v35  ;;  %v8502_v33 = vrot.slane %v8488_v7, %v11313_v35 }
 0x490   :  { %v8922_v63 = vrot.slane %v8915_v20, %v11302_v13  ;;  %v8930_v21 = vrot.slane %v9984_v34, %v11302_v13  ;;  %v9985_v48 = vcombine.high %v8427_v28, %v8434_v2  ;;  %v8938_v25 = vrot.slane %v8931_v17, %v11302_v13  ;;  %v6531_v53 = vpop.xlane.xlu1 %6530 }
 0x491   :  { %v8983_v27 = vcombine.low %v8479_v1, %v8486_v16  ;;  %v9986_v58 = vcombine.high %v8479_v1, %v8486_v16  ;;  %v8999_v12 = vcombine.low %v8495_v37, %v8502_v33  ;;  %v9987_v4 = vcombine.high %v8495_v37, %v8502_v33 }
 0x492   :  { %v8946_v44 = vrot.slane %v9985_v48, %v11302_v13  ;;  %v8948_v11 = vcombine.high %v8922_v63, %v8930_v21  ;;  %v8947_v31 = vcombine.low %v8922_v63, %v8930_v21  ;;  %10837 = vrcp.f32 %v6537_v24 }
 0x493   :  { %v8990_v10 = vrot.slane %v8983_v27, %v11302_v13  ;;  %v8998_v38 = vrot.slane %v9986_v58, %v11302_v13  ;;  %v9006_v39 = vrot.slane %v8999_v12, %v11302_v13  ;;  %10839 = vrcp.f32 %v6522_v55  ;;  %v10836_v17 = vpop.eup %10835 }
 0x494   :  { %v7240_v45 = vpop.f32.mrb[92].mxu0  ;;  %v8962_v26 = vrot.slane %v8948_v11, %v11313_v35  ;;  %v8964_v51 = vcombine.high %v8938_v25, %v8946_v44  ;;  %v9014_v46 = vrot.slane %v9987_v4, %v11302_v13  ;;  %v8955_v47 = vrot.slane %v8947_v31, %v11313_v35 }
 0x495   :  { %v10453_v62 = vpop.f32.mrb[93].mxu0  ;;  %v9016_v52 = vcombine.high %v8990_v10, %v8998_v38  ;;  %v8963_v57 = vcombine.low %v8938_v25, %v8946_v44  ;;  %v9015_v41 = vcombine.low %v8990_v10, %v8998_v38  ;;  %v8171_v32 = vmul.f32 %v10830_v18, %v7240_v45 }
 0x496   :  { %v7108_v14 = vpop.f32.mrb[100].mxu1  ;;  %v7243_v9 = vpop.f32.mrb[94].mxu0  ;;  %v8978_v15 = vrot.slane %v8964_v51, %v11313_v35  ;;  %v9032_v6 = vcombine.high %v9006_v39, %v9014_v46  ;;  %10841 = vrcp.f32 %v6540_v42  ;;  %v9031_v8 = vcombine.low %v9006_v39, %v9014_v46 }
 0x497   :  { %v10435_v5 = vpop.f32.mrb[101].mxu1  ;;  %v8172_v0 = vmul.f32 %v10832_v30, %v7243_v9  ;;  %v9030_v22 = vrot.slane %v9016_v52, %v11313_v35  ;;  %v8165_v49 = vmul.f32 %v10828_v50, %v7108_v14  ;;  %v10454_v3 = vpop.f32.mrb[95].mxu0  ;;  %v8971_v60 = vrot.slane %v8963_v57, %v11313_v35 }
 0x498   :  { %v7111_v43 = vpop.f32.mrb[102].mxu1  ;;  %v8981_v40 = vcombine.low %v8962_v26, %v8978_v15  ;;  %v9046_v36 = vrot.slane %v9032_v6, %v11313_v35  ;;  %v9023_v55 = vrot.slane %v9015_v41, %v11313_v35  ;;  %v8982_v29 = vcombine.high %v8962_v26, %v8978_v15 }
 0x499   :  { %v8166_v28 = vmul.f32 %v10834_v56, %v7111_v43  ;;  %v10436_v61 = vpop.f32.mrb[103].mxu1  ;;  %v13979_v2 = vpack.c.bf16 %v8172_v0, %v8171_v32  ;;  %v8980_v59 = vcombine.high %v8955_v47, %v8971_v60  ;;  %v13983_v7 = vcombine.low %v8955_v47, %v8971_v60 }
 0x49a   :  { %10843 = vrcp.f32 %v6531_v53  ;;  %v9049_v16 = vcombine.low %v9030_v22, %v9046_v36  ;;  %v9039_v20 = vrot.slane %v9031_v8, %v11313_v35  ;;  %v8279_v34 = vshrl.u32 %v13944_v19, 16 }
 0x49b   :  { %v8220_v1 = vpack.c.bf16 %v8166_v28, %v8165_v49  ;;  %10845 = vrcp.f32 %v6534_v54  ;;  %v9474_v37 = vshrl.u32 %v8981_v40, 16  ;;  %v9050_v33 = vcombine.high %v9030_v22, %v9046_v36  ;;  %v6549_v22 = vpop.xlane.xlu1 %6548  ;;  %v6552_v54 = vpop.xlane.xlu0 %6551 }
 0x49c   :  { %v9473_v21 = vpack.i.b16 %v9049_v16, %v8981_v40  ;;  %v9475_v48 = vshrl.u32 %v9049_v16, 16  ;;  %v10838_v24 = vpop.eup %10837  ;;  %v9048_v27 = vcombine.high %v9023_v55, %v9039_v20  ;;  %v13990_v18 = vcombine.low %v9023_v55, %v9039_v20 }
 0x49d   :  { %v13988_v50 = vpack.i.b16 %v8220_v1, %v13944_v19  ;;  %v8280_v63 = vshrl.u32 %v8220_v1, 16  ;;  %v9479_v58 = vpack.i.b16 %v9050_v33, %v8982_v29  ;;  %v9462_v44 = vshrl.u32 %v13983_v7, 16  ;;  %v10840_v11 = vpop.eup %10839 }
 0x49e   :  { %v7196_v25 = vpop.f32.mrb[104].mxu1  ;;  %9579 = vrot.lane.b32.xlu0 %v9473_v21, %s11037_s1  ;;  %v9476_v42 = vpack.i.b16 %v9475_v48, %v9474_v37  ;;  %v9480_v19 = vshrl.u32 %v8982_v29, 16  ;;  %v9481_v10 = vshrl.u32 %v9050_v33, 16  ;;  %v9467_v45 = vpack.i.b16 %v9048_v27, %v8980_v59 }
 0x49f   :  { %v13993_v12 = vpack.i.b16 %v8280_v63, %v8279_v34  ;;  %v10447_v4 = vpop.f32.mrb[105].mxu1  ;;  %v9463_v26 = vshrl.u32 %v13990_v18, 16  ;;  %v9468_v51 = vshrl.u32 %v8980_v59, 16  ;;  %v9469_v39 = vshrl.u32 %v9048_v27, 16  ;;  %v6546_v1 = vpop.xlane.xlu0 %6545 }
 0x4a0   :  { %v7199_v38 = vpop.f32.mrb[106].mxu1  ;;  %v8169_v62 = vmul.f32 %v10836_v17, %v7196_v25  ;;  %v9482_v14 = vpack.i.b16 %v9481_v10, %v9480_v19  ;;  %v9461_v9 = vpack.i.b16 %v13990_v18, %v13983_v7  ;;  %v10842_v15 = vpop.eup %10841  ;;  %9563 = vrot.lane.b32.xlu1 %v9467_v45, %s11046_s16  ;;  %v8287_v6 = vshrl.u32 %v13960_v23, 16 }
 0x4a1   :  { %v7328_v31 = vpop.f32.mrb[96].mxu0  ;;  %v8170_v46 = vmul.f32 %v10840_v11, %v7199_v38  ;;  %v10448_v52 = vpop.f32.mrb[107].mxu1  ;;  %v9464_v57 = vpack.i.b16 %v9463_v26, %v9462_v44  ;;  %v9470_v41 = vpack.i.b16 %v9469_v39, %v9468_v51  ;;  %10847 = vrcp.f32 %v6549_v22 }
 0x4a2   :  { %v10465_v30 = vpop.f32.mrb[97].mxu0  ;;  %v8175_v53 = vmul.f32 %v10838_v24, %v7328_v31  ;;  %9595 = vrot.lane.b32.xlu0 %v9479_v58, %s11042_s3  ;;  %10849 = vrcp.f32 %v6552_v54  ;;  %v8295_v16 = vshrl.u32 %v13979_v2, 16 }
 0x4a3   :  { %v7331_v47 = vpop.f32.mrb[98].mxu0  ;;  %v8222_v56 = vpack.c.bf16 %v8170_v46, %v8169_v62  ;;  %v6564_v24 = vpop.xlane.xlu0 %6563 }
 0x4a4   :  { %v8176_v5 = vmul.f32 %v10842_v15, %v7331_v47  ;;  %v10466_v32 = vpop.f32.mrb[99].mxu0  ;;  %v10844_v0 = vpop.eup %10843  ;;  %9555 = vrot.lane.b32.xlu1 %v9464_v57, %s11047_s17 }
 0x4a5   :  { %v14003_v49 = vpack.i.b16 %v8222_v56, %v13960_v23  ;;  %v8288_v43 = vshrl.u32 %v8222_v56, 16  ;;  %v10846_v40 = vpop.eup %10845  ;;  %v6543_v23 = vpop.xlane.xlu1 %6542 }
 0x4a6   :  { %v14005_v3 = vpack.c.bf16 %v8176_v5, %v8175_v53  ;;  %v7284_v60 = vpop.f32.mrb[108].mxu1  ;;  %9571 = vrot.lane.b32.xlu0 %v9470_v41, %s11045_s15  ;;  %10851 = vrcp.f32 %v6543_v23 }
 0x4a7   :  { %v14008_v28 = vpack.i.b16 %v8288_v43, %v8287_v6  ;;  %v10459_v61 = vpop.f32.mrb[109].mxu1  ;;  %v8173_v8 = vmul.f32 %v10844_v0, %v7284_v60  ;;  %10853 = vrcp.f32 %v6546_v1  ;;  %v6558_v19 = vpop.xlane.xlu0 %6557 }
 0x4a8   :  { %v7287_v36 = vpop.f32.mrb[110].mxu1  ;;  %v8303_v41 = vshrl.u32 %v14005_v3, 16 }
 0x4a9   :  { %v8174_v59 = vmul.f32 %v10846_v40, %v7287_v36  ;;  %v10460_v55 = vpop.f32.mrb[111].mxu1  ;;  %v6561_v63 = vpop.xlane.xlu1 %6560 }
 0x4aa   :  { %9587 = vrot.lane.b32.xlu0 %v9476_v42, %s11044_s14  ;;  %10855 = vrcp.f32 %v6561_v63 }
 0x4ab   :  { %v8224_v29 = vpack.c.bf16 %v8174_v59, %v8173_v8  ;;  %10857 = vrcp.f32 %v6564_v24 }
 0x4ad   :  { %v8293_v20 = vpack.i.b16 %v8224_v29, %v13979_v2  ;;  %v8296_v34 = vshrl.u32 %v8224_v29, 16  ;;  %v10848_v2 = vpop.eup %10847  ;;  %v6555_v11 = vpop.xlane.xlu1 %6554 }
 0x4ae   :  { %9603 = vrot.lane.b32.xlu0 %v9482_v14, %s11043_s13  ;;  %v10850_v44 = vpop.eup %10849  ;;  %10859 = vrcp.f32 %v6555_v11  ;;  %v6576_v14 = vpop.xlane.xlu0 %6575 }
 0x4af   :  { %v14014_v37 = vpack.i.b16 %v8296_v34, %v8295_v16  ;;  %v8507_v33 = vcombine.low %v13988_v50, %v8293_v20  ;;  %v8508_v17 = vcombine.high %v13988_v50, %v8293_v20 }
 0x4b0   :  { %v10852_v31 = vpop.eup %10851 }
 0x4b1   :  { %v8575_v21 = vcombine.low %v13993_v12, %v14014_v37  ;;  %v8576_v48 = vcombine.high %v13993_v12, %v14014_v37  ;;  %v10854_v12 = vpop.eup %10853  ;;  %v6573_v51 = vpop.xlane.xlu1 %6572  ;;  %v8515_v54 = vrot.slane %v8507_v33, %v11302_v13  ;;  %v8522_v61 = vrot.slane %v8508_v17, %v11302_v13 }
 0x4b2   :  { %10861 = vrcp.f32 %v6573_v51 }
 0x4b3   :  { %10863 = vrcp.f32 %v6576_v14  ;;  %v8583_v16 = vrot.slane %v8575_v21, %v11302_v13  ;;  %v8590_v20 = vrot.slane %v8576_v48, %v11302_v13 }
 0x4b4   :  { %v10856_v30 = vpop.eup %10855  ;;  %10865 = vrcp.f32 %v6558_v19 }
 0x4b5   :  { %v7416_v25 = vpop.f32.mrb[100].mxu0  ;;  %v10858_v57 = vpop.eup %10857 }
 0x4b6   :  { %v8179_v27 = vmul.f32 %v10848_v2, %v7416_v25  ;;  %v10477_v58 = vpop.f32.mrb[101].mxu0 }
 0x4b7   :  { %v7419_v50 = vpop.f32.mrb[102].mxu0 }
 0x4b8   :  { %v8180_v4 = vmul.f32 %v10850_v44, %v7419_v50  ;;  %v10478_v42 = vpop.f32.mrb[103].mxu0  ;;  %v10860_v33 = vpop.eup %10859 }
 0x4ba   :  { %v14023_v10 = vpack.c.bf16 %v8180_v4, %v8179_v27 }
 0x4bc   :  { %v7372_v38 = vpop.f32.mrb[112].mxu1  ;;  %v10862_v2 = vpop.eup %10861 }
 0x4bd   :  { %v10471_v45 = vpop.f32.mrb[113].mxu1  ;;  %v8177_v39 = vmul.f32 %v10852_v31, %v7372_v38  ;;  %v10652_v38 = vld [vmem:[#allocation7 + $0x8] sm:$0xff]   ;;  %v10653_v31 = vld [vmem:[#allocation7 + $0x10] sm:$0xff]  }
 0x4be   :  { %v7375_v26 = vpop.f32.mrb[114].mxu1  ;;  %v10864_v45 = vpop.eup %10863 }
 0x4bf   :  { %v8178_v62 = vmul.f32 %v10854_v12, %v7375_v26  ;;  %v10472_v46 = vpop.f32.mrb[115].mxu1 }
 0x4c0   :  { %v7504_v52 = vpop.f32.mrb[104].mxu0 }
 0x4c1   :  { %v8226_v15 = vpack.c.bf16 %v8178_v62, %v8177_v39  ;;  %v10489_v47 = vpop.f32.mrb[105].mxu0  ;;  %v8183_v32 = vmul.f32 %v10856_v30, %v7504_v52 }
 0x4c2   :  { %v7507_v56 = vpop.f32.mrb[106].mxu0 }
 0x4c3   :  { %v8301_v53 = vpack.i.b16 %v8226_v15, %v14005_v3  ;;  %v8304_v5 = vshrl.u32 %v8226_v15, 16  ;;  %v8184_v0 = vmul.f32 %v10858_v57, %v7507_v56  ;;  %v10490_v22 = vpop.f32.mrb[107].mxu0  ;;  %v10866_v57 = vpop.eup %10865 }
 0x4c5   :  { %v8305_v6 = vpack.i.b16 %v8304_v5, %v8303_v41  ;;  %v8523_v43 = vcombine.low %v14003_v49, %v8301_v53  ;;  %v8524_v40 = vcombine.high %v14003_v49, %v8301_v53  ;;  %v14029_v60 = vpack.c.bf16 %v8184_v0, %v8183_v32  ;;  %v10651_v49 = vld [vmem:[#allocation7] sm:$0xff]   ;;  %v14049_v0 = vpop.xlane.xlu1 %6566 }
 0x4c6   :  { %10569 = vmatprep.subr.bf16.mxu0 %v10651_v49 }
 0x4c7   :  { %v8531_v36 = vrot.slane %v8523_v43, %v11302_v13  ;;  %v8538_v3 = vrot.slane %v8524_v40, %v11302_v13  ;;  %v8591_v8 = vcombine.low %v14008_v28, %v8305_v6  ;;  %v8592_v59 = vcombine.high %v14008_v28, %v8305_v6  ;;  %10570 = vmatpush3.bf16.msra.mxu0 %v10651_v49  ;;  %v10654_v49 = vld [vmem:[#allocation7 + $0x18] sm:$0xff]  }
 0x4c8   :  { %10571 = vmatprep.subr.bf16.mxu0 %v10652_v38 }
 0x4c9   :  { %v8539_v55 = vcombine.low %v8515_v54, %v8531_v36  ;;  %v8540_v23 = vcombine.high %v8515_v54, %v8531_v36  ;;  %v8555_v29 = vcombine.low %v8522_v61, %v8538_v3  ;;  %v8556_v1 = vcombine.high %v8522_v61, %v8538_v3 }
 0x4ca   :  { %v8599_v34 = vrot.slane %v8591_v8, %v11302_v13  ;;  %v8606_v37 = vrot.slane %v8592_v59, %v11302_v13 }
 0x4cb   :  { %v8547_v17 = vrot.slane %v8539_v55, %v11313_v35  ;;  %v8554_v63 = vrot.slane %v8540_v23, %v11313_v35  ;;  %v8563_v28 = vrot.slane %v8555_v29, %v11313_v35  ;;  %v8570_v24 = vrot.slane %v8556_v1, %v11313_v35  ;;  %10572 = vmatpush3.bf16.msra.mxu0 %v10652_v38 }
 0x4cc   :  { %v8607_v25 = vcombine.low %v8583_v16, %v8599_v34  ;;  %v8608_v27 = vcombine.high %v8583_v16, %v8599_v34  ;;  %v8623_v21 = vcombine.low %v8590_v20, %v8606_v37  ;;  %v8624_v58 = vcombine.high %v8590_v20, %v8606_v37  ;;  %v7592_v48 = vpop.f32.mrb[108].mxu0  ;;  %10573 = vmatprep.subr.bf16.mxu0 %v10653_v31 }
 0x4cd   :  { %v9051_v44 = vcombine.low %v8547_v17, %v8554_v63  ;;  %v9988_v50 = vcombine.high %v8547_v17, %v8554_v63  ;;  %v9067_v11 = vcombine.low %v8563_v28, %v8570_v24  ;;  %v9989_v4 = vcombine.high %v8563_v28, %v8570_v24  ;;  %v7460_v42 = vpop.f32.mrb[116].mxu1  ;;  %v10501_v19 = vpop.f32.mrb[109].mxu0 }
 0x4ce   :  { %v8615_v12 = vrot.slane %v8607_v25, %v11313_v35  ;;  %v8622_v26 = vrot.slane %v8608_v27, %v11313_v35  ;;  %v8631_v51 = vrot.slane %v8623_v21, %v11313_v35  ;;  %v8638_v39 = vrot.slane %v8624_v58, %v11313_v35  ;;  %v10483_v62 = vpop.f32.mrb[117].mxu1  ;;  %v7595_v46 = vpop.f32.mrb[110].mxu0 }
 0x4cf   :  { %v8181_v52 = vmul.f32 %v10860_v33, %v7460_v42  ;;  %v8187_v30 = vmul.f32 %v10862_v2, %v7592_v48  ;;  %v7463_v14 = vpop.f32.mrb[118].mxu1  ;;  %v8188_v15 = vmul.f32 %v10864_v45, %v7595_v46  ;;  %v10502_v47 = vpop.f32.mrb[111].mxu0  ;;  %v9058_v43 = vrot.slane %v9051_v44, %v11302_v13  ;;  %10574 = vmatpush3.bf16.msra.mxu0 %v10653_v31  ;;  %v10655_v44 = vld [vmem:[#allocation7 + $0x20] sm:$0xff]  }
 0x4d0   :  { %v9119_v41 = vcombine.low %v8615_v12, %v8622_v26  ;;  %v9990_v56 = vcombine.high %v8615_v12, %v8622_v26  ;;  %v9135_v53 = vcombine.low %v8631_v51, %v8638_v39  ;;  %v9991_v5 = vcombine.high %v8631_v51, %v8638_v39  ;;  %v10484_v32 = vpop.f32.mrb[119].mxu1  ;;  %10575 = vmatprep.subr.bf16.mxu0 %v10654_v49  ;;  %v14068_v24 = vpop.xlane.xlu1 %6584 }
 0x4d1   :  { %v8182_v22 = vmul.f32 %v10866_v57, %v7463_v14  ;;  %v14051_v6 = vpack.c.bf16 %v8188_v15, %v8187_v30  ;;  %v9066_v40 = vrot.slane %v9988_v50, %v11302_v13  ;;  %v9074_v54 = vrot.slane %v9067_v11, %v11302_v13  ;;  %v6570_v42 = vpop.xlane.xlu0 %6569 }
 0x4d2   :  { %v9082_v61 = vrot.slane %v9989_v4, %v11302_v13  ;;  %v9126_v36 = vrot.slane %v9119_v41, %v11302_v13  ;;  %v9134_v3 = vrot.slane %v9990_v56, %v11302_v13  ;;  %v9142_v55 = vrot.slane %v9135_v53, %v11302_v13 }
 0x4d3   :  { %v8228_v8 = vpack.c.bf16 %v8182_v22, %v8181_v52  ;;  %v9083_v59 = vcombine.low %v9058_v43, %v9066_v40  ;;  %v9150_v29 = vrot.slane %v9991_v5, %v11302_v13  ;;  %v8311_v16 = vshrl.u32 %v14023_v10, 16  ;;  %10576 = vmatpush3.bf16.msra.mxu0 %v10654_v49  ;;  %v10656_v52 = vld [vmem:[#allocation7 + $0x28] sm:$0xff]  }
 0x4d4   :  { %v9099_v23 = vcombine.low %v9074_v54, %v9082_v61  ;;  %v9151_v1 = vcombine.low %v9126_v36, %v9134_v3  ;;  %v9084_v28 = vcombine.high %v9058_v43, %v9066_v40  ;;  %v9100_v25 = vcombine.high %v9074_v54, %v9082_v61  ;;  %10577 = vmatprep.subr.bf16.mxu0 %v10655_v44  ;;  %v6579_v30 = vpop.xlane.xlu1 %6578  ;;  %v10657_v61 = vld [vmem:[#allocation7 + $0x30] sm:$0xff]  }
 0x4d5   :  { %v14063_v20 = vpack.i.b16 %v8228_v8, %v14023_v10  ;;  %v8312_v34 = vshrl.u32 %v8228_v8, 16  ;;  %v9091_v37 = vrot.slane %v9083_v59, %v11313_v35  ;;  %v9167_v63 = vcombine.low %v9142_v55, %v9150_v29  ;;  %v6588_v40 = vpop.xlane.xlu0 %6587  ;;  %v10658_v8 = vld [vmem:[#allocation7 + $0x38] sm:$0xff]  }
 0x4d6   :  { %v9107_v33 = vrot.slane %v9099_v23, %v11313_v35  ;;  %v9159_v17 = vrot.slane %v9151_v1, %v11313_v35  ;;  %v9152_v27 = vcombine.high %v9126_v36, %v9134_v3  ;;  %v9168_v21 = vcombine.high %v9142_v55, %v9150_v29 }
 0x4d7   :  { %v14070_v2 = vpack.i.b16 %v8312_v34, %v8311_v16  ;;  %v9175_v10 = vrot.slane %v9167_v63, %v11313_v35  ;;  %v9098_v50 = vrot.slane %v9084_v28, %v11313_v35  ;;  %v9114_v11 = vrot.slane %v9100_v25, %v11313_v35  ;;  %10578 = vmatpush3.bf16.msra.mxu0 %v10655_v44 }
 0x4d8   :  { %v9116_v58 = vcombine.high %v9091_v37, %v9107_v33  ;;  %v14073_v48 = vcombine.low %v9091_v37, %v9107_v33  ;;  %v9166_v4 = vrot.slane %v9152_v27, %v11313_v35  ;;  %v9182_v31 = vrot.slane %v9168_v21, %v11313_v35  ;;  %10579 = vmatprep.subr.bf16.mxu0 %v10656_v52  ;;  %v6597_v3 = vpop.xlane.xlu1 %6596 }
 0x4d9   :  { %v9184_v19 = vcombine.high %v9159_v17, %v9175_v10  ;;  %v14078_v38 = vcombine.low %v9159_v17, %v9175_v10  ;;  %v9117_v12 = vcombine.low %v9098_v50, %v9114_v11  ;;  %v9118_v26 = vcombine.high %v9098_v50, %v9114_v11  ;;  %v6582_v59 = vpop.xlane.xlu0 %6581 }
 0x4da   :  { %v9486_v45 = vshrl.u32 %v14073_v48, 16  ;;  %v9185_v62 = vcombine.low %v9166_v4, %v9182_v31  ;;  %v9186_v46 = vcombine.high %v9166_v4, %v9182_v31  ;;  %v9492_v15 = vshrl.u32 %v9116_v58, 16 }
 0x4db   :  { %v9491_v51 = vpack.i.b16 %v9184_v19, %v9116_v58  ;;  %v9487_v39 = vshrl.u32 %v14078_v38, 16  ;;  %v9498_v14 = vshrl.u32 %v9117_v12, 16  ;;  %v9493_v47 = vshrl.u32 %v9184_v19, 16  ;;  %10580 = vmatpush3.bf16.msra.mxu0 %v10656_v52 }
 0x4dc   :  { %v9497_v41 = vpack.i.b16 %v9185_v62, %v9117_v12  ;;  %v9499_v56 = vshrl.u32 %v9185_v62, 16  ;;  %v9503_v53 = vpack.i.b16 %v9186_v46, %v9118_v26  ;;  %v9504_v32 = vshrl.u32 %v9118_v26, 16  ;;  %10581 = vmatprep.subr.bf16.mxu0 %v10657_v61  ;;  %v6591_v55 = vpop.xlane.xlu1 %6590 }
 0x4dd   :  { %9565 = vrot.lane.b32.xlu1 %v9491_v51, %s11046_s16  ;;  %v9488_v57 = vpack.i.b16 %v9487_v39, %v9486_v45  ;;  %v9494_v5 = vpack.i.b16 %v9493_v47, %v9492_v15  ;;  %v9505_v22 = vshrl.u32 %v9186_v46, 16  ;;  %v9485_v43 = vpack.i.b16 %v14078_v38, %v14073_v48  ;;  %v6600_v23 = vpop.xlane.xlu0 %6599 }
 0x4de   :  { %v9500_v54 = vpack.i.b16 %v9499_v56, %v9498_v14  ;;  %10867 = vrcp.f32 %v6570_v42  ;;  %v8319_v31 = vshrl.u32 %v14029_v60, 16 }
 0x4df   :  { %9557 = vrot.lane.b32.xlu0 %v9488_v57, %s11047_s17  ;;  %v9506_v36 = vpack.i.b16 %v9505_v22, %v9504_v32  ;;  %10582 = vmatpush3.bf16.msra.mxu0 %v10657_v61  ;;  %10869 = vrcp.f32 %v14049_v0 }
 0x4e0   :  { %10583 = vmatprep.subr.bf16.mxu0 %v10658_v8  ;;  %v6609_v29 = vpop.xlane.xlu1 %6608  ;;  %10871 = vrcp.f32 %v6588_v40 }
 0x4e1   :  { %9581 = vrot.lane.b32.xlu1 %v9497_v41, %s11037_s1  ;;  %v6594_v1 = vpop.xlane.xlu0 %6593  ;;  %10873 = vrcp.f32 %v14068_v24 }
 0x4e2   :  { %10875 = vrcp.f32 %v6582_v59 }
 0x4e3   :  { %10584 = vmatpush3.bf16.msra.mxu0 %v10658_v8  ;;  %10877 = vrcp.f32 %v6579_v30 }
 0x4e4   :  { %v6603_v49 = vpop.xlane.xlu1 %6602  ;;  %10879 = vrcp.f32 %v6600_v23 }
 0x4e5   :  { %9597 = vrot.lane.b32.xlu1 %v9503_v53, %s11042_s3  ;;  %v6612_v16 = vpop.xlane.xlu0 %6611  ;;  %10881 = vrcp.f32 %v6597_v3 }
 0x4e6   :  { %10883 = vrcp.f32 %v6594_v1 }
 0x4e7   :  { %10885 = vrcp.f32 %v6591_v55 }
 0x4e8   :  { %v6621_v34 = vpop.xlane.xlu1 %6620  ;;  %v10868_v28 = vpop.eup %10867  ;;  %10887 = vrcp.f32 %v6612_v16 }
 0x4e9   :  { %9573 = vrot.lane.b32.xlu1 %v9494_v5, %s11045_s15  ;;  %v6606_v37 = vpop.xlane.xlu0 %6605  ;;  %v10870_v27 = vpop.eup %10869  ;;  %10889 = vrcp.f32 %v6609_v29 }
 0x4ea   :  { %v10872_v4 = vpop.eup %10871  ;;  %10891 = vrcp.f32 %v6606_v37 }
 0x4eb   :  { %v10874_v19 = vpop.eup %10873  ;;  %10893 = vrcp.f32 %v6603_v49 }
 0x4ec   :  { %v6615_v33 = vpop.xlane.xlu1 %6614  ;;  %v10876_v52 = vpop.eup %10875  ;;  %10895 = vrcp.f32 %v6621_v34 }
 0x4ed   :  { %9589 = vrot.lane.b32.xlu1 %v9500_v54, %s11044_s14  ;;  %v14094_v17 = vpop.xlane.xlu0 %6623  ;;  %v10878_v57 = vpop.eup %10877  ;;  %10897 = vrcp.f32 %v6615_v33 }
 0x4ee   :  { %v10880_v22 = vpop.eup %10879  ;;  %10899 = vrcp.f32 %v14094_v17 }
 0x4ef   :  { %v10882_v61 = vpop.eup %10881 }
 0x4f0   :  { %v6633_v58 = vpop.xlane.xlu1 %6632  ;;  %v10884_v34 = vpop.eup %10883 }
 0x4f1   :  { %9605 = vrot.lane.b32.xlu1 %v9506_v36, %s11043_s13  ;;  %v6618_v0 = vpop.xlane.xlu0 %6617  ;;  %v8327_v36 = vshrl.u32 %v14051_v6, 16  ;;  %10901 = vrcp.f32 %v6633_v58 }
 0x4f2   :  { %10903 = vrcp.f32 %v6618_v0 }
 0x4f4   :  { %v6627_v30 = vpop.xlane.xlu1 %6626 }
 0x4f5   :  { %v6636_v41 = vpop.xlane.xlu0 %6635  ;;  %10905 = vrcp.f32 %v6627_v30 }
 0x4f6   :  { %10907 = vrcp.f32 %v6636_v41 }
 0x4f8   :  { %v6639_v8 = vpop.xlane.xlu1 %6638 }
 0x4f9   :  { %v6630_v16 = vpop.xlane.xlu0 %6629  ;;  %10909 = vrcp.f32 %v6639_v8 }
 0x4fa   :  { %10911 = vrcp.f32 %v6630_v16 }
 0x502   :  { %v7548_v63 = vpop.f32.mrb[120].mxu1 }
 0x503   :  { %v10495_v25 = vpop.f32.mrb[121].mxu1  ;;  %v8185_v10 = vmul.f32 %v10870_v27, %v7548_v63 }
 0x504   :  { %v7551_v21 = vpop.f32.mrb[122].mxu1 }
 0x505   :  { %v8186_v44 = vmul.f32 %v10868_v28, %v7551_v21  ;;  %v10496_v50 = vpop.f32.mrb[123].mxu1 }
 0x506   :  { %v7680_v11 = vpop.f32.mrb[112].mxu0 }
 0x507   :  { %v8230_v24 = vpack.c.bf16 %v8186_v44, %v8185_v10  ;;  %v10513_v42 = vpop.f32.mrb[113].mxu0  ;;  %v8191_v51 = vmul.f32 %v10874_v19, %v7680_v11  ;;  %v6642_v19 = vpop.xlane.xlu0 %6641 }
 0x508   :  { %v7683_v45 = vpop.f32.mrb[114].mxu0  ;;  %10913 = vrcp.f32 %v6642_v19 }
 0x509   :  { %v14098_v12 = vpack.i.b16 %v8230_v24, %v14029_v60  ;;  %v8320_v26 = vshrl.u32 %v8230_v24, 16  ;;  %v8192_v39 = vmul.f32 %v10872_v4, %v7683_v45  ;;  %v10514_v62 = vpop.f32.mrb[115].mxu0 }
 0x50a   :  { %v7636_v46 = vpop.f32.mrb[124].mxu1 }
 0x50b   :  { %v14100_v14 = vpack.i.b16 %v8320_v26, %v8319_v31  ;;  %v14102_v15 = vpack.c.bf16 %v8192_v39, %v8191_v51  ;;  %v10507_v47 = vpop.f32.mrb[125].mxu1  ;;  %v8189_v60 = vmul.f32 %v10878_v57, %v7636_v46 }
 0x50c   :  { %v7639_v56 = vpop.f32.mrb[126].mxu1 }
 0x50d   :  { %v8190_v53 = vmul.f32 %v10876_v52, %v7639_v56  ;;  %v10508_v5 = vpop.f32.mrb[127].mxu1 }
 0x50e   :  { %v7768_v32 = vpop.f32.mrb[116].mxu0 }
 0x50f   :  { %v8232_v40 = vpack.c.bf16 %v8190_v53, %v8189_v60  ;;  %v10525_v54 = vpop.f32.mrb[117].mxu0  ;;  %v8195_v23 = vmul.f32 %v10882_v61, %v7768_v32 }
 0x510   :  { %v7771_v3 = vpop.f32.mrb[118].mxu0 }
 0x511   :  { %v8325_v59 = vpack.i.b16 %v8232_v40, %v14051_v6  ;;  %v8328_v55 = vshrl.u32 %v8232_v40, 16  ;;  %v8196_v29 = vmul.f32 %v10880_v22, %v7771_v3  ;;  %v10526_v1 = vpop.f32.mrb[119].mxu0  ;;  %v10886_v6 = vpop.eup %10885 }
 0x512   :  { %v7724_v37 = vpop.f32.mrb[128].mxu1  ;;  %v10888_v50 = vpop.eup %10887 }
 0x513   :  { %v8329_v63 = vpack.i.b16 %v8328_v55, %v8327_v36  ;;  %v8643_v49 = vcombine.low %v14063_v20, %v8325_v59  ;;  %v8644_v28 = vcombine.high %v14063_v20, %v8325_v59  ;;  %v14108_v25 = vpack.c.bf16 %v8196_v29, %v8195_v23  ;;  %v10519_v27 = vpop.f32.mrb[129].mxu1  ;;  %v9564_v24 = vpop.permute.xlu1 %9563 }
 0x514   :  { %v7727_v21 = vpop.f32.mrb[130].mxu1  ;;  %v8193_v11 = vmul.f32 %v10886_v6, %v7724_v37  ;;  %v10890_v20 = vpop.eup %10889 }
 0x515   :  { %v8711_v10 = vcombine.low %v14070_v2, %v8329_v63  ;;  %v8712_v33 = vcombine.high %v14070_v2, %v8329_v63  ;;  %v10520_v44 = vpop.f32.mrb[131].mxu1  ;;  %v8194_v4 = vmul.f32 %v10884_v34, %v7727_v21  ;;  %v10892_v42 = vpop.eup %10891  ;;  %v8335_v2 = vshrl.u32 %v14102_v15, 16 }
 0x516   :  { %v10894_v17 = vpop.eup %10893  ;;  %v8651_v39 = vrot.slane %v8643_v49, %v11302_v13  ;;  %v8658_v62 = vrot.slane %v8644_v28, %v11302_v13  ;;  %v8343_v46 = vshrl.u32 %v14108_v25, 16  ;;  %v14139_v28 = vpop.permute.xlu0 %9579 }
 0x517   :  { %v8234_v31 = vpack.c.bf16 %v8194_v4, %v8193_v11  ;;  %v14113_v58 = vpop.eup %10895  ;;  %v9556_v51 = vpop.permute.xlu1 %9555  ;;  %v8719_v53 = vrot.slane %v8711_v10, %v11302_v13  ;;  %v8726_v5 = vrot.slane %v8712_v33, %v11302_v13 }
 0x518   :  { %v10898_v30 = vpop.eup %10897 }
 0x519   :  { %v8333_v45 = vpack.i.b16 %v8234_v31, %v14102_v15  ;;  %v8336_v0 = vshrl.u32 %v8234_v31, 16  ;;  %v9613_v15 = vsel %vm4562_vm1, %v9461_v9, %v9556_v51  ;;  %v14128_v61 = vpop.eup %10899 }
 0x51a   :  { %v7812_v26 = vpop.f32.mrb[132].mxu1  ;;  %v14134_v9 = vpop.eup %10901  ;;  %v14137_v29 = vsel %vm9623_vm2, %v9613_v15, %v9564_v24 }
 0x51b   :  { %v10531_v52 = vpop.f32.mrb[133].mxu1  ;;  %v8337_v47 = vpack.i.b16 %v8336_v0, %v8335_v2  ;;  %v8659_v57 = vcombine.low %v14098_v12, %v8333_v45  ;;  %v8660_v41 = vcombine.high %v14098_v12, %v8333_v45  ;;  %v8197_v32 = vmul.f32 %v10894_v17, %v7812_v26  ;;  %v10904_v1 = vpop.eup %10903 }
 0x51c   :  { %v7856_v56 = vpop.f32.mrb[120].mxu0  ;;  %v7815_v60 = vpop.f32.mrb[134].mxu1 }
 0x51d   :  { %v10537_v22 = vpop.f32.mrb[121].mxu0  ;;  %v8198_v40 = vmul.f32 %v10892_v42, %v7815_v60  ;;  %v10532_v54 = vpop.f32.mrb[135].mxu1  ;;  %v8667_v36 = vrot.slane %v8659_v57, %v11302_v13  ;;  %v8674_v12 = vrot.slane %v8660_v41, %v11302_v13  ;;  %v8727_v3 = vcombine.low %v14100_v14, %v8337_v47 }
 0x51e   :  { %v8728_v7 = vcombine.high %v14100_v14, %v8337_v47  ;;  %v7859_v18 = vpop.f32.mrb[122].mxu0  ;;  %v8199_v8 = vmul.f32 %v10890_v20, %v7856_v56  ;;  %v14141_v27 = vpop.eup %10905 }
 0x51f   :  { %v8236_v59 = vpack.c.bf16 %v8198_v40, %v8197_v32  ;;  %v8200_v55 = vmul.f32 %v10888_v50, %v7859_v18  ;;  %v10538_v23 = vpop.f32.mrb[123].mxu0  ;;  %v8675_v16 = vcombine.low %v8651_v39, %v8667_v36  ;;  %v8676_v37 = vcombine.high %v8651_v39, %v8667_v36  ;;  %v14148_v10 = vpop.eup %10907 }
 0x520   :  { %v8691_v63 = vcombine.low %v8658_v62, %v8674_v12  ;;  %v8692_v49 = vcombine.high %v8658_v62, %v8674_v12  ;;  %v8735_v14 = vrot.slane %v8727_v3, %v11302_v13  ;;  %v8742_v34 = vrot.slane %v8728_v7, %v11302_v13  ;;  %v14154_v4 = vpop.eup %10909 }
 0x521   :  { %v14146_v21 = vpack.i.b16 %v8236_v59, %v14108_v25  ;;  %v8344_v6 = vshrl.u32 %v8236_v59, 16  ;;  %v8683_v33 = vrot.slane %v8675_v16, %v11313_v35  ;;  %v8690_v44 = vrot.slane %v8676_v37, %v11313_v35  ;;  %v10912_v25 = vpop.eup %10911 }
 0x522   :  { %v8699_v50 = vrot.slane %v8691_v63, %v11313_v35  ;;  %v8706_v11 = vrot.slane %v8692_v49, %v11313_v35  ;;  %v8743_v24 = vcombine.low %v8719_v53, %v8735_v14  ;;  %v8744_v20 = vcombine.high %v8719_v53, %v8735_v14  ;;  %v7900_v31 = vpop.f32.mrb[136].mxu1  ;;  %v14156_v51 = vpop.eup %10913 }
 0x523   :  { %v8759_v42 = vcombine.low %v8726_v5, %v8742_v34  ;;  %v8760_v19 = vcombine.high %v8726_v5, %v8742_v34  ;;  %v9187_v17 = vcombine.low %v8683_v33, %v8690_v44  ;;  %v9992_v2 = vcombine.high %v8683_v33, %v8690_v44  ;;  %v10543_v26 = vpop.f32.mrb[137].mxu1  ;;  %v14164_v5 = vpop.permute.xlu0 %9595 }
 0x524   :  { %v9203_v45 = vcombine.low %v8699_v50, %v8706_v11  ;;  %v9993_v0 = vcombine.high %v8699_v50, %v8706_v11  ;;  %v8751_v39 = vrot.slane %v8743_v24, %v11313_v35  ;;  %v8758_v62 = vrot.slane %v8744_v20, %v11313_v35  ;;  %v7903_v57 = vpop.f32.mrb[138].mxu1 }
 0x525   :  { %v8767_v52 = vrot.slane %v8759_v42, %v11313_v35  ;;  %v8774_v47 = vrot.slane %v8760_v19, %v11313_v35  ;;  %v14162_v41 = vpack.i.b16 %v8344_v6, %v8343_v46  ;;  %v8237_v56 = vpack.c.bf16 %v8200_v55, %v8199_v8  ;;  %v10544_v53 = vpop.f32.mrb[139].mxu1 }
 0x526   :  { %v8201_v60 = vmul.f32 %v10898_v30, %v7900_v31  ;;  %v8202_v15 = vmul.f32 %v10904_v1, %v7903_v57  ;;  %v9255_v32 = vcombine.low %v8751_v39, %v8758_v62  ;;  %v9994_v22 = vcombine.high %v8751_v39, %v8758_v62  ;;  %v7944_v36 = vpop.f32.mrb[124].mxu0 }
 0x527   :  { %v9271_v40 = vcombine.low %v8767_v52, %v8774_v47  ;;  %v9995_v54 = vcombine.high %v8767_v52, %v8774_v47  ;;  %v8351_v12 = vshrl.u32 %v8237_v56, 16  ;;  %v8203_v7 = vmul.f32 %v14113_v58, %v7944_v36  ;;  %v10549_v18 = vpop.f32.mrb[125].mxu0  ;;  %v9572_v42 = vpop.permute.xlu0 %9571 }
 0x528   :  { %v8238_v3 = vpack.c.bf16 %v8202_v15, %v8201_v60  ;;  %v9194_v59 = vrot.slane %v9187_v17, %v11302_v13  ;;  %v7947_v46 = vpop.f32.mrb[126].mxu0  ;;  %v9202_v30 = vrot.slane %v9992_v2, %v11302_v13  ;;  %v9210_v8 = vrot.slane %v9203_v45, %v11302_v13 }
 0x529   :  { %v9218_v55 = vrot.slane %v9993_v0, %v11302_v13  ;;  %v9262_v23 = vrot.slane %v9255_v32, %v11302_v13  ;;  %v8204_v37 = vmul.f32 %v14128_v61, %v7947_v46  ;;  %v10550_v63 = vpop.f32.mrb[127].mxu0  ;;  %v9270_v58 = vrot.slane %v9994_v22, %v11302_v13 }
 0x52a   :  { %v14172_v1 = vpack.i.b16 %v8238_v3, %v8237_v56  ;;  %v8352_v16 = vshrl.u32 %v8238_v3, 16  ;;  %v9219_v14 = vcombine.low %v9194_v59, %v9202_v30  ;;  %v9278_v6 = vrot.slane %v9271_v40, %v11302_v13 }
 0x52b   :  { %v7988_v49 = vpop.f32.mrb[140].mxu1  ;;  %v9235_v34 = vcombine.low %v9210_v8, %v9218_v55  ;;  %v9286_v33 = vrot.slane %v9995_v54, %v11302_v13  ;;  %v8239_v50 = vpack.c.bf16 %v8204_v37, %v8203_v7  ;;  %v9287_v20 = vcombine.low %v9262_v23, %v9270_v58 }
 0x52c   :  { %v14178_v44 = vpack.i.b16 %v8352_v16, %v8351_v12  ;;  %v8205_v11 = vmul.f32 %v14141_v27, %v7988_v49  ;;  %v10555_v24 = vpop.f32.mrb[141].mxu1  ;;  %v9227_v19 = vrot.slane %v9219_v14, %v11313_v35  ;;  %v9220_v2 = vcombine.high %v9194_v59, %v9202_v30  ;;  %v9588_v30 = vpop.permute.xlu0 %9587 }
 0x52d   :  { %v7991_v61 = vpop.f32.mrb[142].mxu1  ;;  %v9243_v31 = vrot.slane %v9235_v34, %v11313_v35  ;;  %v9303_v17 = vcombine.low %v9278_v6, %v9286_v33  ;;  %v8359_v45 = vshrl.u32 %v8239_v50, 16  ;;  %v9295_v39 = vrot.slane %v9287_v20, %v11313_v35 }
 0x52e   :  { %v8206_v0 = vmul.f32 %v10912_v25, %v7991_v61  ;;  %v10556_v26 = vpop.f32.mrb[143].mxu1  ;;  %v9236_v62 = vcombine.high %v9210_v8, %v9218_v55  ;;  %v9234_v57 = vrot.slane %v9220_v2, %v11313_v35  ;;  %v9288_v56 = vcombine.high %v9262_v23, %v9270_v58 }
 0x52f   :  { %v8032_v52 = vpop.f32.mrb[128].mxu0  ;;  %v9252_v47 = vcombine.high %v9227_v19, %v9243_v31  ;;  %v9311_v27 = vrot.slane %v9303_v17, %v11313_v35  ;;  %v9304_v22 = vcombine.high %v9278_v6, %v9286_v33  ;;  %v14189_v36 = vcombine.low %v9227_v19, %v9243_v31 }
 0x530   :  { %v8240_v60 = vpack.c.bf16 %v8206_v0, %v8205_v11  ;;  %v8207_v15 = vmul.f32 %v14134_v9, %v8032_v52  ;;  %v10561_v53 = vpop.f32.mrb[129].mxu0  ;;  %v9250_v32 = vrot.slane %v9236_v62, %v11313_v35  ;;  %v9302_v54 = vrot.slane %v9288_v56, %v11313_v35  ;;  %v9604_v2 = vpop.permute.xlu0 %9603 }
 0x531   :  { %v8035_v40 = vpop.f32.mrb[130].mxu0  ;;  %v9320_v25 = vcombine.high %v9295_v39, %v9311_v27  ;;  %v14191_v12 = vcombine.low %v9295_v39, %v9311_v27  ;;  %v9318_v55 = vrot.slane %v9304_v22, %v11313_v35  ;;  %v9634_v16 = vsel %vm9632_vm3, %v14137_v29, %v9572_v42 }
 0x532   :  { %v8357_v3 = vpack.i.b16 %v8240_v60, %v8239_v50  ;;  %v8360_v7 = vshrl.u32 %v8240_v60, 16  ;;  %v8208_v18 = vmul.f32 %v14148_v10, %v8035_v40  ;;  %v10562_v59 = vpop.f32.mrb[131].mxu0  ;;  %v9253_v46 = vcombine.low %v9234_v57, %v9250_v32 }
 0x533   :  { %v9515_v9 = vpack.i.b16 %v9320_v25, %v9252_v47  ;;  %v8076_v8 = vpop.f32.mrb[144].mxu1  ;;  %v9254_v23 = vcombine.high %v9234_v57, %v9250_v32  ;;  %v9321_v34 = vcombine.low %v9302_v54, %v9318_v55  ;;  %v9322_v6 = vcombine.high %v9302_v54, %v9318_v55 }
 0x534   :  { %v8361_v37 = vpack.i.b16 %v8360_v7, %v8359_v45  ;;  %v8779_v63 = vcombine.low %v14146_v21, %v8357_v3  ;;  %v8780_v58 = vcombine.high %v14146_v21, %v8357_v3  ;;  %v8241_v49 = vpack.c.bf16 %v8208_v18, %v8207_v15  ;;  %v10567_v14 = vpop.f32.mrb[145].mxu1 }
 0x535   :  { %9567 = vrot.lane.b32.xlu0 %v9515_v9, %s11046_s16  ;;  %v8079_v10 = vpop.f32.mrb[146].mxu1  ;;  %v9643_v29 = vsel %vm9641_vm4, %v9634_v16, %v14139_v28  ;;  %v8209_v21 = vmul.f32 %v14154_v4, %v8076_v8  ;;  %v9521_v20 = vpack.i.b16 %v9321_v34, %v9253_v46  ;;  %v9523_v42 = vshrl.u32 %v9321_v34, 16 }
 0x536   :  { %v8847_v33 = vcombine.low %v14162_v41, %v8361_v37  ;;  %v8848_v50 = vcombine.high %v14162_v41, %v8361_v37  ;;  %v10568_v11 = vpop.f32.mrb[147].mxu1  ;;  %v8210_v24 = vmul.f32 %v14156_v51, %v8079_v10  ;;  %v9522_v61 = vshrl.u32 %v9253_v46, 16 }
 0x537   :  { %v9527_v19 = vpack.i.b16 %v9322_v6, %v9254_v23  ;;  %v9510_v31 = vshrl.u32 %v14189_v36, 16  ;;  %v9511_v17 = vshrl.u32 %v14191_v12, 16  ;;  %v9652_v41 = vsel %vm9650_vm5, %v9643_v29, %v9588_v30 }
 0x538   :  { %v8242_v45 = vpack.c.bf16 %v8210_v24, %v8209_v21  ;;  %v9516_v28 = vshrl.u32 %v9252_v47, 16  ;;  %v9517_v0 = vshrl.u32 %v9320_v25, 16  ;;  %v8367_v26 = vshrl.u32 %v8241_v49, 16 }
 0x539   :  { %9583 = vrot.lane.b32.xlu0 %v9521_v20, %s11037_s1  ;;  %v9512_v4 = vpack.i.b16 %v9511_v17, %v9510_v31  ;;  %v9661_v51 = vsel %vm9659_vm6, %v9652_v41, %v14164_v5  ;;  %v9524_v39 = vpack.i.b16 %v9523_v42, %v9522_v61  ;;  %v9528_v56 = vshrl.u32 %v9254_v23, 16 }
 0x53a   :  { %v8365_v62 = vpack.i.b16 %v8242_v45, %v8241_v49  ;;  %v8368_v52 = vshrl.u32 %v8242_v45, 16  ;;  %v9518_v27 = vpack.i.b16 %v9517_v0, %v9516_v28  ;;  %v9670_v57 = vsel %vm9668_vm7, %v9661_v51, %v9604_v2 }
 0x53b   :  { %10585 = vmatprep.mubr.bf16.mxu0 %v9670_v57  ;;  %v9529_v60 = vshrl.u32 %v9322_v6, 16  ;;  %v9509_v15 = vpack.i.b16 %v14191_v12, %v14189_v36  ;;  %v8787_v5 = vrot.slane %v8779_v63, %v11302_v13  ;;  %v8794_v22 = vrot.slane %v8780_v58, %v11302_v13 }
 0x53c   :  { %v8369_v53 = vpack.i.b16 %v8368_v52, %v8367_v26  ;;  %v8795_v47 = vcombine.low %v14172_v1, %v8365_v62  ;;  %v8796_v32 = vcombine.high %v14172_v1, %v8365_v62  ;;  %v8855_v1 = vrot.slane %v8847_v33, %v11302_v13 }
 0x53d   :  { %9599 = vrot.lane.b32.xlu0 %v9527_v19, %s11042_s3  ;;  %v9530_v40 = vpack.i.b16 %v9529_v60, %v9528_v56  ;;  %v8862_v9 = vrot.slane %v8848_v50, %v11302_v13 }
 0x53e   :  { %v8803_v25 = vrot.slane %v8795_v47, %v11302_v13  ;;  %v8810_v54 = vrot.slane %v8796_v32, %v11302_v13  ;;  %v8863_v3 = vcombine.low %v14178_v44, %v8369_v53  ;;  %v8864_v7 = vcombine.high %v14178_v44, %v8369_v53 }
 0x540   :  { %v8811_v18 = vcombine.low %v8787_v5, %v8803_v25  ;;  %v8812_v59 = vcombine.high %v8787_v5, %v8803_v25  ;;  %v8827_v46 = vcombine.low %v8794_v22, %v8810_v54  ;;  %v8828_v30 = vcombine.high %v8794_v22, %v8810_v54 }
 0x541   :  { %9559 = vrot.lane.b32.xlu0 %v9512_v4, %s11047_s17  ;;  %v8871_v8 = vrot.slane %v8863_v3, %v11302_v13  ;;  %v8878_v55 = vrot.slane %v8864_v7, %v11302_v13 }
 0x542   :  { %v8819_v23 = vrot.slane %v8811_v18, %v11313_v35  ;;  %v8826_v16 = vrot.slane %v8812_v59, %v11313_v35  ;;  %v8835_v44 = vrot.slane %v8827_v46, %v11313_v35  ;;  %v8842_v37 = vrot.slane %v8828_v30, %v11313_v35 }
 0x543   :  { %v8879_v63 = vcombine.low %v8855_v1, %v8871_v8  ;;  %v8880_v58 = vcombine.high %v8855_v1, %v8871_v8  ;;  %v8895_v49 = vcombine.low %v8862_v9, %v8878_v55  ;;  %v8896_v14 = vcombine.high %v8862_v9, %v8878_v55 }
 0x544   :  { %v9323_v10 = vcombine.low %v8819_v23, %v8826_v16  ;;  %v9996_v34 = vcombine.high %v8819_v23, %v8826_v16  ;;  %v9339_v6 = vcombine.low %v8835_v44, %v8842_v37  ;;  %v9997_v33 = vcombine.high %v8835_v44, %v8842_v37 }
 0x545   :  { %9575 = vrot.lane.b32.xlu0 %v9518_v27, %s11045_s15  ;;  %v8887_v50 = vrot.slane %v8879_v63, %v11313_v35  ;;  %v8894_v11 = vrot.slane %v8880_v58, %v11313_v35  ;;  %v8903_v29 = vrot.slane %v8895_v49, %v11313_v35  ;;  %v8910_v21 = vrot.slane %v8896_v14, %v11313_v35 }
 0x546   :  { %v9330_v24 = vrot.slane %v9323_v10, %v11302_v13  ;;  %v9338_v20 = vrot.slane %v9996_v34, %v11302_v13  ;;  %v9346_v42 = vrot.slane %v9339_v6, %v11302_v13  ;;  %v9354_v61 = vrot.slane %v9997_v33, %v11302_v13 }
 0x547   :  { %v9391_v19 = vcombine.low %v8887_v50, %v8894_v11  ;;  %v9998_v31 = vcombine.high %v8887_v50, %v8894_v11  ;;  %v9407_v17 = vcombine.low %v8903_v29, %v8910_v21  ;;  %v9999_v2 = vcombine.high %v8903_v29, %v8910_v21 }
 0x548   :  { %v9355_v45 = vcombine.low %v9330_v24, %v9338_v20  ;;  %v9371_v41 = vcombine.low %v9346_v42, %v9354_v61  ;;  %v9356_v28 = vcombine.high %v9330_v24, %v9338_v20  ;;  %v9372_v0 = vcombine.high %v9346_v42, %v9354_v61 }
 0x549   :  { %9591 = vrot.lane.b32.xlu0 %v9524_v39, %s11044_s14  ;;  %v9398_v26 = vrot.slane %v9391_v19, %v11302_v13  ;;  %v9406_v4 = vrot.slane %v9998_v31, %v11302_v13  ;;  %v9414_v51 = vrot.slane %v9407_v17, %v11302_v13  ;;  %v9422_v62 = vrot.slane %v9999_v2, %v11302_v13 }
 0x54a   :  { %v9363_v52 = vrot.slane %v9355_v45, %v11313_v35  ;;  %v9379_v27 = vrot.slane %v9371_v41, %v11313_v35  ;;  %v9370_v57 = vrot.slane %v9356_v28, %v11313_v35  ;;  %v9386_v39 = vrot.slane %v9372_v0, %v11313_v35 }
 0x54b   :  { %v9423_v56 = vcombine.low %v9398_v26, %v9406_v4  ;;  %v9439_v60 = vcombine.low %v9414_v51, %v9422_v62  ;;  %v9424_v53 = vcombine.high %v9398_v26, %v9406_v4  ;;  %v9440_v47 = vcombine.high %v9414_v51, %v9422_v62 }
 0x54c   :  { %v9388_v32 = vcombine.high %v9363_v52, %v9379_v27  ;;  %v9389_v5 = vcombine.low %v9370_v57, %v9386_v39  ;;  %v9390_v22 = vcombine.high %v9370_v57, %v9386_v39  ;;  %v14252_v25 = vcombine.low %v9363_v52, %v9379_v27 }
 0x54d   :  { %9607 = vrot.lane.b32.xlu0 %v9530_v40, %s11043_s13  ;;  %v9431_v13 = vrot.slane %v9423_v56, %v11313_v35  ;;  %v9447_v54 = vrot.slane %v9439_v60, %v11313_v35  ;;  %v9438_v3 = vrot.slane %v9424_v53, %v11313_v35  ;;  %v9454_v7 = vrot.slane %v9440_v47, %v11313_v35 }
 0x54e   :  { %v9546_v9 = vshrl.u32 %v9389_v5, 16  ;;  %v9534_v40 = vshrl.u32 %v14252_v25, 16  ;;  %v9540_v8 = vshrl.u32 %v9388_v32, 16  ;;  %v9552_v58 = vshrl.u32 %v9390_v22, 16 }
 0x54f   :  { %v9456_v18 = vcombine.high %v9431_v13, %v9447_v54  ;;  %v9566_v59 = vpop.permute.xlu1 %9565  ;;  %v9457_v46 = vcombine.low %v9438_v3, %v9454_v7  ;;  %v9458_v30 = vcombine.high %v9438_v3, %v9454_v7  ;;  %v9455_v1 = vcombine.low %v9431_v13, %v9447_v54  ;;  %v10000_v3 = vld [vmem:[#allocation8] ss:$0 sm:$0xff] }
 0x551   :  { %v9539_v55 = vpack.i.b16 %v9456_v18, %v9388_v32  ;;  %v9545_v23 = vpack.i.b16 %v9457_v46, %v9389_v5  ;;  %v9547_v16 = vshrl.u32 %v9457_v46, 16  ;;  %v9551_v44 = vpack.i.b16 %v9458_v30, %v9390_v22  ;;  %v9558_v50 = vpop.permute.xlu0 %9557 }
 0x552   :  { %v9535_v37 = vshrl.u32 %v9455_v1, 16  ;;  %v9541_v63 = vshrl.u32 %v9456_v18, 16  ;;  %v9553_v49 = vshrl.u32 %v9458_v30, 16  ;;  %v9533_v10 = vpack.i.b16 %v9455_v1, %v14252_v25 }
 0x553   :  { %9569 = vrot.lane.b32.xlu1 %v9539_v55, %s11046_s16  ;;  %v9582_v35 = vpop.permute.xlu1 %9581  ;;  %v9548_v14 = vpack.i.b16 %v9547_v16, %v9546_v9  ;;  %v9616_v29 = vsel %vm4562_vm1, %v9485_v43, %v9558_v50 }
 0x554   :  { %v9536_v34 = vpack.i.b16 %v9535_v37, %v9534_v40  ;;  %v9542_v6 = vpack.i.b16 %v9541_v63, %v9540_v8  ;;  %v9554_v33 = vpack.i.b16 %v9553_v49, %v9552_v58  ;;  %v9627_v24 = vsel %vm9623_vm2, %v9616_v29, %v9566_v59 }
 0x557   :  { %9585 = vrot.lane.b32.xlu1 %v9545_v23, %s11037_s1  ;;  %v9598_v11 = vpop.permute.xlu1 %9597  ;;  %s11052_s1 = smov [#allocation10]  }
 0x558   :  { %s9830_s18 = sshll.u32 %s11052_s1, 4  ;;  %s9831_s18 = int_to_ptr.vmem [resolvable:$true] %s9830_s18 }
 0x559   :  { %s11003_s19 = scalar_lea.vmem %s9831_s18, 1024  ;;  %p11008_p5 = scmp.lt.s32.totalorder %s9831_s18, %s9831_s18 }
 0x55a   :  { %p11004_p4 = scmp.ne.s32.totalorder %s9831_s18, %s11003_s19  ;;  %p11009_p6 = scmp.lt.s32.totalorder %s11003_s19, %s11003_s19 }
 0x55b   :  { %9601 = vrot.lane.b32.xlu1 %v9551_v44, %s11042_s3  ;;  %v9574_v21 = vpop.permute.xlu1 %9573 }
 0x55c   :  { %v9636_v20 = vsel %vm9632_vm3, %v9627_v24, %v9574_v21  ;;  %p11010_p7 = por %p11009_p6, %p11008_p5 }
 0x55d   :  { %v9645_v61 = vsel %vm9641_vm4, %v9636_v20, %v9582_v35 }
 0x55e   :  { %p11011_p8 = pnand %p11010_p7, %p11004_p4 }
 0x55f   :  { %9561 = vrot.lane.b32.xlu1 %v9536_v34, %s11047_s17  ;;  %v9590_v42 = vpop.permute.xlu1 %9589 }
 0x560   :  { %v9654_v19 = vsel %vm9650_vm5, %v9645_v61, %v9590_v42 }
 0x561   :  { %v9663_v48 = vsel %vm9659_vm6, %v9654_v19, %v9598_v11 }
 0x563   :  { %9577 = vrot.lane.b32.xlu1 %v9542_v6, %s11045_s15  ;;  %v9606_v31 = vpop.permute.xlu1 %9605 }
 0x564   :  { %v9673_v38 = vsel %vm9668_vm7, %v9663_v48, %v9606_v31 }
 0x565   :  { %10586 = vmatmul.mubr.bf16.vlgmr.msra.gmra.mrb[132].mxu0 %v9673_v38 }
 0x567   :  { %9593 = vrot.lane.b32.xlu1 %v9548_v14, %s11044_s14 }
 0x56b   :  { %9609 = vrot.lane.b32.xlu1 %v9554_v33, %s11043_s13 }
 0x5a7   :  { %v9568_v43 = vpop.permute.xlu0 %9567 }
 0x5ab   :  { %v9584_v17 = vpop.permute.xlu0 %9583 }
 0x5af   :  { %v9600_v2 = vpop.permute.xlu0 %9599 }
 0x5b3   :  { %v9560_v45 = vpop.permute.xlu0 %9559 }
 0x5b4   :  { %v9619_v41 = vsel %vm4562_vm1, %v9509_v15, %v9560_v45 }
 0x5b5   :  { %v9629_v0 = vsel %vm9623_vm2, %v9619_v41, %v9568_v43 }
 0x5b7   :  { %v9576_v28 = vpop.permute.xlu0 %9575 }
 0x5b8   :  { %v9638_v26 = vsel %vm9632_vm3, %v9629_v0, %v9576_v28 }
 0x5b9   :  { %v9647_v51 = vsel %vm9641_vm4, %v9638_v26, %v9584_v17 }
 0x5bb   :  { %v9592_v4 = vpop.permute.xlu0 %9591 }
 0x5bc   :  { %v9656_v62 = vsel %vm9650_vm5, %v9647_v51, %v9592_v4 }
 0x5bd   :  { %v9665_v27 = vsel %vm9659_vm6, %v9656_v62, %v9600_v2 }
 0x5bf   :  { %v9608_v52 = vpop.permute.xlu0 %9607 }
 0x5c0   :  { %v9676_v57 = vsel %vm9668_vm7, %v9665_v27, %v9608_v52 }
 0x5c1   :  { %10589 = vmatprep.mubr.bf16.mxu0 %v9676_v57 }
 0x5c5   :  { %v9570_v39 = vpop.permute.xlu1 %9569 }
 0x5c9   :  { %v9586_v36 = vpop.permute.xlu1 %9585 }
 0x5cd   :  { %v9602_v12 = vpop.permute.xlu1 %9601 }
 0x5d1   :  { %v9562_v15 = vpop.permute.xlu1 %9561 }
 0x5d2   :  { %v9622_v56 = vsel %vm4562_vm1, %v9533_v10, %v9562_v15 }
 0x5d3   :  { %v9631_v53 = vsel %vm9623_vm2, %v9622_v56, %v9570_v39 }
 0x5d5   :  { %v9578_v60 = vpop.permute.xlu1 %9577 }
 0x5d6   :  { %v9640_v47 = vsel %vm9632_vm3, %v9631_v53, %v9578_v60 }
 0x5d7   :  { %v9649_v5 = vsel %vm9641_vm4, %v9640_v47, %v9586_v36 }
 0x5d9   :  { %v9594_v32 = vpop.permute.xlu1 %9593 }
 0x5da   :  { %v9658_v22 = vsel %vm9650_vm5, %v9649_v5, %v9594_v32 }
 0x5db   :  { %v9667_v13 = vsel %vm9659_vm6, %v9658_v22, %v9602_v12 }
 0x5dd   :  { %v9610_v25 = vpop.permute.xlu1 %9609 }
 0x5de   :  { %v9679_v54 = vsel %vm9668_vm7, %v9667_v13, %v9610_v25 }
 0x5df   :  { %10590 = vmatmul.mubr.bf16.gmra.mrb[136].mxu0 %v9679_v54 }
 0x638   :  { %v10587_v7 = vpop.f32.mrb[132].mxu0 }
 0x639   :  { %v9795_v18 = vadd.f32 %v10587_v7, %v10000_v3  ;;  %v9786_v59 = vpop.f32.mrb[133].mxu0 }
 0x63a   :  { %v9787_v46 = vadd.f32 %v10000_v3, %v9786_v59  ;;  %v10588_v30 = vpop.f32.mrb[134].mxu0 }
 0x63b   :  { %9819 = vst [vmem:[#allocation10 + $0x10] sm:$0xff] %v9795_v18  ;;  %v9798_v1 = vadd.f32 %v10588_v30, %v10000_v3  ;;  %v9789_v9 = vpop.f32.mrb[135].mxu0 }
 0x63c   :  { %9817 = vst [vmem:[#allocation10] sm:$0xff] %v9787_v46  ;;  %v9790_v40 = vadd.f32 %v10000_v3, %v9789_v9 }
 0x63d   :  { %9820 = vst [vmem:[#allocation10 + $0x18] sm:$0xff] %v9798_v1 }
 0x63e   :  { %9818 = vst [vmem:[#allocation10 + $0x8] sm:$0xff] %v9790_v40 }
 0x6b2   :  { %v10591_v8 = vpop.f32.mrb[136].mxu0 }
 0x6b3   :  { %v9811_v55 = vadd.f32 %v10591_v8, %v10000_v3  ;;  %v9802_v23 = vpop.f32.mrb[137].mxu0 }
 0x6b4   :  { %v9803_v16 = vadd.f32 %v10000_v3, %v9802_v23  ;;  %v10592_v44 = vpop.f32.mrb[138].mxu0 }
 0x6b5   :  { %9823 = vst [vmem:[#allocation10 + $0x30] sm:$0xff] %v9811_v55  ;;  %v9814_v37 = vadd.f32 %v10592_v44, %v10000_v3  ;;  %v9805_v63 = vpop.f32.mrb[139].mxu0 }
 0x6b6   :  { %9821 = vst [vmem:[#allocation10 + $0x20] sm:$0xff] %v9803_v16  ;;  %v9806_v58 = vadd.f32 %v10000_v3, %v9805_v63 }
 0x6b7   :  { %9824 = vst [vmem:[#allocation10 + $0x38] sm:$0xff] %v9814_v37 }
 0x6b8   :  { %9822 = vst [vmem:[#allocation10 + $0x28] sm:$0xff] %v9806_v58 }
 0x6b9   :  { %11014 = shalt.err (!%p11011_p8)
}
 0x6ba   :  { %s11015_s22 = scalar_lea.hbm %s14310_s4, 1024 }
 0x6bb   :  { %p11016_p9 = scmp.ne.s32.totalorder %s14310_s4, %s11015_s22  ;;  %p11019_p10 = scmp.lt.u32.totalorder %s11015_s22, %s14310_s4 }
 0x6bd   :  { %p11021_p11 = pnand %p11019_p10, %p11016_p9 }
 0x6bf   :  { %11024 = shalt.err (!%p11021_p11)
}
 0x6c0   :  { %s11053_s0 = smov 128   ;;  %s11054_s27 = smov 8  }
 0x6c1   :  { %9836 = dma.vmem_to_hbm [thread:$0]  %s9831_s18, 1024, %s14310_s4, [#allocation4], %s11053_s0, %s11053_s0, %s11054_s27  }
 0x6c2   :  { %11031 = dma.done.wait [#allocation4], 1024  }
 0x6c3   :  { %11032 = vsyncadd [#allocation4], 4294966272 }
 0x6c4   :  { %9840 = vsyncpa [#allocation3], 1 }
 0x6c5   :  { %9841 = vsyncpa [#allocation6], 1 }
 0x6c6   :  { %9842 = vsyncpa [#allocation9], 1 }
 0x6c7   :  { %9843 = vsyncpa [#allocation4], 1 }

// kernel: tpu_custom_call.1
= control target key start
LH: loop header
LB: loop body
LE: loop exit
PB: predicated region body
PF: predicated region fallthrough
CT: control target
= control target key end

     0   :  { %9 = vsyncpa [#allocation3], 0  ;;  %s14306_s0 = inlined_call_operand.hbm [shape: bf16[4,16,128], index: 0, kind: input, shape index: {}]   ;;  %s14307_s1 = inlined_call_operand.hbm [shape: bf16[128,384], index: 1, kind: input, shape index: {}]   ;;  %s14308_s2 = inlined_call_operand.hbm [shape: bf16[128,128], index: 2, kind: input, shape index: {}]   ;;  %s14309_s3 = inlined_call_operand.hbm [shape: f32[1,128], index: 3, kind: input, shape index: {}]   ;;  %s14310_s4 = inlined_call_operand.hbm [shape: f32[4,16,128], index: 4, kind: output, shape index: {}]  }
   0x1   :  { %10 = vsyncpa [#allocation6], 0 }
   0x2   :  { %11 = vsyncpa [#allocation9], 0 }
   0x3   :  { %12 = vsyncpa [#allocation4], 0  ;;  %s11033_s15 = smov [#allocation5]   ;;  %s10915_s19 = scalar_lea.hbm %s14307_s1, 3072 }
   0x4   :  { %s30_s16 = sshll.u32 %s11033_s15, 4  ;;  %p10916_p0 = scmp.ne.s32.totalorder %s14307_s1, %s10915_s19  ;;  %s31_s16 = int_to_ptr.vmem [resolvable:$true] %s30_s16 }
   0x5   :  { %p10919_p1 = scmp.lt.u32.totalorder %s10915_s19, %s14307_s1 }
   0x7   :  { %p10921_p2 = pnand %p10919_p1, %p10916_p0 }
   0x9   :  { %10924 = shalt.err (!%p10921_p2)
}
   0xa   :  { %s10925_s24 = scalar_lea.vmem %s31_s16, 3072  ;;  %p10930_p4 = scmp.lt.s32.totalorder %s31_s16, %s31_s16 }
   0xb   :  { %p10926_p3 = scmp.ne.s32.totalorder %s31_s16, %s10925_s24  ;;  %p10931_p5 = scmp.lt.s32.totalorder %s10925_s24, %s10925_s24 }
   0xd   :  { %p10932_p6 = por %p10931_p5, %p10930_p4 }
   0xf   :  { %p10933_p7 = pnand %p10932_p6, %p10926_p3 }
  0x11   :  { %10936 = shalt.err (!%p10933_p7)
}
  0x12   :  { %s11034_s25 = smov 192   ;;  %s11035_s26 = smov 12  }
  0x13   :  { %36 = dma.hbm_to_vmem [thread:$0]  %s14307_s1, 3072, %s31_s16, [#allocation6], %s11034_s25, %s11034_s25, %s11035_s26  }
  0x14   :  { %s11036_s29 = smov [#allocation2]   ;;  %s10937_s7 = scalar_lea.hbm %s14306_s0, 512 }
  0x15   :  { %s18_s30 = sshll.u32 %s11036_s29, 4  ;;  %p10938_p8 = scmp.ne.s32.totalorder %s14306_s0, %s10937_s7  ;;  %s19_s30 = int_to_ptr.vmem [resolvable:$true] %s18_s30 }
  0x16   :  { %p10941_p9 = scmp.lt.u32.totalorder %s10937_s7, %s14306_s0 }
  0x18   :  { %p10943_p10 = pnand %p10941_p9, %p10938_p8 }
  0x1a   :  { %10946 = shalt.err (!%p10943_p10)
}
  0x1b   :  { %s10947_s12 = scalar_lea.vmem %s19_s30, 512  ;;  %p10952_p12 = scmp.lt.s32.totalorder %s19_s30, %s19_s30 }
  0x1c   :  { %p10948_p11 = scmp.ne.s32.totalorder %s19_s30, %s10947_s12  ;;  %p10953_p13 = scmp.lt.s32.totalorder %s10947_s12, %s10947_s12 }
  0x1e   :  { %p10954_p0 = por %p10953_p13, %p10952_p12 }
  0x20   :  { %p10955_p1 = pnand %p10954_p0, %p10948_p11 }
  0x22   :  { %10958 = shalt.err (!%p10955_p1)
}
  0x23   :  { %s11037_s1 = smov 64   ;;  %s11038_s13 = smov 4  }
  0x24   :  { %24 = dma.hbm_to_vmem [thread:$0]  %s14306_s0, 512, %s19_s30, [#allocation3], %s11037_s1, %s11037_s1, %s11038_s13  }
  0x25   :  { %s11039_s16 = smov [#allocation7]   ;;  %s11040_s18 = smov [#allocation8]  }
  0x26   :  { %s42_s17 = sshll.u32 %s11039_s16, 4  ;;  %s55_s19 = sshll.u32 %s11040_s18, 4  ;;  %s43_s17 = int_to_ptr.vmem [resolvable:$true] %s42_s17  ;;  %s56_s19 = int_to_ptr.vmem [resolvable:$true] %s55_s19 }
  0x27   :  { %s10959_s22 = scalar_lea.hbm %s14308_s2, 1024 }
  0x28   :  { %p10960_p2 = scmp.ne.s32.totalorder %s14308_s2, %s10959_s22  ;;  %p10963_p3 = scmp.lt.u32.totalorder %s10959_s22, %s14308_s2 }
  0x2a   :  { %p10965_p4 = pnand %p10963_p3, %p10960_p2 }
  0x2c   :  { %10968 = shalt.err (!%p10965_p4)
}
  0x2d   :  { %s10969_s0 = scalar_lea.vmem %s43_s17, 1024  ;;  %p10974_p6 = scmp.lt.s32.totalorder %s43_s17, %s43_s17 }
  0x2e   :  { %p10970_p5 = scmp.ne.s32.totalorder %s43_s17, %s10969_s0  ;;  %p10975_p7 = scmp.lt.s32.totalorder %s10969_s0, %s10969_s0 }
  0x30   :  { %p10976_p8 = por %p10975_p7, %p10974_p6 }
  0x32   :  { %p10977_p9 = pnand %p10976_p8, %p10970_p5 }
  0x34   :  { %10980 = shalt.err (!%p10977_p9)
}
  0x35   :  { %48 = dma.hbm_to_vmem [thread:$0]  %s14308_s2, 1024, %s43_s17, [#allocation6], %s11037_s1, %s11037_s1, %s11038_s13  }
  0x36   :  { %s10981_s5 = scalar_lea.hbm %s14309_s3, 16 }
  0x37   :  { %p10982_p10 = scmp.ne.s32.totalorder %s14309_s3, %s10981_s5  ;;  %p10985_p11 = scmp.lt.u32.totalorder %s10981_s5, %s14309_s3 }
  0x39   :  { %p10987_p12 = pnand %p10985_p11, %p10982_p10 }
  0x3b   :  { %10990 = shalt.err (!%p10987_p12)
}
  0x3c   :  { %s10991_s10 = scalar_lea.vmem %s56_s19, 16  ;;  %s10995_s11 = scalar_lea.vmem %s56_s19, 32 }
  0x3d   :  { %p10992_p13 = scmp.ne.s32.totalorder %s56_s19, %s10991_s10  ;;  %p10996_p0 = scmp.lt.s32.totalorder %s56_s19, %s56_s19 }
  0x3e   :  { %p10997_p1 = scmp.lt.s32.totalorder %s10995_s11, %s10991_s10 }
  0x40   :  { %p10998_p2 = por %p10997_p1, %p10996_p0 }
  0x42   :  { %p10999_p3 = pnand %p10998_p2, %p10992_p13 }
  0x44   :  { %11002 = shalt.err (!%p10999_p3)
}
  0x45   :  { %58 = dma.hbm_to_vmem [thread:$0]  %s14309_s3, 16, %s56_s19, [#allocation9]  }
  0x46   :  { %11025 = dma.done.wait [#allocation3], 512  }
  0x47   :  { %11026 = vsyncadd [#allocation3], 4294966784 }
  0x48   :  { %11027 = dma.done.wait [#allocation6], 4096  }
  0x49   :  { %11028 = vsyncadd [#allocation6], 4294963200 }
  0x4a   :  { %11029 = dma.done.wait [#allocation9], 16  }
  0x4b   :  { %11030 = vsyncadd [#allocation9], 4294967280  ;;  %v11041_v0 = vmov 0   ;;  %v10615_v1 = vld [vmem:[#allocation5 + $0x4] ss:$12 sps:$4 sm:$0xff]   ;;  %v10640_v25 = vld [vmem:[#allocation2 + $0x8] sm:$0xff]  }
  0x4c   :  { %296 = vmatprep.mubr.bf16.mxu1 %v11041_v0  ;;  %v10617_v2 = vld [vmem:[#allocation5] ss:$12 sps:$4 sm:$0xff]   ;;  %264 = vmatprep.subr.bf16.mxu1 %v10615_v1  ;;  %v10618_v3 = vld [vmem:[#allocation5 + $0x1c] ss:$12 sps:$4 sm:$0xff]   ;;  %v10620_v4 = vld [vmem:[#allocation5 + $0x18] ss:$12 sps:$4 sm:$0xff]  }
  0x4d   :  { %265 = vmatpush1.bf16.msra.mxu1 %v10617_v2  ;;  %v10621_v5 = vld [vmem:[#allocation5 + $0x34] ss:$12 sps:$4 sm:$0xff]   ;;  %v10623_v6 = vld [vmem:[#allocation5 + $0x30] ss:$12 sps:$4 sm:$0xff]   ;;  %v10624_v7 = vld [vmem:[#allocation5 + $0x4c] ss:$12 sps:$4 sm:$0xff]   ;;  %v607_v2 = vlaneseq }
  0x4e   :  { %266 = vmatprep.subr.bf16.mxu1 %v10618_v3  ;;  %v10626_v8 = vld [vmem:[#allocation5 + $0x48] ss:$12 sps:$4 sm:$0xff]   ;;  %v10639_v9 = vld [vmem:[#allocation2] sm:$0xff]   ;;  %v10635_v18 = vld [vmem:[#allocation5 + $0x90] ss:$12 sps:$4 sm:$0xff]   ;;  %s11042_s3 = smov 96  }
  0x4f   :  { %v10627_v10 = vld [vmem:[#allocation5 + $0x64] ss:$12 sps:$4 sm:$0xff]   ;;  %v10629_v11 = vld [vmem:[#allocation5 + $0x60] ss:$12 sps:$4 sm:$0xff]   ;;  %10177 = vmatprep.mubr.bf16.mxu0 %v10639_v9  ;;  %v10630_v12 = vld [vmem:[#allocation5 + $0x7c] ss:$12 sps:$4 sm:$0xff]  }
  0x50   :  { %v10643_v13 = vld [vmem:[#allocation5 + $0x8] ss:$12 sps:$4 sm:$0xff]   ;;  %v10644_v14 = vld [vmem:[#allocation5 + $0x20] ss:$12 sps:$4 sm:$0xff]   ;;  %v10632_v15 = vld [vmem:[#allocation5 + $0x78] ss:$12 sps:$4 sm:$0xff]  }
  0x51   :  { %267 = vmatpush1.bf16.msra.mxu1 %v10620_v4  ;;  %10161 = vmatprep.subr.bf16.mxu0 %v10643_v13  ;;  %v10645_v16 = vld [vmem:[#allocation5 + $0x38] ss:$12 sps:$4 sm:$0xff]   ;;  %v10633_v17 = vld [vmem:[#allocation5 + $0x94] ss:$12 sps:$4 sm:$0xff]   ;;  %v10646_v20 = vld [vmem:[#allocation5 + $0x50] ss:$12 sps:$4 sm:$0xff]  }
  0x52   :  { %268 = vmatprep.subr.bf16.mxu1 %v10621_v5  ;;  %10162 = vmatpush3.bf16.msra.mxu0 %v10643_v13  ;;  %v10636_v19 = vld [vmem:[#allocation5 + $0xac] ss:$12 sps:$4 sm:$0xff]   ;;  %v10638_v21 = vld [vmem:[#allocation5 + $0xa8] ss:$12 sps:$4 sm:$0xff]   ;;  %v10650_v26 = vld [vmem:[#allocation5 + $0xb0] ss:$12 sps:$4 sm:$0xff]  }
  0x53   :  { %10163 = vmatprep.subr.bf16.mxu0 %v10644_v14  ;;  %v10647_v22 = vld [vmem:[#allocation5 + $0x68] ss:$12 sps:$4 sm:$0xff]   ;;  %v10648_v23 = vld [vmem:[#allocation5 + $0x80] ss:$12 sps:$4 sm:$0xff]   ;;  %v10649_v24 = vld [vmem:[#allocation5 + $0x98] ss:$12 sps:$4 sm:$0xff]  }
  0x54   :  { %v10641_v27 = vld [vmem:[#allocation2 + $0x10] sm:$0xff]   ;;  %v10642_v28 = vld [vmem:[#allocation2 + $0x18] sm:$0xff]   ;;  %s11043_s13 = smov 112   ;;  %s11044_s14 = smov 80   ;;  %v14311_v53 = vmov 0.0   ;;  %vm11049_vm0 = vmmov 0  }
  0x55   :  { %269 = vmatpush1.bf16.msra.mxu1 %v10623_v6  ;;  %s11045_s15 = smov 48   ;;  %s11046_s16 = smov 32   ;;  %v608_v6 = vshrl.u32 %v607_v2, 7  ;;  %vm4562_vm1 = vcmask 130048   ;;  %vm9623_vm2 = vcmask 261120   ;;  %vm9632_vm3 = vcmask 392192  }
  0x56   :  { %270 = vmatprep.subr.bf16.mxu1 %v10624_v7  ;;  %10164 = vmatpush3.bf16.msra.mxu0 %v10644_v14  ;;  %s11047_s17 = smov 16   ;;  %v11051_v7 = vmov 1934713408   ;;  %vm9641_vm4 = vcmask 523264   ;;  %vm9650_vm5 = vcmask 654336   ;;  %vm9659_vm6 = vcmask 785408  }
  0x57   :  { %10165 = vmatprep.subr.bf16.mxu0 %v10645_v16  ;;  %vm9668_vm7 = vcmask 916480  }
  0x59   :  { %271 = vmatpush1.bf16.msra.mxu1 %v10626_v8  ;;  %v637_v8 = vunpack.c.l.s4 %v11051_v7 }
  0x5a   :  { %272 = vmatprep.subr.bf16.mxu1 %v10627_v10  ;;  %10166 = vmatpush3.bf16.msra.mxu0 %v10645_v16 }
  0x5b   :  { %10167 = vmatprep.subr.bf16.mxu0 %v10646_v20 }
  0x5d   :  { %273 = vmatpush1.bf16.msra.mxu1 %v10629_v11 }
  0x5e   :  { %274 = vmatprep.subr.bf16.mxu1 %v10630_v12  ;;  %10168 = vmatpush3.bf16.msra.mxu0 %v10646_v20 }
  0x5f   :  { %10169 = vmatprep.subr.bf16.mxu0 %v10647_v22 }
  0x61   :  { %275 = vmatpush1.bf16.msra.mxu1 %v10632_v15  ;;  %v638_v15 = vunpack.c.0.s8 %v637_v8 }
  0x62   :  { %276 = vmatprep.subr.bf16.mxu1 %v10633_v17  ;;  %10170 = vmatpush3.bf16.msra.mxu0 %v10647_v22 }
  0x63   :  { %10171 = vmatprep.subr.bf16.mxu0 %v10648_v23 }
  0x65   :  { %277 = vmatpush1.bf16.msra.mxu1 %v10635_v18 }
  0x66   :  { %278 = vmatprep.subr.bf16.mxu1 %v10636_v19  ;;  %10172 = vmatpush3.bf16.msra.mxu0 %v10648_v23 }
  0x67   :  { %10173 = vmatprep.subr.bf16.mxu0 %v10649_v24 }
  0x69   :  { %279 = vmatpush1.bf16.msra.mxu1 %v10638_v21 }
  0x6a   :  { %10174 = vmatpush3.bf16.msra.mxu0 %v10649_v24  ;;  %10185 = vmatprep.subr.bf16.mxu1 %v14311_v53 }
  0x6b   :  { %10175 = vmatprep.subr.bf16.mxu0 %v10650_v26 }
  0x6c   :  { %297 = vmatmul.mubr.bf16.vlgmr.msra.gmra.mrb[0].mxu1 %v10639_v9 }
  0x6d   :  { %306 = vmatprep.mubr.bf16.mxu1 %v11041_v0 }
  0x6e   :  { %10176 = vmatpush3.bf16.msra.mxu0 %v10650_v26 }
  0x6f   :  { %10197 = vmatprep.subr.bf16.mxu0 %v14311_v53 }
  0x71   :  { %10178 = vmatmul.mubr.bf16.vlgmr.msra.gmra.mrb[0].mxu0 %v10640_v25 }
  0x72   :  { %10181 = vmatprep.mubr.bf16.mxu0 %v10641_v27 }
  0x74   :  { %307 = vmatmul.mubr.bf16.gmra.mrb[4].mxu1 %v10640_v25 }
  0x75   :  { %316 = vmatprep.mubr.bf16.mxu1 %v11041_v0 }
  0x79   :  { %10182 = vmatmul.mubr.bf16.gmra.mrb[4].mxu0 %v10642_v28 }
  0x7a   :  { %10199 = vmatprep.mubr.msk.bf16.mxu0 %vm11049_vm0, %v14311_v53 }
  0x7c   :  { %317 = vmatmul.mubr.bf16.gmra.mrb[8].mxu1 %v10641_v27 }
  0x7d   :  { %326 = vmatprep.mubr.bf16.mxu1 %v11041_v0  ;;  %v11050_v0 = vmov 1983009808  }
  0x7e   :  { %v605_v1 = vunpack.c.l.s4 %v11050_v0 }
  0x80   :  { %v606_v5 = vunpack.c.0.s8 %v605_v1 }
  0x82   :  { %v11302_v13 = vsub.s32 %v606_v5, %v608_v6 }
  0x84   :  { %327 = vmatmul.mubr.bf16.gmra.mrb[12].mxu1 %v10642_v28 }
  0x85   :  { %10187 = vmatprep.mubr.msk.bf16.mxu1 %vm11049_vm0, %v14311_v53 }
 0x13f   :  { %v298_v29 = vpop.f32.mrb[0].mxu1 }
 0x140   :  { %v300_v30 = vpop.f32.mrb[1].mxu1 }
 0x141   :  { %v302_v31 = vpop.f32.mrb[2].mxu1 }
 0x142   :  { %v11136_v32 = vpack.c.bf16 %v302_v31, %v298_v29  ;;  %v304_v33 = vpop.f32.mrb[3].mxu1 }
 0x143   :  { %v11138_v34 = vpack.c.bf16 %v304_v33, %v300_v30 }
 0x144   :  { %426 = vrot.lane.b32.xlu0 %v11136_v32, %s11042_s3  ;;  %418 = vrot.lane.b32.xlu1 %v11136_v32, %s11043_s13  ;;  %v10179_v54 = vpop.f32.mrb[0].mxu0  ;;  %v478_v11 = vshrl.u32 %v11136_v32, 16 }
 0x145   :  { %v371_v55 = vpop.f32.mrb[1].mxu0  ;;  %v1850_v12 = vshrl.u32 %v11138_v34, 16 }
 0x146   :  { %v10180_v56 = vpop.f32.mrb[2].mxu0 }
 0x147   :  { %v308_v35 = vpop.f32.mrb[4].mxu1  ;;  %v374_v57 = vpop.f32.mrb[3].mxu0  ;;  %v11244_v59 = vpack.c.bf16 %v10180_v56, %v10179_v54 }
 0x148   :  { %434 = vrot.lane.b32.xlu1 %v11136_v32, %s11044_s14  ;;  %1790 = vrot.lane.b32.xlu0 %v11138_v34, %s11043_s13  ;;  %v310_v36 = vpop.f32.mrb[5].mxu1  ;;  %v11242_v58 = vpack.c.bf16 %v374_v57, %v371_v55 }
 0x149   :  { %v312_v37 = vpop.f32.mrb[6].mxu1  ;;  %14374 = vst [vmem:[#allocation17_spill] sm:$0xff] %v11244_v59 }
 0x14a   :  { %v11148_v38 = vpack.c.bf16 %v312_v37, %v308_v35  ;;  %v314_v39 = vpop.f32.mrb[7].mxu1  ;;  %14373 = vst [vmem:[#allocation16_spill] sm:$0xff] %v11242_v58  ;;  %v11313_v35 = vsub.s32 %v638_v15, %v608_v6 }
 0x14b   :  { %v11150_v40 = vpack.c.bf16 %v314_v39, %v310_v36 }
 0x14c   :  { %1806 = vrot.lane.b32.xlu1 %v11138_v34, %s11044_s14  ;;  %1798 = vrot.lane.b32.xlu0 %v11138_v34, %s11042_s3  ;;  %v510_v20 = vshrl.u32 %v11148_v38, 16  ;;  %v11309_v30 = vpop.f32.mrb[4].mxu0 }
 0x14d   :  { %v1882_v21 = vshrl.u32 %v11150_v40, 16  ;;  %v11316_v36 = vpop.f32.mrb[5].mxu0 }
 0x14e   :  { %14375 = vst [vmem:[#allocation18_spill] sm:$0xff] %v11316_v36  ;;  %v11321_v54 = vpop.f32.mrb[6].mxu0 }
 0x14f   :  { %v318_v41 = vpop.f32.mrb[8].mxu1  ;;  %14376 = vst [vmem:[#allocation19_spill] sm:$0xff] %v11321_v54  ;;  %v11331_v15 = vpop.f32.mrb[7].mxu0 }
 0x150   :  { %1814 = vrot.lane.b32.xlu1 %v11138_v34, %s11037_s1  ;;  %1822 = vrot.lane.b32.xlu0 %v11138_v34, %s11045_s15  ;;  %v320_v42 = vpop.f32.mrb[9].mxu1  ;;  %14377 = vst [vmem:[#allocation20_spill] sm:$0xff] %v11331_v15 }
 0x151   :  { %v322_v43 = vpop.f32.mrb[10].mxu1 }
 0x152   :  { %v11160_v44 = vpack.c.bf16 %v322_v43, %v318_v41  ;;  %v324_v45 = vpop.f32.mrb[11].mxu1 }
 0x153   :  { %v11162_v46 = vpack.c.bf16 %v324_v45, %v320_v42 }
 0x154   :  { %1830 = vrot.lane.b32.xlu1 %v11138_v34, %s11046_s16  ;;  %1838 = vrot.lane.b32.xlu0 %v11138_v34, %s11047_s17 }
 0x157   :  { %v328_v47 = vpop.f32.mrb[12].mxu1 }
 0x158   :  { %450 = vrot.lane.b32.xlu1 %v11136_v32, %s11045_s15  ;;  %442 = vrot.lane.b32.xlu0 %v11136_v32, %s11037_s1  ;;  %v330_v48 = vpop.f32.mrb[13].mxu1 }
 0x159   :  { %v332_v49 = vpop.f32.mrb[14].mxu1 }
 0x15a   :  { %v11172_v50 = vpack.c.bf16 %v332_v49, %v328_v47  ;;  %v334_v51 = vpop.f32.mrb[15].mxu1 }
 0x15b   :  { %v11174_v52 = vpack.c.bf16 %v334_v51, %v330_v48 }
 0x15c   :  { %466 = vrot.lane.b32.xlu1 %v11136_v32, %s11047_s17  ;;  %458 = vrot.lane.b32.xlu0 %v11136_v32, %s11046_s16 }
 0x15d   :  { %14372 = vst [vmem:[#allocation15_spill] sm:$0xff] %v11174_v52 }
 0x160   :  { %428 = vrot.lane.b32.xlu0 %v11148_v38, %s11042_s3  ;;  %420 = vrot.lane.b32.xlu1 %v11148_v38, %s11043_s13 }
 0x164   :  { %436 = vrot.lane.b32.xlu1 %v11148_v38, %s11044_s14  ;;  %1792 = vrot.lane.b32.xlu0 %v11150_v40, %s11043_s13 }
 0x168   :  { %1800 = vrot.lane.b32.xlu1 %v11150_v40, %s11042_s3  ;;  %1808 = vrot.lane.b32.xlu0 %v11150_v40, %s11044_s14 }
 0x16c   :  { %1816 = vrot.lane.b32.xlu1 %v11150_v40, %s11037_s1  ;;  %1824 = vrot.lane.b32.xlu0 %v11150_v40, %s11045_s15 }
 0x170   :  { %1832 = vrot.lane.b32.xlu1 %v11150_v40, %s11046_s16  ;;  %1840 = vrot.lane.b32.xlu0 %v11150_v40, %s11047_s17 }
 0x174   :  { %452 = vrot.lane.b32.xlu1 %v11148_v38, %s11045_s15  ;;  %444 = vrot.lane.b32.xlu0 %v11148_v38, %s11037_s1 }
 0x178   :  { %468 = vrot.lane.b32.xlu1 %v11148_v38, %s11047_s17  ;;  %460 = vrot.lane.b32.xlu0 %v11148_v38, %s11046_s16 }
 0x17c   :  { %430 = vrot.lane.b32.xlu0 %v11160_v44, %s11042_s3  ;;  %422 = vrot.lane.b32.xlu1 %v11160_v44, %s11043_s13 }
 0x180   :  { %438 = vrot.lane.b32.xlu1 %v11160_v44, %s11044_s14  ;;  %1794 = vrot.lane.b32.xlu0 %v11162_v46, %s11043_s13 }
 0x184   :  { %1802 = vrot.lane.b32.xlu1 %v11162_v46, %s11042_s3  ;;  %1810 = vrot.lane.b32.xlu0 %v11162_v46, %s11044_s14 }
 0x188   :  { %1818 = vrot.lane.b32.xlu1 %v11162_v46, %s11037_s1  ;;  %1826 = vrot.lane.b32.xlu0 %v11162_v46, %s11045_s15 }
 0x18c   :  { %1834 = vrot.lane.b32.xlu1 %v11162_v46, %s11046_s16  ;;  %1842 = vrot.lane.b32.xlu0 %v11162_v46, %s11047_s17 }
 0x190   :  { %454 = vrot.lane.b32.xlu1 %v11160_v44, %s11045_s15  ;;  %446 = vrot.lane.b32.xlu0 %v11160_v44, %s11037_s1 }
 0x194   :  { %470 = vrot.lane.b32.xlu1 %v11160_v44, %s11047_s17  ;;  %462 = vrot.lane.b32.xlu0 %v11160_v44, %s11046_s16 }
 0x198   :  { %432 = vrot.lane.b32.xlu0 %v11172_v50, %s11042_s3  ;;  %424 = vrot.lane.b32.xlu1 %v11172_v50, %s11043_s13 }
 0x19c   :  { %440 = vrot.lane.b32.xlu1 %v11172_v50, %s11044_s14  ;;  %1796 = vrot.lane.b32.xlu0 %v11174_v52, %s11043_s13 }
 0x1a0   :  { %1804 = vrot.lane.b32.xlu1 %v11174_v52, %s11042_s3  ;;  %1812 = vrot.lane.b32.xlu0 %v11174_v52, %s11044_s14 }
 0x1a4   :  { %1820 = vrot.lane.b32.xlu1 %v11174_v52, %s11037_s1  ;;  %1828 = vrot.lane.b32.xlu0 %v11174_v52, %s11045_s15 }
 0x1a8   :  { %1836 = vrot.lane.b32.xlu1 %v11174_v52, %s11046_s16  ;;  %1844 = vrot.lane.b32.xlu0 %v11174_v52, %s11047_s17 }
 0x1ac   :  { %456 = vrot.lane.b32.xlu1 %v11172_v50, %s11045_s15  ;;  %448 = vrot.lane.b32.xlu0 %v11172_v50, %s11037_s1 }
 0x1b0   :  { %472 = vrot.lane.b32.xlu1 %v11172_v50, %s11047_s17  ;;  %464 = vrot.lane.b32.xlu0 %v11172_v50, %s11046_s16 }
 0x1b4   :  { %3162 = vrot.lane.b32.xlu1 %v11242_v58, %s11043_s13  ;;  %3170 = vrot.lane.b32.xlu0 %v11242_v58, %s11042_s3 }
 0x1b6   :  { %v11278_v60 = vpop.permute.xlu0 %426  ;;  %v11280_v61 = vpop.permute.xlu1 %418 }
 0x1b7   :  { %v476_v47 = vpack.i.b16 %v11280_v61, %v11136_v32  ;;  %v479_v55 = vshrl.u32 %v11280_v61, 16 }
 0x1b8   :  { %3178 = vrot.lane.b32.xlu1 %v11242_v58, %s11044_s14  ;;  %3194 = vrot.lane.b32.xlu0 %v11242_v58, %s11045_s15 }
 0x1ba   :  { %v11286_v62 = vpop.permute.xlu1 %434  ;;  %v1791_v63 = vpop.permute.xlu0 %1790 }
 0x1bb   :  { %v1848_v22 = vpack.i.b16 %v1791_v63, %v11138_v34  ;;  %v1851_v23 = vshrl.u32 %v1791_v63, 16  ;;  %v487_v0 = vshrl.u32 %v11286_v62, 16 }
 0x1bc   :  { %3186 = vrot.lane.b32.xlu1 %v11242_v58, %s11037_s1  ;;  %3210 = vrot.lane.b32.xlu0 %v11242_v58, %s11047_s17 }
 0x1bd   :  { %v1852_v56 = vpack.i.b16 %v1851_v23, %v1850_v12  ;;  %v484_v23 = vpack.i.b16 %v11286_v62, %v11278_v60 }
 0x1be   :  { %v1807_v3 = vpop.permute.xlu1 %1806  ;;  %v1799_v4 = vpop.permute.xlu0 %1798 }
 0x1bf   :  { %v1859_v24 = vshrl.u32 %v1807_v3, 16  ;;  %v1858_v25 = vshrl.u32 %v1799_v4, 16  ;;  %v1856_v26 = vpack.i.b16 %v1807_v3, %v1799_v4 }
 0x1c0   :  { %3202 = vrot.lane.b32.xlu1 %v11242_v58, %s11046_s16  ;;  %3164 = vrot.lane.b32.xlu0 %v11244_v59, %s11043_s13 }
 0x1c1   :  { %v1860_v48 = vpack.i.b16 %v1859_v24, %v1858_v25 }
 0x1c2   :  { %v1815_v9 = vpop.permute.xlu1 %1814  ;;  %v1823_v10 = vpop.permute.xlu0 %1822 }
 0x1c3   :  { %v1864_v14 = vpack.i.b16 %v1823_v10, %v1815_v9  ;;  %v1866_v16 = vshrl.u32 %v1815_v9, 16  ;;  %v1867_v17 = vshrl.u32 %v1823_v10, 16 }
 0x1c4   :  { %3172 = vrot.lane.b32.xlu1 %v11244_v59, %s11042_s3  ;;  %3188 = vrot.lane.b32.xlu0 %v11244_v59, %s11037_s1 }
 0x1c5   :  { %v1974_v31 = vcombine.low %v1848_v22, %v1864_v14  ;;  %v1975_v33 = vcombine.high %v1848_v22, %v1864_v14  ;;  %v1868_v37 = vpack.i.b16 %v1867_v17, %v1866_v16  ;;  %v486_v16 = vshrl.u32 %v11278_v60, 16 }
 0x1c6   :  { %v1831_v18 = vpop.permute.xlu1 %1830  ;;  %v1839_v19 = vpop.permute.xlu0 %1838  ;;  %v480_v22 = vpack.i.b16 %v479_v55, %v478_v11 }
 0x1c7   :  { %v1874_v27 = vshrl.u32 %v1831_v18, 16  ;;  %v1872_v28 = vpack.i.b16 %v1839_v19, %v1831_v18  ;;  %v1875_v29 = vshrl.u32 %v1839_v19, 16  ;;  %v1982_v1 = vrot.slane %v1974_v31, %v11302_v13 }
 0x1c8   :  { %3180 = vrot.lane.b32.xlu1 %v11244_v59, %s11044_s14  ;;  %3204 = vrot.lane.b32.xlu0 %v11244_v59, %s11046_s16  ;;  %v1989_v2 = vrot.slane %v1975_v33, %v11302_v13  ;;  %v2042_v4 = vcombine.low %v1852_v56, %v1868_v37  ;;  %v2043_v5 = vcombine.high %v1852_v56, %v1868_v37 }
 0x1c9   :  { %v1876_v39 = vpack.i.b16 %v1875_v29, %v1874_v27  ;;  %v1990_v41 = vcombine.low %v1856_v26, %v1872_v28  ;;  %v1991_v42 = vcombine.high %v1856_v26, %v1872_v28  ;;  %v488_v26 = vpack.i.b16 %v487_v0, %v486_v16 }
 0x1ca   :  { %v451_v43 = vpop.permute.xlu1 %450  ;;  %v443_v45 = vpop.permute.xlu0 %442  ;;  %v2050_v27 = vrot.slane %v2042_v4, %v11302_v13  ;;  %v2057_v28 = vrot.slane %v2043_v5, %v11302_v13 }
 0x1cb   :  { %v492_v49 = vpack.i.b16 %v451_v43, %v443_v45  ;;  %v1998_v57 = vrot.slane %v1990_v41, %v11302_v13  ;;  %v2005_v63 = vrot.slane %v1991_v42, %v11302_v13  ;;  %v2058_v3 = vcombine.low %v1860_v48, %v1876_v39 }
 0x1cc   :  { %3196 = vrot.lane.b32.xlu1 %v11244_v59, %s11045_s15  ;;  %v2059_v6 = vcombine.high %v1860_v48, %v1876_v39  ;;  %v495_v7 = vshrl.u32 %v451_v43, 16  ;;  %v494_v12 = vshrl.u32 %v443_v45, 16 }
 0x1cd   :  { %v2006_v9 = vcombine.low %v1982_v1, %v1998_v57  ;;  %v2007_v10 = vcombine.high %v1982_v1, %v1998_v57  ;;  %v602_v14 = vcombine.low %v476_v47, %v492_v49  ;;  %v2022_v17 = vcombine.low %v1989_v2, %v2005_v63 }
 0x1ce   :  { %v467_v61 = vpop.permute.xlu1 %466  ;;  %v459_v8 = vpop.permute.xlu0 %458  ;;  %v2023_v18 = vcombine.high %v1989_v2, %v2005_v63  ;;  %v2066_v24 = vrot.slane %v2058_v3, %v11302_v13  ;;  %v603_v25 = vcombine.high %v476_v47, %v492_v49  ;;  %v2073_v29 = vrot.slane %v2059_v6, %v11302_v13 }
 0x1cf   :  { %v11350_v32 = vrot.slane %v2006_v9, %v11313_v35  ;;  %v11353_v11 = vrot.slane %v2007_v10, %v11313_v35  ;;  %v496_v60 = vpack.i.b16 %v495_v7, %v494_v12  ;;  %v610_v62 = vrot.slane %v602_v14, %v11302_v13 }
 0x1d0   :  { %3212 = vrot.lane.b32.xlu1 %v11244_v59, %s11047_s17  ;;  %v11357_v37 = vrot.slane %v2022_v17, %v11313_v35  ;;  %v11360_v39 = vrot.slane %v2023_v18, %v11313_v35  ;;  %v503_v41 = vshrl.u32 %v467_v61, 16  ;;  %v500_v42 = vpack.i.b16 %v467_v61, %v459_v8 }
 0x1d1   :  { %v2074_v43 = vcombine.low %v2050_v27, %v2066_v24  ;;  %v2075_v45 = vcombine.high %v2050_v27, %v2066_v24  ;;  %v617_v47 = vrot.slane %v603_v25, %v11302_v13  ;;  %v502_v48 = vshrl.u32 %v459_v8, 16 }
 0x1d2   :  { %v11345_v31 = vpop.permute.xlu0 %428  ;;  %v11347_v33 = vpop.permute.xlu1 %420  ;;  %v2090_v49 = vcombine.low %v2057_v28, %v2073_v29  ;;  %v2091_v55 = vcombine.high %v2057_v28, %v2073_v29  ;;  %v618_v56 = vcombine.low %v484_v23, %v500_v42  ;;  %v619_v57 = vcombine.high %v484_v23, %v500_v42 }
 0x1d3   :  { %v2518_v0 = vcombine.low %v11350_v32, %v11353_v11  ;;  %v670_v1 = vcombine.low %v480_v22, %v496_v60  ;;  %v671_v2 = vcombine.high %v480_v22, %v496_v60  ;;  %v504_v3 = vpack.i.b16 %v503_v41, %v502_v48 }
 0x1d4   :  { %v9888_v5 = vcombine.high %v11350_v32, %v11353_v11  ;;  %v2534_v6 = vcombine.low %v11357_v37, %v11360_v39  ;;  %v626_v7 = vrot.slane %v618_v56, %v11302_v13  ;;  %v633_v61 = vrot.slane %v619_v57, %v11302_v13 }
 0x1d5   :  { %v11372_v8 = vrot.slane %v2074_v43, %v11313_v35  ;;  %v9889_v9 = vcombine.high %v11357_v37, %v11360_v39  ;;  %v686_v10 = vcombine.low %v488_v26, %v504_v3  ;;  %v687_v12 = vcombine.high %v488_v26, %v504_v3 }
 0x1d6   :  { %v437_v63 = vpop.permute.xlu1 %436  ;;  %v1793_v4 = vpop.permute.xlu0 %1792  ;;  %v634_v14 = vcombine.low %v610_v62, %v626_v7  ;;  %v635_v16 = vcombine.high %v610_v62, %v626_v7  ;;  %v650_v17 = vcombine.low %v617_v47, %v633_v61  ;;  %v651_v18 = vcombine.high %v617_v47, %v633_v61 }
 0x1d7   :  { %v678_v22 = vrot.slane %v670_v1, %v11302_v13  ;;  %v685_v23 = vrot.slane %v671_v2, %v11302_v13  ;;  %v694_v24 = vrot.slane %v686_v10, %v11302_v13  ;;  %v701_v25 = vrot.slane %v687_v12, %v11302_v13 }
 0x1d8   :  { %v642_v27 = vrot.slane %v634_v14, %v11313_v35  ;;  %v649_v28 = vrot.slane %v635_v16, %v11313_v35  ;;  %v658_v29 = vrot.slane %v650_v17, %v11313_v35  ;;  %v665_v26 = vrot.slane %v651_v18, %v11313_v35 }
 0x1d9   :  { %v702_v11 = vcombine.low %v678_v22, %v694_v24  ;;  %v703_v60 = vcombine.high %v678_v22, %v694_v24  ;;  %v718_v62 = vcombine.low %v685_v23, %v701_v25  ;;  %v719_v37 = vcombine.high %v685_v23, %v701_v25 }
 0x1da   :  { %v11384_v32 = vpop.permute.xlu1 %1800  ;;  %v11386_v39 = vpop.permute.xlu0 %1808  ;;  %v1146_v41 = vcombine.low %v642_v27, %v649_v28  ;;  %v9872_v42 = vcombine.high %v642_v27, %v649_v28  ;;  %v1162_v43 = vcombine.low %v658_v29, %v665_v26  ;;  %v9873_v47 = vcombine.high %v658_v29, %v665_v26 }
 0x1db   :  { %v2089_v48 = vrot.slane %v2075_v45, %v11313_v35  ;;  %v710_v56 = vrot.slane %v702_v11, %v11313_v35  ;;  %v717_v57 = vrot.slane %v703_v60, %v11313_v35  ;;  %v511_v1 = vshrl.u32 %v11347_v33, 16 }
 0x1dc   :  { %v2098_v2 = vrot.slane %v2090_v49, %v11313_v35  ;;  %v2105_v3 = vrot.slane %v2091_v55, %v11313_v35  ;;  %v519_v7 = vshrl.u32 %v437_v63, 16  ;;  %v1883_v61 = vshrl.u32 %v1793_v4, 16 }
 0x1dd   :  { %v726_v10 = vrot.slane %v718_v62, %v11313_v35  ;;  %v733_v12 = vrot.slane %v719_v37, %v11313_v35  ;;  %v11397_v14 = vrot.slane %v1146_v41, %v11302_v13  ;;  %v11400_v45 = vrot.slane %v9872_v42, %v11302_v13 }
 0x1de   :  { %v11403_v16 = vrot.slane %v1162_v43, %v11302_v13  ;;  %v11406_v17 = vrot.slane %v9873_v47, %v11302_v13  ;;  %v518_v49 = vshrl.u32 %v11345_v31, 16  ;;  %v11411_v55 = vpack.i.b16 %v11347_v33, %v11148_v38  ;;  %v1817_v18 = vpop.permute.xlu1 %1816  ;;  %v1825_v27 = vpop.permute.xlu0 %1824 }
 0x1df   :  { %v1214_v22 = vcombine.low %v710_v56, %v717_v57  ;;  %v11415_v23 = vpack.i.b16 %v511_v1, %v510_v20  ;;  %v11418_v24 = vpack.i.b16 %v437_v63, %v11345_v31  ;;  %v1880_v25 = vpack.i.b16 %v1793_v4, %v11150_v40 }
 0x1e0   :  { %v9874_v28 = vcombine.high %v710_v56, %v717_v57  ;;  %v11421_v29 = vpack.i.b16 %v519_v7, %v518_v49  ;;  %v11425_v26 = vpack.i.b16 %v1883_v61, %v1882_v21  ;;  %v11428_v33 = vrot.slane %v2518_v0, %v11302_v13 }
 0x1e1   :  { %v1178_v38 = vcombine.low %v11397_v14, %v11400_v45  ;;  %v1230_v20 = vcombine.low %v726_v10, %v733_v12  ;;  %v9875_v11 = vcombine.high %v726_v10, %v733_v12  ;;  %v1890_v31 = vshrl.u32 %v11384_v32, 16 }
 0x1e2   :  { %v1194_v4 = vcombine.low %v11403_v16, %v11406_v17  ;;  %v11438_v40 = vrot.slane %v9888_v5, %v11302_v13  ;;  %v11441_v21 = vrot.slane %v2534_v6, %v11302_v13  ;;  %v11446_v60 = vrot.slane %v1214_v22, %v11302_v13  ;;  %v1833_v6 = vpop.permute.xlu1 %1832 }
 0x1e3   :  { %v11449_v62 = vrot.slane %v9889_v9, %v11302_v13  ;;  %v2586_v37 = vcombine.low %v11372_v8, %v2089_v48  ;;  %v11453_v41 = vrot.slane %v9874_v28, %v11302_v13  ;;  %v1896_v42 = vpack.i.b16 %v1825_v27, %v1817_v18  ;;  %v1841_v9 = vpop.permute.xlu0 %1840 }
 0x1e4   :  { %v9890_v5 = vcombine.high %v11372_v8, %v2089_v48  ;;  %v2602_v43 = vcombine.low %v2098_v2, %v2105_v3  ;;  %v11457_v47 = vrot.slane %v1230_v20, %v11302_v13  ;;  %v1898_v56 = vshrl.u32 %v1817_v18, 16 }
 0x1e5   :  { %v1899_v57 = vshrl.u32 %v1825_v27, 16  ;;  %v11460_v1 = vrot.slane %v2586_v37, %v11302_v13  ;;  %v11463_v7 = vrot.slane %v9875_v11, %v11302_v13  ;;  %v2550_v61 = vcombine.low %v11428_v33, %v11438_v40 }
 0x1e6   :  { %v2566_v8 = vcombine.low %v11441_v21, %v11449_v62  ;;  %v11470_v48 = vrot.slane %v9890_v5, %v11302_v13  ;;  %v1888_v10 = vpack.i.b16 %v11386_v39, %v11384_v32  ;;  %v11475_v12 = vrot.slane %v2602_v43, %v11302_v13 }
 0x1e7   :  { %v9891_v49 = vcombine.high %v2098_v2, %v2105_v3  ;;  %v1906_v18 = vshrl.u32 %v1833_v6, 16  ;;  %v1891_v22 = vshrl.u32 %v11386_v39, 16  ;;  %v2110_v27 = vcombine.low %v1880_v25, %v1896_v42 }
 0x1e8   :  { %v2618_v28 = vcombine.low %v11460_v1, %v11470_v48  ;;  %v1904_v20 = vpack.i.b16 %v1841_v9, %v1833_v6  ;;  %v1900_v11 = vpack.i.b16 %v1899_v57, %v1898_v56  ;;  %v2111_v37 = vcombine.high %v1880_v25, %v1896_v42 }
 0x1e9   :  { %v11481_v5 = vrot.slane %v9891_v49, %v11302_v13  ;;  %v1907_v19 = vshrl.u32 %v1841_v9, 16  ;;  %v2558_v32 = vrot.slane %v2550_v61, %v11313_v35  ;;  %v2574_v43 = vrot.slane %v2566_v8, %v11313_v35  ;;  %v445_v49 = vpop.permute.xlu0 %444 }
 0x1ea   :  { %v2126_v2 = vcombine.low %v1888_v10, %v1904_v20  ;;  %v2127_v3 = vcombine.high %v1888_v10, %v1904_v20  ;;  %v1186_v39 = vrot.slane %v1178_v38, %v11313_v35  ;;  %v2626_v51 = vrot.slane %v2618_v28, %v11313_v35  ;;  %v453_v10 = vpop.permute.xlu1 %452 }
 0x1eb   :  { %v2634_v34 = vcombine.low %v11475_v12, %v11481_v5  ;;  %v1908_v6 = vpack.i.b16 %v1907_v19, %v1906_v18  ;;  %v1202_v25 = vrot.slane %v1194_v4, %v11313_v35  ;;  %v1246_v42 = vcombine.low %v11446_v60, %v11453_v41 }
 0x1ec   :  { %v1892_v56 = vpack.i.b16 %v1891_v22, %v1890_v31  ;;  %v2134_v57 = vrot.slane %v2126_v2, %v11302_v13  ;;  %v2118_v9 = vrot.slane %v2110_v27, %v11302_v13  ;;  %v2125_v61 = vrot.slane %v2111_v37, %v11302_v13 }
 0x1ed   :  { %v2642_v38 = vrot.slane %v2634_v34, %v11313_v35  ;;  %v2141_v8 = vrot.slane %v2127_v3, %v11302_v13  ;;  %v2178_v19 = vcombine.low %v11425_v26, %v1900_v11  ;;  %v2179_v4 = vcombine.high %v11425_v26, %v1900_v11 }
 0x1ee   :  { %v2582_v18 = vcombine.low %v2558_v32, %v2574_v43  ;;  %v2194_v28 = vcombine.low %v1892_v56, %v1908_v6  ;;  %v11499_v31 = vcombine.high %v2558_v32, %v2574_v43  ;;  %v2195_v27 = vcombine.high %v1892_v56, %v1908_v6 }
 0x1ef   :  { %v2650_v20 = vcombine.low %v2626_v51, %v2642_v38  ;;  %v11501_v22 = vcombine.high %v2626_v51, %v2642_v38  ;;  %v2142_v2 = vcombine.low %v2118_v9, %v2134_v57  ;;  %v2143_v37 = vcombine.high %v2118_v9, %v2134_v57 }
 0x1f0   :  { %v527_v0 = vshrl.u32 %v453_v10, 16  ;;  %v526_v34 = vshrl.u32 %v445_v49, 16  ;;  %v2158_v53 = vcombine.low %v2125_v61, %v2141_v8  ;;  %v2159_v59 = vcombine.high %v2125_v61, %v2141_v8 }
 0x1f1   :  { %v3064_v63 = vpack.i.b16 %v2650_v20, %v2582_v18  ;;  %v3070_v3 = vpack.i.b16 %v11501_v22, %v11499_v31  ;;  %v1262_v26 = vcombine.low %v11457_v47, %v11463_v7  ;;  %v11508_v11 = vrot.slane %v2178_v19, %v11302_v13 }
 0x1f2   :  { %v11511_v51 = vrot.slane %v2179_v4, %v11302_v13  ;;  %v11514_v32 = vrot.slane %v2194_v28, %v11302_v13  ;;  %v11519_v56 = vrot.slane %v2195_v27, %v11302_v13  ;;  %v524_v57 = vpack.i.b16 %v453_v10, %v445_v49 }
 0x1f3   :  { %v4567_v43 = vsel %vm4562_vm1, %v3064_v63, 0  ;;  %v4661_v6 = vsel %vm4562_vm1, %v3070_v3, 0  ;;  %v11521_v9 = vpack.i.b16 %v527_v0, %v526_v34  ;;  %v11523_v61 = vcombine.low %v1186_v39, %v1202_v25  ;;  %v469_v34 = vpop.permute.xlu1 %468 }
 0x1f4   :  { %10186 = vmatpush3.bf16.xpose.msra.mxu1 %v4567_v43  ;;  %10198 = vmatpush3.bf16.xpose.msra.mxu0 %v4661_v6  ;;  %v1254_v38 = vrot.slane %v1246_v42, %v11313_v35  ;;  %v11528_v19 = vrot.slane %v2142_v2, %v11313_v35  ;;  %v11531_v63 = vrot.slane %v2143_v37, %v11313_v35  ;;  %v14378_v0 = vmov 0.0  }
 0x1f5   :  { %v11534_v4 = vrot.slane %v2158_v53, %v11313_v35  ;;  %v11537_v10 = vrot.slane %v2159_v59, %v11313_v35  ;;  %10191 = vmatprep.subr.bf16.mxu1 %v14378_v0  ;;  %v1270_v42 = vrot.slane %v1262_v26, %v11313_v35  ;;  %10209 = vmatprep.subr.bf16.mxu0 %v14378_v0  ;;  %v3065_v28 = vshrl.u32 %v2582_v18, 16  ;;  %v461_v18 = vpop.permute.xlu0 %460 }
 0x1f6   :  { %v3066_v27 = vshrl.u32 %v2650_v20, 16  ;;  %v738_v59 = vcombine.low %v11411_v55, %v524_v57  ;;  %v2551_v37 = vcombine.high %v11428_v33, %v11438_v40  ;;  %v11551_v43 = vcombine.high %v1186_v39, %v1202_v25 }
 0x1f7   :  { %v1278_v3 = vcombine.low %v1254_v38, %v1270_v42  ;;  %v11553_v26 = vcombine.high %v1254_v38, %v1270_v42  ;;  %v2567_v8 = vcombine.high %v11441_v21, %v11449_v62  ;;  %v2619_v53 = vcombine.high %v11460_v1, %v11470_v48 }
 0x1f8   :  { %v3067_v6 = vpack.i.b16 %v3066_v27, %v3065_v28  ;;  %v11556_v20 = vrot.slane %v2551_v37, %v11313_v35  ;;  %v2635_v33 = vcombine.high %v11475_v12, %v11481_v5  ;;  %v739_v40 = vcombine.high %v11411_v55, %v524_v57 }
 0x1f9   :  { %v1692_v39 = vpack.i.b16 %v1278_v3, %v11523_v61  ;;  %v1698_v25 = vpack.i.b16 %v11553_v26, %v11551_v43  ;;  %v535_v38 = vshrl.u32 %v469_v34, 16  ;;  %v11569_v42 = vrot.slane %v2567_v8, %v11313_v35 }
 0x1fa   :  { %v11572_v28 = vrot.slane %v2619_v53, %v11313_v35  ;;  %v11575_v21 = vrot.slane %v2635_v33, %v11313_v35  ;;  %v532_v62 = vpack.i.b16 %v469_v34, %v461_v18  ;;  %v806_v55 = vcombine.low %v11415_v23, %v11521_v9 }
 0x1fb   :  { %10188 = vmatmul.mubr.msk.bf16.vlgmr.msra.gmra.mrb[16].mxu1 %vm4562_vm1, %v1692_v39  ;;  %10200 = vmatmul.mubr.msk.bf16.vlgmr.msra.gmra.mrb[8].mxu0 %vm4562_vm1, %v1698_v25  ;;  %v4614_v48 = vsel %vm4562_vm1, %v3067_v6, 0  ;;  %v534_v12 = vshrl.u32 %v461_v18, 16  ;;  %v11586_v5 = vcombine.low %v11556_v20, %v11569_v42  ;;  %v746_v53 = vrot.slane %v738_v59, %v11302_v13  ;;  %v11601_v6 = vpop.permute.xlu1 %422 }
 0x1fc   :  { %10192 = vmatpush3.bf16.xpose.msra.mxu1 %v4614_v48  ;;  %v11590_v57 = vcombine.low %v11572_v28, %v11575_v21  ;;  %v754_v8 = vcombine.low %v11418_v24, %v532_v62  ;;  %v755_v27 = vcombine.high %v11418_v24, %v532_v62  ;;  %v807_v37 = vcombine.high %v11415_v23, %v11521_v9  ;;  %v11608_v23 = vpop.permute.xlu0 %430 }
 0x1fd   :  { %v536_v34 = vpack.i.b16 %v535_v38, %v534_v12  ;;  %10193 = vmatprep.mubr.msk.bf16.mxu1 %vm11049_vm0, %v14378_v0  ;;  %10211 = vmatprep.mubr.msk.bf16.mxu0 %vm11049_vm0, %v14378_v0  ;;  %v1694_v18 = vshrl.u32 %v1278_v3, 16  ;;  %v753_v33 = vrot.slane %v739_v40, %v11302_v13  ;;  %v814_v9 = vrot.slane %v806_v55, %v11302_v13 }
 0x1fe   :  { %v3076_v24 = vpack.i.b16 %v11590_v57, %v11586_v5  ;;  %v762_v59 = vrot.slane %v754_v8, %v11302_v13  ;;  %v769_v39 = vrot.slane %v755_v27, %v11302_v13  ;;  %10203 = vmatprep.subr.bf16.mxu1 %v14378_v0  ;;  %v1693_v3 = vshrl.u32 %v11523_v61, 16 }
 0x1ff   :  { %v822_v25 = vcombine.low %v11421_v29, %v536_v34  ;;  %v823_v38 = vcombine.high %v11421_v29, %v536_v34  ;;  %v821_v55 = vrot.slane %v807_v37, %v11302_v13  ;;  %v2654_v37 = vcombine.low %v11528_v19, %v11531_v63 }
 0x200   :  { %v4755_v40 = vsel %vm4562_vm1, %v3076_v24, 0  ;;  %v770_v62 = vcombine.low %v746_v53, %v762_v59  ;;  %v771_v48 = vcombine.high %v746_v53, %v762_v59  ;;  %v786_v12 = vcombine.low %v753_v33, %v769_v39 }
 0x201   :  { %10210 = vmatpush3.bf16.xpose.msra.mxu0 %v4755_v40  ;;  %v787_v8 = vcombine.high %v753_v33, %v769_v39  ;;  %v830_v27 = vrot.slane %v822_v25, %v11302_v13  ;;  %v837_v1 = vrot.slane %v823_v38, %v11302_v13  ;;  %v1695_v2 = vpack.i.b16 %v1694_v18, %v1693_v3  ;;  %v11627_v18 = vpop.permute.xlu1 %438  ;;  %v11633_v38 = vpop.permute.xlu0 %1794 }
 0x202   :  { %v778_v49 = vrot.slane %v770_v62, %v11313_v35  ;;  %v785_v29 = vrot.slane %v771_v48, %v11313_v35  ;;  %v794_v61 = vrot.slane %v786_v12, %v11313_v35  ;;  %10221 = vmatprep.subr.bf16.mxu0 %v14378_v0  ;;  %v1247_v33 = vcombine.high %v11446_v60, %v11453_v41 }
 0x203   :  { %v801_v53 = vrot.slane %v787_v8, %v11313_v35  ;;  %v838_v34 = vcombine.low %v814_v9, %v830_v27  ;;  %v839_v24 = vcombine.high %v814_v9, %v830_v27  ;;  %10194 = vmatmul.mubr.msk.bf16.vlgmr.msra.gmra.mrb[20].mxu1 %vm4562_vm1, %v1695_v2  ;;  %v9892_v59 = vcombine.high %v11528_v19, %v11531_v63 }
 0x204   :  { %v854_v39 = vcombine.low %v821_v55, %v837_v1  ;;  %v855_v25 = vcombine.high %v821_v55, %v837_v1  ;;  %10205 = vmatprep.mubr.msk.bf16.mxu1 %vm11049_vm0, %v14378_v0  ;;  %v14379_v2 = vcombine.low %v11508_v11, %v11514_v32  ;;  %v1282_v41 = vcombine.low %v778_v49, %v785_v29 }
 0x205   :  { %v14380_v9 = vcombine.high %v11397_v14, %v11400_v45  ;;  %v14381_v1 = vcombine.high %v11403_v16, %v11406_v17  ;;  %v846_v62 = vrot.slane %v838_v34, %v11313_v35  ;;  %v853_v48 = vrot.slane %v839_v24, %v11313_v35 }
 0x206   :  { %v11641_v60 = vrot.slane %v14379_v2, %v11313_v35  ;;  %v9876_v12 = vcombine.high %v778_v49, %v785_v29  ;;  %v1298_v8 = vcombine.low %v794_v61, %v801_v53  ;;  %v14382_v27 = vcombine.high %v11508_v11, %v11514_v32 }
 0x207   :  { %v11647_v3 = vrot.slane %v14380_v9, %v11313_v35  ;;  %v11653_v40 = vrot.slane %v14381_v1, %v11313_v35  ;;  %v14383_v14 = vcombine.low %v11511_v51, %v11519_v56  ;;  %v1261_v16 = vrot.slane %v1247_v33, %v11313_v35 }
 0x208   :  { %v11661_v55 = vrot.slane %v14382_v27, %v11313_v35  ;;  %v1263_v17 = vcombine.high %v11457_v47, %v11463_v7  ;;  %v14384_v49 = vcombine.high %v11511_v51, %v11519_v56  ;;  %v11679_v11 = vrot.slane %v854_v39, %v11313_v35  ;;  %v11692_v51 = vpop.permute.xlu1 %1802 }
 0x209   :  { %v11667_v45 = vrot.slane %v14383_v14, %v11313_v35  ;;  %v11682_v32 = vrot.slane %v855_v25, %v11313_v35  ;;  %v9877_v34 = vcombine.high %v794_v61, %v801_v53  ;;  %v2670_v24 = vcombine.low %v11534_v4, %v11537_v10  ;;  %v11703_v25 = vpop.permute.xlu0 %1810 }
 0x20a   :  { %v11676_v29 = vrot.slane %v14384_v49, %v11313_v35  ;;  %v543_v33 = vshrl.u32 %v11601_v6, 16  ;;  %v11689_v47 = vcombine.low %v11647_v3, %v11653_v40  ;;  %v1277_v7 = vrot.slane %v1263_v17, %v11313_v35 }
 0x20b   :  { %v11695_v56 = vrot.slane %v1282_v41, %v11302_v13  ;;  %v11698_v39 = vrot.slane %v9876_v12, %v11302_v13  ;;  %v11701_v61 = vrot.slane %v1298_v8, %v11302_v13  ;;  %v1350_v53 = vcombine.low %v846_v62, %v853_v48 }
 0x20c   :  { %v9878_v2 = vcombine.high %v846_v62, %v853_v48  ;;  %v11705_v9 = vcombine.low %v1261_v16, %v1277_v7  ;;  %v3071_v1 = vshrl.u32 %v11499_v31, 16  ;;  %v3072_v27 = vshrl.u32 %v11501_v22, 16 }
 0x20d   :  { %v11710_v14 = vrot.slane %v9877_v34, %v11302_v13  ;;  %v1366_v41 = vcombine.low %v11679_v11, %v11682_v32  ;;  %v11716_v12 = vcombine.high %v11556_v20, %v11569_v42  ;;  %v11720_v8 = vcombine.high %v11572_v28, %v11575_v21  ;;  %v1819_v34 = vpop.permute.xlu1 %1818 }
 0x20e   :  { %v9893_v62 = vcombine.high %v11534_v4, %v11537_v10  ;;  %v550_v31 = vshrl.u32 %v11608_v23, 16  ;;  %v1704_v22 = vpack.i.b16 %v11705_v9, %v11689_v47  ;;  %v3073_v48 = vpack.i.b16 %v3072_v27, %v3071_v1 }
 0x20f   :  { %v11731_v20 = vpack.i.b16 %v11601_v6, %v11160_v44  ;;  %v14385_v42 = vshrl.u32 %v11160_v44, 16  ;;  %v3082_v4 = vpack.i.b16 %v11720_v8, %v11716_v12  ;;  %v11742_v21 = vrot.slane %v1350_v53, %v11302_v13 }
 0x210   :  { %v11745_v49 = vrot.slane %v9878_v2, %v11302_v13  ;;  %10212 = vmatmul.mubr.msk.bf16.vlgmr.msra.gmra.mrb[12].mxu0 %vm4562_vm1, %v1704_v22  ;;  %v4708_v6 = vsel %vm4562_vm1, %v3073_v48, 0  ;;  %v9879_v1 = vcombine.high %v11679_v11, %v11682_v32  ;;  %v1827_v2 = vpop.permute.xlu0 %1826  ;;  %v11761_v27 = vpack.i.b16 %v11633_v38, %v11162_v46 }
 0x211   :  { %v11735_v28 = vpack.i.b16 %v543_v33, %v14385_v42  ;;  %v11752_v33 = vrot.slane %v1366_v41, %v11302_v13  ;;  %10204 = vmatpush3.bf16.xpose.msra.mxu1 %v4708_v6  ;;  %v4849_v53 = vsel %vm4562_vm1, %v3082_v4, 0  ;;  %10223 = vmatprep.mubr.msk.bf16.mxu0 %vm11049_vm0, %v14378_v0  ;;  %v1700_v22 = vshrl.u32 %v11553_v26, 16 }
 0x212   :  { %10222 = vmatpush3.bf16.xpose.msra.mxu0 %v4849_v53  ;;  %10215 = vmatprep.subr.bf16.mxu1 %v14378_v0  ;;  %v3077_v41 = vshrl.u32 %v11586_v5, 16  ;;  %v3078_v48 = vshrl.u32 %v11590_v57, 16  ;;  %v1915_v42 = vshrl.u32 %v11633_v38, 16  ;;  %v1699_v4 = vshrl.u32 %v11551_v43, 16 }
 0x213   :  { %v11769_v6 = vcombine.high %v1261_v16, %v1277_v7  ;;  %10233 = vmatprep.subr.bf16.mxu0 %v14378_v0  ;;  %v11776_v53 = vrot.slane %v2654_v37, %v11302_v13  ;;  %v11782_v5 = vrot.slane %v9892_v59, %v11302_v13  ;;  %v11785_v57 = vrot.slane %v2670_v24, %v11302_v13  ;;  %v1835_v24 = vpop.permute.xlu1 %1834 }
 0x214   :  { %v3079_v26 = vpack.i.b16 %v3078_v48, %v3077_v41  ;;  %v11788_v43 = vrot.slane %v9893_v62, %v11302_v13  ;;  %v11792_v38 = vcombine.high %v11647_v3, %v11653_v40  ;;  %v1930_v16 = vshrl.u32 %v1819_v34, 16  ;;  %v1843_v10 = vpop.permute.xlu0 %1842 }
 0x215   :  { %v1931_v37 = vshrl.u32 %v1827_v2, 16  ;;  %v2722_v7 = vcombine.low %v11641_v60, %v11661_v55  ;;  %v1922_v41 = vshrl.u32 %v11692_v51, 16  ;;  %v1701_v19 = vpack.i.b16 %v1700_v22, %v1699_v4 }
 0x216   :  { %v11797_v63 = vpack.i.b16 %v1827_v2, %v1819_v34  ;;  %v9894_v59 = vcombine.high %v11641_v60, %v11661_v55  ;;  %v1920_v62 = vpack.i.b16 %v11703_v25, %v11692_v51  ;;  %v1923_v3 = vshrl.u32 %v11703_v25, 16 }
 0x217   :  { %v1710_v40 = vpack.i.b16 %v11769_v6, %v11792_v38  ;;  %v2686_v48 = vcombine.low %v11776_v53, %v11782_v5  ;;  %v4802_v34 = vsel %vm4562_vm1, %v3079_v26, 0  ;;  %v2702_v60 = vcombine.low %v11785_v57, %v11788_v43 }
 0x218   :  { %10206 = vmatmul.mubr.msk.bf16.vlgmr.msra.gmra.mrb[24].mxu1 %vm4562_vm1, %v1701_v19  ;;  %v11813_v55 = vrot.slane %v2722_v7, %v11302_v13  ;;  %v11816_v51 = vrot.slane %v9894_v59, %v11302_v13  ;;  %v14386_v25 = vshrl.u32 %v11162_v46, 16  ;;  %v1932_v22 = vpack.i.b16 %v1931_v37, %v1930_v16 }
 0x219   :  { %10224 = vmatmul.mubr.msk.bf16.vlgmr.msra.gmra.mrb[16].mxu0 %vm4562_vm1, %v1710_v40  ;;  %10216 = vmatpush3.bf16.xpose.msra.mxu1 %v4802_v34  ;;  %v2738_v4 = vcombine.low %v11667_v45, %v11676_v29  ;;  %v1938_v26 = vshrl.u32 %v1835_v24, 16  ;;  %v2246_v19 = vcombine.low %v11761_v27, %v11797_v63  ;;  %v9895_v7 = vcombine.high %v11667_v45, %v11676_v29 }
 0x21a   :  { %v1916_v2 = vpack.i.b16 %v1915_v42, %v14386_v25  ;;  %v2754_v59 = vcombine.low %v11813_v55, %v11816_v51  ;;  %10217 = vmatprep.mubr.msk.bf16.mxu1 %vm11049_vm0, %v14378_v0  ;;  %v1936_v46 = vpack.i.b16 %v1843_v10, %v1835_v24  ;;  %v11832_v42 = vrot.slane %v2686_v48, %v11313_v35 }
 0x21b   :  { %v11835_v16 = vrot.slane %v2738_v4, %v11302_v13  ;;  %v1939_v37 = vshrl.u32 %v1843_v10, 16  ;;  %v1706_v40 = vshrl.u32 %v11705_v9, 16  ;;  %10227 = vmatprep.subr.bf16.mxu1 %v14378_v0  ;;  %10235 = vmatprep.mubr.msk.bf16.mxu0 %vm11049_vm0, %v14378_v0  ;;  %v11842_v45 = vrot.slane %v2702_v60, %v11313_v35 }
 0x21c   :  { %v11845_v29 = vrot.slane %v9895_v7, %v11302_v13  ;;  %v2262_v24 = vcombine.low %v1920_v62, %v1936_v46  ;;  %v1705_v48 = vshrl.u32 %v11689_v47, 16  ;;  %v2263_v25 = vcombine.high %v1920_v62, %v1936_v46 }
 0x21d   :  { %v1940_v34 = vpack.i.b16 %v1939_v37, %v1938_v26  ;;  %v3083_v10 = vshrl.u32 %v11716_v12, 16  ;;  %v3084_v9 = vshrl.u32 %v11720_v8, 16  ;;  %v2762_v4 = vrot.slane %v2754_v59, %v11313_v35  ;;  %v455_v37 = vpop.permute.xlu1 %454 }
 0x21e   :  { %v2770_v44 = vcombine.low %v11835_v16, %v11845_v29  ;;  %v2270_v60 = vrot.slane %v2262_v24, %v11302_v13  ;;  %v1707_v17 = vpack.i.b16 %v1706_v40, %v1705_v48  ;;  %v11858_v7 = vrot.slane %v9879_v1, %v11302_v13  ;;  %v447_v40 = vpop.permute.xlu0 %446 }
 0x21f   :  { %v1924_v47 = vpack.i.b16 %v1923_v3, %v1922_v41  ;;  %v2247_v12 = vcombine.high %v11761_v27, %v11797_v63  ;;  %v3085_v62 = vpack.i.b16 %v3084_v9, %v3083_v10  ;;  %v551_v8 = vshrl.u32 %v11627_v18, 16 }
 0x220   :  { %v2254_v26 = vrot.slane %v2246_v19, %v11302_v13  ;;  %v2314_v59 = vcombine.low %v1916_v2, %v1932_v22  ;;  %v2778_v46 = vrot.slane %v2770_v44, %v11313_v35  ;;  %10218 = vmatmul.mubr.msk.bf16.vlgmr.msra.gmra.mrb[28].mxu1 %vm4562_vm1, %v1707_v17  ;;  %v2315_v24 = vcombine.high %v1916_v2, %v1932_v22 }
 0x221   :  { %v2277_v11 = vrot.slane %v2263_v25, %v11302_v13  ;;  %v2330_v32 = vcombine.low %v1924_v47, %v1940_v34  ;;  %v4896_v1 = vsel %vm4562_vm1, %v3085_v62, 0  ;;  %10229 = vmatprep.mubr.msk.bf16.mxu1 %vm11049_vm0, %v14378_v0  ;;  %v11872_v27 = vcombine.low %v11832_v42, %v11842_v45 }
 0x222   :  { %v11874_v41 = vcombine.low %v2762_v4, %v2778_v46  ;;  %v2278_v44 = vcombine.low %v2254_v26, %v2270_v60  ;;  %v2331_v63 = vcombine.high %v1924_v47, %v1940_v34  ;;  %10228 = vmatpush3.bf16.xpose.msra.mxu1 %v4896_v1  ;;  %v548_v17 = vpack.i.b16 %v11627_v18, %v11608_v23 }
 0x223   :  { %v2261_v3 = vrot.slane %v2247_v12, %v11302_v13  ;;  %v2279_v2 = vcombine.high %v2254_v26, %v2270_v60  ;;  %v556_v22 = vpack.i.b16 %v455_v37, %v447_v40  ;;  %10239 = vmatprep.subr.bf16.mxu1 %v14378_v0  ;;  %v11882_v19 = vpack.i.b16 %v551_v8, %v550_v31 }
 0x224   :  { %v11885_v48 = vrot.slane %v2314_v59, %v11302_v13  ;;  %v3088_v34 = vpack.i.b16 %v11874_v41, %v11872_v27  ;;  %v559_v25 = vshrl.u32 %v455_v37, 16  ;;  %v11890_v10 = vrot.slane %v2315_v24, %v11302_v13 }
 0x225   :  { %v2294_v18 = vcombine.low %v2261_v3, %v2277_v11  ;;  %v2295_v9 = vcombine.high %v2261_v3, %v2277_v11  ;;  %v11893_v60 = vrot.slane %v2330_v32, %v11302_v13  ;;  %v11897_v23 = vrot.slane %v2278_v44, %v11313_v35  ;;  %v463_v44 = vpop.permute.xlu0 %462 }
 0x226   :  { %v4943_v47 = vsel %vm4562_vm1, %v3088_v34, 0  ;;  %v11900_v31 = vrot.slane %v2331_v63, %v11302_v13  ;;  %v558_v12 = vshrl.u32 %v447_v40, 16  ;;  %v11903_v62 = vrot.slane %v2279_v2, %v11313_v35 }
 0x227   :  { %10234 = vmatpush3.bf16.xpose.msra.mxu0 %v4943_v47  ;;  %v874_v8 = vcombine.low %v11731_v20, %v556_v22  ;;  %v875_v26 = vcombine.high %v11731_v20, %v556_v22  ;;  %v14387_v59 = vcombine.low %v11695_v56, %v11698_v39  ;;  %v14388_v11 = vcombine.low %v11701_v61, %v11710_v14  ;;  %v471_v20 = vpop.permute.xlu1 %470 }
 0x228   :  { %v560_v24 = vpack.i.b16 %v559_v25, %v558_v12  ;;  %v1382_v32 = vcombine.low %v11742_v21, %v11745_v49  ;;  %v1398_v1 = vcombine.low %v11752_v33, %v11858_v7  ;;  %10245 = vmatprep.subr.bf16.mxu0 %v14378_v0  ;;  %v11925_v63 = vrot.slane %v2294_v18, %v11313_v35 }
 0x229   :  { %v11911_v37 = vrot.slane %v14387_v59, %v11313_v35  ;;  %v11917_v40 = vrot.slane %v14388_v11, %v11313_v35  ;;  %v11928_v3 = vrot.slane %v2295_v9, %v11313_v35  ;;  %v11932_v22 = vcombine.high %v2762_v4, %v2778_v46 }
 0x22a   :  { %v882_v34 = vrot.slane %v874_v8, %v11302_v13  ;;  %v11936_v25 = vrot.slane %v1382_v32, %v11313_v35  ;;  %v11939_v47 = vrot.slane %v1398_v1, %v11313_v35  ;;  %v11943_v18 = vcombine.high %v11832_v42, %v11842_v45 }
 0x22b   :  { %v889_v9 = vrot.slane %v875_v26, %v11302_v13  ;;  %v567_v12 = vshrl.u32 %v471_v20, 16  ;;  %v564_v59 = vpack.i.b16 %v471_v20, %v463_v44  ;;  %v566_v11 = vshrl.u32 %v463_v44, 16 }
 0x22c   :  { %v942_v4 = vcombine.low %v11735_v28, %v560_v24  ;;  %v11949_v46 = vcombine.low %v11911_v37, %v11917_v40  ;;  %v11953_v8 = vcombine.low %v11936_v25, %v11939_v47  ;;  %v3094_v32 = vpack.i.b16 %v11932_v22, %v11943_v18 }
 0x22d   :  { %v568_v42 = vpack.i.b16 %v567_v12, %v566_v11  ;;  %v890_v45 = vcombine.low %v548_v17, %v564_v59  ;;  %v891_v1 = vcombine.high %v548_v17, %v564_v59  ;;  %v1711_v26 = vshrl.u32 %v11792_v38, 16  ;;  %v11967_v17 = vpop.permute.xlu1 %424  ;;  %v11972_v11 = vpop.permute.xlu0 %432 }
 0x22e   :  { %v1716_v20 = vpack.i.b16 %v11953_v8, %v11949_v46  ;;  %v1712_v44 = vshrl.u32 %v11769_v6, 16  ;;  %v3089_v2 = vshrl.u32 %v11872_v27, 16  ;;  %v3090_v58 = vshrl.u32 %v11874_v41, 16 }
 0x22f   :  { %v898_v52 = vrot.slane %v890_v45, %v11302_v13  ;;  %v905_v15 = vrot.slane %v891_v1, %v11302_v13  ;;  %v958_v36 = vcombine.low %v11882_v19, %v568_v42  ;;  %v959_v12 = vcombine.high %v11882_v19, %v568_v42 }
 0x230   :  { %v943_v38 = vcombine.high %v11735_v28, %v560_v24  ;;  %10236 = vmatmul.mubr.msk.bf16.vlgmr.msra.gmra.mrb[20].mxu0 %vm4562_vm1, %v1716_v20  ;;  %v5037_v6 = vsel %vm4562_vm1, %v3094_v32, 0  ;;  %v1713_v59 = vpack.i.b16 %v1712_v44, %v1711_v26  ;;  %v3091_v27 = vpack.i.b16 %v3090_v58, %v3089_v2 }
 0x231   :  { %10246 = vmatpush3.bf16.xpose.msra.mxu0 %v5037_v6  ;;  %v906_v41 = vcombine.low %v882_v34, %v898_v52  ;;  %v907_v45 = vcombine.high %v882_v34, %v898_v52  ;;  %v922_v1 = vcombine.low %v889_v9, %v905_v15  ;;  %v923_v54 = vcombine.high %v889_v9, %v905_v15  ;;  %v12003_v6 = vpop.permute.xlu0 %1796 }
 0x232   :  { %v2347_v19 = vcombine.high %v11885_v48, %v11893_v60  ;;  %v966_v42 = vrot.slane %v958_v36, %v11302_v13  ;;  %v973_v28 = vrot.slane %v959_v12, %v11302_v13  ;;  %10230 = vmatmul.mubr.msk.bf16.vlgmr.msra.gmra.mrb[32].mxu1 %vm4562_vm1, %v1713_v59  ;;  %v4990_v24 = vsel %vm4562_vm1, %v3091_v27, 0  ;;  %10247 = vmatprep.mubr.msk.bf16.mxu0 %vm11049_vm0, %v14378_v0 }
 0x233   :  { %v2362_v58 = vcombine.low %v11890_v10, %v11900_v31  ;;  %v950_v52 = vrot.slane %v942_v4, %v11302_v13  ;;  %v914_v15 = vrot.slane %v906_v41, %v11313_v35  ;;  %v921_v2 = vrot.slane %v907_v45, %v11313_v35  ;;  %10240 = vmatpush3.bf16.xpose.msra.mxu1 %v4990_v24 }
 0x234   :  { %v2363_v36 = vcombine.high %v11890_v10, %v11900_v31  ;;  %v957_v34 = vrot.slane %v943_v38, %v11302_v13  ;;  %v930_v9 = vrot.slane %v922_v1, %v11313_v35  ;;  %v937_v32 = vrot.slane %v923_v54, %v11313_v35  ;;  %10257 = vmatprep.subr.bf16.mxu0 %v14378_v0  ;;  %v11999_v10 = vpop.permute.xlu1 %440 }
 0x235   :  { %v1331_v26 = vcombine.high %v11701_v61, %v11710_v14  ;;  %v974_v20 = vcombine.low %v950_v52, %v966_v42  ;;  %v975_v44 = vcombine.high %v950_v52, %v966_v42  ;;  %10241 = vmatprep.mubr.msk.bf16.mxu1 %vm11049_vm0, %v14378_v0  ;;  %v1418_v38 = vcombine.low %v914_v15, %v921_v2 }
 0x236   :  { %v990_v12 = vcombine.low %v957_v34, %v973_v28  ;;  %v991_v54 = vcombine.high %v957_v34, %v973_v28  ;;  %10251 = vmatprep.subr.bf16.mxu1 %v14378_v0  ;;  %v14389_v59 = vcombine.low %v11885_v48, %v11893_v60  ;;  %v12013_v41 = vrot.slane %v2347_v19, %v11313_v35 }
 0x237   :  { %v12016_v45 = vrot.slane %v2362_v58, %v11313_v35  ;;  %v9880_v1 = vcombine.high %v914_v15, %v921_v2  ;;  %v12019_v42 = vrot.slane %v2363_v36, %v11313_v35  ;;  %v1434_v52 = vcombine.low %v930_v9, %v937_v32 }
 0x238   :  { %v12010_v27 = vrot.slane %v14389_v59, %v11313_v35  ;;  %v12026_v48 = vrot.slane %v974_v20, %v11313_v35  ;;  %v12029_v60 = vrot.slane %v975_v44, %v11313_v35  ;;  %v9881_v19 = vcombine.high %v930_v9, %v937_v32 }
 0x239   :  { %v12033_v58 = vpack.i.b16 %v11967_v17, %v11172_v50  ;;  %v12036_v15 = vrot.slane %v990_v12, %v11313_v35  ;;  %v12039_v2 = vrot.slane %v991_v54, %v11313_v35  ;;  %v12042_v36 = vrot.slane %v1418_v38, %v11302_v13  ;;  %v12058_v12 = vpop.permute.xlu1 %1804 }
 0x23a   :  { %v12046_v20 = vrot.slane %v9880_v1, %v11302_v13  ;;  %v12050_v9 = vcombine.high %v11911_v37, %v11917_v40  ;;  %v12054_v32 = vcombine.high %v11936_v25, %v11939_v47  ;;  %v2687_v44 = vcombine.high %v11776_v53, %v11782_v5  ;;  %v12069_v40 = vpop.permute.xlu0 %1812 }
 0x23b   :  { %v12061_v54 = vrot.slane %v1434_v52, %v11302_v13  ;;  %v2703_v38 = vcombine.high %v11785_v57, %v11788_v43  ;;  %v2755_v59 = vcombine.high %v11813_v55, %v11816_v51  ;;  %v2771_v37 = vcombine.high %v11835_v16, %v11845_v29 }
 0x23c   :  { %v12072_v25 = vrot.slane %v9881_v19, %v11302_v13  ;;  %v1486_v53 = vcombine.low %v12026_v48, %v12029_v60  ;;  %v1722_v5 = vpack.i.b16 %v12054_v32, %v12050_v9  ;;  %v2701_v47 = vrot.slane %v2687_v44, %v11313_v35 }
 0x23d   :  { %v9882_v57 = vcombine.high %v12026_v48, %v12029_v60  ;;  %v2717_v43 = vrot.slane %v2703_v38, %v11313_v35  ;;  %v2769_v55 = vrot.slane %v2755_v59, %v11313_v35  ;;  %v2785_v51 = vrot.slane %v2771_v37, %v11313_v35 }
 0x23e   :  { %v1502_v16 = vcombine.low %v12036_v15, %v12039_v2  ;;  %10248 = vmatmul.mubr.msk.bf16.vlgmr.msra.gmra.mrb[24].mxu0 %vm4562_vm1, %v1722_v5  ;;  %v1717_v1 = vshrl.u32 %v11949_v46, 16  ;;  %v1718_v52 = vshrl.u32 %v11953_v8, 16  ;;  %v3095_v60 = vshrl.u32 %v11943_v18, 16  ;;  %v1821_v8 = vpop.permute.xlu1 %1820  ;;  %v1829_v59 = vpop.permute.xlu0 %1828 }
 0x23f   :  { %v2720_v19 = vcombine.low %v2701_v47, %v2717_v43  ;;  %v2788_v48 = vcombine.low %v2769_v55, %v2785_v51  ;;  %v3096_v44 = vshrl.u32 %v11932_v22, 16  ;;  %10259 = vmatprep.mubr.msk.bf16.mxu0 %vm11049_vm0, %v14378_v0  ;;  %v14390_v22 = vcombine.high %v11695_v56, %v11698_v39  ;;  %v14391_v39 = vld [vmem:[#allocation19_spill] sm:$0xff] }
 0x240   :  { %v1719_v37 = vpack.i.b16 %v1718_v52, %v1717_v1  ;;  %v12111_v38 = vrot.slane %v1331_v26, %v11313_v35  ;;  %v1383_v1 = vcombine.high %v11742_v21, %v11745_v49  ;;  %v1399_v56 = vcombine.high %v11752_v33, %v11858_v7 }
 0x241   :  { %v3100_v5 = vpack.i.b16 %v2788_v48, %v2720_v19  ;;  %v3097_v34 = vpack.i.b16 %v3096_v44, %v3095_v60  ;;  %v12105_v18 = vrot.slane %v14390_v22, %v11313_v35  ;;  %v12122_v52 = vpack.c.bf16 %v14391_v39, %v11309_v30  ;;  %v14392_v44 = vld [vmem:[#allocation18_spill] sm:$0xff] }
 0x242   :  { %10242 = vmatmul.mubr.msk.bf16.vlgmr.msra.gmra.mrb[36].mxu1 %vm4562_vm1, %v1719_v37  ;;  %v12125_v61 = vrot.slane %v1486_v53, %v11302_v13  ;;  %v1947_v26 = vshrl.u32 %v12003_v6, 16  ;;  %v1954_v21 = vshrl.u32 %v12058_v12, 16  ;;  %v1397_v49 = vrot.slane %v1383_v1, %v11313_v35  ;;  %v14393_v37 = vld [vmem:[#allocation20_spill] sm:$0xff] }
 0x243   :  { %v5131_v14 = vsel %vm4562_vm1, %v3100_v5, 0  ;;  %v5084_v60 = vsel %vm4562_vm1, %v3097_v34, 0  ;;  %10253 = vmatprep.mubr.msk.bf16.mxu1 %vm11049_vm0, %v14378_v0  ;;  %v1413_v30 = vrot.slane %v1399_v56, %v11313_v35  ;;  %v12135_v33 = vcombine.high %v2769_v55, %v2785_v51  ;;  %v1837_v56 = vpop.permute.xlu1 %1836 }
 0x244   :  { %10258 = vmatpush3.bf16.xpose.msra.mxu0 %v5131_v14  ;;  %10252 = vmatpush3.bf16.xpose.msra.mxu1 %v5084_v60  ;;  %v1955_v7 = vshrl.u32 %v12069_v40, 16  ;;  %v12140_v53 = vcombine.low %v12105_v18, %v12111_v38  ;;  %v12143_v34 = vcombine.high %v2701_v47, %v2717_v43  ;;  %v12147_v5 = vpack.c.bf16 %v14393_v37, %v14392_v44  ;;  %v1845_v60 = vpop.permute.xlu0 %1844  ;;  %v14394_v37 = vld [vmem:[#allocation15_spill] sm:$0xff] }
 0x245   :  { %10269 = vmatprep.subr.bf16.mxu0 %v14378_v0  ;;  %10263 = vmatprep.subr.bf16.mxu1 %v14378_v0  ;;  %v12150_v22 = vcombine.low %v1397_v49, %v1413_v30  ;;  %v1962_v55 = vshrl.u32 %v1821_v8, 16  ;;  %v12152_v51 = vpack.i.b16 %v1829_v59, %v1821_v8  ;;  %v1724_v1 = vshrl.u32 %v12054_v32, 16 }
 0x246   :  { %v3106_v39 = vpack.i.b16 %v12135_v33, %v12143_v34  ;;  %v1963_v14 = vshrl.u32 %v1829_v59, 16  ;;  %v1723_v47 = vshrl.u32 %v12050_v9, 16  ;;  %v3102_v43 = vshrl.u32 %v2788_v48, 16  ;;  %3166 = vrot.lane.b32.xlu1 %v12147_v5, %s11043_s13  ;;  %3174 = vrot.lane.b32.xlu0 %v12147_v5, %s11042_s3 }
 0x247   :  { %v12163_v8 = vrot.slane %v9882_v57, %v11302_v13  ;;  %v12166_v32 = vrot.slane %v1502_v16, %v11302_v13  ;;  %v1952_v44 = vpack.i.b16 %v12069_v40, %v12058_v12  ;;  %v3101_v59 = vshrl.u32 %v2720_v19, 16 }
 0x248   :  { %v1944_v9 = vpack.i.b16 %v12003_v6, %v14394_v37  ;;  %v1728_v48 = vpack.i.b16 %v12150_v22, %v12140_v53  ;;  %v1725_v46 = vpack.i.b16 %v1724_v1, %v1723_v47  ;;  %v1970_v24 = vshrl.u32 %v1837_v56, 16 }
 0x249   :  { %v14395_v28 = vshrl.u32 %v14394_v37, 16  ;;  %v3103_v57 = vpack.i.b16 %v3102_v43, %v3101_v59  ;;  %v1968_v31 = vpack.i.b16 %v1845_v60, %v1837_v56  ;;  %v1971_v4 = vshrl.u32 %v1845_v60, 16 }
 0x24a   :  { %v1956_v16 = vpack.i.b16 %v1955_v7, %v1954_v21  ;;  %v5225_v12 = vsel %vm4562_vm1, %v3106_v39, 0  ;;  %v1964_v40 = vpack.i.b16 %v1963_v14, %v1962_v55  ;;  %v2382_v19 = vcombine.low %v1944_v9, %v12152_v51  ;;  %3182 = vrot.lane.b32.xlu1 %v12147_v5, %s11044_s14  ;;  %3198 = vrot.lane.b32.xlu0 %v12147_v5, %s11045_s15 }
 0x24b   :  { %v1948_v29 = vpack.i.b16 %v1947_v26, %v14395_v28  ;;  %10260 = vmatmul.mubr.msk.bf16.vlgmr.msra.gmra.mrb[28].mxu0 %vm4562_vm1, %v1728_v48  ;;  %10254 = vmatmul.mubr.msk.bf16.vlgmr.msra.gmra.mrb[40].mxu1 %vm4562_vm1, %v1725_v46  ;;  %v5178_v6 = vsel %vm4562_vm1, %v3103_v57, 0  ;;  %v2398_v28 = vcombine.low %v1952_v44, %v1968_v31  ;;  %v2399_v26 = vcombine.high %v1952_v44, %v1968_v31 }
 0x24c   :  { %10270 = vmatpush3.bf16.xpose.msra.mxu0 %v5225_v12  ;;  %10271 = vmatprep.mubr.msk.bf16.mxu0 %vm11049_vm0, %v14378_v0  ;;  %v12183_v1 = vcombine.high %v1397_v49, %v1413_v30  ;;  %v582_v21 = vshrl.u32 %v11972_v11, 16  ;;  %v1972_v7 = vpack.i.b16 %v1971_v4, %v1970_v24  ;;  %v14396_v46 = vcombine.low %v11897_v23, %v11903_v62 }
 0x24d   :  { %10264 = vmatpush3.bf16.xpose.msra.mxu1 %v5178_v6  ;;  %10281 = vmatprep.subr.bf16.mxu0 %v14378_v0  ;;  %v14397_v56 = vcombine.high %v11897_v23, %v11903_v62  ;;  %v14398_v31 = vcombine.high %v12036_v15, %v12039_v2  ;;  %v583_v4 = vshrl.u32 %v11999_v10, 16  ;;  %v2383_v24 = vcombine.high %v1944_v9, %v12152_v51  ;;  %v449_v9 = vpop.permute.xlu0 %448 }
 0x24e   :  { %v12191_v55 = vrot.slane %v14396_v46, %v11302_v13  ;;  %v2406_v30 = vrot.slane %v2398_v28, %v11302_v13  ;;  %v2450_v14 = vcombine.low %v1948_v29, %v1964_v40  ;;  %v12212_v23 = vcombine.high %v12105_v18, %v12111_v38  ;;  %10265 = vmatprep.mubr.msk.bf16.mxu1 %vm11049_vm0, %v14378_v0 }
 0x24f   :  { %v12197_v39 = vrot.slane %v14397_v56, %v11302_v13  ;;  %v12203_v49 = vrot.slane %v14398_v31, %v11302_v13  ;;  %v14399_v62 = vcombine.low %v11925_v63, %v11928_v3  ;;  %v14400_v2 = vcombine.high %v11925_v63, %v11928_v3  ;;  %10275 = vmatprep.subr.bf16.mxu1 %v14378_v0 }
 0x250   :  { %v14401_v47 = vshrl.u32 %v11172_v50, 16  ;;  %v14402_v38 = vshrl.u32 %v11967_v17, 16  ;;  %v2390_v43 = vrot.slane %v2382_v19, %v11302_v13  ;;  %v2451_v60 = vcombine.high %v1948_v29, %v1964_v40  ;;  %v457_v50 = vpop.permute.xlu1 %456  ;;  %3190 = vrot.lane.b32.xlu1 %v12147_v5, %s11037_s1  ;;  %3214 = vrot.lane.b32.xlu0 %v12147_v5, %s11047_s17 }
 0x251   :  { %v12218_v15 = vrot.slane %v14399_v62, %v11302_v13  ;;  %v12224_v51 = vrot.slane %v14400_v2, %v11302_v13  ;;  %v2413_v44 = vrot.slane %v2399_v26, %v11302_v13  ;;  %v2466_v59 = vcombine.low %v1956_v16, %v1972_v7 }
 0x252   :  { %v12232_v18 = vpack.i.b16 %v14402_v38, %v14401_v47  ;;  %v2467_v63 = vcombine.high %v1956_v16, %v1972_v7  ;;  %v1734_v3 = vpack.i.b16 %v12183_v1, %v12212_v23  ;;  %v2822_v37 = vcombine.low %v12191_v55, %v12197_v39 }
 0x253   :  { %v12245_v17 = vpack.i.b16 %v11999_v10, %v11972_v11  ;;  %v2397_v29 = vrot.slane %v2383_v24, %v11302_v13  ;;  %v2414_v48 = vcombine.low %v2390_v43, %v2406_v30  ;;  %v2858_v57 = vcombine.low %v12010_v27, %v12013_v41 }
 0x254   :  { %v12252_v16 = vpack.i.b16 %v583_v4, %v582_v21  ;;  %v12255_v12 = vrot.slane %v2450_v14, %v11302_v13  ;;  %v2415_v40 = vcombine.high %v2390_v43, %v2406_v30  ;;  %10272 = vmatmul.mubr.msk.bf16.vlgmr.msra.gmra.mrb[32].mxu0 %vm4562_vm1, %v1734_v3  ;;  %v2838_v11 = vcombine.low %v12218_v15, %v12224_v51  ;;  %v465_v3 = vpop.permute.xlu0 %464 }
 0x255   :  { %v12261_v10 = vrot.slane %v2451_v60, %v11302_v13  ;;  %v2430_v19 = vcombine.low %v2397_v29, %v2413_v44  ;;  %v591_v6 = vshrl.u32 %v457_v50, 16  ;;  %v590_v28 = vshrl.u32 %v449_v9, 16  ;;  %10283 = vmatprep.mubr.msk.bf16.mxu0 %vm11049_vm0, %v14378_v0  ;;  %3206 = vrot.lane.b32.xlu1 %v12147_v5, %s11046_s16 }
 0x256   :  { %v2431_v26 = vcombine.high %v2397_v29, %v2413_v44  ;;  %v12266_v21 = vrot.slane %v2466_v59, %v11302_v13  ;;  %v12269_v7 = vrot.slane %v2467_v63, %v11302_v13  ;;  %v12272_v46 = vrot.slane %v2822_v37, %v11313_v35  ;;  %3168 = vrot.lane.b32.xlu0 %v12122_v52, %s11043_s13 }
 0x257   :  { %v12277_v56 = vrot.slane %v2414_v48, %v11313_v35  ;;  %v12280_v31 = vrot.slane %v2858_v57, %v11302_v13  ;;  %v9898_v4 = vcombine.high %v12010_v27, %v12013_v41  ;;  %v2874_v24 = vcombine.low %v12016_v45, %v12019_v42 }
 0x258   :  { %v12289_v30 = vrot.slane %v2415_v40, %v11313_v35  ;;  %v12292_v14 = vrot.slane %v2838_v11, %v11313_v35  ;;  %v9899_v62 = vcombine.high %v12016_v45, %v12019_v42  ;;  %v588_v2 = vpack.i.b16 %v457_v50, %v449_v9  ;;  %v473_v42 = vpop.permute.xlu1 %472 }
 0x259   :  { %v12297_v47 = vrot.slane %v9898_v4, %v11302_v13  ;;  %v12300_v27 = vrot.slane %v2874_v24, %v11302_v13  ;;  %v1729_v41 = vshrl.u32 %v12140_v53, 16  ;;  %v1730_v38 = vshrl.u32 %v12150_v22, 16  ;;  %3176 = vrot.lane.b32.xlu1 %v12122_v52, %s11042_s3 }
 0x25a   :  { %v12305_v43 = vrot.slane %v2430_v19, %v11313_v35  ;;  %v12308_v60 = vrot.slane %v2431_v26, %v11313_v35  ;;  %v12311_v44 = vrot.slane %v9899_v62, %v11302_v13  ;;  %v12313_v45 = vpack.i.b16 %v591_v6, %v590_v28  ;;  %3192 = vrot.lane.b32.xlu0 %v12122_v52, %s11037_s1 }
 0x25b   :  { %v2482_v53 = vcombine.low %v12255_v12, %v12266_v21  ;;  %v2483_v22 = vcombine.high %v12255_v12, %v12266_v21  ;;  %v2890_v59 = vcombine.low %v12280_v31, %v12297_v47  ;;  %v1731_v63 = vpack.i.b16 %v1730_v38, %v1729_v41 }
 0x25c   :  { %v12327_v37 = vcombine.low %v12272_v46, %v12292_v14  ;;  %v2906_v50 = vcombine.low %v12300_v27, %v12311_v44  ;;  %v1010_v9 = vcombine.low %v12033_v58, %v588_v2  ;;  %v1011_v29 = vcombine.high %v12033_v58, %v588_v2 }
 0x25d   :  { %v2898_v48 = vrot.slane %v2890_v59, %v11313_v35  ;;  %10266 = vmatmul.mubr.msk.bf16.vlgmr.msra.gmra.mrb[44].mxu1 %vm4562_vm1, %v1731_v63  ;;  %v3107_v57 = vshrl.u32 %v12143_v34, 16  ;;  %v3108_v40 = vshrl.u32 %v12135_v33, 16  ;;  %v599_v11 = vshrl.u32 %v473_v42, 16  ;;  %3184 = vrot.lane.b32.xlu1 %v12122_v52, %s11044_s14 }
 0x25e   :  { %v2914_v19 = vrot.slane %v2906_v50, %v11313_v35  ;;  %v1078_v6 = vcombine.low %v12232_v18, %v12313_v45  ;;  %v596_v28 = vpack.i.b16 %v473_v42, %v465_v3  ;;  %v598_v26 = vshrl.u32 %v465_v3, 16  ;;  %10277 = vmatprep.mubr.msk.bf16.mxu1 %vm11049_vm0, %v14378_v0 }
 0x25f   :  { %v3109_v58 = vpack.i.b16 %v3108_v40, %v3107_v57  ;;  %v14403_v34 = vcombine.low %v12042_v36, %v12046_v20  ;;  %v1518_v4 = vcombine.low %v12125_v61, %v12163_v8  ;;  %v1534_v24 = vcombine.low %v12166_v32, %v12203_v49 }
 0x260   :  { %v12356_v62 = vcombine.low %v2898_v48, %v2914_v19  ;;  %v600_v2 = vpack.i.b16 %v599_v11, %v598_v26  ;;  %v1026_v41 = vcombine.low %v12245_v17, %v596_v28  ;;  %v1027_v38 = vcombine.high %v12245_v17, %v596_v28 }
 0x261   :  { %v12348_v33 = vrot.slane %v14403_v34, %v11313_v35  ;;  %v5272_v42 = vsel %vm4562_vm1, %v3109_v58, 0  ;;  %v14404_v59 = vcombine.low %v12061_v54, %v12072_v25  ;;  %v12368_v3 = vrot.slane %v1518_v4, %v11313_v35  ;;  %3200 = vrot.lane.b32.xlu1 %v12122_v52, %s11045_s15 }
 0x262   :  { %v12371_v50 = vrot.slane %v1534_v24, %v11313_v35  ;;  %v3112_v57 = vpack.i.b16 %v12356_v62, %v12327_v37  ;;  %10276 = vmatpush3.bf16.xpose.msra.mxu1 %v5272_v42  ;;  %v1034_v17 = vrot.slane %v1026_v41, %v11302_v13  ;;  %v1041_v40 = vrot.slane %v1027_v38, %v11302_v13 }
 0x263   :  { %v12365_v63 = vrot.slane %v14404_v59, %v11313_v35  ;;  %v1094_v11 = vcombine.low %v12252_v16, %v600_v2  ;;  %v1018_v28 = vrot.slane %v1010_v9, %v11302_v13  ;;  %v1025_v26 = vrot.slane %v1011_v29, %v11302_v13  ;;  %10287 = vmatprep.subr.bf16.mxu1 %v14378_v0 }
 0x264   :  { %v1079_v58 = vcombine.high %v12232_v18, %v12313_v45  ;;  %v1095_v34 = vcombine.high %v12252_v16, %v600_v2  ;;  %v5319_v4 = vsel %vm4562_vm1, %v3112_v57, 0  ;;  %v1086_v24 = vrot.slane %v1078_v6, %v11302_v13 }
 0x265   :  { %v12388_v41 = vcombine.low %v12368_v3, %v12371_v50  ;;  %v12390_v38 = vcombine.high %v2898_v48, %v2914_v19  ;;  %10282 = vmatpush3.bf16.xpose.msra.mxu0 %v5319_v4  ;;  %v1042_v9 = vcombine.low %v1018_v28, %v1034_v17  ;;  %v1043_v18 = vcombine.high %v1018_v28, %v1034_v17 }
 0x266   :  { %v1102_v16 = vrot.slane %v1094_v11, %v11302_v13  ;;  %v1109_v45 = vrot.slane %v1095_v34, %v11302_v13  ;;  %v1058_v29 = vcombine.low %v1025_v26, %v1041_v40  ;;  %v1059_v2 = vcombine.high %v1025_v26, %v1041_v40  ;;  %10293 = vmatprep.subr.bf16.mxu0 %v14378_v0 }
 0x267   :  { %v12398_v6 = vcombine.low %v12348_v33, %v12365_v63  ;;  %v12403_v48 = vcombine.high %v12272_v46, %v12292_v14  ;;  %v2498_v19 = vcombine.low %v12261_v10, %v12269_v7  ;;  %v1093_v42 = vrot.slane %v1079_v58, %v11302_v13 }
 0x268   :  { %v1110_v59 = vcombine.low %v1086_v24, %v1102_v16  ;;  %v1111_v57 = vcombine.high %v1086_v24, %v1102_v16  ;;  %v2499_v17 = vcombine.high %v12261_v10, %v12269_v7  ;;  %v2926_v40 = vcombine.low %v12277_v56, %v12289_v30 }
 0x269   :  { %v1740_v11 = vpack.i.b16 %v12388_v41, %v12398_v6  ;;  %v3118_v46 = vpack.i.b16 %v12390_v38, %v12403_v48  ;;  %v12417_v14 = vrot.slane %v1042_v9, %v11313_v35  ;;  %v12420_v28 = vrot.slane %v1043_v18, %v11313_v35 }
 0x26a   :  { %v1126_v26 = vcombine.low %v1093_v42, %v1109_v45  ;;  %v1127_v58 = vcombine.high %v1093_v42, %v1109_v45  ;;  %v12423_v34 = vrot.slane %v1058_v29, %v11313_v35  ;;  %v12426_v10 = vrot.slane %v1059_v2, %v11313_v35 }
 0x26b   :  { %v12429_v7 = vrot.slane %v1110_v59, %v11313_v35  ;;  %v12432_v4 = vrot.slane %v1111_v57, %v11313_v35  ;;  %v12438_v24 = vrot.slane %v2482_v53, %v11313_v35  ;;  %v9900_v9 = vcombine.high %v12277_v56, %v12289_v30 }
 0x26c   :  { %v2942_v18 = vcombine.low %v12305_v43, %v12308_v60  ;;  %v9901_v16 = vcombine.high %v12305_v43, %v12308_v60  ;;  %v12450_v45 = vrot.slane %v2483_v22, %v11313_v35  ;;  %v12453_v29 = vrot.slane %v2498_v19, %v11313_v35  ;;  %10284 = vmatmul.mubr.msk.bf16.vlgmr.msra.gmra.mrb[36].mxu0 %vm4562_vm1, %v1740_v11 }
 0x26d   :  { %v12456_v53 = vrot.slane %v2499_v17, %v11313_v35  ;;  %v5413_v2 = vsel %vm4562_vm1, %v3118_v46, 0  ;;  %v1134_v42 = vrot.slane %v1126_v26, %v11313_v35  ;;  %v1141_v59 = vrot.slane %v1127_v58, %v11313_v35  ;;  %10295 = vmatprep.mubr.msk.bf16.mxu0 %vm11049_vm0, %v14378_v0 }
 0x26e   :  { %10294 = vmatpush3.bf16.xpose.msra.mxu0 %v5413_v2  ;;  %v1735_v57 = vshrl.u32 %v12212_v23, 16  ;;  %v1736_v12 = vshrl.u32 %v12183_v1, 16  ;;  %v1554_v21 = vcombine.low %v12417_v14, %v12420_v28  ;;  %v9884_v22 = vcombine.high %v12417_v14, %v12420_v28 }
 0x26f   :  { %v1570_v19 = vcombine.low %v12423_v34, %v12426_v10  ;;  %v1622_v17 = vcombine.low %v12429_v7, %v12432_v4  ;;  %10305 = vmatprep.subr.bf16.mxu0 %v14378_v0  ;;  %v3113_v1 = vshrl.u32 %v12327_v37, 16  ;;  %v3114_v11 = vshrl.u32 %v12356_v62, 16 }
 0x270   :  { %v1737_v23 = vpack.i.b16 %v1736_v12, %v1735_v57  ;;  %v12479_v46 = vcombine.high %v12348_v33, %v12365_v63  ;;  %v12483_v14 = vcombine.high %v12368_v3, %v12371_v50  ;;  %v2823_v28 = vcombine.high %v12191_v55, %v12197_v39 }
 0x271   :  { %v2839_v26 = vcombine.high %v12218_v15, %v12224_v51  ;;  %v2891_v58 = vcombine.high %v12280_v31, %v12297_v47  ;;  %v9886_v37 = vcombine.high %v12429_v7, %v12432_v4  ;;  %v1638_v62 = vcombine.low %v1134_v42, %v1141_v59 }
 0x272   :  { %10278 = vmatmul.mubr.msk.bf16.vlgmr.msra.gmra.mrb[48].mxu1 %vm4562_vm1, %v1737_v23  ;;  %v3115_v33 = vpack.i.b16 %v3114_v11, %v3113_v1  ;;  %v2907_v63 = vcombine.high %v12300_v27, %v12311_v44  ;;  %v1746_v3 = vpack.i.b16 %v12483_v14, %v12479_v46  ;;  %v2837_v55 = vrot.slane %v2823_v28, %v11313_v35 }
 0x273   :  { %v2853_v39 = vrot.slane %v2839_v26, %v11313_v35  ;;  %v2905_v15 = vrot.slane %v2891_v58, %v11313_v35  ;;  %10289 = vmatprep.mubr.msk.bf16.mxu1 %vm11049_vm0, %v14378_v0  ;;  %v9887_v51 = vcombine.high %v1134_v42, %v1141_v59  ;;  %v1742_v50 = vshrl.u32 %v12388_v41, 16 }
 0x274   :  { %v5366_v31 = vsel %vm4562_vm1, %v3115_v33, 0  ;;  %v2921_v47 = vrot.slane %v2907_v63, %v11313_v35  ;;  %v3120_v44 = vshrl.u32 %v12390_v38, 16  ;;  %v14405_v7 = vcombine.high %v12042_v36, %v12046_v20 }
 0x275   :  { %10288 = vmatpush3.bf16.xpose.msra.mxu1 %v5366_v31  ;;  %10296 = vmatmul.mubr.msk.bf16.vlgmr.msra.gmra.mrb[40].mxu0 %vm4562_vm1, %v1746_v3  ;;  %v2856_v27 = vcombine.low %v2837_v55, %v2853_v39  ;;  %v14406_v2 = vcombine.high %v12061_v54, %v12072_v25  ;;  %v3119_v41 = vshrl.u32 %v12403_v48, 16  ;;  %v1519_v38 = vcombine.high %v12125_v61, %v12163_v8 }
 0x276   :  { %v12512_v4 = vrot.slane %v14405_v7, %v11313_v35  ;;  %v2924_v59 = vcombine.low %v2905_v15, %v2921_v47  ;;  %10299 = vmatprep.subr.bf16.mxu1 %v14378_v0  ;;  %10307 = vmatprep.mubr.msk.bf16.mxu0 %vm11049_vm0, %v14378_v0  ;;  %v1535_v36 = vcombine.high %v12166_v32, %v12203_v49  ;;  %v1741_v48 = vshrl.u32 %v12398_v6, 16 }
 0x277   :  { %v12518_v42 = vrot.slane %v14406_v2, %v11313_v35  ;;  %v12529_v20 = vrot.slane %v1554_v21, %v11302_v13  ;;  %v12532_v54 = vrot.slane %v9884_v22, %v11302_v13  ;;  %v9885_v25 = vcombine.high %v12423_v34, %v12426_v10 }
 0x278   :  { %v3124_v57 = vpack.i.b16 %v2924_v59, %v2856_v27  ;;  %v3121_v12 = vpack.i.b16 %v3120_v44, %v3119_v41  ;;  %v1533_v23 = vrot.slane %v1519_v38, %v11313_v35  ;;  %v1549_v61 = vrot.slane %v1535_v36, %v11313_v35 }
 0x279   :  { %v12540_v8 = vrot.slane %v1622_v17, %v11302_v13  ;;  %v12543_v32 = vrot.slane %v9886_v37, %v11302_v13  ;;  %v12546_v49 = vrot.slane %v1638_v62, %v11302_v13  ;;  %v12548_v21 = vcombine.high %v2905_v15, %v2921_v47 }
 0x27a   :  { %v12551_v22 = vrot.slane %v9887_v51, %v11302_v13  ;;  %v5507_v6 = vsel %vm4562_vm1, %v3124_v57, 0  ;;  %v1743_v1 = vpack.i.b16 %v1742_v50, %v1741_v48  ;;  %v12556_v11 = vcombine.low %v12512_v4, %v12518_v42  ;;  %v12653_v48 = vpop.permute.xlu1 %3162 }
 0x27b   :  { %10306 = vmatpush3.bf16.xpose.msra.mxu0 %v5507_v6  ;;  %v12558_v17 = vcombine.high %v2837_v55, %v2853_v39  ;;  %v1748_v28 = vshrl.u32 %v12483_v14, 16  ;;  %v3126_v26 = vshrl.u32 %v2924_v59, 16  ;;  %v12565_v58 = vrot.slane %v2926_v40, %v11302_v13 }
 0x27c   :  { %10290 = vmatmul.mubr.msk.bf16.vlgmr.msra.gmra.mrb[52].mxu1 %vm4562_vm1, %v1743_v1  ;;  %v5460_v37 = vsel %vm4562_vm1, %v3121_v12, 0  ;;  %v1552_v62 = vcombine.low %v1533_v23, %v1549_v61  ;;  %10317 = vmatprep.subr.bf16.mxu0 %v14378_v0  ;;  %v12574_v33 = vrot.slane %v9900_v9, %v11302_v13  ;;  %v12580_v14 = vrot.slane %v2942_v18, %v11302_v13 }
 0x27d   :  { %10300 = vmatpush3.bf16.xpose.msra.mxu1 %v5460_v37  ;;  %v3130_v40 = vpack.i.b16 %v12548_v21, %v12558_v17  ;;  %10301 = vmatprep.mubr.msk.bf16.mxu1 %vm11049_vm0, %v14378_v0  ;;  %v3125_v63 = vshrl.u32 %v2856_v27, 16  ;;  %v12590_v56 = vrot.slane %v9901_v16, %v11302_v13  ;;  %v2994_v30 = vcombine.low %v12438_v24, %v12450_v45 }
 0x27e   :  { %10311 = vmatprep.subr.bf16.mxu1 %v14378_v0  ;;  %v2958_v9 = vcombine.low %v12565_v58, %v12574_v33  ;;  %v9902_v18 = vcombine.high %v12438_v24, %v12450_v45  ;;  %v3010_v3 = vcombine.low %v12453_v29, %v12456_v53  ;;  %v9903_v55 = vcombine.high %v12453_v29, %v12456_v53 }
 0x27f   :  { %v1747_v43 = vshrl.u32 %v12479_v46, 16  ;;  %v3127_v60 = vpack.i.b16 %v3126_v26, %v3125_v63  ;;  %v2974_v16 = vcombine.low %v12580_v14, %v12590_v56  ;;  %v12607_v39 = vrot.slane %v2994_v30, %v11302_v13 }
 0x280   :  { %v1752_v15 = vpack.i.b16 %v1552_v62, %v12556_v11  ;;  %v12611_v51 = vrot.slane %v9902_v18, %v11302_v13  ;;  %v12614_v24 = vrot.slane %v3010_v3, %v11302_v13  ;;  %v3025_v45 = vrot.slane %v9903_v55, %v11302_v13  ;;  %v12676_v18 = vpop.permute.xlu1 %3178 }
 0x281   :  { %v12621_v29 = vrot.slane %v1570_v19, %v11302_v13  ;;  %v12624_v53 = vrot.slane %v9885_v25, %v11302_v13  ;;  %v5601_v46 = vsel %vm4562_vm1, %v3130_v40, 0  ;;  %v1749_v31 = vpack.i.b16 %v1748_v28, %v1747_v43 }
 0x282   :  { %10308 = vmatmul.mubr.msk.bf16.vlgmr.msra.gmra.mrb[44].mxu0 %vm4562_vm1, %v1752_v15  ;;  %v2966_v47 = vrot.slane %v2958_v9, %v11313_v35  ;;  %v2982_v50 = vrot.slane %v2974_v16, %v11313_v35  ;;  %v3026_v27 = vcombine.low %v12607_v39, %v12611_v51  ;;  %v3042_v44 = vcombine.low %v12614_v24, %v3025_v45 }
 0x283   :  { %10318 = vmatpush3.bf16.xpose.msra.mxu0 %v5601_v46  ;;  %v5554_v34 = vsel %vm4562_vm1, %v3127_v60, 0  ;;  %10319 = vmatprep.mubr.msk.bf16.mxu0 %vm11049_vm0, %v14378_v0  ;;  %v12636_v10 = vcombine.high %v1533_v23, %v1549_v61  ;;  %v1654_v19 = vcombine.low %v12540_v8, %v12543_v32  ;;  %v3132_v59 = vshrl.u32 %v12548_v21, 16 }
 0x284   :  { %10302 = vmatmul.mubr.msk.bf16.vlgmr.msra.gmra.mrb[56].mxu1 %vm4562_vm1, %v1749_v31  ;;  %10329 = vmatprep.subr.bf16.mxu0 %v14378_v0  ;;  %v3034_v7 = vrot.slane %v3026_v27, %v11313_v35  ;;  %v3050_v2 = vrot.slane %v3042_v44, %v11313_v35  ;;  %v1670_v41 = vcombine.low %v12546_v49, %v12551_v22  ;;  %v1754_v25 = vshrl.u32 %v1552_v62, 16 }
 0x285   :  { %v1586_v38 = vcombine.low %v12529_v20, %v12532_v54  ;;  %10312 = vmatpush3.bf16.xpose.msra.mxu1 %v5554_v34  ;;  %v1485_v36 = vcombine.high %v12512_v4, %v12518_v42  ;;  %10313 = vmatprep.mubr.msk.bf16.mxu1 %vm11049_vm0, %v14378_v0  ;;  %v1602_v57 = vcombine.low %v12621_v29, %v12624_v53  ;;  %v3131_v61 = vshrl.u32 %v12558_v17, 16 }
 0x286   :  { %v2990_v12 = vcombine.low %v2966_v47, %v2982_v50  ;;  %v3058_v23 = vcombine.low %v3034_v7, %v3050_v2  ;;  %10323 = vmatprep.subr.bf16.mxu1 %v14378_v0  ;;  %v1753_v6 = vshrl.u32 %v12556_v11, 16  ;;  %v1662_v1 = vrot.slane %v1654_v19, %v11313_v35 }
 0x287   :  { %v1758_v21 = vpack.i.b16 %v12636_v10, %v1485_v36  ;;  %v3133_v42 = vpack.i.b16 %v3132_v59, %v3131_v61  ;;  %v1678_v28 = vrot.slane %v1670_v41, %v11313_v35  ;;  %v3027_v37 = vcombine.high %v12607_v39, %v12611_v51  ;;  %v14407_v61 = vld [vmem:[#allocation16_spill] sm:$0xff] }
 0x288   :  { %v3136_v4 = vpack.i.b16 %v3058_v23, %v2990_v12  ;;  %v1755_v26 = vpack.i.b16 %v1754_v25, %v1753_v6  ;;  %v1594_v17 = vrot.slane %v1586_v38, %v11313_v35  ;;  %v1610_v40 = vrot.slane %v1602_v57, %v11313_v35 }
 0x289   :  { %v3059_v63 = vcombine.high %v3034_v7, %v3050_v2  ;;  %v2959_v11 = vcombine.high %v12565_v58, %v12574_v33  ;;  %v2975_v30 = vcombine.high %v12580_v14, %v12590_v56  ;;  %v3043_v9 = vcombine.high %v12614_v24, %v3025_v45  ;;  %v3171_v14 = vpop.permute.xlu0 %3170 }
 0x28a   :  { %10320 = vmatmul.mubr.msk.bf16.vlgmr.msra.gmra.mrb[48].mxu0 %vm4562_vm1, %v1758_v21  ;;  %v5695_v62 = vsel %vm4562_vm1, %v3136_v4, 0  ;;  %v5648_v3 = vsel %vm4562_vm1, %v3133_v42, 0  ;;  %v1686_v55 = vcombine.low %v1662_v1, %v1678_v28  ;;  %v2991_v43 = vcombine.high %v2966_v47, %v2982_v50 }
 0x28b   :  { %10330 = vmatpush3.bf16.xpose.msra.mxu0 %v5695_v62  ;;  %10331 = vmatprep.mubr.msk.bf16.mxu0 %vm11049_vm0, %v14378_v0  ;;  %v3138_v60 = vshrl.u32 %v3058_v23, 16  ;;  %v1587_v16 = vcombine.high %v12529_v20, %v12532_v54  ;;  %v3041_v58 = vrot.slane %v3027_v37, %v11313_v35  ;;  %v3057_v33 = vrot.slane %v3043_v9, %v11313_v35 }
 0x28c   :  { %10314 = vmatmul.mubr.msk.bf16.vlgmr.msra.gmra.mrb[60].mxu1 %vm4562_vm1, %v1755_v26  ;;  %10341 = vmatprep.subr.bf16.mxu0 %v14378_v0  ;;  %v1618_v56 = vcombine.low %v1594_v17, %v1610_v40  ;;  %v3142_v39 = vpack.i.b16 %v3059_v63, %v2991_v43  ;;  %v1760_v15 = vshrl.u32 %v12636_v10, 16  ;;  %v3137_v51 = vshrl.u32 %v2990_v12, 16 }
 0x28d   :  { %10324 = vmatpush3.bf16.xpose.msra.mxu1 %v5648_v3  ;;  %10325 = vmatprep.mubr.msk.bf16.mxu1 %vm11049_vm0, %v14378_v0  ;;  %v1603_v24 = vcombine.high %v12621_v29, %v12624_v53  ;;  %v12691_v20 = vcombine.high %v1662_v1, %v1678_v28  ;;  %v2973_v54 = vrot.slane %v2959_v11, %v11313_v35  ;;  %v1759_v31 = vshrl.u32 %v1485_v36, 16  ;;  %v3187_v53 = vpop.permute.xlu1 %3186 }
 0x28e   :  { %10335 = vmatprep.subr.bf16.mxu1 %v14378_v0  ;;  %v2989_v45 = vrot.slane %v2975_v30, %v11313_v35  ;;  %v1764_v46 = vpack.i.b16 %v1686_v55, %v1618_v56  ;;  %v3139_v47 = vpack.i.b16 %v3138_v60, %v3137_v51  ;;  %v1766_v50 = vshrl.u32 %v1686_v55, 16 }
 0x28f   :  { %v12695_v27 = vcombine.high %v1594_v17, %v1610_v40  ;;  %v12697_v44 = vcombine.low %v3041_v58, %v3057_v33  ;;  %v1655_v34 = vcombine.high %v12540_v8, %v12543_v32  ;;  %v1671_v29 = vcombine.high %v12546_v49, %v12551_v22  ;;  %v3195_v8 = vpop.permute.xlu0 %3194 }
 0x290   :  { %v5789_v10 = vsel %vm4562_vm1, %v3142_v39, 0  ;;  %v1761_v19 = vpack.i.b16 %v1760_v15, %v1759_v31  ;;  %v1765_v7 = vshrl.u32 %v1618_v56, 16  ;;  %v3144_v2 = vshrl.u32 %v3059_v63, 16 }
 0x291   :  { %v1770_v59 = vpack.i.b16 %v12691_v20, %v12695_v27  ;;  %v2992_v41 = vcombine.low %v2973_v54, %v2989_v45  ;;  %v5742_v32 = vsel %vm4562_vm1, %v3139_v47, 0  ;;  %v3143_v22 = vshrl.u32 %v2991_v43, 16  ;;  %v3203_v26 = vpop.permute.xlu1 %3202 }
 0x292   :  { %10332 = vmatmul.mubr.msk.bf16.vlgmr.msra.gmra.mrb[52].mxu0 %vm4562_vm1, %v1764_v46  ;;  %v1767_v49 = vpack.i.b16 %v1766_v50, %v1765_v7  ;;  %v12713_v38 = vrot.slane %v1587_v16, %v11313_v35  ;;  %v1669_v25 = vrot.slane %v1655_v34, %v11313_v35  ;;  %v1685_v57 = vrot.slane %v1671_v29, %v11313_v35 }
 0x293   :  { %10342 = vmatpush3.bf16.xpose.msra.mxu0 %v5789_v10  ;;  %10343 = vmatprep.mubr.msk.bf16.mxu0 %vm11049_vm0, %v14378_v0  ;;  %v3148_v36 = vpack.i.b16 %v12697_v44, %v2992_v41  ;;  %v3145_v12 = vpack.i.b16 %v3144_v2, %v3143_v22  ;;  %v12722_v23 = vrot.slane %v1603_v24, %v11313_v35  ;;  %v3222_v21 = vshrl.u32 %v14407_v61, 16  ;;  %v3211_v3 = vpop.permute.xlu0 %3210 }
 0x294   :  { %10326 = vmatmul.mubr.msk.bf16.vlgmr.msra.gmra.mrb[64].mxu1 %vm4562_vm1, %v1761_v19  ;;  %10353 = vmatprep.subr.bf16.mxu0 %v14378_v0  ;;  %v3223_v6 = vshrl.u32 %v12653_v48, 16  ;;  %v12726_v4 = vcombine.high %v2973_v54, %v2989_v45  ;;  %v3220_v42 = vpack.i.b16 %v12653_v48, %v14407_v61  ;;  %v3231_v1 = vshrl.u32 %v12676_v18, 16 }
 0x295   :  { %10336 = vmatpush3.bf16.xpose.msra.mxu1 %v5742_v32  ;;  %10337 = vmatprep.mubr.msk.bf16.mxu1 %vm11049_vm0, %v14378_v0  ;;  %v3238_v28 = vshrl.u32 %v3187_v53, 16  ;;  %v12731_v37 = vcombine.high %v3041_v58, %v3057_v33  ;;  %v3228_v62 = vpack.i.b16 %v12676_v18, %v3171_v14  ;;  %v3230_v17 = vshrl.u32 %v3171_v14, 16 }
 0x296   :  { %10347 = vmatprep.subr.bf16.mxu1 %v14378_v0  ;;  %v3246_v40 = vshrl.u32 %v3203_v26, 16  ;;  %v5883_v63 = vsel %vm4562_vm1, %v3148_v36, 0  ;;  %v12735_v11 = vcombine.low %v1669_v25, %v1685_v57  ;;  %v3236_v30 = vpack.i.b16 %v3195_v8, %v3187_v53 }
 0x297   :  { %v3239_v9 = vshrl.u32 %v3195_v8, 16  ;;  %v3224_v48 = vpack.i.b16 %v3223_v6, %v3222_v21  ;;  %v3232_v55 = vpack.i.b16 %v3231_v1, %v3230_v17  ;;  %v3244_v43 = vpack.i.b16 %v3211_v3, %v3203_v26 }
 0x298   :  { %v3247_v60 = vshrl.u32 %v3211_v3, 16  ;;  %v3150_v18 = vshrl.u32 %v12697_v44, 16  ;;  %v3346_v58 = vcombine.low %v3220_v42, %v3236_v30  ;;  %v3347_v33 = vcombine.high %v3220_v42, %v3236_v30 }
 0x299   :  { %v3240_v16 = vpack.i.b16 %v3239_v9, %v3238_v28  ;;  %v5836_v14 = vsel %vm4562_vm1, %v3145_v12, 0  ;;  %v3362_v39 = vcombine.low %v3228_v62, %v3244_v43  ;;  %v3363_v15 = vcombine.high %v3228_v62, %v3244_v43  ;;  %v12766_v12 = vpop.permute.xlu1 %3172 }
 0x29a   :  { %10344 = vmatmul.mubr.msk.bf16.vlgmr.msra.gmra.mrb[56].mxu0 %vm4562_vm1, %v1770_v59  ;;  %v3248_v56 = vpack.i.b16 %v3247_v60, %v3246_v40  ;;  %v1620_v51 = vcombine.low %v12713_v38, %v12722_v23  ;;  %v3149_v24 = vshrl.u32 %v2992_v41, 16  ;;  %v3354_v54 = vrot.slane %v3346_v58, %v11302_v13 }
 0x29b   :  { %10354 = vmatpush3.bf16.xpose.msra.mxu0 %v5883_v63  ;;  %10355 = vmatprep.mubr.msk.bf16.mxu0 %vm11049_vm0, %v14378_v0  ;;  %v3154_v45 = vpack.i.b16 %v12731_v37, %v12726_v4  ;;  %v1771_v46 = vshrl.u32 %v12695_v27, 16  ;;  %v1772_v31 = vshrl.u32 %v12691_v20, 16  ;;  %v3370_v47 = vrot.slane %v3362_v39, %v11302_v13  ;;  %v12799_v39 = vpop.permute.xlu0 %3164 }
 0x29c   :  { %10338 = vmatmul.mubr.msk.bf16.vlgmr.msra.gmra.mrb[68].mxu1 %vm4562_vm1, %v1767_v49  ;;  %10365 = vmatprep.subr.bf16.mxu0 %v14378_v0  ;;  %v1776_v50 = vpack.i.b16 %v12735_v11, %v1620_v51  ;;  %v3151_v44 = vpack.i.b16 %v3150_v18, %v3149_v24  ;;  %v3361_v34 = vrot.slane %v3347_v33, %v11302_v13  ;;  %v3156_v32 = vshrl.u32 %v12731_v37, 16 }
 0x29d   :  { %10348 = vmatpush3.bf16.xpose.msra.mxu1 %v5836_v14  ;;  %10349 = vmatprep.mubr.msk.bf16.mxu1 %vm11049_vm0, %v14378_v0  ;;  %v3377_v29 = vrot.slane %v3363_v15, %v11302_v13  ;;  %v3414_v53 = vcombine.low %v3224_v48, %v3240_v16  ;;  %v3378_v10 = vcombine.low %v3354_v54, %v3370_v47  ;;  %v5977_v20 = vsel %vm4562_vm1, %v3154_v45, 0 }
 0x29e   :  { %10359 = vmatprep.subr.bf16.mxu1 %v14378_v0  ;;  %v3379_v19 = vcombine.high %v3354_v54, %v3370_v47  ;;  %v3430_v7 = vcombine.low %v3232_v55, %v3248_v56  ;;  %v3415_v2 = vcombine.high %v3224_v48, %v3240_v16  ;;  %v3431_v59 = vcombine.high %v3232_v55, %v3248_v56 }
 0x29f   :  { %v1773_v27 = vpack.i.b16 %v1772_v31, %v1771_v46  ;;  %v1689_v41 = vcombine.high %v1669_v25, %v1685_v57  ;;  %v5930_v8 = vsel %vm4562_vm1, %v3151_v44, 0  ;;  %v3394_v49 = vcombine.low %v3361_v34, %v3377_v29 }
 0x2a0   :  { %v3395_v22 = vcombine.high %v3361_v34, %v3377_v29  ;;  %v3422_v36 = vrot.slane %v3414_v53, %v11302_v13  ;;  %v3386_v61 = vrot.slane %v3378_v10, %v11313_v35  ;;  %v3393_v25 = vrot.slane %v3379_v19, %v11313_v35  ;;  %v12809_v19 = vpop.permute.xlu0 %3188 }
 0x2a1   :  { %v3438_v57 = vrot.slane %v3430_v7, %v11302_v13  ;;  %v1621_v21 = vcombine.high %v12713_v38, %v12722_v23  ;;  %v3155_v6 = vshrl.u32 %v12726_v4, 16  ;;  %v3429_v42 = vrot.slane %v3415_v2, %v11302_v13 }
 0x2a2   :  { %10356 = vmatmul.mubr.msk.bf16.vlgmr.msra.gmra.mrb[60].mxu0 %vm4562_vm1, %v1776_v50  ;;  %v3445_v1 = vrot.slane %v3431_v59, %v11302_v13  ;;  %v1777_v28 = vshrl.u32 %v1620_v51, 16  ;;  %v1778_v26 = vshrl.u32 %v12735_v11, 16  ;;  %v3402_v17 = vrot.slane %v3394_v49, %v11313_v35  ;;  %v12784_v11 = vpop.permute.xlu1 %3180 }
 0x2a3   :  { %10366 = vmatpush3.bf16.xpose.msra.mxu0 %v5977_v20  ;;  %10367 = vmatprep.mubr.msk.bf16.mxu0 %vm11049_vm0, %v14378_v0  ;;  %v1782_v37 = vpack.i.b16 %v1689_v41, %v1621_v21  ;;  %v3157_v62 = vpack.i.b16 %v3156_v32, %v3155_v6  ;;  %v3409_v38 = vrot.slane %v3395_v22, %v11313_v35  ;;  %v1784_v56 = vshrl.u32 %v1689_v41, 16 }
 0x2a4   :  { %10350 = vmatmul.mubr.msk.bf16.vlgmr.msra.gmra.mrb[72].mxu1 %vm4562_vm1, %v1773_v27  ;;  %10377 = vmatprep.subr.bf16.mxu0 %v14378_v0  ;;  %v3446_v23 = vcombine.low %v3422_v36, %v3438_v57  ;;  %v3447_v40 = vcombine.high %v3422_v36, %v3438_v57  ;;  %v3890_v4 = vcombine.low %v3386_v61, %v3393_v25  ;;  %v1783_v24 = vshrl.u32 %v1621_v21, 16 }
 0x2a5   :  { %10360 = vmatpush3.bf16.xpose.msra.mxu1 %v5930_v8  ;;  %10361 = vmatprep.mubr.msk.bf16.mxu1 %vm11049_vm0, %v14378_v0  ;;  %v9904_v63 = vcombine.high %v3386_v61, %v3393_v25  ;;  %v3462_v30 = vcombine.low %v3429_v42, %v3445_v1  ;;  %v3463_v9 = vcombine.high %v3429_v42, %v3445_v1  ;;  %v6024_v48 = vsel %vm4562_vm1, %v3157_v62, 0 }
 0x2a6   :  { %10371 = vmatprep.subr.bf16.mxu1 %v14378_v0  ;;  %v1779_v3 = vpack.i.b16 %v1778_v26, %v1777_v28  ;;  %v3906_v55 = vcombine.low %v3402_v17, %v3409_v38  ;;  %v9905_v43 = vcombine.high %v3402_v17, %v3409_v38  ;;  %v3454_v60 = vrot.slane %v3446_v23, %v11313_v35  ;;  %v12803_v46 = vpop.permute.xlu1 %3196  ;;  %v12826_v28 = vpop.permute.xlu0 %3204 }
 0x2a7   :  { %v3461_v18 = vrot.slane %v3447_v40, %v11313_v35  ;;  %v3897_v16 = vrot.slane %v3890_v4, %v11302_v13  ;;  %v3905_v58 = vrot.slane %v9904_v63, %v11302_v13  ;;  %v3470_v33 = vrot.slane %v3462_v30, %v11313_v35 }
 0x2a8   :  { %v3477_v14 = vrot.slane %v3463_v9, %v11313_v35  ;;  %v3913_v15 = vrot.slane %v3906_v55, %v11302_v13  ;;  %v3921_v51 = vrot.slane %v9905_v43, %v11302_v13  ;;  %v1785_v50 = vpack.i.b16 %v1784_v56, %v1783_v24 }
 0x2a9   :  { %v3958_v54 = vcombine.low %v3454_v60, %v3461_v18  ;;  %v9906_v45 = vcombine.high %v3454_v60, %v3461_v18  ;;  %v3922_v31 = vcombine.low %v3897_v16, %v3905_v58  ;;  %v3923_v32 = vcombine.high %v3897_v16, %v3905_v58 }
 0x2aa   :  { %10368 = vmatmul.mubr.msk.bf16.vlgmr.msra.gmra.mrb[64].mxu0 %vm4562_vm1, %v1782_v37  ;;  %v3974_v47 = vcombine.low %v3470_v33, %v3477_v14  ;;  %v9907_v44 = vcombine.high %v3470_v33, %v3477_v14  ;;  %v3938_v29 = vcombine.low %v3913_v15, %v3921_v51  ;;  %v12815_v59 = vpop.permute.xlu1 %3212  ;;  %v3939_v49 = vcombine.high %v3913_v15, %v3921_v51 }
 0x2ab   :  { %10379 = vmatprep.mubr.msk.bf16.mxu0 %vm11049_vm0, %v14378_v0  ;;  %v3930_v34 = vrot.slane %v3922_v31, %v11313_v35  ;;  %v3965_v53 = vrot.slane %v3958_v54, %v11302_v13  ;;  %v3973_v10 = vrot.slane %v9906_v45, %v11302_v13  ;;  %v3937_v57 = vrot.slane %v3923_v32, %v11313_v35 }
 0x2ac   :  { %10362 = vmatmul.mubr.msk.bf16.vlgmr.msra.gmra.mrb[76].mxu1 %vm4562_vm1, %v1779_v3  ;;  %v3946_v7 = vrot.slane %v3938_v29, %v11313_v35  ;;  %v3981_v2 = vrot.slane %v3974_v47, %v11302_v13  ;;  %v3989_v20 = vrot.slane %v9907_v44, %v11302_v13  ;;  %v3953_v21 = vrot.slane %v3939_v49, %v11313_v35 }
 0x2ad   :  { %10372 = vmatpush3.bf16.xpose.msra.mxu1 %v6024_v48  ;;  %10373 = vmatprep.mubr.msk.bf16.mxu1 %vm11049_vm0, %v14378_v0  ;;  %v3990_v27 = vcombine.low %v3965_v53, %v3973_v10  ;;  %v3991_v61 = vcombine.high %v3965_v53, %v3973_v10  ;;  %v3286_v51 = vshrl.u32 %v12147_v5, 16 }
 0x2ae   :  { %10383 = vmatprep.subr.bf16.mxu1 %v14378_v0  ;;  %v3954_v41 = vcombine.low %v3930_v34, %v3946_v7  ;;  %v12818_v8 = vcombine.high %v3930_v34, %v3946_v7  ;;  %v4006_v36 = vcombine.low %v3981_v2, %v3989_v20  ;;  %v4007_v25 = vcombine.high %v3981_v2, %v3989_v20 }
 0x2af   :  { %v3998_v22 = vrot.slane %v3990_v27, %v11313_v35  ;;  %v4005_v42 = vrot.slane %v3991_v61, %v11313_v35  ;;  %v12828_v26 = vcombine.low %v3937_v57, %v3953_v21  ;;  %v12830_v37 = vcombine.high %v3937_v57, %v3953_v21 }
 0x2b0   :  { %v4014_v6 = vrot.slane %v4006_v36, %v11313_v35  ;;  %v4021_v1 = vrot.slane %v4007_v25, %v11313_v35  ;;  %v4438_v38 = vshrl.u32 %v3954_v41, 16  ;;  %v4446_v4 = vshrl.u32 %v12818_v8, 16 }
 0x2b1   :  { %v4454_v3 = vshrl.u32 %v12828_v26, 16  ;;  %v4462_v15 = vshrl.u32 %v12830_v37, 16 }
 0x2b2   :  { %v4022_v17 = vcombine.low %v3998_v22, %v4014_v6  ;;  %v12832_v23 = vcombine.high %v3998_v22, %v4014_v6  ;;  %v12834_v40 = vcombine.low %v4005_v42, %v4021_v1  ;;  %v12837_v63 = vcombine.high %v4005_v42, %v4021_v1 }
 0x2b4   :  { %10374 = vmatmul.mubr.msk.bf16.vlgmr.msra.gmra.mrb[80].mxu1 %vm4562_vm1, %v1785_v50  ;;  %v4436_v30 = vpack.i.b16 %v4022_v17, %v3954_v41  ;;  %v4439_v9 = vshrl.u32 %v4022_v17, 16  ;;  %v4447_v60 = vshrl.u32 %v12832_v23, 16  ;;  %v4455_v58 = vshrl.u32 %v12834_v40, 16 }
 0x2b5   :  { %10385 = vmatprep.mubr.msk.bf16.mxu1 %vm11049_vm0, %v14378_v0  ;;  %v4463_v54 = vshrl.u32 %v12837_v63, 16 }
 0x2b6   :  { %10378 = vmatpush3.bf16.msra.mxu0 %v4436_v30  ;;  %v4440_v16 = vpack.i.b16 %v4439_v9, %v4438_v38  ;;  %v12849_v33 = vpack.i.b16 %v4447_v60, %v4446_v4  ;;  %v12851_v56 = vpack.i.b16 %v4455_v58, %v4454_v3 }
 0x2b7   :  { %10389 = vmatprep.subr.bf16.mxu0 %v14378_v0  ;;  %v12858_v44 = vpack.i.b16 %v4463_v54, %v4462_v15 }
 0x2b8   :  { %v3167_v62 = vpop.permute.xlu1 %3166  ;;  %v3175_v48 = vpop.permute.xlu0 %3174  ;;  %10384 = vmatpush3.bf16.msra.mxu1 %v4440_v16 }
 0x2b9   :  { %10395 = vmatprep.subr.bf16.mxu1 %v14378_v0  ;;  %v3287_v24 = vshrl.u32 %v3167_v62, 16  ;;  %v3284_v31 = vpack.i.b16 %v3167_v62, %v12147_v5  ;;  %14408 = vst [vmem:[#allocation19_spill] sm:$0xff] %v12858_v44  ;;  %v3294_v53 = vshrl.u32 %v3175_v48, 16 }
 0x2bb   :  { %v3288_v7 = vpack.i.b16 %v3287_v24, %v3286_v51 }
 0x2bc   :  { %v3183_v14 = vpop.permute.xlu1 %3182  ;;  %v3199_v45 = vpop.permute.xlu0 %3198 }
 0x2bd   :  { %v3303_v50 = vshrl.u32 %v3199_v45, 16  ;;  %v3295_v34 = vshrl.u32 %v3183_v14, 16  ;;  %v3292_v27 = vpack.i.b16 %v3183_v14, %v3175_v48 }
 0x2bf   :  { %v3296_v36 = vpack.i.b16 %v3295_v34, %v3294_v53 }
 0x2c2   :  { %v3191_v47 = vpop.permute.xlu1 %3190  ;;  %v3215_v20 = vpop.permute.xlu0 %3214 }
 0x2c3   :  { %v3302_v29 = vshrl.u32 %v3191_v47, 16  ;;  %v3300_v10 = vpack.i.b16 %v3199_v45, %v3191_v47  ;;  %v3311_v22 = vshrl.u32 %v3215_v20, 16 }
 0x2c5   :  { %v3304_v2 = vpack.i.b16 %v3303_v50, %v3302_v29  ;;  %v3618_v32 = vcombine.low %v3284_v31, %v3300_v10  ;;  %v3619_v49 = vcombine.high %v3284_v31, %v3300_v10 }
 0x2c7   :  { %v3207_v41 = vpop.permute.xlu1 %3206  ;;  %v3686_v25 = vcombine.low %v3288_v7, %v3304_v2  ;;  %v3687_v5 = vcombine.high %v3288_v7, %v3304_v2  ;;  %v3626_v6 = vrot.slane %v3618_v32, %v11302_v13  ;;  %v3633_v42 = vrot.slane %v3619_v49, %v11302_v13 }
 0x2c8   :  { %v3310_v61 = vshrl.u32 %v3207_v41, 16  ;;  %v3308_v57 = vpack.i.b16 %v3215_v20, %v3207_v41 }
 0x2c9   :  { %v3694_v4 = vrot.slane %v3686_v25, %v11302_v13  ;;  %v3701_v30 = vrot.slane %v3687_v5, %v11302_v13 }
 0x2ca   :  { %v3312_v21 = vpack.i.b16 %v3311_v22, %v3310_v61  ;;  %v3634_v1 = vcombine.low %v3292_v27, %v3308_v57  ;;  %v3635_v62 = vcombine.high %v3292_v27, %v3308_v57 }
 0x2cc   :  { %v3702_v17 = vcombine.low %v3296_v36, %v3312_v21  ;;  %v3703_v38 = vcombine.high %v3296_v36, %v3312_v21  ;;  %v3642_v9 = vrot.slane %v3634_v1, %v11302_v13  ;;  %v3649_v3 = vrot.slane %v3635_v62, %v11302_v13 }
 0x2ce   :  { %v12866_v48 = vpop.f32.mrb[16].mxu1  ;;  %v12868_v60 = vpop.f32.mrb[8].mxu0  ;;  %v3710_v16 = vrot.slane %v3702_v17, %v11302_v13  ;;  %v3717_v58 = vrot.slane %v3703_v38, %v11302_v13  ;;  %v3650_v51 = vcombine.low %v3626_v6, %v3642_v9  ;;  %v3651_v24 = vcombine.high %v3626_v6, %v3642_v9 }
 0x2cf   :  { %v10189_v14 = vpop.f32.mrb[17].mxu1  ;;  %v6079_v15 = vsel %vm4562_vm1, %v12868_v60, -inf  ;;  %v3666_v54 = vcombine.low %v3633_v42, %v3649_v3  ;;  %v3667_v45 = vcombine.high %v3633_v42, %v3649_v3  ;;  %v10201_v31 = vpop.f32.mrb[9].mxu0  ;;  %v6067_v5 = vsel %vm4562_vm1, %v12866_v48, -inf }
 0x2d0   :  { %6080 = vmax.xlane.f32.xlu1 %v6079_v15  ;;  %v12874_v47 = vpop.f32.mrb[18].mxu1  ;;  %v12876_v50 = vpop.f32.mrb[10].mxu0  ;;  %v3718_v34 = vcombine.low %v3694_v4, %v3710_v16  ;;  %v3719_v29 = vcombine.high %v3694_v4, %v3710_v16  ;;  %v3734_v53 = vcombine.low %v3701_v30, %v3717_v58  ;;  %v3735_v10 = vcombine.high %v3701_v30, %v3717_v58 }
 0x2d1   :  { %v10190_v7 = vpop.f32.mrb[19].mxu1  ;;  %v10202_v2 = vpop.f32.mrb[11].mxu0  ;;  %v3658_v20 = vrot.slane %v3650_v51, %v11313_v35  ;;  %v3665_v27 = vrot.slane %v3651_v24, %v11313_v35  ;;  %v3674_v41 = vrot.slane %v3666_v54, %v11313_v35  ;;  %v3681_v32 = vrot.slane %v3667_v45, %v11313_v35  ;;  %6068 = vmax.xlane.f32.xlu0 %v6067_v5 }
 0x2d2   :  { %v3726_v49 = vrot.slane %v3718_v34, %v11313_v35  ;;  %v3733_v22 = vrot.slane %v3719_v29, %v11313_v35  ;;  %v3742_v36 = vrot.slane %v3734_v53, %v11313_v35  ;;  %v3749_v61 = vrot.slane %v3735_v10, %v11313_v35 }
 0x2d3   :  { %v6070_v57 = vsel %vm4562_vm1, %v12874_v47, -inf  ;;  %v4162_v6 = vcombine.low %v3658_v20, %v3665_v27  ;;  %v9912_v42 = vcombine.high %v3658_v20, %v3665_v27  ;;  %v4178_v1 = vcombine.low %v3674_v41, %v3681_v32 }
 0x2d4   :  { %6071 = vmax.xlane.f32.xlu1 %v6070_v57  ;;  %v9913_v17 = vcombine.high %v3674_v41, %v3681_v32  ;;  %v4230_v4 = vcombine.low %v3726_v49, %v3733_v22  ;;  %v9914_v30 = vcombine.high %v3726_v49, %v3733_v22  ;;  %v4246_v9 = vcombine.low %v3742_v36, %v3749_v61 }
 0x2d5   :  { %v9915_v3 = vcombine.high %v3742_v36, %v3749_v61  ;;  %v6082_v16 = vsel %vm4562_vm1, %v12876_v50, -inf  ;;  %v12897_v58 = vrot.slane %v4162_v6, %v11302_v13  ;;  %v12900_v14 = vrot.slane %v9912_v42, %v11302_v13 }
 0x2d6   :  { %v12886_v25 = vpop.f32.mrb[20].mxu1  ;;  %6083 = vmax.xlane.f32.xlu0 %v6082_v16  ;;  %v12903_v15 = vrot.slane %v4178_v1, %v11302_v13  ;;  %v12908_v24 = vrot.slane %v9913_v17, %v11302_v13  ;;  %v12911_v54 = vrot.slane %v4230_v4, %v11302_v13  ;;  %v12914_v45 = vrot.slane %v9914_v30, %v11302_v13 }
 0x2d7   :  { %v10195_v21 = vpop.f32.mrb[21].mxu1  ;;  %14409 = vst [vmem:[#allocation18_spill] sm:$0xff] %v12897_v58  ;;  %14410 = vst [vmem:[#allocation20_spill] sm:$0xff] %v12900_v14  ;;  %v6073_v51 = vsel %vm4562_vm1, %v12886_v25, -inf  ;;  %v12917_v31 = vrot.slane %v4246_v9, %v11302_v13  ;;  %v12920_v34 = vrot.slane %v9915_v3, %v11302_v13  ;;  %v4195_v29 = vcombine.high %v12897_v58, %v12900_v14  ;;  %v14454_v58 = vld [vmem:[#allocation17_spill] sm:$0xff] }
 0x2d8   :  { %v12892_v62 = vpop.f32.mrb[22].mxu1  ;;  %14411 = vst [vmem:[#allocation15_spill] sm:$0xff] %v12903_v15  ;;  %14412 = vst [vmem:[#allocation16_spill] sm:$0xff] %v12908_v24  ;;  %v4211_v53 = vcombine.high %v12903_v15, %v12908_v24  ;;  %v4263_v10 = vcombine.high %v12911_v54, %v12914_v45  ;;  %v3270_v14 = vshrl.u32 %v12809_v19, 16 }
 0x2d9   :  { %v10196_v38 = vpop.f32.mrb[23].mxu1  ;;  %14413 = vst [vmem:[#allocation21_spill] sm:$0xff] %v12911_v54  ;;  %14414 = vst [vmem:[#allocation22_spill] sm:$0xff] %v12914_v45  ;;  %v12931_v2 = vrot.slane %v4195_v29, %v11313_v35  ;;  %v4279_v27 = vcombine.high %v12917_v31, %v12920_v34  ;;  %v6076_v42 = vsel %vm4562_vm1, %v12892_v62, -inf }
 0x2da   :  { %14415 = vst [vmem:[#allocation23_spill] sm:$0xff] %v12917_v31  ;;  %14416 = vst [vmem:[#allocation24_spill] sm:$0xff] %v12920_v34  ;;  %6074 = vmax.xlane.f32.xlu0 %v6073_v51  ;;  %v12934_v20 = vrot.slane %v4211_v53, %v11313_v35  ;;  %v12947_v36 = vrot.slane %v4263_v10, %v11313_v35 }
 0x2db   :  { %14417 = vst [vmem:[#allocation25_spill] sm:$0xff] %v12931_v2  ;;  %v12950_v61 = vrot.slane %v4279_v27, %v11313_v35 }
 0x2dc   :  { %14418 = vst [vmem:[#allocation26_spill] sm:$0xff] %v12934_v20  ;;  %v12944_v22 = vcombine.low %v12931_v2, %v12934_v20  ;;  %14420 = vst [vmem:[#allocation28_spill] sm:$0xff] %v12947_v36 }
 0x2dd   :  { %14421 = vst [vmem:[#allocation29_spill] sm:$0xff] %v12950_v61  ;;  %v12956_v21 = vcombine.low %v12947_v36, %v12950_v61 }
 0x2de   :  { %14419 = vst [vmem:[#allocation27_spill] sm:$0xff] %v12944_v22  ;;  %v4518_v6 = vshrl.u32 %v12944_v22, 16 }
 0x2df   :  { %14422 = vst [vmem:[#allocation30_spill] sm:$0xff] %v12956_v21  ;;  %v4519_v1 = vshrl.u32 %v12956_v21, 16 }
 0x2e1   :  { %v12964_v38 = vpack.i.b16 %v4519_v1, %v4518_v6 }
 0x2e3   :  { %v12928_v7 = vpop.f32.mrb[12].mxu0  ;;  %14423 = vst [vmem:[#allocation31_spill] sm:$0xff] %v12964_v38 }
 0x2e4   :  { %v10213_v41 = vpop.f32.mrb[13].mxu0  ;;  %v6091_v32 = vsel %vm4562_vm1, %v12928_v7, -inf }
 0x2e5   :  { %v12940_v49 = vpop.f32.mrb[14].mxu0  ;;  %6092 = vmax.xlane.f32.xlu0 %v6091_v32 }
 0x2e6   :  { %v10214_v5 = vpop.f32.mrb[15].mxu0  ;;  %v6094_v57 = vsel %vm4562_vm1, %v12940_v49, -inf }
 0x2e7   :  { %6095 = vmax.xlane.f32.xlu1 %v6094_v57 }
 0x2e9   :  { %6077 = vmax.xlane.f32.xlu0 %v6076_v42 }
 0x2eb   :  { %v12962_v17 = vpop.f32.mrb[24].mxu1 }
 0x2ec   :  { %v12966_v4 = vpop.f32.mrb[16].mxu0  ;;  %v10207_v30 = vpop.f32.mrb[25].mxu1  ;;  %v6085_v9 = vsel %vm4562_vm1, %v12962_v17, -inf }
 0x2ed   :  { %v10225_v3 = vpop.f32.mrb[17].mxu0  ;;  %v12970_v16 = vpop.f32.mrb[26].mxu1  ;;  %6086 = vmax.xlane.f32.xlu0 %v6085_v9  ;;  %v6103_v27 = vsel %vm4562_vm1, %v12966_v4, -inf }
 0x2ee   :  { %v12972_v51 = vpop.f32.mrb[18].mxu0  ;;  %v10208_v29 = vpop.f32.mrb[27].mxu1  ;;  %v6088_v53 = vsel %vm4562_vm1, %v12970_v16, -inf }
 0x2ef   :  { %v10226_v10 = vpop.f32.mrb[19].mxu0  ;;  %6089 = vmax.xlane.f32.xlu1 %v6088_v53  ;;  %v6106_v41 = vsel %vm4562_vm1, %v12972_v51, -inf }
 0x2f1   :  { %6104 = vmax.xlane.f32.xlu0 %v6103_v27 }
 0x2f3   :  { %v12980_v32 = vpop.f32.mrb[28].mxu1  ;;  %6107 = vmax.xlane.f32.xlu1 %v6106_v41 }
 0x2f4   :  { %v10219_v5 = vpop.f32.mrb[29].mxu1  ;;  %v6097_v57 = vsel %vm4562_vm1, %v12980_v32, -inf }
 0x2f5   :  { %v12984_v6 = vpop.f32.mrb[30].mxu1  ;;  %6098 = vmax.xlane.f32.xlu0 %v6097_v57 }
 0x2f6   :  { %v10220_v42 = vpop.f32.mrb[31].mxu1  ;;  %v6100_v1 = vsel %vm4562_vm1, %v12984_v6, -inf }
 0x2f7   :  { %6101 = vmax.xlane.f32.xlu1 %v6100_v1 }
 0x303   :  { %v12988_v30 = vpop.f32.mrb[20].mxu0 }
 0x304   :  { %v10237_v9 = vpop.f32.mrb[21].mxu0  ;;  %v6115_v3 = vsel %vm4562_vm1, %v12988_v30, -inf }
 0x305   :  { %v12992_v29 = vpop.f32.mrb[22].mxu0  ;;  %v12994_v53 = vpop.f32.mrb[32].mxu1  ;;  %6116 = vmax.xlane.f32.xlu0 %v6115_v3 }
 0x306   :  { %v10238_v10 = vpop.f32.mrb[23].mxu0  ;;  %v6118_v27 = vsel %vm4562_vm1, %v12992_v29, -inf  ;;  %v10231_v41 = vpop.f32.mrb[33].mxu1  ;;  %v6109_v1 = vsel %vm4562_vm1, %v12994_v53, -inf }
 0x307   :  { %6119 = vmax.xlane.f32.xlu1 %v6118_v27  ;;  %v12998_v5 = vpop.f32.mrb[34].mxu1 }
 0x308   :  { %v10232_v57 = vpop.f32.mrb[35].mxu1  ;;  %v6112_v42 = vsel %vm4562_vm1, %v12998_v5, -inf }
 0x309   :  { %6110 = vmax.xlane.f32.xlu0 %v6109_v1 }
 0x30b   :  { %6113 = vmax.xlane.f32.xlu1 %v6112_v42 }
 0x311   :  { %v13004_v9 = vpop.f32.mrb[24].mxu0 }
 0x312   :  { %14424 = vst [vmem:[#allocation32_spill] sm:$0xff] %v13004_v9  ;;  %v10249_v3 = vpop.f32.mrb[25].mxu0  ;;  %v6127_v10 = vsel %vm4562_vm1, %v13004_v9, -inf }
 0x313   :  { %v13008_v18 = vpop.f32.mrb[26].mxu0  ;;  %6128 = vmax.xlane.f32.xlu0 %v6127_v10 }
 0x314   :  { %14425 = vst [vmem:[#allocation33_spill] sm:$0xff] %v13008_v18  ;;  %v10250_v27 = vpop.f32.mrb[27].mxu0  ;;  %v6130_v41 = vsel %vm4562_vm1, %v13008_v18, -inf }
 0x315   :  { %v13012_v57 = vpop.f32.mrb[36].mxu1  ;;  %6131 = vmax.xlane.f32.xlu1 %v6130_v41 }
 0x316   :  { %14426 = vst [vmem:[#allocation34_spill] sm:$0xff] %v13012_v57  ;;  %v10243_v43 = vpop.f32.mrb[37].mxu1  ;;  %v6121_v42 = vsel %vm4562_vm1, %v13012_v57, -inf }
 0x317   :  { %v13016_v1 = vpop.f32.mrb[38].mxu1  ;;  %6122 = vmax.xlane.f32.xlu0 %v6121_v42 }
 0x318   :  { %14427 = vst [vmem:[#allocation35_spill] sm:$0xff] %v13016_v1  ;;  %v10244_v3 = vpop.f32.mrb[39].mxu1 }
 0x319   :  { %v6124_v3 = vsel %vm4562_vm1, %v13016_v1, -inf }
 0x31e   :  { %v13018_v55 = vpop.f32.mrb[28].mxu0  ;;  %v13020_v38 = vpop.f32.mrb[40].mxu1 }
 0x31f   :  { %14428 = vst [vmem:[#allocation36_spill] sm:$0xff] %v13018_v55  ;;  %14429 = vst [vmem:[#allocation37_spill] sm:$0xff] %v13020_v38  ;;  %v10261_v10 = vpop.f32.mrb[29].mxu0  ;;  %v6139_v27 = vsel %vm4562_vm1, %v13018_v55, -inf  ;;  %v10255_v36 = vpop.f32.mrb[41].mxu1  ;;  %v3276_v55 = vpack.i.b16 %v12815_v59, %v12826_v28 }
 0x320   :  { %v13024_v61 = vpop.f32.mrb[30].mxu0  ;;  %6140 = vmax.xlane.f32.xlu1 %v6139_v27  ;;  %v13026_v43 = vpop.f32.mrb[42].mxu1  ;;  %v6133_v10 = vsel %vm4562_vm1, %v13020_v38, -inf }
 0x321   :  { %14430 = vst [vmem:[#allocation38_spill] sm:$0xff] %v13024_v61  ;;  %14431 = vst [vmem:[#allocation39_spill] sm:$0xff] %v13026_v43  ;;  %v10262_v41 = vpop.f32.mrb[31].mxu0  ;;  %v6142_v2 = vsel %vm4562_vm1, %v13024_v61, -inf  ;;  %v10256_v42 = vpop.f32.mrb[43].mxu1  ;;  %v3260_v61 = vpack.i.b16 %v12784_v11, %v12766_v12 }
 0x322   :  { %6143 = vmax.xlane.f32.xlu0 %v6142_v2  ;;  %v6136_v2 = vsel %vm4562_vm1, %v13026_v43, -inf  ;;  %v3252_v43 = vpack.i.b16 %v12799_v39, %v14454_v58 }
 0x323   :  { %v3499_v44 = vcombine.high %v3260_v61, %v3276_v55 }
 0x324   :  { %6125 = vmax.xlane.f32.xlu1 %v6124_v3 }
 0x326   :  { %6134 = vmax.xlane.f32.xlu0 %v6133_v10 }
 0x327   :  { %v13034_v20 = vpop.f32.mrb[32].mxu0 }
 0x328   :  { %14432 = vst [vmem:[#allocation40_spill] sm:$0xff] %v13034_v20  ;;  %v10273_v36 = vpop.f32.mrb[33].mxu0  ;;  %v6151_v27 = vsel %vm4562_vm1, %v13034_v20, -inf  ;;  %v3268_v20 = vpack.i.b16 %v12803_v46, %v12809_v19 }
 0x329   :  { %v13038_v41 = vpop.f32.mrb[34].mxu0  ;;  %6152 = vmax.xlane.f32.xlu1 %v6151_v27 }
 0x32a   :  { %14433 = vst [vmem:[#allocation41_spill] sm:$0xff] %v13038_v41  ;;  %v10274_v21 = vpop.f32.mrb[35].mxu0  ;;  %6137 = vmax.xlane.f32.xlu0 %v6136_v2  ;;  %v6154_v42 = vsel %vm4562_vm1, %v13038_v41, -inf }
 0x32e   :  { %6155 = vmax.xlane.f32.xlu0 %v6154_v42 }
 0x330   :  { %v13044_v3 = vpop.f32.mrb[44].mxu1 }
 0x331   :  { %14434 = vst [vmem:[#allocation42_spill] sm:$0xff] %v13044_v3  ;;  %v10267_v22 = vpop.f32.mrb[45].mxu1  ;;  %v6145_v10 = vsel %vm4562_vm1, %v13044_v3, -inf }
 0x332   :  { %v13048_v36 = vpop.f32.mrb[46].mxu1  ;;  %6146 = vmax.xlane.f32.xlu1 %v6145_v10 }
 0x333   :  { %14435 = vst [vmem:[#allocation43_spill] sm:$0xff] %v13048_v36  ;;  %v10268_v31 = vpop.f32.mrb[47].mxu1  ;;  %v6148_v21 = vsel %vm4562_vm1, %v13048_v36, -inf }
 0x334   :  { %6149 = vmax.xlane.f32.xlu0 %v6148_v21 }
 0x33f   :  { %v13052_v27 = vpop.f32.mrb[36].mxu0 }
 0x340   :  { %14436 = vst [vmem:[#allocation44_spill] sm:$0xff] %v13052_v27  ;;  %v10285_v2 = vpop.f32.mrb[37].mxu0  ;;  %v6163_v42 = vsel %vm4562_vm1, %v13052_v27, -inf }
 0x341   :  { %v13056_v34 = vpop.f32.mrb[38].mxu0  ;;  %6164 = vmax.xlane.f32.xlu1 %v6163_v42 }
 0x342   :  { %14437 = vst [vmem:[#allocation45_spill] sm:$0xff] %v13056_v34  ;;  %v10286_v22 = vpop.f32.mrb[39].mxu0  ;;  %v6166_v54 = vsel %vm4562_vm1, %v13056_v34, -inf }
 0x343   :  { %6167 = vmax.xlane.f32.xlu0 %v6166_v54 }
 0x345   :  { %v13060_v10 = vpop.f32.mrb[48].mxu1 }
 0x346   :  { %14438 = vst [vmem:[#allocation46_spill] sm:$0xff] %v13060_v10  ;;  %v10279_v31 = vpop.f32.mrb[49].mxu1  ;;  %v6157_v21 = vsel %vm4562_vm1, %v13060_v10, -inf }
 0x347   :  { %v13064_v36 = vpop.f32.mrb[50].mxu1  ;;  %6158 = vmax.xlane.f32.xlu1 %v6157_v21 }
 0x348   :  { %14439 = vst [vmem:[#allocation47_spill] sm:$0xff] %v13064_v36  ;;  %v10280_v2 = vpop.f32.mrb[51].mxu1  ;;  %v13066_v45 = vpop.f32.mrb[40].mxu0  ;;  %v6160_v42 = vsel %vm4562_vm1, %v13064_v36, -inf }
 0x349   :  { %14440 = vst [vmem:[#allocation48_spill] sm:$0xff] %v13066_v45  ;;  %v10297_v22 = vpop.f32.mrb[41].mxu0  ;;  %v6175_v34 = vsel %vm4562_vm1, %v13066_v45, -inf  ;;  %6161 = vmax.xlane.f32.xlu0 %v6160_v42  ;;  %v13078_v2 = vpop.permute.xlu1 %3176 }
 0x34a   :  { %v13072_v54 = vpop.f32.mrb[42].mxu0  ;;  %14443 = vst [vmem:[#allocation51_spill] sm:$0xff] %v13078_v2 }
 0x34b   :  { %14441 = vst [vmem:[#allocation49_spill] sm:$0xff] %v13072_v54  ;;  %6176 = vmax.xlane.f32.xlu1 %v6175_v34  ;;  %v10298_v31 = vpop.f32.mrb[43].mxu0  ;;  %v6178_v10 = vsel %vm4562_vm1, %v13072_v54, -inf }
 0x34d   :  { %6179 = vmax.xlane.f32.xlu0 %v6178_v10  ;;  %v13086_v34 = vpop.permute.xlu1 %3184 }
 0x34e   :  { %14446 = vst [vmem:[#allocation54_spill] sm:$0xff] %v13086_v34 }
 0x34f   :  { %v13076_v21 = vpop.f32.mrb[52].mxu1 }
 0x350   :  { %14442 = vst [vmem:[#allocation50_spill] sm:$0xff] %v13076_v21  ;;  %v10291_v27 = vpop.f32.mrb[53].mxu1  ;;  %v6169_v22 = vsel %vm4562_vm1, %v13076_v21, -inf }
 0x351   :  { %v13082_v36 = vpop.f32.mrb[54].mxu1  ;;  %6170 = vmax.xlane.f32.xlu1 %v6169_v22 }
 0x352   :  { %14444 = vst [vmem:[#allocation52_spill] sm:$0xff] %v13082_v36  ;;  %v10292_v42 = vpop.f32.mrb[55].mxu1  ;;  %v6172_v34 = vsel %vm4562_vm1, %v13082_v36, -inf }
 0x355   :  { %v13084_v45 = vpop.f32.mrb[44].mxu0 }
 0x356   :  { %14445 = vst [vmem:[#allocation53_spill] sm:$0xff] %v13084_v45  ;;  %v10309_v31 = vpop.f32.mrb[45].mxu0  ;;  %v6187_v10 = vsel %vm4562_vm1, %v13084_v45, -inf  ;;  %v13102_v45 = vpop.permute.xlu0 %3168 }
 0x357   :  { %v13090_v54 = vpop.f32.mrb[46].mxu0  ;;  %v13092_v15 = vpop.f32.mrb[56].mxu1  ;;  %6188 = vmax.xlane.f32.xlu0 %v6187_v10  ;;  %14449 = vst [vmem:[#allocation57_spill] sm:$0xff] %v13102_v45 }
 0x358   :  { %14447 = vst [vmem:[#allocation55_spill] sm:$0xff] %v13090_v54  ;;  %v10310_v27 = vpop.f32.mrb[47].mxu0  ;;  %v6190_v2 = vsel %vm4562_vm1, %v13090_v54, -inf  ;;  %v10303_v21 = vpop.f32.mrb[57].mxu1 }
 0x359   :  { %6191 = vmax.xlane.f32.xlu1 %v6190_v2  ;;  %v13096_v22 = vpop.f32.mrb[58].mxu1  ;;  %v13106_v10 = vpop.permute.xlu1 %3200 }
 0x35a   :  { %14448 = vst [vmem:[#allocation56_spill] sm:$0xff] %v13096_v22  ;;  %v10304_v42 = vpop.f32.mrb[59].mxu1  ;;  %v6184_v31 = vsel %vm4562_vm1, %v13096_v22, -inf  ;;  %14450 = vst [vmem:[#allocation58_spill] sm:$0xff] %v13106_v10  ;;  %v13118_v3 = vpop.permute.xlu0 %3192  ;;  %v3262_v10 = vshrl.u32 %v12766_v12, 16 }
 0x35b   :  { %6173 = vmax.xlane.f32.xlu0 %v6172_v34  ;;  %14453 = vst [vmem:[#allocation61_spill] sm:$0xff] %v13118_v3  ;;  %v3278_v3 = vshrl.u32 %v12826_v28, 16  ;;  %v3483_v28 = vcombine.high %v3252_v43, %v3268_v20 }
 0x35d   :  { %v13104_v24 = vpop.f32.mrb[48].mxu0  ;;  %6185 = vmax.xlane.f32.xlu1 %v6184_v31  ;;  %v6081_v31 = vpop.xlane.xlu1 %6080 }
 0x35e   :  { %v10321_v27 = vpop.f32.mrb[49].mxu0  ;;  %v6263_v18 = vsub.f32 %v12868_v60, %v6081_v31 }
 0x35f   :  { %v13108_v21 = vpop.f32.mrb[50].mxu0  ;;  %v13110_v2 = vpop.f32.mrb[60].mxu1 }
 0x360   :  { %14451 = vst [vmem:[#allocation59_spill] sm:$0xff] %v13108_v21  ;;  %v10322_v42 = vpop.f32.mrb[51].mxu0  ;;  %v6202_v22 = vsel %vm4562_vm1, %v13108_v21, -inf  ;;  %v10315_v54 = vpop.f32.mrb[61].mxu1  ;;  %v3254_v21 = vshrl.u32 %v14454_v58, 16 }
 0x361   :  { %6203 = vmax.xlane.f32.xlu1 %v6202_v22  ;;  %v13114_v36 = vpop.f32.mrb[62].mxu1  ;;  %v3263_v42 = vshrl.u32 %v12784_v11, 16  ;;  %v3255_v54 = vshrl.u32 %v12799_v39, 16  ;;  %v6069_v39 = vpop.xlane.xlu0 %6068 }
 0x362   :  { %14452 = vst [vmem:[#allocation60_spill] sm:$0xff] %v13114_v36  ;;  %v10316_v34 = vpop.f32.mrb[63].mxu1  ;;  %v6196_v45 = vsel %vm4562_vm1, %v13114_v36, -inf  ;;  %v3279_v36 = vshrl.u32 %v12815_v59, 16  ;;  %v6259_v19 = vsub.f32 %v12866_v48, %v6069_v39  ;;  %v3482_v59 = vcombine.low %v3252_v43, %v3268_v20 }
 0x363   :  { %v3271_v34 = vshrl.u32 %v12803_v46, 16  ;;  %v3264_v58 = vpack.i.b16 %v3263_v42, %v3262_v10 }
 0x364   :  { %v3280_v12 = vpack.i.b16 %v3279_v36, %v3278_v3  ;;  %v3490_v20 = vrot.slane %v3482_v59, %v11302_v13 }
 0x365   :  { %6197 = vmax.xlane.f32.xlu1 %v6196_v45  ;;  %v13120_v27 = vpop.f32.mrb[52].mxu0  ;;  %v6084_v31 = vpop.xlane.xlu0 %6083 }
 0x366   :  { %v10333_v22 = vpop.f32.mrb[53].mxu0  ;;  %v6264_v48 = vsub.f32 %v12876_v50, %v6084_v31  ;;  %v3513_v50 = vrot.slane %v3499_v44, %v11302_v13 }
 0x367   :  { %v13130_v45 = vpop.f32.mrb[54].mxu0  ;;  %v13132_v41 = vpop.f32.mrb[64].mxu1 }
 0x368   :  { %14455 = vst [vmem:[#allocation17_spill] sm:$0xff] %v13130_v45  ;;  %14456 = vst [vmem:[#allocation62_spill] sm:$0xff] %v13132_v41  ;;  %v10334_v38 = vpop.f32.mrb[55].mxu0  ;;  %v6214_v22 = vsel %vm4562_vm1, %v13130_v45, -inf  ;;  %v10327_v1 = vpop.f32.mrb[65].mxu1  ;;  %v3272_v45 = vpack.i.b16 %v3271_v34, %v3270_v14  ;;  %v3498_v41 = vcombine.low %v3260_v61, %v3276_v55  ;;  %v3566_v14 = vcombine.low %v3264_v58, %v3280_v12 }
 0x369   :  { %6215 = vmax.xlane.f32.xlu1 %v6214_v22  ;;  %v13144_v57 = vpop.f32.mrb[66].mxu1  ;;  %v6072_v38 = vpop.xlane.xlu1 %6071  ;;  %v3256_v1 = vpack.i.b16 %v3255_v54, %v3254_v21  ;;  %v6323_v22 = vmul.f32 1.442695, %v6259_v19  ;;  %v3567_v61 = vcombine.high %v3264_v58, %v3280_v12  ;;  %v3497_v54 = vrot.slane %v3483_v28, %v11302_v13 }
 0x36a   :  { %v10328_v9 = vpop.f32.mrb[67].mxu1  ;;  %v6208_v46 = vsel %vm4562_vm1, %v13144_v57, -inf  ;;  %v6260_v11 = vsub.f32 %v12874_v47, %v6072_v38  ;;  %v3506_v34 = vrot.slane %v3498_v41, %v11302_v13  ;;  %v3574_v38 = vrot.slane %v3566_v14, %v11302_v13 }
 0x36b   :  { %v6331_v9 = vmul.f32 1.442695, %v6263_v18  ;;  %10659 = vpow2.f32 %v6323_v22  ;;  %v3550_v21 = vcombine.low %v3256_v1, %v3272_v45  ;;  %v3551_v55 = vcombine.high %v3256_v1, %v3272_v45 }
 0x36c   :  { %v6325_v10 = vmul.f32 1.442695, %v6260_v11  ;;  %v6333_v18 = vmul.f32 1.442695, %v6264_v48  ;;  %v3581_v44 = vrot.slane %v3567_v61, %v11302_v13  ;;  %v3514_v1 = vcombine.low %v3490_v20, %v3506_v34 }
 0x36d   :  { %6209 = vmax.xlane.f32.xlu1 %v6208_v46  ;;  %v13151_v60 = vpop.f32.mrb[56].mxu0  ;;  %v6075_v46 = vpop.xlane.xlu0 %6074  ;;  %v3558_v58 = vrot.slane %v3550_v21, %v11302_v13  ;;  %v3565_v41 = vrot.slane %v3551_v55, %v11302_v13  ;;  %v3515_v12 = vcombine.high %v3490_v20, %v3506_v34  ;;  %v3530_v11 = vcombine.low %v3497_v54, %v3513_v50 }
 0x36e   :  { %v10345_v42 = vpop.f32.mrb[57].mxu0  ;;  %10661 = vpow2.f32 %v6325_v10  ;;  %v3531_v22 = vcombine.high %v3497_v54, %v3513_v50  ;;  %v6261_v10 = vsub.f32 %v12886_v25, %v6075_v46  ;;  %v3522_v25 = vrot.slane %v3514_v1, %v11313_v35 }
 0x36f   :  { %v13154_v3 = vpop.f32.mrb[58].mxu0  ;;  %v13156_v47 = vpop.f32.mrb[68].mxu1  ;;  %10663 = vpow2.f32 %v6331_v9  ;;  %v3582_v48 = vcombine.low %v3558_v58, %v3574_v38  ;;  %v3583_v21 = vcombine.high %v3558_v58, %v3574_v38  ;;  %v3538_v46 = vrot.slane %v3530_v11, %v11313_v35 }
 0x370   :  { %v10346_v43 = vpop.f32.mrb[59].mxu0  ;;  %v10339_v36 = vpop.f32.mrb[69].mxu1  ;;  %10665 = vpow2.f32 %v6333_v18  ;;  %v6327_v38 = vmul.f32 1.442695, %v6261_v10 }
 0x371   :  { %v13162_v39 = vpop.f32.mrb[70].mxu1  ;;  %3208 = vrot.lane.b32.xlu0 %v12122_v52, %s11046_s16  ;;  %v3598_v43 = vcombine.low %v3565_v41, %v3581_v44  ;;  %v3599_v36 = vcombine.high %v3565_v41, %v3581_v44  ;;  %v3590_v1 = vrot.slane %v3582_v48, %v11313_v35  ;;  %v14459_v48 = vpack.i.b16 %v12832_v23, %v12818_v8 }
 0x372   :  { %14457 = vst [vmem:[#allocation63_spill] sm:$0xff] %v13162_v39  ;;  %v10340_v19 = vpop.f32.mrb[71].mxu1  ;;  %v6220_v45 = vsel %vm4562_vm1, %v13162_v39, -inf  ;;  %v6093_v42 = vpop.xlane.xlu0 %6092 }
 0x373   :  { %6221 = vmax.xlane.f32.xlu1 %v6220_v45  ;;  %v6267_v61 = vsub.f32 %v12928_v7, %v6093_v42  ;;  %v3545_v7 = vrot.slane %v3531_v22, %v11313_v35  ;;  %v3606_v22 = vrot.slane %v3598_v43, %v11313_v35  ;;  %v3613_v10 = vrot.slane %v3599_v36, %v11313_v35 }
 0x374   :  { %v6096_v28 = vpop.xlane.xlu1 %6095 }
 0x375   :  { %v13172_v59 = vpop.f32.mrb[60].mxu0  ;;  %v6268_v31 = vsub.f32 %v12940_v49, %v6096_v28  ;;  %v13181_v20 = vpop.eup %10659  ;;  %v3529_v49 = vrot.slane %v3515_v12, %v11313_v35  ;;  %v6339_v45 = vmul.f32 1.442695, %v6267_v61  ;;  %v3597_v12 = vrot.slane %v3583_v21, %v11313_v35 }
 0x376   :  { %v10357_v9 = vpop.f32.mrb[61].mxu0  ;;  %v6078_v41 = vpop.xlane.xlu0 %6077  ;;  %v4042_v43 = vcombine.low %v3538_v46, %v3545_v7 }
 0x377   :  { %v13176_v14 = vpop.f32.mrb[62].mxu0  ;;  %v13178_v55 = vpop.f32.mrb[72].mxu1  ;;  %v6341_v34 = vmul.f32 1.442695, %v6268_v31  ;;  %v6262_v11 = vsub.f32 %v12892_v62, %v6078_v41  ;;  %v4026_v31 = vcombine.low %v3522_v25, %v3529_v49  ;;  %v9908_v21 = vcombine.high %v3522_v25, %v3529_v49 }
 0x378   :  { %v10358_v18 = vpop.f32.mrb[63].mxu0  ;;  %v10351_v54 = vpop.f32.mrb[73].mxu1  ;;  %v9911_v25 = vcombine.high %v3606_v22, %v3613_v10 }
 0x379   :  { %v13183_v50 = vpop.eup %10661  ;;  %v13188_v19 = vpop.f32.mrb[74].mxu1  ;;  %10667 = vpow2.f32 %v6341_v34  ;;  %v6329_v61 = vmul.f32 1.442695, %v6262_v11  ;;  %v4110_v11 = vcombine.low %v3606_v22, %v3613_v10 }
 0x37a   :  { %v10352_v58 = vpop.f32.mrb[75].mxu1  ;;  %v6643_v44 = vpack.c.bf16 %v13183_v50, %v13181_v20  ;;  %v13193_v28 = vpop.eup %10663  ;;  %10669 = vpow2.f32 %v6339_v45  ;;  %v9909_v45 = vcombine.high %v3538_v46, %v3545_v7  ;;  %v13222_v46 = vrot.slane %v4026_v31, %v11302_v13 }
 0x37b   :  { %v13198_v9 = vpop.eup %10665  ;;  %10671 = vpow2.f32 %v6327_v38  ;;  %v6087_v34 = vpop.xlane.xlu0 %6086  ;;  %v4094_v58 = vcombine.low %v3590_v1, %v3597_v12 }
 0x37c   :  { %10380 = vmatmul.mubr.msk.bf16.vlgmr.msra.gmra.mrb[68].mxu0 %vm4562_vm1, %v6643_v44  ;;  %v6090_v18 = vpop.xlane.xlu1 %6089  ;;  %v6645_v62 = vpack.c.bf16 %v13198_v9, %v13193_v28  ;;  %10673 = vpow2.f32 %v6329_v61  ;;  %v6265_v23 = vsub.f32 %v12962_v17, %v6087_v34  ;;  %v9910_v44 = vcombine.high %v3590_v1, %v3597_v12 }
 0x37d   :  { %v13203_v42 = vpop.f32.mrb[64].mxu0  ;;  %10390 = vmatpush3.bf16.msra.mxu0 %v14459_v48  ;;  %10391 = vmatprep.mubr.msk.bf16.mxu0 %vm11049_vm0, %v14378_v0  ;;  %v6266_v54 = vsub.f32 %v12970_v16, %v6090_v18  ;;  %v13226_v17 = vrot.slane %v9908_v21, %v11302_v13  ;;  %v13229_v1 = vrot.slane %v4042_v43, %v11302_v13 }
 0x37e   :  { %14458 = vst [vmem:[#allocation64_spill] sm:$0xff] %v13203_v42  ;;  %v10369_v36 = vpop.f32.mrb[65].mxu0  ;;  %10401 = vmatprep.subr.bf16.mxu0 %v14378_v0  ;;  %v6335_v16 = vmul.f32 1.442695, %v6265_v23  ;;  %v13233_v22 = vrot.slane %v9909_v45, %v11302_v13  ;;  %v13236_v10 = vrot.slane %v4094_v58, %v11302_v13  ;;  %v13244_v21 = vrot.slane %v9910_v44, %v11302_v13 }
 0x37f   :  { %v13214_v41 = vpop.f32.mrb[66].mxu0  ;;  %v13216_v8 = vpop.f32.mrb[76].mxu1  ;;  %v6337_v38 = vmul.f32 1.442695, %v6266_v54  ;;  %v13247_v43 = vrot.slane %v4110_v11, %v11302_v13  ;;  %v14463_v58 = vpack.i.b16 %v12834_v40, %v12828_v26  ;;  %v4058_v26 = vcombine.low %v13222_v46, %v13226_v17 }
 0x380   :  { %14460 = vst [vmem:[#allocation65_spill] sm:$0xff] %v13214_v41  ;;  %14461 = vst [vmem:[#allocation66_spill] sm:$0xff] %v13216_v8  ;;  %v10370_v49 = vpop.f32.mrb[67].mxu0  ;;  %v10363_v48 = vpop.f32.mrb[77].mxu1 }
 0x381   :  { %v13219_v36 = vpop.f32.mrb[78].mxu1  ;;  %v6108_v18 = vpop.xlane.xlu1 %6107  ;;  %10675 = vpow2.f32 %v6337_v38  ;;  %v4126_v48 = vcombine.low %v13236_v10, %v13244_v21 }
 0x382   :  { %14462 = vst [vmem:[#allocation67_spill] sm:$0xff] %v13219_v36  ;;  %v10364_v7 = vpop.f32.mrb[79].mxu1  ;;  %v6272_v39 = vsub.f32 %v12972_v51, %v6108_v18  ;;  %v6105_v61 = vpop.xlane.xlu0 %6104  ;;  %10677 = vpow2.f32 %v6335_v16 }
 0x383   :  { %v6271_v12 = vsub.f32 %v12966_v4, %v6105_v61  ;;  %v13238_v31 = vpop.eup %10667  ;;  %v13250_v4 = vrot.slane %v9911_v25, %v11302_v13 }
 0x384   :  { %3216 = vrot.lane.b32.xlu1 %v12122_v52, %s11047_s17  ;;  %v6349_v51 = vmul.f32 1.442695, %v6272_v39  ;;  %10392 = vmatmul.mubr.msk.bf16.vlgmr.msra.gmra.mrb[72].mxu0 %vm4562_vm1, %v6645_v62  ;;  %v13252_v54 = vpop.eup %10669 }
 0x385   :  { %v6347_v34 = vmul.f32 1.442695, %v6271_v12  ;;  %v6102_v45 = vpop.xlane.xlu1 %6101  ;;  %10402 = vmatpush3.bf16.msra.mxu0 %v14463_v58  ;;  %10403 = vmatprep.mubr.msk.bf16.mxu0 %vm11049_vm0, %v14378_v0  ;;  %v6647_v23 = vpack.c.bf16 %v13238_v31, %v13252_v54  ;;  %v13268_v40 = vpop.eup %10671  ;;  %v4142_v38 = vcombine.low %v13247_v43, %v13250_v4  ;;  %v13283_v12 = vrot.slane %v4058_v26, %v11313_v35 }
 0x386   :  { %10679 = vpow2.f32 %v6349_v51  ;;  %v6270_v39 = vsub.f32 %v12984_v6, %v6102_v45  ;;  %v6099_v62 = vpop.xlane.xlu0 %6098  ;;  %10413 = vmatprep.subr.bf16.mxu0 %v14378_v0  ;;  %v4074_v6 = vcombine.low %v13229_v1, %v13233_v22  ;;  %v13276_v16 = vpop.eup %10673  ;;  %v4134_v45 = vrot.slane %v4126_v48, %v11313_v35 }
 0x387   :  { %v13263_v44 = vpop.f32.mrb[80].mxu1  ;;  %10681 = vpow2.f32 %v6347_v34  ;;  %v6269_v11 = vsub.f32 %v12980_v32, %v6099_v62  ;;  %v6644_v61 = vpack.c.bf16 %v13276_v16, %v13268_v40  ;;  %v4150_v58 = vrot.slane %v4142_v38, %v11313_v35 }
 0x388   :  { %14464 = vst [vmem:[#allocation68_spill] sm:$0xff] %v13263_v44  ;;  %v10375_v25 = vpop.f32.mrb[81].mxu1  ;;  %v6345_v49 = vmul.f32 1.442695, %v6270_v39  ;;  %v4082_v34 = vrot.slane %v4074_v6, %v11313_v35  ;;  %v14466_v62 = vpack.i.b16 %v12837_v63, %v12830_v37 }
 0x389   :  { %v13278_v18 = vpop.f32.mrb[82].mxu1  ;;  %v6343_v32 = vmul.f32 1.442695, %v6269_v11  ;;  %10386 = vmatmul.mubr.msk.bf16.vlgmr.msra.gmra.mrb[84].mxu1 %vm4562_vm1, %v6644_v61  ;;  %v6181_v11 = vsel %vm4562_vm1, %v13092_v15, -inf  ;;  %v13313_v63 = vcombine.low %v4134_v45, %v4150_v58 }
 0x38a   :  { %14465 = vst [vmem:[#allocation69_spill] sm:$0xff] %v13278_v18  ;;  %v10376_v7 = vpop.f32.mrb[83].mxu1  ;;  %10683 = vpow2.f32 %v6345_v49  ;;  %10396 = vmatpush3.bf16.msra.mxu1 %v12849_v33  ;;  %10397 = vmatprep.mubr.msk.bf16.mxu1 %vm11049_vm0, %v14378_v0  ;;  %v13311_v37 = vcombine.low %v13283_v12, %v4082_v34  ;;  %v6199_v49 = vsel %vm4562_vm1, %v13104_v24, -inf }
 0x38b   :  { %10685 = vpow2.f32 %v6343_v32  ;;  %v13285_v51 = vpop.eup %10675  ;;  %10407 = vmatprep.subr.bf16.mxu1 %v14378_v0 }
 0x38c   :  { %10404 = vmatmul.mubr.msk.bf16.vlgmr.msra.gmra.mrb[76].mxu0 %vm4562_vm1, %v6647_v23  ;;  %v13292_v39 = vpop.eup %10677  ;;  %v4468_v32 = vpack.i.b16 %v13313_v63, %v13311_v37 }
 0x38d   :  { %10414 = vmatpush3.bf16.msra.mxu0 %v14466_v62  ;;  %v6646_v23 = vpack.c.bf16 %v13285_v51, %v13292_v39  ;;  %10415 = vmatprep.mubr.msk.bf16.mxu0 %vm11049_vm0, %v14378_v0 }
 0x38e   :  { %10425 = vmatprep.subr.bf16.mxu0 %v14378_v0 }
 0x390   :  { %v13308_v33 = vpop.eup %10679  ;;  %6182 = vmax.xlane.f32.xlu0 %v6181_v11 }
 0x391   :  { %v13315_v26 = vpop.eup %10681  ;;  %10398 = vmatmul.mubr.msk.bf16.vlgmr.msra.gmra.mrb[88].mxu1 %vm4562_vm1, %v6646_v23  ;;  %v6193_v23 = vsel %vm4562_vm1, %v13110_v2, -inf }
 0x392   :  { %v6649_v25 = vpack.c.bf16 %v13308_v33, %v13315_v26  ;;  %v6117_v6 = vpop.xlane.xlu0 %6116  ;;  %10408 = vmatpush3.bf16.msra.mxu1 %v12851_v56  ;;  %10409 = vmatprep.mubr.msk.bf16.mxu1 %vm11049_vm0, %v14378_v0 }
 0x393   :  { %v6275_v38 = vsub.f32 %v12988_v30, %v6117_v6  ;;  %10419 = vmatprep.subr.bf16.mxu1 %v14378_v0 }
 0x394   :  { %v13321_v48 = vpop.eup %10683  ;;  %6200 = vmax.xlane.f32.xlu0 %v6199_v49  ;;  %v6120_v61 = vpop.xlane.xlu1 %6119  ;;  %10416 = vmatmul.mubr.msk.bf16.vlgmr.msra.gmra.mrb[80].mxu0 %vm4562_vm1, %v6649_v25 }
 0x395   :  { %v13327_v7 = vpop.eup %10685  ;;  %v6276_v62 = vsub.f32 %v12992_v29, %v6120_v61  ;;  %v6355_v11 = vmul.f32 1.442695, %v6275_v38  ;;  %10426 = vmatpush3.bf16.msra.mxu0 %v4468_v32  ;;  %10427 = vmatprep.mubr.msk.bf16.mxu0 %vm11049_vm0, %v14378_v0  ;;  %v6211_v32 = vsel %vm4562_vm1, %v13120_v27, -inf }
 0x396   :  { %v6648_v30 = vpack.c.bf16 %v13321_v48, %v13327_v7  ;;  %v6111_v49 = vpop.xlane.xlu0 %6110  ;;  %10437 = vmatprep.subr.bf16.mxu0 %v14378_v0 }
 0x397   :  { %v6357_v56 = vmul.f32 1.442695, %v6276_v62  ;;  %10687 = vpow2.f32 %v6355_v11  ;;  %v6273_v29 = vsub.f32 %v12994_v53, %v6111_v49  ;;  %v14468_v53 = vld [vmem:[#allocation62_spill] sm:$0xff]  ;;  %v13356_v49 = vcombine.high %v13283_v12, %v4082_v34 }
 0x398   :  { %6194 = vmax.xlane.f32.xlu0 %v6193_v23  ;;  %v6114_v25 = vpop.xlane.xlu1 %6113  ;;  %v14467_v23 = vld [vmem:[#allocation19_spill] sm:$0xff]  ;;  %v4470_v34 = vshrl.u32 %v13311_v37, 16  ;;  %v4075_v37 = vcombine.high %v13229_v1, %v13233_v22 }
 0x399   :  { %10689 = vpow2.f32 %v6357_v56  ;;  %v6274_v6 = vsub.f32 %v12998_v5, %v6114_v25  ;;  %v6351_v38 = vmul.f32 1.442695, %v6273_v29  ;;  %10410 = vmatmul.mubr.msk.bf16.vlgmr.msra.gmra.mrb[92].mxu1 %vm4562_vm1, %v6648_v30  ;;  %v6205_v5 = vsel %vm4562_vm1, %v14468_v53, -inf  ;;  %v14469_v29 = vld [vmem:[#allocation32_spill] sm:$0xff] }
 0x39a   :  { %10420 = vmatpush3.bf16.msra.mxu1 %v14467_v23  ;;  %10421 = vmatprep.mubr.msk.bf16.mxu1 %vm11049_vm0, %v14378_v0  ;;  %v13358_v56 = vcombine.high %v4134_v45, %v4150_v58  ;;  %v6217_v30 = vsel %vm4562_vm1, %v13156_v47, -inf  ;;  %v4471_v45 = vshrl.u32 %v13313_v63, 16  ;;  %v6226_v58 = vsel %vm4562_vm1, %v13154_v3, -inf }
 0x39b   :  { %v6353_v61 = vmul.f32 1.442695, %v6274_v6  ;;  %10691 = vpow2.f32 %v6351_v38  ;;  %10431 = vmatprep.subr.bf16.mxu1 %v14378_v0 }
 0x39c   :  { %6212 = vmax.xlane.f32.xlu0 %v6211_v32  ;;  %v14470_v32 = vld [vmem:[#allocation33_spill] sm:$0xff]  ;;  %v4476_v12 = vpack.i.b16 %v13358_v56, %v13356_v49  ;;  %v4472_v22 = vpack.i.b16 %v4471_v45, %v4470_v34  ;;  %v14472_v45 = vld [vmem:[#allocation36_spill] sm:$0xff] }
 0x39d   :  { %10693 = vpow2.f32 %v6353_v61 }
 0x3a0   :  { %6206 = vmax.xlane.f32.xlu0 %v6205_v5  ;;  %v6129_v11 = vpop.xlane.xlu0 %6128 }
 0x3a1   :  { %v13353_v62 = vpop.eup %10687  ;;  %v6279_v25 = vsub.f32 %v14469_v29, %v6129_v11  ;;  %v6223_v11 = vsel %vm4562_vm1, %v13151_v60, -inf }
 0x3a2   :  { %v6132_v38 = vpop.xlane.xlu1 %6131 }
 0x3a3   :  { %v13363_v6 = vpop.eup %10689  ;;  %v6280_v61 = vsub.f32 %v14470_v32, %v6132_v38  ;;  %v6363_v23 = vmul.f32 1.442695, %v6279_v25  ;;  %v4059_v25 = vcombine.high %v13222_v46, %v13226_v17  ;;  %v4127_v38 = vcombine.high %v13236_v10, %v13244_v21 }
 0x3a4   :  { %6218 = vmax.xlane.f32.xlu0 %v6217_v30  ;;  %v6651_v5 = vpack.c.bf16 %v13363_v6, %v13353_v62  ;;  %v4143_v32 = vcombine.high %v13247_v43, %v13250_v4  ;;  %v6235_v46 = vsel %vm4562_vm1, %v13172_v59, -inf  ;;  %v6229_v17 = vsel %vm4562_vm1, %v13178_v55, -inf  ;;  %v6123_v1 = vpop.xlane.xlu0 %6122 }
 0x3a5   :  { %v13368_v53 = vpop.eup %10691  ;;  %v6365_v30 = vmul.f32 1.442695, %v6280_v61  ;;  %10695 = vpow2.f32 %v6363_v23  ;;  %v4073_v61 = vrot.slane %v4059_v25, %v11313_v35  ;;  %v4089_v10 = vrot.slane %v4075_v37, %v11313_v35 }
 0x3a6   :  { %10428 = vmatmul.mubr.msk.bf16.vlgmr.msra.gmra.mrb[84].mxu0 %vm4562_vm1, %v6651_v5  ;;  %v4141_v21 = vrot.slane %v4127_v38, %v11313_v35  ;;  %v4157_v43 = vrot.slane %v4143_v32, %v11313_v35  ;;  %v6241_v4 = vsel %vm4562_vm1, %v13216_v8, -inf  ;;  %v6232_v23 = vsel %vm4562_vm1, %v13188_v19, -inf  ;;  %v14473_v38 = vld [vmem:[#allocation38_spill] sm:$0xff] }
 0x3a7   :  { %v13379_v29 = vpop.eup %10693  ;;  %10697 = vpow2.f32 %v6365_v30  ;;  %10438 = vmatpush3.bf16.msra.mxu0 %v4476_v12  ;;  %10439 = vmatprep.mubr.msk.bf16.mxu0 %vm11049_vm0, %v14378_v0  ;;  %v14471_v12 = vld [vmem:[#allocation34_spill] sm:$0xff]  ;;  %v13414_v25 = vcombine.low %v4073_v61, %v4089_v10 }
 0x3a8   :  { %6227 = vmax.xlane.f32.xlu1 %v6226_v58  ;;  %6224 = vmax.xlane.f32.xlu0 %v6223_v11  ;;  %v6650_v63 = vpack.c.bf16 %v13379_v29, %v13368_v53  ;;  %v6277_v34 = vsub.f32 %v14471_v12, %v6123_v1  ;;  %v13416_v37 = vcombine.low %v4141_v21, %v4157_v43  ;;  %v6238_v1 = vsel %vm4562_vm1, %v13176_v14, -inf }
 0x3a9   :  { %10449 = vmatprep.subr.bf16.mxu0 %v14378_v0 }
 0x3aa   :  { %10422 = vmatmul.mubr.msk.bf16.vlgmr.msra.gmra.mrb[96].mxu1 %vm4562_vm1, %v6650_v63 }
 0x3ab   :  { %10432 = vmatpush3.bf16.msra.mxu1 %v4472_v22  ;;  %10433 = vmatprep.mubr.msk.bf16.mxu1 %vm11049_vm0, %v14378_v0  ;;  %v6359_v22 = vmul.f32 1.442695, %v6277_v34  ;;  %v6253_v34 = vsel %vm4562_vm1, %v13263_v44, -inf  ;;  %v14488_v44 = vld [vmem:[#allocation43_spill] sm:$0xff] }
 0x3ac   :  { %6236 = vmax.xlane.f32.xlu1 %v6235_v46  ;;  %6230 = vmax.xlane.f32.xlu0 %v6229_v17  ;;  %v6247_v17 = vsel %vm4562_vm1, %v13203_v42, -inf  ;;  %v14475_v42 = vld [vmem:[#allocation37_spill] sm:$0xff] }
 0x3ad   :  { %10443 = vmatprep.subr.bf16.mxu1 %v14378_v0  ;;  %v6141_v5 = vpop.xlane.xlu1 %6140 }
 0x3ae   :  { %v6283_v58 = vsub.f32 %v14472_v45, %v6141_v5 }
 0x3af   :  { %v13412_v11 = vpop.eup %10695  ;;  %v6144_v30 = vpop.xlane.xlu0 %6143 }
 0x3b0   :  { %6242 = vmax.xlane.f32.xlu1 %v6241_v4  ;;  %6233 = vmax.xlane.f32.xlu0 %v6232_v23  ;;  %v6371_v63 = vmul.f32 1.442695, %v6283_v58  ;;  %v6284_v32 = vsub.f32 %v14473_v38, %v6144_v30  ;;  %v14474_v23 = vld [vmem:[#allocation35_spill] sm:$0xff]  ;;  %v4484_v30 = vpack.i.b16 %v13416_v37, %v13414_v25 }
 0x3b1   :  { %v13419_v46 = vpop.eup %10697  ;;  %v6126_v4 = vpop.xlane.xlu1 %6125 }
 0x3b2   :  { %v6278_v5 = vsub.f32 %v14474_v23, %v6126_v4  ;;  %v6373_v12 = vmul.f32 1.442695, %v6284_v32  ;;  %v6653_v45 = vpack.c.bf16 %v13419_v46, %v13412_v11  ;;  %10699 = vpow2.f32 %v6371_v63  ;;  %v14476_v63 = vld [vmem:[#allocation40_spill] sm:$0xff]  ;;  %v14477_v23 = vld [vmem:[#allocation39_spill] sm:$0xff] }
 0x3b3   :  { %v6135_v58 = vpop.xlane.xlu0 %6134  ;;  %v6244_v32 = vsel %vm4562_vm1, %v13219_v36, -inf }
 0x3b4   :  { %6248 = vmax.xlane.f32.xlu1 %v6247_v17  ;;  %6239 = vmax.xlane.f32.xlu0 %v6238_v1  ;;  %v6361_v38 = vmul.f32 1.442695, %v6278_v5  ;;  %10701 = vpow2.f32 %v6373_v12  ;;  %v6281_v8 = vsub.f32 %v14475_v42, %v6135_v58  ;;  %v6451_v12 = vsel %vm4562_vm1, %v13181_v20, 0.0 }
 0x3b5   :  { %10440 = vmatmul.mubr.msk.bf16.vlgmr.msra.gmra.mrb[88].mxu0 %vm4562_vm1, %v6653_v45  ;;  %10703 = vpow2.f32 %v6359_v22  ;;  %v6250_v22 = vsel %vm4562_vm1, %v13214_v41, -inf  ;;  %v13445_v58 = vcombine.high %v4073_v61, %v4089_v10  ;;  %v6463_v20 = vsel %vm4562_vm1, %v13193_v28, 0.0 }
 0x3b6   :  { %v6153_v17 = vpop.xlane.xlu1 %6152  ;;  %10450 = vmatpush3.bf16.msra.mxu0 %v4484_v30  ;;  %10451 = vmatprep.mubr.msk.bf16.mxu0 %vm11049_vm0, %v14378_v0  ;;  %10705 = vpow2.f32 %v6361_v38  ;;  %v6367_v42 = vmul.f32 1.442695, %v6281_v8  ;;  %v13447_v30 = vcombine.high %v4141_v21, %v4157_v43  ;;  %v4479_v43 = vshrl.u32 %v13358_v56, 16 }
 0x3b7   :  { %v6287_v1 = vsub.f32 %v14476_v63, %v6153_v17  ;;  %v6138_v4 = vpop.xlane.xlu0 %6137  ;;  %10461 = vmatprep.subr.bf16.mxu0 %v14378_v0  ;;  %v6256_v63 = vsel %vm4562_vm1, %v13278_v18, -inf  ;;  %v6454_v56 = vsel %vm4562_vm1, %v13183_v50, 0.0  ;;  %v14486_v18 = vld [vmem:[#allocation24_spill] sm:$0xff] }
 0x3b8   :  { %6254 = vmax.xlane.f32.xlu1 %v6253_v34  ;;  %6245 = vmax.xlane.f32.xlu0 %v6244_v32  ;;  %v6282_v5 = vsub.f32 %v14477_v23, %v6138_v4  ;;  %10707 = vpow2.f32 %v6367_v42  ;;  %v14478_v34 = vld [vmem:[#allocation41_spill] sm:$0xff]  ;;  %v4478_v4 = vshrl.u32 %v13356_v49, 16  ;;  %v14479_v42 = vld [vmem:[#allocation20_spill] sm:$0xff]  ;;  %v14480_v23 = vld [vmem:[#allocation18_spill] sm:$0xff] }
 0x3b9   :  { %v6379_v38 = vmul.f32 1.442695, %v6287_v1  ;;  %v4492_v1 = vpack.i.b16 %v13447_v30, %v13445_v58 }
 0x3ba   :  { %v6369_v45 = vmul.f32 1.442695, %v6282_v5  ;;  %v4194_v5 = vcombine.low %v14480_v23, %v14479_v42  ;;  %v14485_v42 = vld [vmem:[#allocation21_spill] sm:$0xff]  ;;  %v4480_v50 = vpack.i.b16 %v4479_v43, %v4478_v4  ;;  %v6466_v4 = vsel %vm4562_vm1, %v13198_v9, 0.0 }
 0x3bb   :  { %v6156_v8 = vpop.xlane.xlu0 %6155 }
 0x3bc   :  { %6452 = vadd.xlane.f32.xlu1 %v6451_v12  ;;  %6251 = vmax.xlane.f32.xlu0 %v6250_v22  ;;  %10709 = vpow2.f32 %v6369_v45  ;;  %v6288_v32 = vsub.f32 %v14478_v34, %v6156_v8  ;;  %v13450_v17 = vpop.eup %10699  ;;  %v14481_v12 = vld [vmem:[#allocation42_spill] sm:$0xff]  ;;  %v14482_v45 = vld [vmem:[#allocation16_spill] sm:$0xff]  ;;  %v14483_v8 = vld [vmem:[#allocation15_spill] sm:$0xff] }
 0x3bd   :  { %10711 = vpow2.f32 %v6379_v38  ;;  %v4210_v34 = vcombine.low %v14483_v8, %v14482_v45  ;;  %v14487_v38 = vld [vmem:[#allocation23_spill] sm:$0xff]  ;;  %v6469_v8 = vsel %vm4562_vm1, %v13292_v39, 0.0 }
 0x3be   :  { %v13457_v61 = vpop.eup %10701  ;;  %v6381_v21 = vmul.f32 1.442695, %v6288_v32  ;;  %v4278_v41 = vcombine.low %v14487_v38, %v14486_v18  ;;  %v14489_v38 = vld [vmem:[#allocation44_spill] sm:$0xff] }
 0x3bf   :  { %v6147_v10 = vpop.xlane.xlu1 %6146  ;;  %v13464_v28 = vpop.eup %10703  ;;  %v6655_v49 = vpack.c.bf16 %v13457_v61, %v13450_v17 }
 0x3c0   :  { %6464 = vadd.xlane.f32.xlu1 %v6463_v20  ;;  %6257 = vmax.xlane.f32.xlu0 %v6256_v63  ;;  %v6285_v22 = vsub.f32 %v14481_v12, %v6147_v10  ;;  %v13471_v32 = vpop.eup %10705  ;;  %10713 = vpow2.f32 %v6381_v21  ;;  %v14484_v63 = vld [vmem:[#allocation22_spill] sm:$0xff]  ;;  %v6457_v10 = vsel %vm4562_vm1, %v13268_v40, 0.0  ;;  %v13489_v40 = vrot.slane %v4194_v5, %v11313_v35 }
 0x3c1   :  { %v6150_v20 = vpop.xlane.xlu0 %6149  ;;  %v4262_v23 = vcombine.low %v14485_v42, %v14484_v63  ;;  %v6652_v45 = vpack.c.bf16 %v13471_v32, %v13464_v28  ;;  %10452 = vmatmul.mubr.msk.bf16.vlgmr.msra.gmra.mrb[92].mxu0 %vm4562_vm1, %v6655_v49  ;;  %v13507_v43 = vrot.slane %v4278_v41, %v11313_v35  ;;  %v4486_v5 = vshrl.u32 %v13414_v25, 16 }
 0x3c2   :  { %v6375_v12 = vmul.f32 1.442695, %v6285_v22  ;;  %v6286_v36 = vsub.f32 %v14488_v44, %v6150_v20  ;;  %10462 = vmatpush3.bf16.msra.mxu0 %v4492_v1  ;;  %v13492_v44 = vrot.slane %v4210_v34, %v11313_v35  ;;  %v13497_v22 = vpop.eup %10707  ;;  %10463 = vmatprep.mubr.msk.bf16.mxu0 %vm11049_vm0, %v14378_v0  ;;  %v6460_v41 = vsel %vm4562_vm1, %v13276_v16, 0.0 }
 0x3c3   :  { %10434 = vmatmul.mubr.msk.bf16.vlgmr.msra.gmra.mrb[100].mxu1 %vm4562_vm1, %v6652_v45  ;;  %v13495_v18 = vrot.slane %v4262_v23, %v11313_v35  ;;  %10473 = vmatprep.subr.bf16.mxu0 %v14378_v0  ;;  %v6487_v16 = vsel %vm4562_vm1, %v13315_v26, 0.0  ;;  %v6478_v63 = vsel %vm4562_vm1, %v13238_v31, 0.0  ;;  %v4495_v26 = vshrl.u32 %v13447_v30, 16 }
 0x3c4   :  { %6458 = vadd.xlane.f32.xlu1 %v6457_v10  ;;  %6455 = vadd.xlane.f32.xlu0 %v6454_v56  ;;  %v6377_v21 = vmul.f32 1.442695, %v6286_v36  ;;  %10715 = vpow2.f32 %v6375_v12  ;;  %v6475_v36 = vsel %vm4562_vm1, %v13252_v54, 0.0  ;;  %v4487_v54 = vshrl.u32 %v13416_v37, 16 }
 0x3c5   :  { %10444 = vmatpush3.bf16.msra.mxu1 %v4480_v50  ;;  %10445 = vmatprep.mubr.msk.bf16.mxu1 %vm11049_vm0, %v14378_v0  ;;  %v13524_v34 = vcombine.low %v13489_v40, %v13492_v44  ;;  %v13528_v25 = vcombine.low %v13495_v18, %v13507_v43  ;;  %v4494_v12 = vshrl.u32 %v13445_v58, 16  ;;  %v6481_v58 = vsel %vm4562_vm1, %v13327_v7, 0.0 }
 0x3c6   :  { %10717 = vpow2.f32 %v6377_v21  ;;  %10455 = vmatprep.subr.bf16.mxu1 %v14378_v0  ;;  %v13509_v1 = vpop.eup %10709  ;;  %v4488_v56 = vpack.i.b16 %v4487_v54, %v4486_v5  ;;  %v14490_v21 = vld [vmem:[#allocation45_spill] sm:$0xff]  ;;  %v6472_v30 = vsel %vm4562_vm1, %v13285_v51, 0.0  ;;  %v6499_v51 = vsel %vm4562_vm1, %v13353_v62, 0.0 }
 0x3c7   :  { %v6654_v9 = vpack.c.bf16 %v13509_v1, %v13497_v22  ;;  %v13516_v49 = vpop.eup %10711  ;;  %v4500_v42 = vpack.i.b16 %v13528_v25, %v13524_v34  ;;  %v6493_v62 = vsel %vm4562_vm1, %v13368_v53, 0.0  ;;  %v6502_v53 = vsel %vm4562_vm1, %v13363_v6, 0.0 }
 0x3c8   :  { %6476 = vadd.xlane.f32.xlu1 %v6475_v36  ;;  %6467 = vadd.xlane.f32.xlu0 %v6466_v4 }
 0x3ca   :  { %v13530_v37 = vpop.eup %10713 }
 0x3cb   :  { %10446 = vmatmul.mubr.msk.bf16.vlgmr.msra.gmra.mrb[104].mxu1 %vm4562_vm1, %v6654_v9  ;;  %v6657_v39 = vpack.c.bf16 %v13530_v37, %v13516_v49  ;;  %v4496_v9 = vpack.i.b16 %v4495_v26, %v4494_v12  ;;  %v6484_v12 = vsel %vm4562_vm1, %v13321_v48, 0.0  ;;  %v6511_v48 = vsel %vm4562_vm1, %v13412_v11, 0.0 }
 0x3cc   :  { %6470 = vadd.xlane.f32.xlu1 %v6469_v8  ;;  %6461 = vadd.xlane.f32.xlu0 %v6460_v41  ;;  %v14491_v8 = vld [vmem:[#allocation46_spill] sm:$0xff]  ;;  %v6496_v11 = vsel %vm4562_vm1, %v13379_v29, 0.0 }
 0x3cd   :  { %10456 = vmatpush3.bf16.msra.mxu1 %v4488_v56  ;;  %10457 = vmatprep.mubr.msk.bf16.mxu1 %vm11049_vm0, %v14378_v0 }
 0x3ce   :  { %v6165_v20 = vpop.xlane.xlu1 %6164  ;;  %10464 = vmatmul.mubr.msk.bf16.vlgmr.msra.gmra.mrb[96].mxu0 %vm4562_vm1, %v6657_v39  ;;  %10467 = vmatprep.subr.bf16.mxu1 %v14378_v0  ;;  %v13545_v23 = vpop.eup %10715  ;;  %v6490_v39 = vsel %vm4562_vm1, %v13308_v33, 0.0  ;;  %v14494_v33 = vld [vmem:[#allocation49_spill] sm:$0xff] }
 0x3cf   :  { %v6291_v10 = vsub.f32 %v14489_v38, %v6165_v20  ;;  %10474 = vmatpush3.bf16.msra.mxu0 %v4500_v42  ;;  %10475 = vmatprep.mubr.msk.bf16.mxu0 %vm11049_vm0, %v14378_v0  ;;  %v14493_v42 = vld [vmem:[#allocation48_spill] sm:$0xff] }
 0x3d0   :  { %6488 = vadd.xlane.f32.xlu1 %v6487_v16  ;;  %6479 = vadd.xlane.f32.xlu0 %v6478_v63  ;;  %v13550_v45 = vpop.eup %10717  ;;  %v6168_v31 = vpop.xlane.xlu0 %6167  ;;  %v14492_v16 = vld [vmem:[#allocation47_spill] sm:$0xff] }
 0x3d1   :  { %v6387_v50 = vmul.f32 1.442695, %v6291_v10  ;;  %v6292_v36 = vsub.f32 %v14490_v21, %v6168_v31  ;;  %v6656_v4 = vpack.c.bf16 %v13550_v45, %v13545_v23  ;;  %10485 = vmatprep.subr.bf16.mxu0 %v14378_v0 }
 0x3d3   :  { %v6389_v54 = vmul.f32 1.442695, %v6292_v36  ;;  %10719 = vpow2.f32 %v6387_v50  ;;  %10458 = vmatmul.mubr.msk.bf16.vlgmr.msra.gmra.mrb[108].mxu1 %vm4562_vm1, %v6656_v4  ;;  %v13580_v36 = vcombine.high %v13489_v40, %v13492_v44  ;;  %v6505_v44 = vsel %vm4562_vm1, %v13464_v28, 0.0 }
 0x3d4   :  { %6482 = vadd.xlane.f32.xlu1 %v6481_v58  ;;  %v6159_v5 = vpop.xlane.xlu1 %6158  ;;  %6473 = vadd.xlane.f32.xlu0 %v6472_v30  ;;  %v13590_v58 = vcombine.high %v13495_v18, %v13507_v43  ;;  %v14495_v43 = vld [vmem:[#allocation50_spill] sm:$0xff] }
 0x3d5   :  { %v6289_v41 = vsub.f32 %v14491_v8, %v6159_v5  ;;  %10721 = vpow2.f32 %v6389_v54  ;;  %10468 = vmatpush3.bf16.msra.mxu1 %v4496_v9  ;;  %10469 = vmatprep.mubr.msk.bf16.mxu1 %vm11049_vm0, %v14378_v0  ;;  %v4502_v8 = vshrl.u32 %v13524_v34, 16  ;;  %v6523_v34 = vsel %vm4562_vm1, %v13450_v17, 0.0 }
 0x3d6   :  { %v6162_v56 = vpop.xlane.xlu0 %6161  ;;  %10479 = vmatprep.subr.bf16.mxu1 %v14378_v0  ;;  %v4508_v6 = vpack.i.b16 %v13590_v58, %v13580_v36 }
 0x3d7   :  { %v6383_v7 = vmul.f32 1.442695, %v6289_v41  ;;  %v6290_v20 = vsub.f32 %v14492_v16, %v6162_v56  ;;  %v4503_v41 = vshrl.u32 %v13528_v25, 16  ;;  %v14496_v56 = vld [vmem:[#allocation53_spill] sm:$0xff]  ;;  %v6514_v25 = vsel %vm4562_vm1, %v13419_v46, 0.0 }
 0x3d8   :  { %6500 = vadd.xlane.f32.xlu1 %v6499_v51  ;;  %v6177_v63 = vpop.xlane.xlu1 %6176  ;;  %6491 = vadd.xlane.f32.xlu0 %v6490_v39  ;;  %v14497_v39 = vld [vmem:[#allocation55_spill] sm:$0xff] }
 0x3d9   :  { %v6295_v38 = vsub.f32 %v14493_v42, %v6177_v63  ;;  %v6385_v10 = vmul.f32 1.442695, %v6290_v20  ;;  %10723 = vpow2.f32 %v6383_v7 }
 0x3da   :  { %v6180_v26 = vpop.xlane.xlu0 %6179 }
 0x3db   :  { %v6395_v31 = vmul.f32 1.442695, %v6295_v38  ;;  %10725 = vpow2.f32 %v6385_v10  ;;  %v6296_v50 = vsub.f32 %v14494_v33, %v6180_v26  ;;  %v4504_v10 = vpack.i.b16 %v4503_v41, %v4502_v8  ;;  %v14504_v8 = vld [vmem:[#allocation28_spill] sm:$0xff] }
 0x3dc   :  { %6494 = vadd.xlane.f32.xlu1 %v6493_v62  ;;  %6485 = vadd.xlane.f32.xlu0 %v6484_v12 }
 0x3dd   :  { %v6397_v21 = vmul.f32 1.442695, %v6296_v50  ;;  %10727 = vpow2.f32 %v6395_v31  ;;  %v13582_v4 = vpop.eup %10719  ;;  %v14498_v31 = vld [vmem:[#allocation52_spill] sm:$0xff]  ;;  %v6517_v50 = vsel %vm4562_vm1, %v13497_v22, 0.0  ;;  %v6526_v22 = vsel %vm4562_vm1, %v13457_v61, 0.0  ;;  %v14503_v61 = vld [vmem:[#allocation29_spill] sm:$0xff] }
 0x3de   :  { %v6171_v5 = vpop.xlane.xlu1 %6170  ;;  %v13662_v41 = vcombine.high %v14504_v8, %v14503_v61 }
 0x3df   :  { %10729 = vpow2.f32 %v6397_v21  ;;  %v13592_v30 = vpop.eup %10721  ;;  %v6293_v54 = vsub.f32 %v14495_v43, %v6171_v5  ;;  %v6508_v21 = vsel %vm4562_vm1, %v13471_v32, 0.0  ;;  %v6535_v32 = vsel %vm4562_vm1, %v13516_v49, 0.0  ;;  %v14502_v49 = vld [vmem:[#allocation25_spill] sm:$0xff] }
 0x3e0   :  { %6512 = vadd.xlane.f32.xlu1 %v6511_v48  ;;  %6503 = vadd.xlane.f32.xlu0 %v6502_v53  ;;  %v6659_v40 = vpack.c.bf16 %v13592_v30, %v13582_v4  ;;  %v14499_v48 = vld [vmem:[#allocation27_spill] sm:$0xff]  ;;  %v14500_v53 = vld [vmem:[#allocation30_spill] sm:$0xff]  ;;  %v6520_v43 = vsel %vm4562_vm1, %v13509_v1, 0.0 }
 0x3e1   :  { %v6391_v42 = vmul.f32 1.442695, %v6293_v54  ;;  %v4516_v5 = vpack.i.b16 %v14500_v53, %v14499_v48  ;;  %v14501_v54 = vld [vmem:[#allocation26_spill] sm:$0xff] }
 0x3e2   :  { %10476 = vmatmul.mubr.msk.bf16.vlgmr.msra.gmra.mrb[100].mxu0 %vm4562_vm1, %v6659_v40  ;;  %v14508_v48 = vld [vmem:[#allocation54_spill] sm:$0xff] }
 0x3e3   :  { %v13603_v18 = vpop.eup %10723  ;;  %10486 = vmatpush3.bf16.msra.mxu0 %v4508_v6  ;;  %10487 = vmatprep.mubr.msk.bf16.mxu0 %vm11049_vm0, %v14378_v0  ;;  %v6529_v6 = vsel %vm4562_vm1, %v13545_v23, 0.0  ;;  %v3327_v53 = vshrl.u32 %v14508_v48, 16 }
 0x3e4   :  { %6506 = vadd.xlane.f32.xlu1 %v6505_v44  ;;  %v6189_v9 = vpop.xlane.xlu0 %6188  ;;  %6497 = vadd.xlane.f32.xlu0 %v6496_v11 }
 0x3e5   :  { %v13608_v28 = vpop.eup %10725  ;;  %v6299_v29 = vsub.f32 %v14496_v56, %v6189_v9  ;;  %10497 = vmatprep.subr.bf16.mxu0 %v14378_v0  ;;  %v13658_v9 = vcombine.high %v14502_v49, %v14501_v54  ;;  %v14511_v54 = vld [vmem:[#allocation60_spill] sm:$0xff]  ;;  %v14512_v49 = vld [vmem:[#allocation61_spill] sm:$0xff] }
 0x3e6   :  { %v6192_v7 = vpop.xlane.xlu1 %6191  ;;  %v6658_v51 = vpack.c.bf16 %v13608_v28, %v13603_v18  ;;  %v3334_v61 = vshrl.u32 %v14512_v49, 16 }
 0x3e7   :  { %v6300_v16 = vsub.f32 %v14497_v39, %v6192_v7  ;;  %v6403_v20 = vmul.f32 1.442695, %v6299_v29  ;;  %v13621_v63 = vpop.eup %10727  ;;  %v4510_v29 = vshrl.u32 %v13580_v36, 16  ;;  %v4511_v7 = vshrl.u32 %v13590_v58, 16 }
 0x3e8   :  { %6524 = vadd.xlane.f32.xlu1 %v6523_v34  ;;  %v6174_v38 = vpop.xlane.xlu0 %6173  ;;  %6515 = vadd.xlane.f32.xlu0 %v6514_v25  ;;  %v4524_v36 = vpack.i.b16 %v13662_v41, %v13658_v9  ;;  %v6541_v58 = vsel %vm4562_vm1, %v13603_v18, 0.0  ;;  %v6550_v18 = vsel %vm4562_vm1, %v13592_v30, 0.0  ;;  %v14507_v30 = vld [vmem:[#allocation51_spill] sm:$0xff] }
 0x3e9   :  { %v13623_v12 = vpop.eup %10729  ;;  %v6405_v26 = vmul.f32 1.442695, %v6300_v16  ;;  %10731 = vpow2.f32 %v6403_v20  ;;  %v6294_v62 = vsub.f32 %v14498_v31, %v6174_v38  ;;  %10470 = vmatmul.mubr.msk.bf16.vlgmr.msra.gmra.mrb[112].mxu1 %vm4562_vm1, %v6658_v51  ;;  %v6547_v16 = vsel %vm4562_vm1, %v13582_v4, 0.0  ;;  %v14506_v31 = vld [vmem:[#allocation59_spill] sm:$0xff] }
 0x3ea   :  { %v13627_v33 = vpop.xlane.xlu1 %6185  ;;  %10480 = vmatpush3.bf16.msra.mxu1 %v4504_v10  ;;  %v6661_v46 = vpack.c.bf16 %v13623_v12, %v13621_v63  ;;  %10481 = vmatprep.mubr.msk.bf16.mxu1 %vm11049_vm0, %v14378_v0  ;;  %v6538_v20 = vsel %vm4562_vm1, %v13530_v37, 0.0  ;;  %v4512_v25 = vpack.i.b16 %v4511_v7, %v4510_v29  ;;  %v6532_v4 = vsel %vm4562_vm1, %v13550_v45, 0.0 }
 0x3eb   :  { %10733 = vpow2.f32 %v6405_v26  ;;  %v6393_v17 = vmul.f32 1.442695, %v6294_v62  ;;  %10491 = vmatprep.subr.bf16.mxu1 %v14378_v0  ;;  %v6559_v45 = vsel %vm4562_vm1, %v13621_v63, 0.0  ;;  %v6562_v7 = vsel %vm4562_vm1, %v13623_v12, 0.0 }
 0x3ec   :  { %10735 = vpow2.f32 %v6391_v42  ;;  %6518 = vadd.xlane.f32.xlu1 %v6517_v50  ;;  %6509 = vadd.xlane.f32.xlu0 %v6508_v21  ;;  %v14505_v42 = vld [vmem:[#allocation56_spill] sm:$0xff]  ;;  %v3209_v50 = vpop.permute.xlu0 %3208  ;;  %v3326_v21 = vshrl.u32 %v14507_v30, 16 }
 0x3ed   :  { %10737 = vpow2.f32 %v6393_v17  ;;  %10488 = vmatmul.mubr.msk.bf16.vlgmr.msra.gmra.mrb[104].mxu0 %vm4562_vm1, %v6661_v46  ;;  %v6298_v38 = vsub.f32 %v14505_v42, %v13627_v33  ;;  %v6544_v33 = vsel %vm4562_vm1, %v13608_v28, 0.0  ;;  %v3318_v17 = vshrl.u32 %v12122_v52, 16 }
 0x3ee   :  { %v13641_v40 = vpop.xlane.xlu1 %6203  ;;  %10498 = vmatpush3.bf16.msra.mxu0 %v4516_v5  ;;  %10499 = vmatprep.mubr.msk.bf16.mxu0 %vm11049_vm0, %v14378_v0  ;;  %v14509_v5 = vld [vmem:[#allocation57_spill] sm:$0xff]  ;;  %v3342_v8 = vshrl.u32 %v3209_v50, 16 }
 0x3ef   :  { %10509 = vmatprep.subr.bf16.mxu0 %v14378_v0  ;;  %v6401_v26 = vmul.f32 1.442695, %v6298_v38  ;;  %v6304_v62 = vsub.f32 %v14506_v31, %v13641_v40  ;;  %v3316_v12 = vpack.i.b16 %v14509_v5, %v12122_v52 }
 0x3f0   :  { %6536 = vadd.xlane.f32.xlu1 %v6535_v32  ;;  %6527 = vadd.xlane.f32.xlu0 %v6526_v22  ;;  %v3319_v32 = vshrl.u32 %v14509_v5, 16 }
 0x3f1   :  { %10739 = vpow2.f32 %v6401_v26 }
 0x3f2   :  { %v13650_v44 = vpop.xlane.xlu1 %6197 }
 0x3f3   :  { %v10732_v11 = vpop.eup %10731  ;;  %v6302_v28 = vsub.f32 %v14511_v54, %v13650_v44 }
 0x3f4   :  { %6530 = vadd.xlane.f32.xlu1 %v6529_v6  ;;  %6521 = vadd.xlane.f32.xlu0 %v6520_v43  ;;  %v14510_v6 = vld [vmem:[#allocation58_spill] sm:$0xff]  ;;  %v6413_v43 = vmul.f32 1.442695, %v6304_v62  ;;  %v6571_v29 = vsel %vm4562_vm1, %v10732_v11, 0.0 }
 0x3f5   :  { %v13664_v56 = vpop.eup %10733  ;;  %v3335_v40 = vshrl.u32 %v14510_v6, 16 }
 0x3f6   :  { %v10736_v23 = vpop.eup %10735  ;;  %v13668_v51 = vpop.xlane.xlu1 %6215  ;;  %v6663_v1 = vpack.c.bf16 %v13664_v56, %v10732_v11  ;;  %10741 = vpow2.f32 %v6413_v43  ;;  %v3324_v11 = vpack.i.b16 %v14508_v48, %v14507_v30 }
 0x3f7   :  { %v10738_v39 = vpop.eup %10737  ;;  %v6553_v46 = vsel %vm4562_vm1, %v10736_v23, 0.0 }
 0x3f8   :  { %6548 = vadd.xlane.f32.xlu1 %v6547_v16  ;;  %6539 = vadd.xlane.f32.xlu0 %v6538_v20  ;;  %v6660_v34 = vpack.c.bf16 %v10738_v39, %v10736_v23  ;;  %v6409_v16 = vmul.f32 1.442695, %v6302_v28  ;;  %v14513_v20 = vld [vmem:[#allocation17_spill] sm:$0xff] }
 0x3f9   :  { %10500 = vmatmul.mubr.msk.bf16.vlgmr.msra.gmra.mrb[108].mxu0 %vm4562_vm1, %v6663_v1  ;;  %v3320_v1 = vpack.i.b16 %v3319_v32, %v3318_v17 }
 0x3fa   :  { %10482 = vmatmul.mubr.msk.bf16.vlgmr.msra.gmra.mrb[116].mxu1 %vm4562_vm1, %v6660_v34  ;;  %10510 = vmatpush3.bf16.msra.mxu0 %v4524_v36  ;;  %v13685_v37 = vpop.xlane.xlu1 %6209  ;;  %v6308_v34 = vsub.f32 %v14513_v20, %v13668_v51  ;;  %v3328_v36 = vpack.i.b16 %v3327_v53, %v3326_v21  ;;  %10743 = vpow2.f32 %v6409_v16 }
 0x3fb   :  { %10492 = vmatpush3.bf16.msra.mxu1 %v4512_v25  ;;  %10493 = vmatprep.mubr.msk.bf16.mxu1 %vm11049_vm0, %v14378_v0  ;;  %v3336_v25 = vpack.i.b16 %v3335_v40, %v3334_v61  ;;  %v6306_v51 = vsub.f32 %v13144_v57, %v13685_v37  ;;  %v13728_v31 = vpop.eup %10739 }
 0x3fc   :  { %6542 = vadd.xlane.f32.xlu1 %v6541_v58  ;;  %6533 = vadd.xlane.f32.xlu0 %v6532_v4  ;;  %v6556_v58 = vsel %vm4562_vm1, %v10738_v39, 0.0  ;;  %v3332_v4 = vpack.i.b16 %v14510_v6, %v14512_v49  ;;  %v6421_v38 = vmul.f32 1.442695, %v6308_v34  ;;  %v6574_v39 = vsel %vm4562_vm1, %v13664_v56, 0.0 }
 0x3fd   :  { %10503 = vmatprep.subr.bf16.mxu1 %v14378_v0  ;;  %10511 = vmatprep.mubr.msk.bf16.mxu0 %vm11049_vm0, %v14378_v0  ;;  %v3823_v62 = vcombine.high %v3320_v1, %v3336_v25  ;;  %v6568_v56 = vsel %vm4562_vm1, %v13728_v31, 0.0 }
 0x3fe   :  { %10521 = vmatprep.subr.bf16.mxu0 %v14378_v0  ;;  %v3754_v52 = vcombine.low %v3316_v12, %v3332_v4  ;;  %v3755_v17 = vcombine.high %v3316_v12, %v3332_v4  ;;  %10745 = vpow2.f32 %v6421_v38 }
 0x3ff   :  { %v3837_v21 = vrot.slane %v3823_v62, %v11302_v13 }
 0x400   :  { %v13697_v10 = vpop.xlane.xlu1 %6221  ;;  %6560 = vadd.xlane.f32.xlu1 %v6559_v45  ;;  %6551 = vadd.xlane.f32.xlu0 %v6550_v18  ;;  %v3822_v18 = vcombine.low %v3320_v1, %v3336_v25  ;;  %v13736_v30 = vpop.eup %10741  ;;  %v3762_v53 = vrot.slane %v3754_v52, %v11302_v13 }
 0x401   :  { %v6586_v28 = vsel %vm4562_vm1, %v13736_v30, 0.0 }
 0x402   :  { %v3830_v57 = vrot.slane %v3822_v18, %v11302_v13 }
 0x404   :  { %v3217_v63 = vpop.permute.xlu1 %3216  ;;  %6554 = vadd.xlane.f32.xlu1 %v6553_v46  ;;  %6545 = vadd.xlane.f32.xlu0 %v6544_v33  ;;  %v13744_v49 = vpop.eup %10743 }
 0x405   :  { %v3343_v22 = vshrl.u32 %v3217_v63, 16  ;;  %v3340_v44 = vpack.i.b16 %v3217_v63, %v3209_v50  ;;  %v6417_v50 = vmul.f32 1.442695, %v6306_v51  ;;  %v6580_v34 = vsel %vm4562_vm1, %v13744_v49, 0.0 }
 0x407   :  { %v3344_v23 = vpack.i.b16 %v3343_v22, %v3342_v8  ;;  %v3770_v26 = vcombine.low %v3324_v11, %v3340_v44  ;;  %v3771_v46 = vcombine.high %v3324_v11, %v3340_v44  ;;  %v3769_v22 = vrot.slane %v3755_v17, %v11302_v13 }
 0x408   :  { %6572 = vadd.xlane.f32.xlu1 %v6571_v29  ;;  %6563 = vadd.xlane.f32.xlu0 %v6562_v7  ;;  %10747 = vpow2.f32 %v6417_v50 }
 0x409   :  { %v3838_v42 = vcombine.low %v3328_v36, %v3344_v23  ;;  %v3839_v45 = vcombine.high %v3328_v36, %v3344_v23  ;;  %v3778_v37 = vrot.slane %v3770_v26, %v11302_v13  ;;  %v3785_v48 = vrot.slane %v3771_v46, %v11302_v13  ;;  %v13754_v36 = vpop.eup %10745 }
 0x40b   :  { %v3846_v33 = vrot.slane %v3838_v42, %v11302_v13  ;;  %v3853_v63 = vrot.slane %v3839_v45, %v11302_v13  ;;  %v3786_v43 = vcombine.low %v3762_v53, %v3778_v37  ;;  %v3787_v54 = vcombine.high %v3762_v53, %v3778_v37 }
 0x40c   :  { %6557 = vadd.xlane.f32.xlu0 %v6556_v58  ;;  %v3802_v61 = vcombine.low %v3769_v22, %v3785_v48  ;;  %v3803_v8 = vcombine.high %v3769_v22, %v3785_v48  ;;  %v6598_v45 = vsel %vm4562_vm1, %v13754_v36, 0.0 }
 0x40d   :  { %v3854_v5 = vcombine.low %v3830_v57, %v3846_v33  ;;  %v3855_v32 = vcombine.high %v3830_v57, %v3846_v33  ;;  %v3870_v6 = vcombine.low %v3837_v21, %v3853_v63  ;;  %v3871_v40 = vcombine.high %v3837_v21, %v3853_v63 }
 0x40e   :  { %v3794_v16 = vrot.slane %v3786_v43, %v11313_v35  ;;  %v3801_v20 = vrot.slane %v3787_v54, %v11313_v35  ;;  %v3810_v25 = vrot.slane %v3802_v61, %v11313_v35  ;;  %v3817_v44 = vrot.slane %v3803_v8, %v11313_v35 }
 0x40f   :  { %v3862_v29 = vrot.slane %v3854_v5, %v11313_v35  ;;  %v3869_v7 = vrot.slane %v3855_v32, %v11313_v35  ;;  %v3878_v23 = vrot.slane %v3870_v6, %v11313_v35  ;;  %v3885_v1 = vrot.slane %v3871_v40, %v11313_v35 }
 0x410   :  { %6575 = vadd.xlane.f32.xlu0 %v6574_v39  ;;  %v4298_v51 = vcombine.low %v3794_v16, %v3801_v20  ;;  %v9916_v26 = vcombine.high %v3794_v16, %v3801_v20  ;;  %v4314_v39 = vcombine.low %v3810_v25, %v3817_v44  ;;  %v9917_v62 = vcombine.high %v3810_v25, %v3817_v44 }
 0x411   :  { %v4366_v58 = vcombine.low %v3862_v29, %v3869_v7  ;;  %v9918_v11 = vcombine.high %v3862_v29, %v3869_v7  ;;  %v4382_v4 = vcombine.low %v3878_v23, %v3885_v1  ;;  %v9919_v42 = vcombine.high %v3878_v23, %v3885_v1  ;;  %v14514_v1 = vld [vmem:[#allocation63_spill] sm:$0xff] }
 0x412   :  { %v13761_v18 = vpop.eup %10747  ;;  %v13779_v37 = vrot.slane %v4298_v51, %v11302_v13  ;;  %v13782_v21 = vrot.slane %v9916_v26, %v11302_v13  ;;  %v13785_v48 = vrot.slane %v4314_v39, %v11302_v13  ;;  %v6310_v16 = vsub.f32 %v14514_v1, %v13697_v10 }
 0x413   :  { %v13764_v33 = vrot.slane %v4366_v58, %v11302_v13  ;;  %v13767_v17 = vrot.slane %v9918_v11, %v11302_v13  ;;  %v13771_v50 = vrot.slane %v4382_v4, %v11302_v13  ;;  %v13774_v63 = vrot.slane %v9919_v42, %v11302_v13  ;;  %v14516_v4 = vld [vmem:[#allocation31_spill] sm:$0xff] }
 0x414   :  { %6569 = vadd.xlane.f32.xlu0 %v6568_v56  ;;  %v6592_v57 = vsel %vm4562_vm1, %v13761_v18, 0.0  ;;  %v4330_v40 = vcombine.low %v13779_v37, %v13782_v21  ;;  %v6425_v10 = vmul.f32 1.442695, %v6310_v16 }
 0x415   :  { %v4398_v32 = vcombine.low %v13764_v33, %v13767_v17  ;;  %v4414_v22 = vcombine.low %v13771_v50, %v13774_v63 }
 0x416   :  { %v4338_v7 = vrot.slane %v4330_v40, %v11313_v35 }
 0x417   :  { %v4406_v61 = vrot.slane %v4398_v32, %v11313_v35 }
 0x418   :  { %6587 = vadd.xlane.f32.xlu0 %v6586_v28 }
 0x41c   :  { %6581 = vadd.xlane.f32.xlu0 %v6580_v34 }
 0x41d   :  { %v6183_v12 = vpop.xlane.xlu0 %6182 }
 0x41e   :  { %v6297_v38 = vsub.f32 %v13092_v15, %v6183_v12 }
 0x420   :  { %v6399_v46 = vmul.f32 1.442695, %v6297_v38  ;;  %6599 = vadd.xlane.f32.xlu0 %v6598_v45  ;;  %v4526_v45 = vshrl.u32 %v13658_v9, 16 }
 0x421   :  { %v6201_v52 = vpop.xlane.xlu0 %6200 }
 0x422   :  { %10749 = vpow2.f32 %v6399_v46  ;;  %v6303_v15 = vsub.f32 %v13104_v24, %v6201_v52  ;;  %v13788_v24 = vrot.slane %v9917_v62, %v11302_v13  ;;  %v4527_v62 = vshrl.u32 %v13662_v41, 16 }
 0x424   :  { %v6411_v56 = vmul.f32 1.442695, %v6303_v15  ;;  %6593 = vadd.xlane.f32.xlu0 %v6592_v57  ;;  %v4346_v43 = vcombine.low %v13785_v48, %v13788_v24 }
 0x425   :  { %v6195_v53 = vpop.xlane.xlu0 %6194 }
 0x426   :  { %10751 = vpow2.f32 %v6411_v56  ;;  %v6301_v5 = vsub.f32 %v13110_v2, %v6195_v53  ;;  %v4422_v2 = vrot.slane %v4414_v22, %v11313_v35  ;;  %v4354_v23 = vrot.slane %v4346_v43, %v11313_v35 }
 0x427   :  { %v4528_v53 = vpack.i.b16 %v4527_v62, %v4526_v45 }
 0x428   :  { %v6407_v6 = vmul.f32 1.442695, %v6301_v5  ;;  %v13809_v58 = vcombine.low %v4406_v61, %v4422_v2  ;;  %v13813_v42 = vcombine.low %v4338_v7, %v4354_v23  ;;  %v13831_v57 = vcombine.high %v4406_v61, %v4422_v2 }
 0x429   :  { %v6213_v54 = vpop.xlane.xlu0 %6212  ;;  %v13836_v5 = vcombine.high %v4338_v7, %v4354_v23 }
 0x42a   :  { %10753 = vpow2.f32 %v6407_v6  ;;  %v6307_v28 = vsub.f32 %v13120_v27, %v6213_v54  ;;  %v14515_v27 = vld [vmem:[#allocation62_spill] sm:$0xff]  ;;  %v4532_v39 = vpack.i.b16 %v13809_v58, %v13813_v42  ;;  %v4535_v61 = vshrl.u32 %v13809_v58, 16 }
 0x42b   :  { %v14517_v58 = vld [vmem:[#allocation66_spill] sm:$0xff] }
 0x42c   :  { %v10750_v8 = vpop.eup %10749  ;;  %v6419_v29 = vmul.f32 1.442695, %v6307_v28 }
 0x42d   :  { %v6207_v20 = vpop.xlane.xlu0 %6206  ;;  %v6565_v34 = vsel %vm4562_vm1, %v10750_v8, 0.0  ;;  %v6662_v25 = vpack.c.bf16 %v13728_v31, %v10750_v8  ;;  %v4331_v8 = vcombine.high %v13779_v37, %v13782_v21 }
 0x42e   :  { %10755 = vpow2.f32 %v6419_v29  ;;  %v6305_v44 = vsub.f32 %v14515_v27, %v6207_v20  ;;  %6566 = vadd.xlane.f32.xlu1 %v6565_v34  ;;  %v4347_v20 = vcombine.high %v13785_v48, %v13788_v24  ;;  %v4543_v27 = vshrl.u32 %v13831_v57, 16 }
 0x42f   :  { %10494 = vmatmul.mubr.msk.bf16.vlgmr.msra.gmra.mrb[120].mxu1 %vm4562_vm1, %v6662_v25 }
 0x430   :  { %v10752_v11 = vpop.eup %10751  ;;  %v6415_v12 = vmul.f32 1.442695, %v6305_v44  ;;  %10504 = vmatpush3.bf16.msra.mxu1 %v14516_v4  ;;  %10505 = vmatprep.mubr.msk.bf16.mxu1 %vm11049_vm0, %v14378_v0  ;;  %v13879_v44 = vrot.slane %v4347_v20, %v11313_v35 }
 0x431   :  { %v6219_v38 = vpop.xlane.xlu0 %6218  ;;  %v6583_v31 = vsel %vm4562_vm1, %v10752_v11, 0.0  ;;  %v6665_v51 = vpack.c.bf16 %v13736_v30, %v10752_v11  ;;  %10515 = vmatprep.subr.bf16.mxu1 %v14378_v0 }
 0x432   :  { %10757 = vpow2.f32 %v6415_v12  ;;  %v6309_v26 = vsub.f32 %v13156_v47, %v6219_v38  ;;  %6584 = vadd.xlane.f32.xlu1 %v6583_v31  ;;  %v14518_v12 = vld [vmem:[#allocation64_spill] sm:$0xff]  ;;  %v4542_v31 = vshrl.u32 %v13836_v5, 16 }
 0x433   :  { %10512 = vmatmul.mubr.msk.bf16.vlgmr.msra.gmra.mrb[112].mxu0 %vm4562_vm1, %v6665_v51  ;;  %10759 = vpow2.f32 %v6425_v10 }
 0x434   :  { %v10754_v46 = vpop.eup %10753  ;;  %v6423_v52 = vmul.f32 1.442695, %v6309_v26  ;;  %10522 = vmatpush3.bf16.msra.mxu0 %v4532_v39  ;;  %10523 = vmatprep.mubr.msk.bf16.mxu0 %vm11049_vm0, %v14378_v0 }
 0x435   :  { %v6228_v30 = vpop.xlane.xlu1 %6227  ;;  %v6225_v9 = vpop.xlane.xlu0 %6224  ;;  %v6577_v15 = vsel %vm4562_vm1, %v10754_v46, 0.0  ;;  %v6664_v47 = vpack.c.bf16 %v13744_v49, %v10754_v46  ;;  %10533 = vmatprep.subr.bf16.mxu0 %v14378_v0 }
 0x436   :  { %10761 = vpow2.f32 %v6423_v52  ;;  %v6312_v41 = vsub.f32 %v13154_v3, %v6228_v30  ;;  %v6311_v56 = vsub.f32 %v13151_v60, %v6225_v9  ;;  %6578 = vadd.xlane.f32.xlu1 %v6577_v15  ;;  %v4540_v60 = vpack.i.b16 %v13831_v57, %v13836_v5 }
 0x437   :  { %10506 = vmatmul.mubr.msk.bf16.vlgmr.msra.gmra.mrb[124].mxu1 %vm4562_vm1, %v6664_v47  ;;  %v4544_v47 = vpack.i.b16 %v4543_v27, %v4542_v31 }
 0x438   :  { %v10756_v32 = vpop.eup %10755  ;;  %v6429_v22 = vmul.f32 1.442695, %v6312_v41  ;;  %v6427_v6 = vmul.f32 1.442695, %v6311_v56  ;;  %10516 = vmatpush3.bf16.msra.mxu1 %v4528_v53  ;;  %10517 = vmatprep.mubr.msk.bf16.mxu1 %vm11049_vm0, %v14378_v0  ;;  %v14520_v53 = vld [vmem:[#allocation68_spill] sm:$0xff] }
 0x439   :  { %v6237_v49 = vpop.xlane.xlu1 %6236  ;;  %v6231_v40 = vpop.xlane.xlu0 %6230  ;;  %v6595_v43 = vsel %vm4562_vm1, %v10756_v32, 0.0  ;;  %v6667_v3 = vpack.c.bf16 %v13754_v36, %v10756_v32  ;;  %10527 = vmatprep.subr.bf16.mxu1 %v14378_v0  ;;  %v4534_v36 = vshrl.u32 %v13813_v42, 16 }
 0x43a   :  { %10763 = vpow2.f32 %v6429_v22  ;;  %v6315_v54 = vsub.f32 %v13172_v59, %v6237_v49  ;;  %v6313_v28 = vsub.f32 %v13178_v55, %v6231_v40  ;;  %6596 = vadd.xlane.f32.xlu1 %v6595_v43  ;;  %v4399_v59 = vcombine.high %v13764_v33, %v13767_v17  ;;  %v14521_v49 = vld [vmem:[#allocation65_spill] sm:$0xff] }
 0x43b   :  { %10765 = vpow2.f32 %v6427_v6  ;;  %10524 = vmatmul.mubr.msk.bf16.vlgmr.msra.gmra.mrb[116].mxu0 %vm4562_vm1, %v6667_v3  ;;  %v4415_v55 = vcombine.high %v13771_v50, %v13774_v63  ;;  %v4536_v33 = vpack.i.b16 %v4535_v61, %v4534_v36 }
 0x43c   :  { %v10758_v2 = vpop.eup %10757  ;;  %10534 = vmatpush3.bf16.msra.mxu0 %v4540_v60  ;;  %10535 = vmatprep.mubr.msk.bf16.mxu0 %vm11049_vm0, %v14378_v0  ;;  %v6435_v29 = vmul.f32 1.442695, %v6315_v54  ;;  %v6431_v34 = vmul.f32 1.442695, %v6313_v28  ;;  %v13871_v21 = vrot.slane %v4399_v59, %v11313_v35 }
 0x43d   :  { %v6243_v7 = vpop.xlane.xlu1 %6242  ;;  %v6234_v23 = vpop.xlane.xlu0 %6233  ;;  %v6589_v1 = vsel %vm4562_vm1, %v10758_v2, 0.0  ;;  %v6666_v16 = vpack.c.bf16 %v13761_v18, %v10758_v2  ;;  %10545 = vmatprep.subr.bf16.mxu0 %v14378_v0  ;;  %v13868_v18 = vrot.slane %v4331_v8, %v11313_v35  ;;  %v13874_v48 = vrot.slane %v4415_v55, %v11313_v35  ;;  %v14522_v55 = vld [vmem:[#allocation69_spill] sm:$0xff] }
 0x43e   :  { %v6314_v37 = vsub.f32 %v13188_v19, %v6234_v23  ;;  %6590 = vadd.xlane.f32.xlu1 %v6589_v1  ;;  %v10760_v17 = vpop.eup %10759  ;;  %10767 = vpow2.f32 %v6435_v29  ;;  %v6317_v11 = vsub.f32 %v14517_v58, %v6243_v7 }
 0x43f   :  { %10518 = vmatmul.mubr.msk.bf16.vlgmr.msra.gmra.mrb[128].mxu1 %vm4562_vm1, %v6666_v16  ;;  %10769 = vpow2.f32 %v6431_v34  ;;  %v4432_v51 = vcombine.low %v13871_v21, %v13874_v48  ;;  %v4364_v52 = vcombine.low %v13868_v18, %v13879_v44  ;;  %v6604_v22 = vsel %vm4562_vm1, %v10760_v17, 0.0 }
 0x440   :  { %v10762_v50 = vpop.eup %10761  ;;  %v6433_v63 = vmul.f32 1.442695, %v6314_v37  ;;  %10528 = vmatpush3.bf16.msra.mxu1 %v4536_v33  ;;  %10529 = vmatprep.mubr.msk.bf16.mxu1 %vm11049_vm0, %v14378_v0  ;;  %v6439_v30 = vmul.f32 1.442695, %v6317_v11  ;;  %v4433_v16 = vcombine.high %v13871_v21, %v13874_v48 }
 0x441   :  { %v6249_v19 = vpop.xlane.xlu1 %6248  ;;  %v6240_v24 = vpop.xlane.xlu0 %6239  ;;  %10539 = vmatprep.subr.bf16.mxu1 %v14378_v0  ;;  %v6668_v25 = vpack.c.bf16 %v10760_v17, %v10762_v50  ;;  %v4548_v56 = vpack.i.b16 %v4432_v51, %v4364_v52  ;;  %v6601_v43 = vsel %vm4562_vm1, %v10762_v50, 0.0  ;;  %v4551_v60 = vshrl.u32 %v4432_v51, 16 }
 0x442   :  { %v6319_v4 = vsub.f32 %v14518_v12, %v6249_v19  ;;  %v6316_v42 = vsub.f32 %v13176_v14, %v6240_v24  ;;  %10771 = vpow2.f32 %v6433_v63  ;;  %v14519_v14 = vld [vmem:[#allocation67_spill] sm:$0xff]  ;;  %v4550_v59 = vshrl.u32 %v4364_v52, 16 }
 0x443   :  { %v4365_v63 = vcombine.high %v13868_v18, %v13879_v44  ;;  %v4559_v58 = vshrl.u32 %v4433_v16, 16 }
 0x444   :  { %v10764_v10 = vpop.eup %10763  ;;  %v6437_v38 = vmul.f32 1.442695, %v6316_v42  ;;  %v6443_v26 = vmul.f32 1.442695, %v6319_v4  ;;  %v4552_v1 = vpack.i.b16 %v4551_v60, %v4550_v59 }
 0x445   :  { %v10766_v45 = vpop.eup %10765  ;;  %v6255_v39 = vpop.xlane.xlu1 %6254  ;;  %v6610_v62 = vsel %vm4562_vm1, %v10764_v10, 0.0  ;;  %v4556_v27 = vpack.i.b16 %v4433_v16, %v4365_v63  ;;  %v4558_v42 = vshrl.u32 %v4365_v63, 16 }
 0x446   :  { %v6246_v46 = vpop.xlane.xlu0 %6245  ;;  %6611 = vadd.xlane.f32.xlu0 %v6610_v62  ;;  %v6607_v15 = vsel %vm4562_vm1, %v10766_v45, 0.0  ;;  %10773 = vpow2.f32 %v6437_v38  ;;  %v6669_v57 = vpack.c.bf16 %v10764_v10, %v10766_v45  ;;  %v6321_v5 = vsub.f32 %v14520_v53, %v6255_v39 }
 0x447   :  { %v6318_v9 = vsub.f32 %v14519_v14, %v6246_v46  ;;  %6608 = vadd.xlane.f32.xlu1 %v6607_v15  ;;  %10530 = vmatmul.mubr.msk.bf16.vlgmr.msra.gmra.mrb[132].mxu1 %vm4562_vm1, %v6668_v25  ;;  %10775 = vpow2.f32 %v6443_v26  ;;  %v4560_v51 = vpack.i.b16 %v4559_v58, %v4558_v42 }
 0x448   :  { %10540 = vmatpush3.bf16.msra.mxu1 %v4544_v47  ;;  %10541 = vmatprep.mubr.msk.bf16.mxu1 %vm11049_vm0, %v14378_v0  ;;  %10777 = vpow2.f32 %v6439_v30  ;;  %v10768_v3 = vpop.eup %10767  ;;  %v6447_v2 = vmul.f32 1.442695, %v6321_v5 }
 0x449   :  { %v6441_v41 = vmul.f32 1.442695, %v6318_v9  ;;  %10536 = vmatmul.mubr.msk.bf16.vlgmr.msra.gmra.mrb[120].mxu0 %vm4562_vm1, %v6669_v57  ;;  %v6453_v32 = vpop.xlane.xlu1 %6452  ;;  %10551 = vmatprep.subr.bf16.mxu1 %v14378_v0  ;;  %v10770_v54 = vpop.eup %10769  ;;  %v6619_v7 = vsel %vm4562_vm1, %v10768_v3, 0.0 }
 0x44a   :  { %v6252_v6 = vpop.xlane.xlu0 %6251  ;;  %10546 = vmatpush3.bf16.msra.mxu0 %v4548_v56  ;;  %6605 = vadd.xlane.f32.xlu0 %v6604_v22  ;;  %v6613_v21 = vsel %vm4562_vm1, %v10770_v54, 0.0 }
 0x44b   :  { %v6320_v40 = vsub.f32 %v14521_v49, %v6252_v6  ;;  %10779 = vpow2.f32 %v6441_v41  ;;  %6602 = vadd.xlane.f32.xlu1 %v6601_v43  ;;  %10547 = vmatprep.mubr.msk.bf16.mxu0 %vm11049_vm0, %v14378_v0 }
 0x44c   :  { %10557 = vmatprep.subr.bf16.mxu0 %v14378_v0  ;;  %v10772_v61 = vpop.eup %10771 }
 0x44d   :  { %v6445_v28 = vmul.f32 1.442695, %v6320_v40  ;;  %v6465_v36 = vpop.xlane.xlu1 %6464  ;;  %v6670_v23 = vpack.c.bf16 %v10772_v61, %v10770_v54  ;;  %v6616_v38 = vsel %vm4562_vm1, %v10772_v61, 0.0 }
 0x44e   :  { %v6258_v8 = vpop.xlane.xlu0 %6257 }
 0x44f   :  { %10781 = vpow2.f32 %v6445_v28  ;;  %v6322_v29 = vsub.f32 %v14522_v55, %v6258_v8  ;;  %6620 = vadd.xlane.f32.xlu1 %v6619_v7  ;;  %v13908_v20 = vpop.f32.mrb[68].mxu0  ;;  %10542 = vmatmul.mubr.msk.bf16.vlgmr.msra.gmra.mrb[136].mxu1 %vm4562_vm1, %v6670_v23 }
 0x450   :  { %v10381_v37 = vpop.f32.mrb[69].mxu0  ;;  %v10774_v33 = vpop.eup %10773  ;;  %10783 = vpow2.f32 %v6447_v2  ;;  %10552 = vmatpush3.bf16.msra.mxu1 %v4552_v1  ;;  %10553 = vmatprep.mubr.msk.bf16.mxu1 %vm11049_vm0, %v14378_v0 }
 0x451   :  { %v6449_v34 = vmul.f32 1.442695, %v6322_v29  ;;  %v6459_v17 = vpop.xlane.xlu1 %6458  ;;  %v6622_v48 = vsel %vm4562_vm1, %v10774_v33, 0.0  ;;  %v6671_v19 = vpack.c.bf16 %v10774_v33, %v10768_v3  ;;  %10563 = vmatprep.subr.bf16.mxu1 %v14378_v0  ;;  %v6715_v24 = vpop.f32.mrb[70].mxu0 }
 0x452   :  { %v6456_v50 = vpop.xlane.xlu0 %6455  ;;  %v10776_v25 = vpop.eup %10775  ;;  %6623 = vadd.xlane.f32.xlu0 %v6622_v48 }
 0x453   :  { %10785 = vpow2.f32 %v6449_v34  ;;  %6614 = vadd.xlane.f32.xlu1 %v6613_v21  ;;  %v10382_v11 = vpop.f32.mrb[71].mxu0  ;;  %v10778_v18 = vpop.eup %10777  ;;  %10548 = vmatmul.mubr.msk.bf16.vlgmr.msra.gmra.mrb[124].mxu0 %vm4562_vm1, %v6671_v19  ;;  %v6631_v10 = vsel %vm4562_vm1, %v10776_v25, 0.0 }
 0x454   :  { %10787 = vrcp.f32 %v6453_v32  ;;  %10558 = vmatpush3.bf16.msra.mxu0 %v4556_v27  ;;  %10559 = vmatprep.mubr.msk.bf16.mxu0 %vm11049_vm0, %v14378_v0  ;;  %v6625_v14 = vsel %vm4562_vm1, %v10778_v18, 0.0 }
 0x455   :  { %10789 = vrcp.f32 %v6456_v50  ;;  %v10780_v44 = vpop.eup %10779  ;;  %v6477_v12 = vpop.xlane.xlu1 %6476 }
 0x456   :  { %v6468_v4 = vpop.xlane.xlu0 %6467  ;;  %10791 = vrcp.f32 %v6465_v36  ;;  %v6672_v31 = vpack.c.bf16 %v10780_v44, %v10778_v18  ;;  %6617 = vadd.xlane.f32.xlu0 %v6616_v38  ;;  %v6628_v22 = vsel %vm4562_vm1, %v10780_v44, 0.0 }
 0x457   :  { %10793 = vrcp.f32 %v6468_v4  ;;  %6632 = vadd.xlane.f32.xlu1 %v6631_v10  ;;  %v6800_v45 = vpop.f32.mrb[72].mxu0 }
 0x458   :  { %10554 = vmatmul.mubr.msk.bf16.vlgmr.msra.gmra.mrb[140].mxu1 %vm4562_vm1, %v6672_v31  ;;  %v10393_v39 = vpop.f32.mrb[73].mxu0  ;;  %10795 = vrcp.f32 %v6459_v17 }
 0x459   :  { %v10782_v26 = vpop.eup %10781  ;;  %10564 = vmatpush3.bf16.msra.mxu1 %v4560_v51  ;;  %v6471_v62 = vpop.xlane.xlu1 %6470  ;;  %10565 = vmatprep.mubr.msk.bf16.mxu1 %vm11049_vm0, %v14378_v0 }
 0x45a   :  { %v6462_v46 = vpop.xlane.xlu0 %6461  ;;  %v6634_v52 = vsel %vm4562_vm1, %v10782_v26, 0.0  ;;  %v6673_v30 = vpack.c.bf16 %v10782_v26, %v10776_v25  ;;  %v6803_v9 = vpop.f32.mrb[74].mxu0 }
 0x45b   :  { %v10784_v15 = vpop.eup %10783  ;;  %10797 = vrcp.f32 %v6462_v46  ;;  %6626 = vadd.xlane.f32.xlu1 %v6625_v14  ;;  %6635 = vadd.xlane.f32.xlu0 %v6634_v52  ;;  %v10394_v47 = vpop.f32.mrb[75].mxu0 }
 0x45c   :  { %10560 = vmatmul.mubr.msk.bf16.vlgmr.msra.gmra.mrb[128].mxu0 %vm4562_vm1, %v6673_v30  ;;  %10799 = vrcp.f32 %v6477_v12  ;;  %v6637_v0 = vsel %vm4562_vm1, %v10784_v15, 0.0  ;;  %v6756_v40 = vpop.f32.mrb[84].mxu1 }
 0x45d   :  { %v10786_v57 = vpop.eup %10785  ;;  %v6489_v32 = vpop.xlane.xlu1 %6488 }
 0x45e   :  { %v10788_v41 = vpop.eup %10787  ;;  %v6480_v56 = vpop.xlane.xlu0 %6479  ;;  %v6674_v53 = vpack.c.bf16 %v10786_v57, %v10784_v15  ;;  %v6640_v36 = vsel %vm4562_vm1, %v10786_v57, 0.0 }
 0x45f   :  { %v10790_v5 = vpop.eup %10789  ;;  %10801 = vrcp.f32 %v6480_v56  ;;  %6638 = vadd.xlane.f32.xlu1 %v6637_v0  ;;  %6629 = vadd.xlane.f32.xlu0 %v6628_v22  ;;  %v8147_v6 = vmul.f32 %v10788_v41, %v13908_v20  ;;  %v6888_v43 = vpop.f32.mrb[76].mxu0 }
 0x460   :  { %v8148_v49 = vmul.f32 %v10790_v5, %v6715_v24  ;;  %v10792_v3 = vpop.eup %10791  ;;  %10566 = vmatmul.mubr.msk.bf16.vlgmr.msra.gmra.mrb[144].mxu1 %vm4562_vm1, %v6674_v53  ;;  %v10387_v60 = vpop.f32.mrb[85].mxu1  ;;  %10803 = vrcp.f32 %v6471_v62 }
 0x461   :  { %v10405_v54 = vpop.f32.mrb[77].mxu0  ;;  %v10794_v28 = vpop.eup %10793  ;;  %v8151_v8 = vmul.f32 %v10792_v3, %v6800_v45 }
 0x462   :  { %v6474_v61 = vpop.xlane.xlu0 %6473  ;;  %v8211_v2 = vpack.c.bf16 %v8148_v49, %v8147_v6  ;;  %v8152_v59 = vmul.f32 %v10794_v28, %v6803_v9  ;;  %v6759_v55 = vpop.f32.mrb[86].mxu1 }
 0x463   :  { %v6891_v29 = vpop.f32.mrb[78].mxu0  ;;  %10805 = vrcp.f32 %v6474_v61  ;;  %6641 = vadd.xlane.f32.xlu0 %v6640_v36  ;;  %v10388_v7 = vpop.f32.mrb[87].mxu1 }
 0x464   :  { %v10406_v23 = vpop.f32.mrb[79].mxu0  ;;  %v10796_v1 = vpop.eup %10795  ;;  %v8213_v16 = vpack.c.bf16 %v8152_v59, %v8151_v8  ;;  %10807 = vrcp.f32 %v6489_v32  ;;  %v8247_v58 = vshrl.u32 %v8211_v2, 16 }
 0x465   :  { %v10798_v20 = vpop.eup %10797  ;;  %v6483_v37 = vpop.xlane.xlu1 %6482  ;;  %v8149_v33 = vmul.f32 %v10796_v1, %v6756_v40 }
 0x466   :  { %v6492_v34 = vpop.xlane.xlu0 %6491  ;;  %v8150_v17 = vmul.f32 %v10798_v20, %v6759_v55  ;;  %v6844_v50 = vpop.f32.mrb[88].mxu1  ;;  %v8255_v57 = vshrl.u32 %v8213_v16, 16 }
 0x467   :  { %10809 = vrcp.f32 %v6492_v34  ;;  %v10800_v63 = vpop.eup %10799  ;;  %v10399_v48 = vpop.f32.mrb[89].mxu1 }
 0x468   :  { %v8212_v21 = vpack.c.bf16 %v8150_v17, %v8149_v33  ;;  %v6976_v19 = vpop.f32.mrb[80].mxu0  ;;  %10811 = vrcp.f32 %v6483_v37  ;;  %v8155_v27 = vmul.f32 %v10800_v63, %v6888_v43  ;;  %v6847_v12 = vpop.f32.mrb[90].mxu1 }
 0x469   :  { %v10802_v24 = vpop.eup %10801  ;;  %v10417_v4 = vpop.f32.mrb[81].mxu0 }
 0x46a   :  { %v6486_v25 = vpop.xlane.xlu0 %6485  ;;  %v13934_v11 = vpack.i.b16 %v8212_v21, %v8211_v2  ;;  %v8248_v18 = vshrl.u32 %v8212_v21, 16  ;;  %v8156_v44 = vmul.f32 %v10802_v24, %v6891_v29  ;;  %v10400_v42 = vpop.f32.mrb[91].mxu1 }
 0x46b   :  { %10813 = vrcp.f32 %v6486_v25  ;;  %v6979_v10 = vpop.f32.mrb[82].mxu0  ;;  %v10804_v38 = vpop.eup %10803 }
 0x46c   :  { %v6501_v31 = vpop.xlane.xlu1 %6500  ;;  %v13936_v51 = vpack.i.b16 %v8248_v18, %v8247_v58  ;;  %v8215_v45 = vpack.c.bf16 %v8156_v44, %v8155_v27  ;;  %v10418_v26 = vpop.f32.mrb[83].mxu0  ;;  %v8153_v46 = vmul.f32 %v10804_v38, %v6844_v50 }
 0x46d   :  { %v10806_v39 = vpop.eup %10805  ;;  %v6932_v30 = vpop.f32.mrb[92].mxu1  ;;  %10815 = vrcp.f32 %v6501_v31 }
 0x46e   :  { %v6504_v62 = vpop.xlane.xlu0 %6503  ;;  %v8154_v52 = vmul.f32 %v10806_v39, %v6847_v12  ;;  %v10808_v14 = vpop.eup %10807  ;;  %v8263_v2 = vshrl.u32 %v8215_v45, 16 }
 0x46f   :  { %v10411_v15 = vpop.f32.mrb[93].mxu1  ;;  %v8159_v41 = vmul.f32 %v10808_v14, %v6976_v19  ;;  %10817 = vrcp.f32 %v6504_v62 }
 0x470   :  { %v8214_v9 = vpack.c.bf16 %v8154_v52, %v8153_v46  ;;  %v6495_v56 = vpop.xlane.xlu1 %6494  ;;  %v6935_v0 = vpop.f32.mrb[94].mxu1 }
 0x471   :  { %v10810_v47 = vpop.eup %10809  ;;  %v10412_v49 = vpop.f32.mrb[95].mxu1  ;;  %10819 = vrcp.f32 %v6495_v56 }
 0x472   :  { %v8253_v53 = vpack.i.b16 %v8214_v9, %v8213_v16  ;;  %v8256_v5 = vshrl.u32 %v8214_v9, 16  ;;  %v8160_v32 = vmul.f32 %v10810_v47, %v6979_v10  ;;  %v10812_v22 = vpop.eup %10811  ;;  %v6498_v6 = vpop.xlane.xlu0 %6497 }
 0x473   :  { %10821 = vrcp.f32 %v6498_v6  ;;  %v8157_v60 = vmul.f32 %v10812_v22, %v6932_v30 }
 0x474   :  { %v13938_v40 = vpack.i.b16 %v8256_v5, %v8255_v57  ;;  %v8217_v43 = vpack.c.bf16 %v8160_v32, %v8159_v41  ;;  %v6513_v55 = vpop.xlane.xlu1 %6512 }
 0x475   :  { %v10814_v3 = vpop.eup %10813  ;;  %10823 = vrcp.f32 %v6513_v55 }
 0x476   :  { %v8158_v54 = vmul.f32 %v10814_v3, %v6935_v0  ;;  %v6516_v37 = vpop.xlane.xlu0 %6515  ;;  %v8271_v42 = vshrl.u32 %v8217_v43, 16 }
 0x477   :  { %v10816_v61 = vpop.eup %10815  ;;  %10825 = vrcp.f32 %v6516_v37 }
 0x478   :  { %v8216_v28 = vpack.c.bf16 %v8158_v54, %v8157_v60  ;;  %v6507_v58 = vpop.xlane.xlu1 %6506 }
 0x479   :  { %v7064_v59 = vpop.f32.mrb[84].mxu0  ;;  %v10818_v23 = vpop.eup %10817  ;;  %10827 = vrcp.f32 %v6507_v58 }
 0x47a   :  { %v8261_v36 = vpack.i.b16 %v8216_v28, %v8215_v45  ;;  %v8264_v8 = vshrl.u32 %v8216_v28, 16  ;;  %v8163_v29 = vmul.f32 %v10816_v61, %v7064_v59  ;;  %v10429_v7 = vpop.f32.mrb[85].mxu0  ;;  %v6510_v12 = vpop.xlane.xlu0 %6509 }
 0x47b   :  { %v7067_v34 = vpop.f32.mrb[86].mxu0  ;;  %v10820_v21 = vpop.eup %10819 }
 0x47c   :  { %v8265_v1 = vpack.i.b16 %v8264_v8, %v8263_v2  ;;  %v8371_v16 = vcombine.low %v13934_v11, %v8261_v36  ;;  %v8372_v20 = vcombine.high %v13934_v11, %v8261_v36  ;;  %v8164_v33 = vmul.f32 %v10818_v23, %v7067_v34  ;;  %v10430_v50 = vpop.f32.mrb[87].mxu0  ;;  %v6525_v31 = vpop.xlane.xlu1 %6524 }
 0x47d   :  { %v7020_v63 = vpop.f32.mrb[96].mxu1  ;;  %v10822_v25 = vpop.eup %10821  ;;  %10829 = vrcp.f32 %v6525_v31 }
 0x47e   :  { %v8439_v17 = vcombine.low %v13936_v51, %v8265_v1  ;;  %v8440_v48 = vcombine.high %v13936_v51, %v8265_v1  ;;  %v13944_v19 = vpack.c.bf16 %v8164_v33, %v8163_v29  ;;  %v10423_v24 = vpop.f32.mrb[97].mxu1  ;;  %v8161_v18 = vmul.f32 %v10820_v21, %v7020_v63  ;;  %v6528_v46 = vpop.xlane.xlu0 %6527 }
 0x47f   :  { %v7023_v27 = vpop.f32.mrb[98].mxu1  ;;  %v8379_v39 = vrot.slane %v8371_v16, %v11302_v13  ;;  %v8386_v62 = vrot.slane %v8372_v20, %v11302_v13  ;;  %v10824_v57 = vpop.eup %10823  ;;  %10831 = vrcp.f32 %v6528_v46 }
 0x480   :  { %v8162_v44 = vmul.f32 %v10822_v25, %v7023_v27  ;;  %v10424_v11 = vpop.f32.mrb[99].mxu1  ;;  %v8447_v15 = vrot.slane %v8439_v17, %v11302_v13  ;;  %v8454_v41 = vrot.slane %v8440_v48, %v11302_v13  ;;  %10833 = vrcp.f32 %v6510_v12 }
 0x481   :  { %v10826_v0 = vpop.eup %10825 }
 0x482   :  { %v8218_v4 = vpack.c.bf16 %v8162_v44, %v8161_v18  ;;  %v6522_v55 = vpop.xlane.xlu0 %6521 }
 0x483   :  { %v10828_v50 = vpop.eup %10827 }
 0x484   :  { %v8269_v10 = vpack.i.b16 %v8218_v4, %v8217_v43  ;;  %v8272_v38 = vshrl.u32 %v8218_v4, 16 }
 0x486   :  { %v8273_v45 = vpack.i.b16 %v8272_v38, %v8271_v42  ;;  %v8387_v26 = vcombine.low %v8253_v53, %v8269_v10  ;;  %v8388_v51 = vcombine.high %v8253_v53, %v8269_v10  ;;  %v6540_v42 = vpop.xlane.xlu0 %6539 }
 0x487   :  { %v10830_v18 = vpop.eup %10829 }
 0x488   :  { %v8395_v52 = vrot.slane %v8387_v26, %v11302_v13  ;;  %v8402_v30 = vrot.slane %v8388_v51, %v11302_v13  ;;  %v8455_v14 = vcombine.low %v13938_v40, %v8273_v45  ;;  %v8456_v9 = vcombine.high %v13938_v40, %v8273_v45  ;;  %v7152_v47 = vpop.f32.mrb[88].mxu0  ;;  %v6519_v40 = vpop.xlane.xlu1 %6518 }
 0x489   :  { %v10441_v32 = vpop.f32.mrb[89].mxu0  ;;  %v8167_v43 = vmul.f32 %v10824_v57, %v7152_v47  ;;  %10835 = vrcp.f32 %v6519_v40 }
 0x48a   :  { %v8403_v56 = vcombine.low %v8379_v39, %v8395_v52  ;;  %v8404_v53 = vcombine.high %v8379_v39, %v8395_v52  ;;  %v8419_v5 = vcombine.low %v8386_v62, %v8402_v30  ;;  %v8420_v22 = vcombine.high %v8386_v62, %v8402_v30  ;;  %v7155_v3 = vpop.f32.mrb[90].mxu0  ;;  %v10832_v30 = vpop.eup %10831 }
 0x48b   :  { %v8463_v6 = vrot.slane %v8455_v14, %v11302_v13  ;;  %v8470_v49 = vrot.slane %v8456_v9, %v11302_v13  ;;  %v8168_v61 = vmul.f32 %v10826_v0, %v7155_v3  ;;  %v10442_v59 = vpop.f32.mrb[91].mxu0 }
 0x48c   :  { %v8411_v60 = vrot.slane %v8403_v56, %v11313_v35  ;;  %v8418_v54 = vrot.slane %v8404_v53, %v11313_v35  ;;  %v8427_v28 = vrot.slane %v8419_v5, %v11313_v35  ;;  %v8434_v2 = vrot.slane %v8420_v22, %v11313_v35  ;;  %v6537_v24 = vpop.xlane.xlu1 %6536  ;;  %v10834_v56 = vpop.eup %10833 }
 0x48d   :  { %v8471_v36 = vcombine.low %v8447_v15, %v8463_v6  ;;  %v8472_v8 = vcombine.high %v8447_v15, %v8463_v6  ;;  %v8487_v29 = vcombine.low %v8454_v41, %v8470_v49  ;;  %v8488_v7 = vcombine.high %v8454_v41, %v8470_v49 }
 0x48e   :  { %v13960_v23 = vpack.c.bf16 %v8168_v61, %v8167_v43  ;;  %v8915_v20 = vcombine.low %v8411_v60, %v8418_v54  ;;  %v9984_v34 = vcombine.high %v8411_v60, %v8418_v54  ;;  %v8931_v17 = vcombine.low %v8427_v28, %v8434_v2  ;;  %v6534_v54 = vpop.xlane.xlu0 %6533 }
 0x48f   :  { %v8479_v1 = vrot.slane %v8471_v36, %v11313_v35  ;;  %v8486_v16 = vrot.slane %v8472_v8, %v11313_v35  ;;  %v8495_v37 = vrot.slane %v8487_v29, %v11313_v35  ;;  %v8502_v33 = vrot.slane %v8488_v7, %v11313_v35 }
 0x490   :  { %v8922_v63 = vrot.slane %v8915_v20, %v11302_v13  ;;  %v8930_v21 = vrot.slane %v9984_v34, %v11302_v13  ;;  %v9985_v48 = vcombine.high %v8427_v28, %v8434_v2  ;;  %v8938_v25 = vrot.slane %v8931_v17, %v11302_v13  ;;  %v6531_v53 = vpop.xlane.xlu1 %6530 }
 0x491   :  { %v8983_v27 = vcombine.low %v8479_v1, %v8486_v16  ;;  %v9986_v58 = vcombine.high %v8479_v1, %v8486_v16  ;;  %v8999_v12 = vcombine.low %v8495_v37, %v8502_v33  ;;  %v9987_v4 = vcombine.high %v8495_v37, %v8502_v33 }
 0x492   :  { %v8946_v44 = vrot.slane %v9985_v48, %v11302_v13  ;;  %v8948_v11 = vcombine.high %v8922_v63, %v8930_v21  ;;  %v8947_v31 = vcombine.low %v8922_v63, %v8930_v21  ;;  %10837 = vrcp.f32 %v6537_v24 }
 0x493   :  { %v8990_v10 = vrot.slane %v8983_v27, %v11302_v13  ;;  %v8998_v38 = vrot.slane %v9986_v58, %v11302_v13  ;;  %v9006_v39 = vrot.slane %v8999_v12, %v11302_v13  ;;  %10839 = vrcp.f32 %v6522_v55  ;;  %v10836_v17 = vpop.eup %10835 }
 0x494   :  { %v7240_v45 = vpop.f32.mrb[92].mxu0  ;;  %v8962_v26 = vrot.slane %v8948_v11, %v11313_v35  ;;  %v8964_v51 = vcombine.high %v8938_v25, %v8946_v44  ;;  %v9014_v46 = vrot.slane %v9987_v4, %v11302_v13  ;;  %v8955_v47 = vrot.slane %v8947_v31, %v11313_v35 }
 0x495   :  { %v10453_v62 = vpop.f32.mrb[93].mxu0  ;;  %v9016_v52 = vcombine.high %v8990_v10, %v8998_v38  ;;  %v8963_v57 = vcombine.low %v8938_v25, %v8946_v44  ;;  %v9015_v41 = vcombine.low %v8990_v10, %v8998_v38  ;;  %v8171_v32 = vmul.f32 %v10830_v18, %v7240_v45 }
 0x496   :  { %v7108_v14 = vpop.f32.mrb[100].mxu1  ;;  %v7243_v9 = vpop.f32.mrb[94].mxu0  ;;  %v8978_v15 = vrot.slane %v8964_v51, %v11313_v35  ;;  %v9032_v6 = vcombine.high %v9006_v39, %v9014_v46  ;;  %10841 = vrcp.f32 %v6540_v42  ;;  %v9031_v8 = vcombine.low %v9006_v39, %v9014_v46 }
 0x497   :  { %v10435_v5 = vpop.f32.mrb[101].mxu1  ;;  %v8172_v0 = vmul.f32 %v10832_v30, %v7243_v9  ;;  %v9030_v22 = vrot.slane %v9016_v52, %v11313_v35  ;;  %v8165_v49 = vmul.f32 %v10828_v50, %v7108_v14  ;;  %v10454_v3 = vpop.f32.mrb[95].mxu0  ;;  %v8971_v60 = vrot.slane %v8963_v57, %v11313_v35 }
 0x498   :  { %v7111_v43 = vpop.f32.mrb[102].mxu1  ;;  %v8981_v40 = vcombine.low %v8962_v26, %v8978_v15  ;;  %v9046_v36 = vrot.slane %v9032_v6, %v11313_v35  ;;  %v9023_v55 = vrot.slane %v9015_v41, %v11313_v35  ;;  %v8982_v29 = vcombine.high %v8962_v26, %v8978_v15 }
 0x499   :  { %v8166_v28 = vmul.f32 %v10834_v56, %v7111_v43  ;;  %v10436_v61 = vpop.f32.mrb[103].mxu1  ;;  %v13979_v2 = vpack.c.bf16 %v8172_v0, %v8171_v32  ;;  %v8980_v59 = vcombine.high %v8955_v47, %v8971_v60  ;;  %v13983_v7 = vcombine.low %v8955_v47, %v8971_v60 }
 0x49a   :  { %10843 = vrcp.f32 %v6531_v53  ;;  %v9049_v16 = vcombine.low %v9030_v22, %v9046_v36  ;;  %v9039_v20 = vrot.slane %v9031_v8, %v11313_v35  ;;  %v8279_v34 = vshrl.u32 %v13944_v19, 16 }
 0x49b   :  { %v8220_v1 = vpack.c.bf16 %v8166_v28, %v8165_v49  ;;  %10845 = vrcp.f32 %v6534_v54  ;;  %v9474_v37 = vshrl.u32 %v8981_v40, 16  ;;  %v9050_v33 = vcombine.high %v9030_v22, %v9046_v36  ;;  %v6549_v22 = vpop.xlane.xlu1 %6548  ;;  %v6552_v54 = vpop.xlane.xlu0 %6551 }
 0x49c   :  { %v9473_v21 = vpack.i.b16 %v9049_v16, %v8981_v40  ;;  %v9475_v48 = vshrl.u32 %v9049_v16, 16  ;;  %v10838_v24 = vpop.eup %10837  ;;  %v9048_v27 = vcombine.high %v9023_v55, %v9039_v20  ;;  %v13990_v18 = vcombine.low %v9023_v55, %v9039_v20 }
 0x49d   :  { %v13988_v50 = vpack.i.b16 %v8220_v1, %v13944_v19  ;;  %v8280_v63 = vshrl.u32 %v8220_v1, 16  ;;  %v9479_v58 = vpack.i.b16 %v9050_v33, %v8982_v29  ;;  %v9462_v44 = vshrl.u32 %v13983_v7, 16  ;;  %v10840_v11 = vpop.eup %10839 }
 0x49e   :  { %v7196_v25 = vpop.f32.mrb[104].mxu1  ;;  %9579 = vrot.lane.b32.xlu0 %v9473_v21, %s11037_s1  ;;  %v9476_v42 = vpack.i.b16 %v9475_v48, %v9474_v37  ;;  %v9480_v19 = vshrl.u32 %v8982_v29, 16  ;;  %v9481_v10 = vshrl.u32 %v9050_v33, 16  ;;  %v9467_v45 = vpack.i.b16 %v9048_v27, %v8980_v59 }
 0x49f   :  { %v13993_v12 = vpack.i.b16 %v8280_v63, %v8279_v34  ;;  %v10447_v4 = vpop.f32.mrb[105].mxu1  ;;  %v9463_v26 = vshrl.u32 %v13990_v18, 16  ;;  %v9468_v51 = vshrl.u32 %v8980_v59, 16  ;;  %v9469_v39 = vshrl.u32 %v9048_v27, 16  ;;  %v6546_v1 = vpop.xlane.xlu0 %6545 }
 0x4a0   :  { %v7199_v38 = vpop.f32.mrb[106].mxu1  ;;  %v8169_v62 = vmul.f32 %v10836_v17, %v7196_v25  ;;  %v9482_v14 = vpack.i.b16 %v9481_v10, %v9480_v19  ;;  %v9461_v9 = vpack.i.b16 %v13990_v18, %v13983_v7  ;;  %v10842_v15 = vpop.eup %10841  ;;  %9563 = vrot.lane.b32.xlu1 %v9467_v45, %s11046_s16  ;;  %v8287_v6 = vshrl.u32 %v13960_v23, 16 }
 0x4a1   :  { %v7328_v31 = vpop.f32.mrb[96].mxu0  ;;  %v8170_v46 = vmul.f32 %v10840_v11, %v7199_v38  ;;  %v10448_v52 = vpop.f32.mrb[107].mxu1  ;;  %v9464_v57 = vpack.i.b16 %v9463_v26, %v9462_v44  ;;  %v9470_v41 = vpack.i.b16 %v9469_v39, %v9468_v51  ;;  %10847 = vrcp.f32 %v6549_v22 }
 0x4a2   :  { %v10465_v30 = vpop.f32.mrb[97].mxu0  ;;  %v8175_v53 = vmul.f32 %v10838_v24, %v7328_v31  ;;  %9595 = vrot.lane.b32.xlu0 %v9479_v58, %s11042_s3  ;;  %10849 = vrcp.f32 %v6552_v54  ;;  %v8295_v16 = vshrl.u32 %v13979_v2, 16 }
 0x4a3   :  { %v7331_v47 = vpop.f32.mrb[98].mxu0  ;;  %v8222_v56 = vpack.c.bf16 %v8170_v46, %v8169_v62  ;;  %v6564_v24 = vpop.xlane.xlu0 %6563 }
 0x4a4   :  { %v8176_v5 = vmul.f32 %v10842_v15, %v7331_v47  ;;  %v10466_v32 = vpop.f32.mrb[99].mxu0  ;;  %v10844_v0 = vpop.eup %10843  ;;  %9555 = vrot.lane.b32.xlu1 %v9464_v57, %s11047_s17 }
 0x4a5   :  { %v14003_v49 = vpack.i.b16 %v8222_v56, %v13960_v23  ;;  %v8288_v43 = vshrl.u32 %v8222_v56, 16  ;;  %v10846_v40 = vpop.eup %10845  ;;  %v6543_v23 = vpop.xlane.xlu1 %6542 }
 0x4a6   :  { %v14005_v3 = vpack.c.bf16 %v8176_v5, %v8175_v53  ;;  %v7284_v60 = vpop.f32.mrb[108].mxu1  ;;  %9571 = vrot.lane.b32.xlu0 %v9470_v41, %s11045_s15  ;;  %10851 = vrcp.f32 %v6543_v23 }
 0x4a7   :  { %v14008_v28 = vpack.i.b16 %v8288_v43, %v8287_v6  ;;  %v10459_v61 = vpop.f32.mrb[109].mxu1  ;;  %v8173_v8 = vmul.f32 %v10844_v0, %v7284_v60  ;;  %10853 = vrcp.f32 %v6546_v1  ;;  %v6558_v19 = vpop.xlane.xlu0 %6557 }
 0x4a8   :  { %v7287_v36 = vpop.f32.mrb[110].mxu1  ;;  %v8303_v41 = vshrl.u32 %v14005_v3, 16 }
 0x4a9   :  { %v8174_v59 = vmul.f32 %v10846_v40, %v7287_v36  ;;  %v10460_v55 = vpop.f32.mrb[111].mxu1  ;;  %v6561_v63 = vpop.xlane.xlu1 %6560 }
 0x4aa   :  { %9587 = vrot.lane.b32.xlu0 %v9476_v42, %s11044_s14  ;;  %10855 = vrcp.f32 %v6561_v63 }
 0x4ab   :  { %v8224_v29 = vpack.c.bf16 %v8174_v59, %v8173_v8  ;;  %10857 = vrcp.f32 %v6564_v24 }
 0x4ad   :  { %v8293_v20 = vpack.i.b16 %v8224_v29, %v13979_v2  ;;  %v8296_v34 = vshrl.u32 %v8224_v29, 16  ;;  %v10848_v2 = vpop.eup %10847  ;;  %v6555_v11 = vpop.xlane.xlu1 %6554 }
 0x4ae   :  { %9603 = vrot.lane.b32.xlu0 %v9482_v14, %s11043_s13  ;;  %v10850_v44 = vpop.eup %10849  ;;  %10859 = vrcp.f32 %v6555_v11  ;;  %v6576_v14 = vpop.xlane.xlu0 %6575 }
 0x4af   :  { %v14014_v37 = vpack.i.b16 %v8296_v34, %v8295_v16  ;;  %v8507_v33 = vcombine.low %v13988_v50, %v8293_v20  ;;  %v8508_v17 = vcombine.high %v13988_v50, %v8293_v20 }
 0x4b0   :  { %v10852_v31 = vpop.eup %10851 }
 0x4b1   :  { %v8575_v21 = vcombine.low %v13993_v12, %v14014_v37  ;;  %v8576_v48 = vcombine.high %v13993_v12, %v14014_v37  ;;  %v10854_v12 = vpop.eup %10853  ;;  %v6573_v51 = vpop.xlane.xlu1 %6572  ;;  %v8515_v54 = vrot.slane %v8507_v33, %v11302_v13  ;;  %v8522_v61 = vrot.slane %v8508_v17, %v11302_v13 }
 0x4b2   :  { %10861 = vrcp.f32 %v6573_v51 }
 0x4b3   :  { %10863 = vrcp.f32 %v6576_v14  ;;  %v8583_v16 = vrot.slane %v8575_v21, %v11302_v13  ;;  %v8590_v20 = vrot.slane %v8576_v48, %v11302_v13 }
 0x4b4   :  { %v10856_v30 = vpop.eup %10855  ;;  %10865 = vrcp.f32 %v6558_v19 }
 0x4b5   :  { %v7416_v25 = vpop.f32.mrb[100].mxu0  ;;  %v10858_v57 = vpop.eup %10857 }
 0x4b6   :  { %v8179_v27 = vmul.f32 %v10848_v2, %v7416_v25  ;;  %v10477_v58 = vpop.f32.mrb[101].mxu0 }
 0x4b7   :  { %v7419_v50 = vpop.f32.mrb[102].mxu0 }
 0x4b8   :  { %v8180_v4 = vmul.f32 %v10850_v44, %v7419_v50  ;;  %v10478_v42 = vpop.f32.mrb[103].mxu0  ;;  %v10860_v33 = vpop.eup %10859 }
 0x4ba   :  { %v14023_v10 = vpack.c.bf16 %v8180_v4, %v8179_v27 }
 0x4bc   :  { %v7372_v38 = vpop.f32.mrb[112].mxu1  ;;  %v10862_v2 = vpop.eup %10861 }
 0x4bd   :  { %v10471_v45 = vpop.f32.mrb[113].mxu1  ;;  %v8177_v39 = vmul.f32 %v10852_v31, %v7372_v38  ;;  %v10652_v38 = vld [vmem:[#allocation7 + $0x8] sm:$0xff]   ;;  %v10653_v31 = vld [vmem:[#allocation7 + $0x10] sm:$0xff]  }
 0x4be   :  { %v7375_v26 = vpop.f32.mrb[114].mxu1  ;;  %v10864_v45 = vpop.eup %10863 }
 0x4bf   :  { %v8178_v62 = vmul.f32 %v10854_v12, %v7375_v26  ;;  %v10472_v46 = vpop.f32.mrb[115].mxu1 }
 0x4c0   :  { %v7504_v52 = vpop.f32.mrb[104].mxu0 }
 0x4c1   :  { %v8226_v15 = vpack.c.bf16 %v8178_v62, %v8177_v39  ;;  %v10489_v47 = vpop.f32.mrb[105].mxu0  ;;  %v8183_v32 = vmul.f32 %v10856_v30, %v7504_v52 }
 0x4c2   :  { %v7507_v56 = vpop.f32.mrb[106].mxu0 }
 0x4c3   :  { %v8301_v53 = vpack.i.b16 %v8226_v15, %v14005_v3  ;;  %v8304_v5 = vshrl.u32 %v8226_v15, 16  ;;  %v8184_v0 = vmul.f32 %v10858_v57, %v7507_v56  ;;  %v10490_v22 = vpop.f32.mrb[107].mxu0  ;;  %v10866_v57 = vpop.eup %10865 }
 0x4c5   :  { %v8305_v6 = vpack.i.b16 %v8304_v5, %v8303_v41  ;;  %v8523_v43 = vcombine.low %v14003_v49, %v8301_v53  ;;  %v8524_v40 = vcombine.high %v14003_v49, %v8301_v53  ;;  %v14029_v60 = vpack.c.bf16 %v8184_v0, %v8183_v32  ;;  %v10651_v49 = vld [vmem:[#allocation7] sm:$0xff]   ;;  %v14049_v0 = vpop.xlane.xlu1 %6566 }
 0x4c6   :  { %10569 = vmatprep.subr.bf16.mxu0 %v10651_v49 }
 0x4c7   :  { %v8531_v36 = vrot.slane %v8523_v43, %v11302_v13  ;;  %v8538_v3 = vrot.slane %v8524_v40, %v11302_v13  ;;  %v8591_v8 = vcombine.low %v14008_v28, %v8305_v6  ;;  %v8592_v59 = vcombine.high %v14008_v28, %v8305_v6  ;;  %10570 = vmatpush3.bf16.msra.mxu0 %v10651_v49  ;;  %v10654_v49 = vld [vmem:[#allocation7 + $0x18] sm:$0xff]  }
 0x4c8   :  { %10571 = vmatprep.subr.bf16.mxu0 %v10652_v38 }
 0x4c9   :  { %v8539_v55 = vcombine.low %v8515_v54, %v8531_v36  ;;  %v8540_v23 = vcombine.high %v8515_v54, %v8531_v36  ;;  %v8555_v29 = vcombine.low %v8522_v61, %v8538_v3  ;;  %v8556_v1 = vcombine.high %v8522_v61, %v8538_v3 }
 0x4ca   :  { %v8599_v34 = vrot.slane %v8591_v8, %v11302_v13  ;;  %v8606_v37 = vrot.slane %v8592_v59, %v11302_v13 }
 0x4cb   :  { %v8547_v17 = vrot.slane %v8539_v55, %v11313_v35  ;;  %v8554_v63 = vrot.slane %v8540_v23, %v11313_v35  ;;  %v8563_v28 = vrot.slane %v8555_v29, %v11313_v35  ;;  %v8570_v24 = vrot.slane %v8556_v1, %v11313_v35  ;;  %10572 = vmatpush3.bf16.msra.mxu0 %v10652_v38 }
 0x4cc   :  { %v8607_v25 = vcombine.low %v8583_v16, %v8599_v34  ;;  %v8608_v27 = vcombine.high %v8583_v16, %v8599_v34  ;;  %v8623_v21 = vcombine.low %v8590_v20, %v8606_v37  ;;  %v8624_v58 = vcombine.high %v8590_v20, %v8606_v37  ;;  %v7592_v48 = vpop.f32.mrb[108].mxu0  ;;  %10573 = vmatprep.subr.bf16.mxu0 %v10653_v31 }
 0x4cd   :  { %v9051_v44 = vcombine.low %v8547_v17, %v8554_v63  ;;  %v9988_v50 = vcombine.high %v8547_v17, %v8554_v63  ;;  %v9067_v11 = vcombine.low %v8563_v28, %v8570_v24  ;;  %v9989_v4 = vcombine.high %v8563_v28, %v8570_v24  ;;  %v7460_v42 = vpop.f32.mrb[116].mxu1  ;;  %v10501_v19 = vpop.f32.mrb[109].mxu0 }
 0x4ce   :  { %v8615_v12 = vrot.slane %v8607_v25, %v11313_v35  ;;  %v8622_v26 = vrot.slane %v8608_v27, %v11313_v35  ;;  %v8631_v51 = vrot.slane %v8623_v21, %v11313_v35  ;;  %v8638_v39 = vrot.slane %v8624_v58, %v11313_v35  ;;  %v10483_v62 = vpop.f32.mrb[117].mxu1  ;;  %v7595_v46 = vpop.f32.mrb[110].mxu0 }
 0x4cf   :  { %v8181_v52 = vmul.f32 %v10860_v33, %v7460_v42  ;;  %v8187_v30 = vmul.f32 %v10862_v2, %v7592_v48  ;;  %v7463_v14 = vpop.f32.mrb[118].mxu1  ;;  %v8188_v15 = vmul.f32 %v10864_v45, %v7595_v46  ;;  %v10502_v47 = vpop.f32.mrb[111].mxu0  ;;  %v9058_v43 = vrot.slane %v9051_v44, %v11302_v13  ;;  %10574 = vmatpush3.bf16.msra.mxu0 %v10653_v31  ;;  %v10655_v44 = vld [vmem:[#allocation7 + $0x20] sm:$0xff]  }
 0x4d0   :  { %v9119_v41 = vcombine.low %v8615_v12, %v8622_v26  ;;  %v9990_v56 = vcombine.high %v8615_v12, %v8622_v26  ;;  %v9135_v53 = vcombine.low %v8631_v51, %v8638_v39  ;;  %v9991_v5 = vcombine.high %v8631_v51, %v8638_v39  ;;  %v10484_v32 = vpop.f32.mrb[119].mxu1  ;;  %10575 = vmatprep.subr.bf16.mxu0 %v10654_v49  ;;  %v14068_v24 = vpop.xlane.xlu1 %6584 }
 0x4d1   :  { %v8182_v22 = vmul.f32 %v10866_v57, %v7463_v14  ;;  %v14051_v6 = vpack.c.bf16 %v8188_v15, %v8187_v30  ;;  %v9066_v40 = vrot.slane %v9988_v50, %v11302_v13  ;;  %v9074_v54 = vrot.slane %v9067_v11, %v11302_v13  ;;  %v6570_v42 = vpop.xlane.xlu0 %6569 }
 0x4d2   :  { %v9082_v61 = vrot.slane %v9989_v4, %v11302_v13  ;;  %v9126_v36 = vrot.slane %v9119_v41, %v11302_v13  ;;  %v9134_v3 = vrot.slane %v9990_v56, %v11302_v13  ;;  %v9142_v55 = vrot.slane %v9135_v53, %v11302_v13 }
 0x4d3   :  { %v8228_v8 = vpack.c.bf16 %v8182_v22, %v8181_v52  ;;  %v9083_v59 = vcombine.low %v9058_v43, %v9066_v40  ;;  %v9150_v29 = vrot.slane %v9991_v5, %v11302_v13  ;;  %v8311_v16 = vshrl.u32 %v14023_v10, 16  ;;  %10576 = vmatpush3.bf16.msra.mxu0 %v10654_v49  ;;  %v10656_v52 = vld [vmem:[#allocation7 + $0x28] sm:$0xff]  }
 0x4d4   :  { %v9099_v23 = vcombine.low %v9074_v54, %v9082_v61  ;;  %v9151_v1 = vcombine.low %v9126_v36, %v9134_v3  ;;  %v9084_v28 = vcombine.high %v9058_v43, %v9066_v40  ;;  %v9100_v25 = vcombine.high %v9074_v54, %v9082_v61  ;;  %10577 = vmatprep.subr.bf16.mxu0 %v10655_v44  ;;  %v6579_v30 = vpop.xlane.xlu1 %6578  ;;  %v10657_v61 = vld [vmem:[#allocation7 + $0x30] sm:$0xff]  }
 0x4d5   :  { %v14063_v20 = vpack.i.b16 %v8228_v8, %v14023_v10  ;;  %v8312_v34 = vshrl.u32 %v8228_v8, 16  ;;  %v9091_v37 = vrot.slane %v9083_v59, %v11313_v35  ;;  %v9167_v63 = vcombine.low %v9142_v55, %v9150_v29  ;;  %v6588_v40 = vpop.xlane.xlu0 %6587  ;;  %v10658_v8 = vld [vmem:[#allocation7 + $0x38] sm:$0xff]  }
 0x4d6   :  { %v9107_v33 = vrot.slane %v9099_v23, %v11313_v35  ;;  %v9159_v17 = vrot.slane %v9151_v1, %v11313_v35  ;;  %v9152_v27 = vcombine.high %v9126_v36, %v9134_v3  ;;  %v9168_v21 = vcombine.high %v9142_v55, %v9150_v29 }
 0x4d7   :  { %v14070_v2 = vpack.i.b16 %v8312_v34, %v8311_v16  ;;  %v9175_v10 = vrot.slane %v9167_v63, %v11313_v35  ;;  %v9098_v50 = vrot.slane %v9084_v28, %v11313_v35  ;;  %v9114_v11 = vrot.slane %v9100_v25, %v11313_v35  ;;  %10578 = vmatpush3.bf16.msra.mxu0 %v10655_v44 }
 0x4d8   :  { %v9116_v58 = vcombine.high %v9091_v37, %v9107_v33  ;;  %v14073_v48 = vcombine.low %v9091_v37, %v9107_v33  ;;  %v9166_v4 = vrot.slane %v9152_v27, %v11313_v35  ;;  %v9182_v31 = vrot.slane %v9168_v21, %v11313_v35  ;;  %10579 = vmatprep.subr.bf16.mxu0 %v10656_v52  ;;  %v6597_v3 = vpop.xlane.xlu1 %6596 }
 0x4d9   :  { %v9184_v19 = vcombine.high %v9159_v17, %v9175_v10  ;;  %v14078_v38 = vcombine.low %v9159_v17, %v9175_v10  ;;  %v9117_v12 = vcombine.low %v9098_v50, %v9114_v11  ;;  %v9118_v26 = vcombine.high %v9098_v50, %v9114_v11  ;;  %v6582_v59 = vpop.xlane.xlu0 %6581 }
 0x4da   :  { %v9486_v45 = vshrl.u32 %v14073_v48, 16  ;;  %v9185_v62 = vcombine.low %v9166_v4, %v9182_v31  ;;  %v9186_v46 = vcombine.high %v9166_v4, %v9182_v31  ;;  %v9492_v15 = vshrl.u32 %v9116_v58, 16 }
 0x4db   :  { %v9491_v51 = vpack.i.b16 %v9184_v19, %v9116_v58  ;;  %v9487_v39 = vshrl.u32 %v14078_v38, 16  ;;  %v9498_v14 = vshrl.u32 %v9117_v12, 16  ;;  %v9493_v47 = vshrl.u32 %v9184_v19, 16  ;;  %10580 = vmatpush3.bf16.msra.mxu0 %v10656_v52 }
 0x4dc   :  { %v9497_v41 = vpack.i.b16 %v9185_v62, %v9117_v12  ;;  %v9499_v56 = vshrl.u32 %v9185_v62, 16  ;;  %v9503_v53 = vpack.i.b16 %v9186_v46, %v9118_v26  ;;  %v9504_v32 = vshrl.u32 %v9118_v26, 16  ;;  %10581 = vmatprep.subr.bf16.mxu0 %v10657_v61  ;;  %v6591_v55 = vpop.xlane.xlu1 %6590 }
 0x4dd   :  { %9565 = vrot.lane.b32.xlu1 %v9491_v51, %s11046_s16  ;;  %v9488_v57 = vpack.i.b16 %v9487_v39, %v9486_v45  ;;  %v9494_v5 = vpack.i.b16 %v9493_v47, %v9492_v15  ;;  %v9505_v22 = vshrl.u32 %v9186_v46, 16  ;;  %v9485_v43 = vpack.i.b16 %v14078_v38, %v14073_v48  ;;  %v6600_v23 = vpop.xlane.xlu0 %6599 }
 0x4de   :  { %v9500_v54 = vpack.i.b16 %v9499_v56, %v9498_v14  ;;  %10867 = vrcp.f32 %v6570_v42  ;;  %v8319_v31 = vshrl.u32 %v14029_v60, 16 }
 0x4df   :  { %9557 = vrot.lane.b32.xlu0 %v9488_v57, %s11047_s17  ;;  %v9506_v36 = vpack.i.b16 %v9505_v22, %v9504_v32  ;;  %10582 = vmatpush3.bf16.msra.mxu0 %v10657_v61  ;;  %10869 = vrcp.f32 %v14049_v0 }
 0x4e0   :  { %10583 = vmatprep.subr.bf16.mxu0 %v10658_v8  ;;  %v6609_v29 = vpop.xlane.xlu1 %6608  ;;  %10871 = vrcp.f32 %v6588_v40 }
 0x4e1   :  { %9581 = vrot.lane.b32.xlu1 %v9497_v41, %s11037_s1  ;;  %v6594_v1 = vpop.xlane.xlu0 %6593  ;;  %10873 = vrcp.f32 %v14068_v24 }
 0x4e2   :  { %10875 = vrcp.f32 %v6582_v59 }
 0x4e3   :  { %10584 = vmatpush3.bf16.msra.mxu0 %v10658_v8  ;;  %10877 = vrcp.f32 %v6579_v30 }
 0x4e4   :  { %v6603_v49 = vpop.xlane.xlu1 %6602  ;;  %10879 = vrcp.f32 %v6600_v23 }
 0x4e5   :  { %9597 = vrot.lane.b32.xlu1 %v9503_v53, %s11042_s3  ;;  %v6612_v16 = vpop.xlane.xlu0 %6611  ;;  %10881 = vrcp.f32 %v6597_v3 }
 0x4e6   :  { %10883 = vrcp.f32 %v6594_v1 }
 0x4e7   :  { %10885 = vrcp.f32 %v6591_v55 }
 0x4e8   :  { %v6621_v34 = vpop.xlane.xlu1 %6620  ;;  %v10868_v28 = vpop.eup %10867  ;;  %10887 = vrcp.f32 %v6612_v16 }
 0x4e9   :  { %9573 = vrot.lane.b32.xlu1 %v9494_v5, %s11045_s15  ;;  %v6606_v37 = vpop.xlane.xlu0 %6605  ;;  %v10870_v27 = vpop.eup %10869  ;;  %10889 = vrcp.f32 %v6609_v29 }
 0x4ea   :  { %v10872_v4 = vpop.eup %10871  ;;  %10891 = vrcp.f32 %v6606_v37 }
 0x4eb   :  { %v10874_v19 = vpop.eup %10873  ;;  %10893 = vrcp.f32 %v6603_v49 }
 0x4ec   :  { %v6615_v33 = vpop.xlane.xlu1 %6614  ;;  %v10876_v52 = vpop.eup %10875  ;;  %10895 = vrcp.f32 %v6621_v34 }
 0x4ed   :  { %9589 = vrot.lane.b32.xlu1 %v9500_v54, %s11044_s14  ;;  %v14094_v17 = vpop.xlane.xlu0 %6623  ;;  %v10878_v57 = vpop.eup %10877  ;;  %10897 = vrcp.f32 %v6615_v33 }
 0x4ee   :  { %v10880_v22 = vpop.eup %10879  ;;  %10899 = vrcp.f32 %v14094_v17 }
 0x4ef   :  { %v10882_v61 = vpop.eup %10881 }
 0x4f0   :  { %v6633_v58 = vpop.xlane.xlu1 %6632  ;;  %v10884_v34 = vpop.eup %10883 }
 0x4f1   :  { %9605 = vrot.lane.b32.xlu1 %v9506_v36, %s11043_s13  ;;  %v6618_v0 = vpop.xlane.xlu0 %6617  ;;  %v8327_v36 = vshrl.u32 %v14051_v6, 16  ;;  %10901 = vrcp.f32 %v6633_v58 }
 0x4f2   :  { %10903 = vrcp.f32 %v6618_v0 }
 0x4f4   :  { %v6627_v30 = vpop.xlane.xlu1 %6626 }
 0x4f5   :  { %v6636_v41 = vpop.xlane.xlu0 %6635  ;;  %10905 = vrcp.f32 %v6627_v30 }
 0x4f6   :  { %10907 = vrcp.f32 %v6636_v41 }
 0x4f8   :  { %v6639_v8 = vpop.xlane.xlu1 %6638 }
 0x4f9   :  { %v6630_v16 = vpop.xlane.xlu0 %6629  ;;  %10909 = vrcp.f32 %v6639_v8 }
 0x4fa   :  { %10911 = vrcp.f32 %v6630_v16 }
 0x502   :  { %v7548_v63 = vpop.f32.mrb[120].mxu1 }
 0x503   :  { %v10495_v25 = vpop.f32.mrb[121].mxu1  ;;  %v8185_v10 = vmul.f32 %v10870_v27, %v7548_v63 }
 0x504   :  { %v7551_v21 = vpop.f32.mrb[122].mxu1 }
 0x505   :  { %v8186_v44 = vmul.f32 %v10868_v28, %v7551_v21  ;;  %v10496_v50 = vpop.f32.mrb[123].mxu1 }
 0x506   :  { %v7680_v11 = vpop.f32.mrb[112].mxu0 }
 0x507   :  { %v8230_v24 = vpack.c.bf16 %v8186_v44, %v8185_v10  ;;  %v10513_v42 = vpop.f32.mrb[113].mxu0  ;;  %v8191_v51 = vmul.f32 %v10874_v19, %v7680_v11  ;;  %v6642_v19 = vpop.xlane.xlu0 %6641 }
 0x508   :  { %v7683_v45 = vpop.f32.mrb[114].mxu0  ;;  %10913 = vrcp.f32 %v6642_v19 }
 0x509   :  { %v14098_v12 = vpack.i.b16 %v8230_v24, %v14029_v60  ;;  %v8320_v26 = vshrl.u32 %v8230_v24, 16  ;;  %v8192_v39 = vmul.f32 %v10872_v4, %v7683_v45  ;;  %v10514_v62 = vpop.f32.mrb[115].mxu0 }
 0x50a   :  { %v7636_v46 = vpop.f32.mrb[124].mxu1 }
 0x50b   :  { %v14100_v14 = vpack.i.b16 %v8320_v26, %v8319_v31  ;;  %v14102_v15 = vpack.c.bf16 %v8192_v39, %v8191_v51  ;;  %v10507_v47 = vpop.f32.mrb[125].mxu1  ;;  %v8189_v60 = vmul.f32 %v10878_v57, %v7636_v46 }
 0x50c   :  { %v7639_v56 = vpop.f32.mrb[126].mxu1 }
 0x50d   :  { %v8190_v53 = vmul.f32 %v10876_v52, %v7639_v56  ;;  %v10508_v5 = vpop.f32.mrb[127].mxu1 }
 0x50e   :  { %v7768_v32 = vpop.f32.mrb[116].mxu0 }
 0x50f   :  { %v8232_v40 = vpack.c.bf16 %v8190_v53, %v8189_v60  ;;  %v10525_v54 = vpop.f32.mrb[117].mxu0  ;;  %v8195_v23 = vmul.f32 %v10882_v61, %v7768_v32 }
 0x510   :  { %v7771_v3 = vpop.f32.mrb[118].mxu0 }
 0x511   :  { %v8325_v59 = vpack.i.b16 %v8232_v40, %v14051_v6  ;;  %v8328_v55 = vshrl.u32 %v8232_v40, 16  ;;  %v8196_v29 = vmul.f32 %v10880_v22, %v7771_v3  ;;  %v10526_v1 = vpop.f32.mrb[119].mxu0  ;;  %v10886_v6 = vpop.eup %10885 }
 0x512   :  { %v7724_v37 = vpop.f32.mrb[128].mxu1  ;;  %v10888_v50 = vpop.eup %10887 }
 0x513   :  { %v8329_v63 = vpack.i.b16 %v8328_v55, %v8327_v36  ;;  %v8643_v49 = vcombine.low %v14063_v20, %v8325_v59  ;;  %v8644_v28 = vcombine.high %v14063_v20, %v8325_v59  ;;  %v14108_v25 = vpack.c.bf16 %v8196_v29, %v8195_v23  ;;  %v10519_v27 = vpop.f32.mrb[129].mxu1  ;;  %v9564_v24 = vpop.permute.xlu1 %9563 }
 0x514   :  { %v7727_v21 = vpop.f32.mrb[130].mxu1  ;;  %v8193_v11 = vmul.f32 %v10886_v6, %v7724_v37  ;;  %v10890_v20 = vpop.eup %10889 }
 0x515   :  { %v8711_v10 = vcombine.low %v14070_v2, %v8329_v63  ;;  %v8712_v33 = vcombine.high %v14070_v2, %v8329_v63  ;;  %v10520_v44 = vpop.f32.mrb[131].mxu1  ;;  %v8194_v4 = vmul.f32 %v10884_v34, %v7727_v21  ;;  %v10892_v42 = vpop.eup %10891  ;;  %v8335_v2 = vshrl.u32 %v14102_v15, 16 }
 0x516   :  { %v10894_v17 = vpop.eup %10893  ;;  %v8651_v39 = vrot.slane %v8643_v49, %v11302_v13  ;;  %v8658_v62 = vrot.slane %v8644_v28, %v11302_v13  ;;  %v8343_v46 = vshrl.u32 %v14108_v25, 16  ;;  %v14139_v28 = vpop.permute.xlu0 %9579 }
 0x517   :  { %v8234_v31 = vpack.c.bf16 %v8194_v4, %v8193_v11  ;;  %v14113_v58 = vpop.eup %10895  ;;  %v9556_v51 = vpop.permute.xlu1 %9555  ;;  %v8719_v53 = vrot.slane %v8711_v10, %v11302_v13  ;;  %v8726_v5 = vrot.slane %v8712_v33, %v11302_v13 }
 0x518   :  { %v10898_v30 = vpop.eup %10897 }
 0x519   :  { %v8333_v45 = vpack.i.b16 %v8234_v31, %v14102_v15  ;;  %v8336_v0 = vshrl.u32 %v8234_v31, 16  ;;  %v9613_v15 = vsel %vm4562_vm1, %v9461_v9, %v9556_v51  ;;  %v14128_v61 = vpop.eup %10899 }
 0x51a   :  { %v7812_v26 = vpop.f32.mrb[132].mxu1  ;;  %v14134_v9 = vpop.eup %10901  ;;  %v14137_v29 = vsel %vm9623_vm2, %v9613_v15, %v9564_v24 }
 0x51b   :  { %v10531_v52 = vpop.f32.mrb[133].mxu1  ;;  %v8337_v47 = vpack.i.b16 %v8336_v0, %v8335_v2  ;;  %v8659_v57 = vcombine.low %v14098_v12, %v8333_v45  ;;  %v8660_v41 = vcombine.high %v14098_v12, %v8333_v45  ;;  %v8197_v32 = vmul.f32 %v10894_v17, %v7812_v26  ;;  %v10904_v1 = vpop.eup %10903 }
 0x51c   :  { %v7856_v56 = vpop.f32.mrb[120].mxu0  ;;  %v7815_v60 = vpop.f32.mrb[134].mxu1 }
 0x51d   :  { %v10537_v22 = vpop.f32.mrb[121].mxu0  ;;  %v8198_v40 = vmul.f32 %v10892_v42, %v7815_v60  ;;  %v10532_v54 = vpop.f32.mrb[135].mxu1  ;;  %v8667_v36 = vrot.slane %v8659_v57, %v11302_v13  ;;  %v8674_v12 = vrot.slane %v8660_v41, %v11302_v13  ;;  %v8727_v3 = vcombine.low %v14100_v14, %v8337_v47 }
 0x51e   :  { %v8728_v7 = vcombine.high %v14100_v14, %v8337_v47  ;;  %v7859_v18 = vpop.f32.mrb[122].mxu0  ;;  %v8199_v8 = vmul.f32 %v10890_v20, %v7856_v56  ;;  %v14141_v27 = vpop.eup %10905 }
 0x51f   :  { %v8236_v59 = vpack.c.bf16 %v8198_v40, %v8197_v32  ;;  %v8200_v55 = vmul.f32 %v10888_v50, %v7859_v18  ;;  %v10538_v23 = vpop.f32.mrb[123].mxu0  ;;  %v8675_v16 = vcombine.low %v8651_v39, %v8667_v36  ;;  %v8676_v37 = vcombine.high %v8651_v39, %v8667_v36  ;;  %v14148_v10 = vpop.eup %10907 }
 0x520   :  { %v8691_v63 = vcombine.low %v8658_v62, %v8674_v12  ;;  %v8692_v49 = vcombine.high %v8658_v62, %v8674_v12  ;;  %v8735_v14 = vrot.slane %v8727_v3, %v11302_v13  ;;  %v8742_v34 = vrot.slane %v8728_v7, %v11302_v13  ;;  %v14154_v4 = vpop.eup %10909 }
 0x521   :  { %v14146_v21 = vpack.i.b16 %v8236_v59, %v14108_v25  ;;  %v8344_v6 = vshrl.u32 %v8236_v59, 16  ;;  %v8683_v33 = vrot.slane %v8675_v16, %v11313_v35  ;;  %v8690_v44 = vrot.slane %v8676_v37, %v11313_v35  ;;  %v10912_v25 = vpop.eup %10911 }
 0x522   :  { %v8699_v50 = vrot.slane %v8691_v63, %v11313_v35  ;;  %v8706_v11 = vrot.slane %v8692_v49, %v11313_v35  ;;  %v8743_v24 = vcombine.low %v8719_v53, %v8735_v14  ;;  %v8744_v20 = vcombine.high %v8719_v53, %v8735_v14  ;;  %v7900_v31 = vpop.f32.mrb[136].mxu1  ;;  %v14156_v51 = vpop.eup %10913 }
 0x523   :  { %v8759_v42 = vcombine.low %v8726_v5, %v8742_v34  ;;  %v8760_v19 = vcombine.high %v8726_v5, %v8742_v34  ;;  %v9187_v17 = vcombine.low %v8683_v33, %v8690_v44  ;;  %v9992_v2 = vcombine.high %v8683_v33, %v8690_v44  ;;  %v10543_v26 = vpop.f32.mrb[137].mxu1  ;;  %v14164_v5 = vpop.permute.xlu0 %9595 }
 0x524   :  { %v9203_v45 = vcombine.low %v8699_v50, %v8706_v11  ;;  %v9993_v0 = vcombine.high %v8699_v50, %v8706_v11  ;;  %v8751_v39 = vrot.slane %v8743_v24, %v11313_v35  ;;  %v8758_v62 = vrot.slane %v8744_v20, %v11313_v35  ;;  %v7903_v57 = vpop.f32.mrb[138].mxu1 }
 0x525   :  { %v8767_v52 = vrot.slane %v8759_v42, %v11313_v35  ;;  %v8774_v47 = vrot.slane %v8760_v19, %v11313_v35  ;;  %v14162_v41 = vpack.i.b16 %v8344_v6, %v8343_v46  ;;  %v8237_v56 = vpack.c.bf16 %v8200_v55, %v8199_v8  ;;  %v10544_v53 = vpop.f32.mrb[139].mxu1 }
 0x526   :  { %v8201_v60 = vmul.f32 %v10898_v30, %v7900_v31  ;;  %v8202_v15 = vmul.f32 %v10904_v1, %v7903_v57  ;;  %v9255_v32 = vcombine.low %v8751_v39, %v8758_v62  ;;  %v9994_v22 = vcombine.high %v8751_v39, %v8758_v62  ;;  %v7944_v36 = vpop.f32.mrb[124].mxu0 }
 0x527   :  { %v9271_v40 = vcombine.low %v8767_v52, %v8774_v47  ;;  %v9995_v54 = vcombine.high %v8767_v52, %v8774_v47  ;;  %v8351_v12 = vshrl.u32 %v8237_v56, 16  ;;  %v8203_v7 = vmul.f32 %v14113_v58, %v7944_v36  ;;  %v10549_v18 = vpop.f32.mrb[125].mxu0  ;;  %v9572_v42 = vpop.permute.xlu0 %9571 }
 0x528   :  { %v8238_v3 = vpack.c.bf16 %v8202_v15, %v8201_v60  ;;  %v9194_v59 = vrot.slane %v9187_v17, %v11302_v13  ;;  %v7947_v46 = vpop.f32.mrb[126].mxu0  ;;  %v9202_v30 = vrot.slane %v9992_v2, %v11302_v13  ;;  %v9210_v8 = vrot.slane %v9203_v45, %v11302_v13 }
 0x529   :  { %v9218_v55 = vrot.slane %v9993_v0, %v11302_v13  ;;  %v9262_v23 = vrot.slane %v9255_v32, %v11302_v13  ;;  %v8204_v37 = vmul.f32 %v14128_v61, %v7947_v46  ;;  %v10550_v63 = vpop.f32.mrb[127].mxu0  ;;  %v9270_v58 = vrot.slane %v9994_v22, %v11302_v13 }
 0x52a   :  { %v14172_v1 = vpack.i.b16 %v8238_v3, %v8237_v56  ;;  %v8352_v16 = vshrl.u32 %v8238_v3, 16  ;;  %v9219_v14 = vcombine.low %v9194_v59, %v9202_v30  ;;  %v9278_v6 = vrot.slane %v9271_v40, %v11302_v13 }
 0x52b   :  { %v7988_v49 = vpop.f32.mrb[140].mxu1  ;;  %v9235_v34 = vcombine.low %v9210_v8, %v9218_v55  ;;  %v9286_v33 = vrot.slane %v9995_v54, %v11302_v13  ;;  %v8239_v50 = vpack.c.bf16 %v8204_v37, %v8203_v7  ;;  %v9287_v20 = vcombine.low %v9262_v23, %v9270_v58 }
 0x52c   :  { %v14178_v44 = vpack.i.b16 %v8352_v16, %v8351_v12  ;;  %v8205_v11 = vmul.f32 %v14141_v27, %v7988_v49  ;;  %v10555_v24 = vpop.f32.mrb[141].mxu1  ;;  %v9227_v19 = vrot.slane %v9219_v14, %v11313_v35  ;;  %v9220_v2 = vcombine.high %v9194_v59, %v9202_v30  ;;  %v9588_v30 = vpop.permute.xlu0 %9587 }
 0x52d   :  { %v7991_v61 = vpop.f32.mrb[142].mxu1  ;;  %v9243_v31 = vrot.slane %v9235_v34, %v11313_v35  ;;  %v9303_v17 = vcombine.low %v9278_v6, %v9286_v33  ;;  %v8359_v45 = vshrl.u32 %v8239_v50, 16  ;;  %v9295_v39 = vrot.slane %v9287_v20, %v11313_v35 }
 0x52e   :  { %v8206_v0 = vmul.f32 %v10912_v25, %v7991_v61  ;;  %v10556_v26 = vpop.f32.mrb[143].mxu1  ;;  %v9236_v62 = vcombine.high %v9210_v8, %v9218_v55  ;;  %v9234_v57 = vrot.slane %v9220_v2, %v11313_v35  ;;  %v9288_v56 = vcombine.high %v9262_v23, %v9270_v58 }
 0x52f   :  { %v8032_v52 = vpop.f32.mrb[128].mxu0  ;;  %v9252_v47 = vcombine.high %v9227_v19, %v9243_v31  ;;  %v9311_v27 = vrot.slane %v9303_v17, %v11313_v35  ;;  %v9304_v22 = vcombine.high %v9278_v6, %v9286_v33  ;;  %v14189_v36 = vcombine.low %v9227_v19, %v9243_v31 }
 0x530   :  { %v8240_v60 = vpack.c.bf16 %v8206_v0, %v8205_v11  ;;  %v8207_v15 = vmul.f32 %v14134_v9, %v8032_v52  ;;  %v10561_v53 = vpop.f32.mrb[129].mxu0  ;;  %v9250_v32 = vrot.slane %v9236_v62, %v11313_v35  ;;  %v9302_v54 = vrot.slane %v9288_v56, %v11313_v35  ;;  %v9604_v2 = vpop.permute.xlu0 %9603 }
 0x531   :  { %v8035_v40 = vpop.f32.mrb[130].mxu0  ;;  %v9320_v25 = vcombine.high %v9295_v39, %v9311_v27  ;;  %v14191_v12 = vcombine.low %v9295_v39, %v9311_v27  ;;  %v9318_v55 = vrot.slane %v9304_v22, %v11313_v35  ;;  %v9634_v16 = vsel %vm9632_vm3, %v14137_v29, %v9572_v42 }
 0x532   :  { %v8357_v3 = vpack.i.b16 %v8240_v60, %v8239_v50  ;;  %v8360_v7 = vshrl.u32 %v8240_v60, 16  ;;  %v8208_v18 = vmul.f32 %v14148_v10, %v8035_v40  ;;  %v10562_v59 = vpop.f32.mrb[131].mxu0  ;;  %v9253_v46 = vcombine.low %v9234_v57, %v9250_v32 }
 0x533   :  { %v9515_v9 = vpack.i.b16 %v9320_v25, %v9252_v47  ;;  %v8076_v8 = vpop.f32.mrb[144].mxu1  ;;  %v9254_v23 = vcombine.high %v9234_v57, %v9250_v32  ;;  %v9321_v34 = vcombine.low %v9302_v54, %v9318_v55  ;;  %v9322_v6 = vcombine.high %v9302_v54, %v9318_v55 }
 0x534   :  { %v8361_v37 = vpack.i.b16 %v8360_v7, %v8359_v45  ;;  %v8779_v63 = vcombine.low %v14146_v21, %v8357_v3  ;;  %v8780_v58 = vcombine.high %v14146_v21, %v8357_v3  ;;  %v8241_v49 = vpack.c.bf16 %v8208_v18, %v8207_v15  ;;  %v10567_v14 = vpop.f32.mrb[145].mxu1 }
 0x535   :  { %9567 = vrot.lane.b32.xlu0 %v9515_v9, %s11046_s16  ;;  %v8079_v10 = vpop.f32.mrb[146].mxu1  ;;  %v9643_v29 = vsel %vm9641_vm4, %v9634_v16, %v14139_v28  ;;  %v8209_v21 = vmul.f32 %v14154_v4, %v8076_v8  ;;  %v9521_v20 = vpack.i.b16 %v9321_v34, %v9253_v46  ;;  %v9523_v42 = vshrl.u32 %v9321_v34, 16 }
 0x536   :  { %v8847_v33 = vcombine.low %v14162_v41, %v8361_v37  ;;  %v8848_v50 = vcombine.high %v14162_v41, %v8361_v37  ;;  %v10568_v11 = vpop.f32.mrb[147].mxu1  ;;  %v8210_v24 = vmul.f32 %v14156_v51, %v8079_v10  ;;  %v9522_v61 = vshrl.u32 %v9253_v46, 16 }
 0x537   :  { %v9527_v19 = vpack.i.b16 %v9322_v6, %v9254_v23  ;;  %v9510_v31 = vshrl.u32 %v14189_v36, 16  ;;  %v9511_v17 = vshrl.u32 %v14191_v12, 16  ;;  %v9652_v41 = vsel %vm9650_vm5, %v9643_v29, %v9588_v30 }
 0x538   :  { %v8242_v45 = vpack.c.bf16 %v8210_v24, %v8209_v21  ;;  %v9516_v28 = vshrl.u32 %v9252_v47, 16  ;;  %v9517_v0 = vshrl.u32 %v9320_v25, 16  ;;  %v8367_v26 = vshrl.u32 %v8241_v49, 16 }
 0x539   :  { %9583 = vrot.lane.b32.xlu0 %v9521_v20, %s11037_s1  ;;  %v9512_v4 = vpack.i.b16 %v9511_v17, %v9510_v31  ;;  %v9661_v51 = vsel %vm9659_vm6, %v9652_v41, %v14164_v5  ;;  %v9524_v39 = vpack.i.b16 %v9523_v42, %v9522_v61  ;;  %v9528_v56 = vshrl.u32 %v9254_v23, 16 }
 0x53a   :  { %v8365_v62 = vpack.i.b16 %v8242_v45, %v8241_v49  ;;  %v8368_v52 = vshrl.u32 %v8242_v45, 16  ;;  %v9518_v27 = vpack.i.b16 %v9517_v0, %v9516_v28  ;;  %v9670_v57 = vsel %vm9668_vm7, %v9661_v51, %v9604_v2 }
 0x53b   :  { %10585 = vmatprep.mubr.bf16.mxu0 %v9670_v57  ;;  %v9529_v60 = vshrl.u32 %v9322_v6, 16  ;;  %v9509_v15 = vpack.i.b16 %v14191_v12, %v14189_v36  ;;  %v8787_v5 = vrot.slane %v8779_v63, %v11302_v13  ;;  %v8794_v22 = vrot.slane %v8780_v58, %v11302_v13 }
 0x53c   :  { %v8369_v53 = vpack.i.b16 %v8368_v52, %v8367_v26  ;;  %v8795_v47 = vcombine.low %v14172_v1, %v8365_v62  ;;  %v8796_v32 = vcombine.high %v14172_v1, %v8365_v62  ;;  %v8855_v1 = vrot.slane %v8847_v33, %v11302_v13 }
 0x53d   :  { %9599 = vrot.lane.b32.xlu0 %v9527_v19, %s11042_s3  ;;  %v9530_v40 = vpack.i.b16 %v9529_v60, %v9528_v56  ;;  %v8862_v9 = vrot.slane %v8848_v50, %v11302_v13 }
 0x53e   :  { %v8803_v25 = vrot.slane %v8795_v47, %v11302_v13  ;;  %v8810_v54 = vrot.slane %v8796_v32, %v11302_v13  ;;  %v8863_v3 = vcombine.low %v14178_v44, %v8369_v53  ;;  %v8864_v7 = vcombine.high %v14178_v44, %v8369_v53 }
 0x540   :  { %v8811_v18 = vcombine.low %v8787_v5, %v8803_v25  ;;  %v8812_v59 = vcombine.high %v8787_v5, %v8803_v25  ;;  %v8827_v46 = vcombine.low %v8794_v22, %v8810_v54  ;;  %v8828_v30 = vcombine.high %v8794_v22, %v8810_v54 }
 0x541   :  { %9559 = vrot.lane.b32.xlu0 %v9512_v4, %s11047_s17  ;;  %v8871_v8 = vrot.slane %v8863_v3, %v11302_v13  ;;  %v8878_v55 = vrot.slane %v8864_v7, %v11302_v13 }
 0x542   :  { %v8819_v23 = vrot.slane %v8811_v18, %v11313_v35  ;;  %v8826_v16 = vrot.slane %v8812_v59, %v11313_v35  ;;  %v8835_v44 = vrot.slane %v8827_v46, %v11313_v35  ;;  %v8842_v37 = vrot.slane %v8828_v30, %v11313_v35 }
 0x543   :  { %v8879_v63 = vcombine.low %v8855_v1, %v8871_v8  ;;  %v8880_v58 = vcombine.high %v8855_v1, %v8871_v8  ;;  %v8895_v49 = vcombine.low %v8862_v9, %v8878_v55  ;;  %v8896_v14 = vcombine.high %v8862_v9, %v8878_v55 }
 0x544   :  { %v9323_v10 = vcombine.low %v8819_v23, %v8826_v16  ;;  %v9996_v34 = vcombine.high %v8819_v23, %v8826_v16  ;;  %v9339_v6 = vcombine.low %v8835_v44, %v8842_v37  ;;  %v9997_v33 = vcombine.high %v8835_v44, %v8842_v37 }
 0x545   :  { %9575 = vrot.lane.b32.xlu0 %v9518_v27, %s11045_s15  ;;  %v8887_v50 = vrot.slane %v8879_v63, %v11313_v35  ;;  %v8894_v11 = vrot.slane %v8880_v58, %v11313_v35  ;;  %v8903_v29 = vrot.slane %v8895_v49, %v11313_v35  ;;  %v8910_v21 = vrot.slane %v8896_v14, %v11313_v35 }
 0x546   :  { %v9330_v24 = vrot.slane %v9323_v10, %v11302_v13  ;;  %v9338_v20 = vrot.slane %v9996_v34, %v11302_v13  ;;  %v9346_v42 = vrot.slane %v9339_v6, %v11302_v13  ;;  %v9354_v61 = vrot.slane %v9997_v33, %v11302_v13 }
 0x547   :  { %v9391_v19 = vcombine.low %v8887_v50, %v8894_v11  ;;  %v9998_v31 = vcombine.high %v8887_v50, %v8894_v11  ;;  %v9407_v17 = vcombine.low %v8903_v29, %v8910_v21  ;;  %v9999_v2 = vcombine.high %v8903_v29, %v8910_v21 }
 0x548   :  { %v9355_v45 = vcombine.low %v9330_v24, %v9338_v20  ;;  %v9371_v41 = vcombine.low %v9346_v42, %v9354_v61  ;;  %v9356_v28 = vcombine.high %v9330_v24, %v9338_v20  ;;  %v9372_v0 = vcombine.high %v9346_v42, %v9354_v61 }
 0x549   :  { %9591 = vrot.lane.b32.xlu0 %v9524_v39, %s11044_s14  ;;  %v9398_v26 = vrot.slane %v9391_v19, %v11302_v13  ;;  %v9406_v4 = vrot.slane %v9998_v31, %v11302_v13  ;;  %v9414_v51 = vrot.slane %v9407_v17, %v11302_v13  ;;  %v9422_v62 = vrot.slane %v9999_v2, %v11302_v13 }
 0x54a   :  { %v9363_v52 = vrot.slane %v9355_v45, %v11313_v35  ;;  %v9379_v27 = vrot.slane %v9371_v41, %v11313_v35  ;;  %v9370_v57 = vrot.slane %v9356_v28, %v11313_v35  ;;  %v9386_v39 = vrot.slane %v9372_v0, %v11313_v35 }
 0x54b   :  { %v9423_v56 = vcombine.low %v9398_v26, %v9406_v4  ;;  %v9439_v60 = vcombine.low %v9414_v51, %v9422_v62  ;;  %v9424_v53 = vcombine.high %v9398_v26, %v9406_v4  ;;  %v9440_v47 = vcombine.high %v9414_v51, %v9422_v62 }
 0x54c   :  { %v9388_v32 = vcombine.high %v9363_v52, %v9379_v27  ;;  %v9389_v5 = vcombine.low %v9370_v57, %v9386_v39  ;;  %v9390_v22 = vcombine.high %v9370_v57, %v9386_v39  ;;  %v14252_v25 = vcombine.low %v9363_v52, %v9379_v27 }
 0x54d   :  { %9607 = vrot.lane.b32.xlu0 %v9530_v40, %s11043_s13  ;;  %v9431_v13 = vrot.slane %v9423_v56, %v11313_v35  ;;  %v9447_v54 = vrot.slane %v9439_v60, %v11313_v35  ;;  %v9438_v3 = vrot.slane %v9424_v53, %v11313_v35  ;;  %v9454_v7 = vrot.slane %v9440_v47, %v11313_v35 }
 0x54e   :  { %v9546_v9 = vshrl.u32 %v9389_v5, 16  ;;  %v9534_v40 = vshrl.u32 %v14252_v25, 16  ;;  %v9540_v8 = vshrl.u32 %v9388_v32, 16  ;;  %v9552_v58 = vshrl.u32 %v9390_v22, 16 }
 0x54f   :  { %v9456_v18 = vcombine.high %v9431_v13, %v9447_v54  ;;  %v9566_v59 = vpop.permute.xlu1 %9565  ;;  %v9457_v46 = vcombine.low %v9438_v3, %v9454_v7  ;;  %v9458_v30 = vcombine.high %v9438_v3, %v9454_v7  ;;  %v9455_v1 = vcombine.low %v9431_v13, %v9447_v54  ;;  %v10000_v3 = vld [vmem:[#allocation8] ss:$0 sm:$0xff] }
 0x551   :  { %v9539_v55 = vpack.i.b16 %v9456_v18, %v9388_v32  ;;  %v9545_v23 = vpack.i.b16 %v9457_v46, %v9389_v5  ;;  %v9547_v16 = vshrl.u32 %v9457_v46, 16  ;;  %v9551_v44 = vpack.i.b16 %v9458_v30, %v9390_v22  ;;  %v9558_v50 = vpop.permute.xlu0 %9557 }
 0x552   :  { %v9535_v37 = vshrl.u32 %v9455_v1, 16  ;;  %v9541_v63 = vshrl.u32 %v9456_v18, 16  ;;  %v9553_v49 = vshrl.u32 %v9458_v30, 16  ;;  %v9533_v10 = vpack.i.b16 %v9455_v1, %v14252_v25 }
 0x553   :  { %9569 = vrot.lane.b32.xlu1 %v9539_v55, %s11046_s16  ;;  %v9582_v35 = vpop.permute.xlu1 %9581  ;;  %v9548_v14 = vpack.i.b16 %v9547_v16, %v9546_v9  ;;  %v9616_v29 = vsel %vm4562_vm1, %v9485_v43, %v9558_v50 }
 0x554   :  { %v9536_v34 = vpack.i.b16 %v9535_v37, %v9534_v40  ;;  %v9542_v6 = vpack.i.b16 %v9541_v63, %v9540_v8  ;;  %v9554_v33 = vpack.i.b16 %v9553_v49, %v9552_v58  ;;  %v9627_v24 = vsel %vm9623_vm2, %v9616_v29, %v9566_v59 }
 0x557   :  { %9585 = vrot.lane.b32.xlu1 %v9545_v23, %s11037_s1  ;;  %v9598_v11 = vpop.permute.xlu1 %9597  ;;  %s11052_s1 = smov [#allocation10]  }
 0x558   :  { %s9830_s18 = sshll.u32 %s11052_s1, 4  ;;  %s9831_s18 = int_to_ptr.vmem [resolvable:$true] %s9830_s18 }
 0x559   :  { %s11003_s19 = scalar_lea.vmem %s9831_s18, 1024  ;;  %p11008_p5 = scmp.lt.s32.totalorder %s9831_s18, %s9831_s18 }
 0x55a   :  { %p11004_p4 = scmp.ne.s32.totalorder %s9831_s18, %s11003_s19  ;;  %p11009_p6 = scmp.lt.s32.totalorder %s11003_s19, %s11003_s19 }
 0x55b   :  { %9601 = vrot.lane.b32.xlu1 %v9551_v44, %s11042_s3  ;;  %v9574_v21 = vpop.permute.xlu1 %9573 }
 0x55c   :  { %v9636_v20 = vsel %vm9632_vm3, %v9627_v24, %v9574_v21  ;;  %p11010_p7 = por %p11009_p6, %p11008_p5 }
 0x55d   :  { %v9645_v61 = vsel %vm9641_vm4, %v9636_v20, %v9582_v35 }
 0x55e   :  { %p11011_p8 = pnand %p11010_p7, %p11004_p4 }
 0x55f   :  { %9561 = vrot.lane.b32.xlu1 %v9536_v34, %s11047_s17  ;;  %v9590_v42 = vpop.permute.xlu1 %9589 }
 0x560   :  { %v9654_v19 = vsel %vm9650_vm5, %v9645_v61, %v9590_v42 }
 0x561   :  { %v9663_v48 = vsel %vm9659_vm6, %v9654_v19, %v9598_v11 }
 0x563   :  { %9577 = vrot.lane.b32.xlu1 %v9542_v6, %s11045_s15  ;;  %v9606_v31 = vpop.permute.xlu1 %9605 }
 0x564   :  { %v9673_v38 = vsel %vm9668_vm7, %v9663_v48, %v9606_v31 }
 0x565   :  { %10586 = vmatmul.mubr.bf16.vlgmr.msra.gmra.mrb[132].mxu0 %v9673_v38 }
 0x567   :  { %9593 = vrot.lane.b32.xlu1 %v9548_v14, %s11044_s14 }
 0x56b   :  { %9609 = vrot.lane.b32.xlu1 %v9554_v33, %s11043_s13 }
 0x5a7   :  { %v9568_v43 = vpop.permute.xlu0 %9567 }
 0x5ab   :  { %v9584_v17 = vpop.permute.xlu0 %9583 }
 0x5af   :  { %v9600_v2 = vpop.permute.xlu0 %9599 }
 0x5b3   :  { %v9560_v45 = vpop.permute.xlu0 %9559 }
 0x5b4   :  { %v9619_v41 = vsel %vm4562_vm1, %v9509_v15, %v9560_v45 }
 0x5b5   :  { %v9629_v0 = vsel %vm9623_vm2, %v9619_v41, %v9568_v43 }
 0x5b7   :  { %v9576_v28 = vpop.permute.xlu0 %9575 }
 0x5b8   :  { %v9638_v26 = vsel %vm9632_vm3, %v9629_v0, %v9576_v28 }
 0x5b9   :  { %v9647_v51 = vsel %vm9641_vm4, %v9638_v26, %v9584_v17 }
 0x5bb   :  { %v9592_v4 = vpop.permute.xlu0 %9591 }
 0x5bc   :  { %v9656_v62 = vsel %vm9650_vm5, %v9647_v51, %v9592_v4 }
 0x5bd   :  { %v9665_v27 = vsel %vm9659_vm6, %v9656_v62, %v9600_v2 }
 0x5bf   :  { %v9608_v52 = vpop.permute.xlu0 %9607 }
 0x5c0   :  { %v9676_v57 = vsel %vm9668_vm7, %v9665_v27, %v9608_v52 }
 0x5c1   :  { %10589 = vmatprep.mubr.bf16.mxu0 %v9676_v57 }
 0x5c5   :  { %v9570_v39 = vpop.permute.xlu1 %9569 }
 0x5c9   :  { %v9586_v36 = vpop.permute.xlu1 %9585 }
 0x5cd   :  { %v9602_v12 = vpop.permute.xlu1 %9601 }
 0x5d1   :  { %v9562_v15 = vpop.permute.xlu1 %9561 }
 0x5d2   :  { %v9622_v56 = vsel %vm4562_vm1, %v9533_v10, %v9562_v15 }
 0x5d3   :  { %v9631_v53 = vsel %vm9623_vm2, %v9622_v56, %v9570_v39 }
 0x5d5   :  { %v9578_v60 = vpop.permute.xlu1 %9577 }
 0x5d6   :  { %v9640_v47 = vsel %vm9632_vm3, %v9631_v53, %v9578_v60 }
 0x5d7   :  { %v9649_v5 = vsel %vm9641_vm4, %v9640_v47, %v9586_v36 }
 0x5d9   :  { %v9594_v32 = vpop.permute.xlu1 %9593 }
 0x5da   :  { %v9658_v22 = vsel %vm9650_vm5, %v9649_v5, %v9594_v32 }
 0x5db   :  { %v9667_v13 = vsel %vm9659_vm6, %v9658_v22, %v9602_v12 }
 0x5dd   :  { %v9610_v25 = vpop.permute.xlu1 %9609 }
 0x5de   :  { %v9679_v54 = vsel %vm9668_vm7, %v9667_v13, %v9610_v25 }
 0x5df   :  { %10590 = vmatmul.mubr.bf16.gmra.mrb[136].mxu0 %v9679_v54 }
 0x638   :  { %v10587_v7 = vpop.f32.mrb[132].mxu0 }
 0x639   :  { %v9795_v18 = vadd.f32 %v10587_v7, %v10000_v3  ;;  %v9786_v59 = vpop.f32.mrb[133].mxu0 }
 0x63a   :  { %v9787_v46 = vadd.f32 %v10000_v3, %v9786_v59  ;;  %v10588_v30 = vpop.f32.mrb[134].mxu0 }
 0x63b   :  { %9819 = vst [vmem:[#allocation10 + $0x10] sm:$0xff] %v9795_v18  ;;  %v9798_v1 = vadd.f32 %v10588_v30, %v10000_v3  ;;  %v9789_v9 = vpop.f32.mrb[135].mxu0 }
 0x63c   :  { %9817 = vst [vmem:[#allocation10] sm:$0xff] %v9787_v46  ;;  %v9790_v40 = vadd.f32 %v10000_v3, %v9789_v9 }
 0x63d   :  { %9820 = vst [vmem:[#allocation10 + $0x18] sm:$0xff] %v9798_v1 }
 0x63e   :  { %9818 = vst [vmem:[#allocation10 + $0x8] sm:$0xff] %v9790_v40 }
 0x6b2   :  { %v10591_v8 = vpop.f32.mrb[136].mxu0 }
 0x6b3   :  { %v9811_v55 = vadd.f32 %v10591_v8, %v10000_v3  ;;  %v9802_v23 = vpop.f32.mrb[137].mxu0 }
 0x6b4   :  { %v9803_v16 = vadd.f32 %v10000_v3, %v9802_v23  ;;  %v10592_v44 = vpop.f32.mrb[138].mxu0 }
 0x6b5   :  { %9823 = vst [vmem:[#allocation10 + $0x30] sm:$0xff] %v9811_v55  ;;  %v9814_v37 = vadd.f32 %v10592_v44, %v10000_v3  ;;  %v9805_v63 = vpop.f32.mrb[139].mxu0 }
 0x6b6   :  { %9821 = vst [vmem:[#allocation10 + $0x20] sm:$0xff] %v9803_v16  ;;  %v9806_v58 = vadd.f32 %v10000_v3, %v9805_v63 }
 0x6b7   :  { %9824 = vst [vmem:[#allocation10 + $0x38] sm:$0xff] %v9814_v37 }
 0x6b8   :  { %9822 = vst [vmem:[#allocation10 + $0x28] sm:$0xff] %v9806_v58 }
 0x6b9   :  { %11014 = shalt.err (!%p11011_p8)
}
 0x6ba   :  { %s11015_s22 = scalar_lea.hbm %s14310_s4, 1024 }
 0x6bb   :  { %p11016_p9 = scmp.ne.s32.totalorder %s14310_s4, %s11015_s22  ;;  %p11019_p10 = scmp.lt.u32.totalorder %s11015_s22, %s14310_s4 }
 0x6bd   :  { %p11021_p11 = pnand %p11019_p10, %p11016_p9 }
 0x6bf   :  { %11024 = shalt.err (!%p11021_p11)
}
 0x6c0   :  { %s11053_s0 = smov 128   ;;  %s11054_s27 = smov 8  }
 0x6c1   :  { %9836 = dma.vmem_to_hbm [thread:$0]  %s9831_s18, 1024, %s14310_s4, [#allocation4], %s11053_s0, %s11053_s0, %s11054_s27  }
 0x6c2   :  { %11031 = dma.done.wait [#allocation4], 1024  }
 0x6c3   :  { %11032 = vsyncadd [#allocation4], 4294966272 }
 0x6c4   :  { %9840 = vsyncpa [#allocation3], 1 }
 0x6c5   :  { %9841 = vsyncpa [#allocation6], 1 }
 0x6c6   :  { %9842 = vsyncpa [#allocation9], 1 }
 0x6c7   :  { %9843 = vsyncpa [#allocation4], 1 }

</bundles_post_ra>
